<compile_context>
chip_gen: v7x
topology: tpu7x:2x2x1
jax: 0.10.0
libtpu: 0.0.40
codegen_flags: <defaults>
</compile_context>

<pallas_src>
import functools

import jax
import jax.numpy as jnp
from jax.experimental import pallas as pl
from jax.experimental.pallas import tpu as pltpu


def _round_up(x, m):
    return ((x + m - 1) // m) * m


def _cdiv(a, b):
    return -(-a // b)


def _vmem_capacity_bytes():
    """Physical VMEM of the current TPU generation (conservative fallback)."""
    try:
        info = pltpu.get_tpu_info()
        cap = getattr(info, "vmem_capacity_bytes", None)
        if cap:
            return int(cap)
    except Exception:
        pass
    return 64 * 1024 * 1024  # v7x has the smallest VMEM; safe everywhere.


def _weight_spec(shape, index_map, buffer_count):
    """BlockSpec for a streamed weight tile, optionally >2-deep buffered."""
    if buffer_count > 2:
        try:
            return pl.BlockSpec(shape, index_map,
                                pipeline_mode=pl.Buffered(buffer_count))
        except TypeError:
            pass  # older jax without pipeline_mode kwarg -> default 2 buffers
    return pl.BlockSpec(shape, index_map)


def _ff_kernel(x_ref, g_ref, beta_ref, w1_ref, b1_ref, w2_ref, b2_ref,
               o_ref, xn_ref, acc_ref, *, d_norm):
    """One (tile_m, D_pad) row tile x one tile_h hidden slice per grid step."""
    h_idx = pl.program_id(1)

    @pl.when(h_idx == 0)
    def _init():
        # LayerNorm over the true feature dim. Padded lanes of x/gamma/beta are
        # zero, so sums over the padded tile are exact; divide by true D.
        x = x_ref[...].astype(jnp.float32)
        s = jnp.sum(x, axis=-1, keepdims=True)
        sq = jnp.sum(x * x, axis=-1, keepdims=True)
        mu = s * (1.0 / d_norm)
        var = jnp.maximum(sq * (1.0 / d_norm) - mu * mu, 0.0)
        xhat = (x - mu) * jax.lax.rsqrt(var + 1e-5)
        xn = xhat * g_ref[...].astype(jnp.float32) + beta_ref[...].astype(jnp.float32)
        xn_ref[...] = xn.astype(xn_ref.dtype)          # cached for all H steps
        acc_ref[...] = jnp.zeros_like(acc_ref)

    # ff1 hidden slice + exact (erf) GELU -- matches torch nn.GELU() default.
    h = jnp.dot(xn_ref[...], w1_ref[...], preferred_element_type=jnp.float32)
    h = h + b1_ref[...].astype(jnp.float32)
    h = 0.5 * h * (1.0 + jax.lax.erf(h * 0.7071067811865476))

    # Partial ff2: accumulate this hidden slice's contribution (f32 acc).
    acc_ref[...] += jnp.dot(h.astype(w2_ref.dtype), w2_ref[...],
                            preferred_element_type=jnp.float32)

    @pl.when(h_idx == pl.num_programs(1) - 1)
    def _finalize():
        # Dropout(p=0.0) is identity in this forward pass.
        o_ref[...] = (acc_ref[...] + b2_ref[...].astype(jnp.float32)
                      ).astype(o_ref.dtype)


def feedforward_pallas(x, params, *, tile_m=None, tile_h=None,
                       matmul_dtype=jnp.bfloat16, weight_buffer_count=2):
    """x: (B, N, D). params: gamma, beta, w1 (D,H), b1 (H,), w2 (H,D), b2 (D,)."""
    B, N, D = x.shape
    H = params["w1"].shape[1]
    M = B * N

    x_bytes = jnp.dtype(x.dtype).itemsize
    mm_bytes = jnp.dtype(matmul_dtype).itemsize

    D_pad = _round_up(D, 128)

    # ---- VMEM budget (generation aware) ----------------------------------
    vmem_cap = _vmem_capacity_bytes()
    budget = int(vmem_cap * 0.72)          # headroom for compiler scratch etc.

    # Hidden tile (multiple of 128, <= padded H).
    tile_h = 512 if tile_h is None else tile_h
    tile_h = max(128, min(_round_up(tile_h, 128), _round_up(H, 128)))

    wbuf = max(2, int(weight_buffer_count))

    def weight_bytes(th):
        wb = 2 * (D_pad * th) * mm_bytes * wbuf          # w1 + w2 slices
        wb += (th + 3 * D_pad) * 4 * 2                   # b1, gamma, beta, b2
        return wb

    # Per-row VMEM bytes: x tile (x2 bufs), out tile (x2 bufs), xn cache, f32 acc.
    row_bytes = D_pad * (2 * x_bytes + 2 * x_bytes + mm_bytes + 4)

    # Shrink the hidden tile if weight streaming alone would eat the budget.
    while tile_h > 128 and budget - weight_bytes(tile_h) < 8 * row_bytes:
        tile_h = max(128, _round_up(tile_h // 2, 128))
    H_pad = _round_up(H, tile_h)

    # Row tile: as large as VMEM allows (capped at 1024), then split M evenly
    # across row tiles to avoid padding an almost-empty last tile.
    tile_m_cap = 1024 if tile_m is None else max(8, _round_up(tile_m, 8))
    fit = max(8, ((budget - weight_bytes(tile_h)) // row_bytes) // 8 * 8)
    tile_m_cap = max(8, min(tile_m_cap, fit))
    n_row_tiles = _cdiv(M, tile_m_cap)
    tile_m = min(_round_up(_cdiv(M, n_row_tiles), 8), tile_m_cap)
    M_pad = _round_up(M, tile_m)

    total_vmem = weight_bytes(tile_h) + tile_m * row_bytes
    vmem_limit = int(min(vmem_cap, max(32 << 20, total_vmem + (8 << 20))))

    # ---- Host-side padding (no f32 up-cast of activations or weights) -----
    x2d = jnp.pad(x.reshape(M, D), ((0, M_pad - M), (0, D_pad - D)))

    def pad_vec(v, n):
        return jnp.pad(v.astype(jnp.float32), (0, n - v.shape[0])).reshape(1, n)

    gamma = pad_vec(params["gamma"], D_pad)
    beta = pad_vec(params["beta"], D_pad)
    b1 = pad_vec(params["b1"], H_pad)
    b2 = pad_vec(params["b2"], D_pad)
    # Pad directly in matmul_dtype: no padded-f32 weight copy in HBM per call.
    w1 = jnp.pad(params["w1"].astype(matmul_dtype),
                 ((0, D_pad - D), (0, H_pad - H)))
    w2 = jnp.pad(params["w2"].astype(matmul_dtype),
                 ((0, H_pad - H), (0, D_pad - D)))

    grid = (M_pad // tile_m, H_pad // tile_h)
    # TODO(synk): for decode-shaped inputs (single row tile) on v7x, split the
    # H reduction across a parallel axis with per-core partial accumulators so
    # the second TensorCore is not idle.

    out2d = pl.pallas_call(
        functools.partial(_ff_kernel, d_norm=float(D)),
        out_shape=jax.ShapeDtypeStruct((M_pad, D_pad), x.dtype),
        grid=grid,
        in_specs=[
            pl.BlockSpec((tile_m, D_pad), lambda i, h: (i, 0)),       # x rows (resident over H)
            pl.BlockSpec((1, D_pad), lambda i, h: (0, 0)),            # gamma
            pl.BlockSpec((1, D_pad), lambda i, h: (0, 0)),            # beta
            _weight_spec((D_pad, tile_h), lambda i, h: (0, h), wbuf),  # w1 hidden slice
            pl.BlockSpec((1, tile_h), lambda i, h: (0, h)),           # b1 hidden slice
            _weight_spec((tile_h, D_pad), lambda i, h: (h, 0), wbuf),  # w2 hidden slice
            pl.BlockSpec((1, D_pad), lambda i, h: (0, 0)),            # b2
        ],
        out_specs=pl.BlockSpec((tile_m, D_pad), lambda i, h: (i, 0)),
        scratch_shapes=[
            pltpu.VMEM((tile_m, D_pad), matmul_dtype),   # cached LayerNorm output
            pltpu.VMEM((tile_m, D_pad), jnp.float32),    # ff2 accumulator
        ],
        compiler_params=pltpu.CompilerParams(
            dimension_semantics=("parallel", "arbitrary"),
            vmem_limit_bytes=vmem_limit),
    )(x2d, gamma, beta, w1, b1, w2, b2)

    return out2d[:M, :D].reshape(B, N, D)


def init_params(key, dim, hidden_dim):
    """Deterministic synthetic params (PyTorch-style uniform fan-in init)."""
    k1, k2, k3, k4 = jax.random.split(key, 4)
    lim1 = 1.0 / jnp.sqrt(dim)
    lim2 = 1.0 / jnp.sqrt(hidden_dim)
    return dict(
        gamma=jnp.ones((dim,), jnp.float32),
        beta=jnp.zeros((dim,), jnp.float32),
        # stored as (in, out) so kernel does x @ w, equivalent to torch Linear
        w1=jax.random.uniform(k1, (dim, hidden_dim), jnp.float32, -lim1, lim1),
        b1=jax.random.uniform(k2, (hidden_dim,), jnp.float32, -lim1, lim1),
        w2=jax.random.uniform(k3, (hidden_dim, dim), jnp.float32, -lim2, lim2),
        b2=jax.random.uniform(k4, (dim,), jnp.float32, -lim2, lim2),
    )


def feedforward_ref(x, p):
    mu = jnp.mean(x, axis=-1, keepdims=True)
    var = jnp.mean((x - mu) ** 2, axis=-1, keepdims=True)
    xn = (x - mu) / jnp.sqrt(var + 1e-5) * p["gamma"] + p["beta"]
    h = xn @ p["w1"] + p["b1"]
    h = 0.5 * h * (1.0 + jax.lax.erf(h / jnp.sqrt(2.0)))
    return h @ p["w2"] + p["b2"]


if __name__ == "__main__":
    key = jax.random.PRNGKey(0)
    kx, kp, kx2, kp2 = jax.random.split(key, 4)

    # Lane-dense, MXU-friendly small config; exercises both the parallel row
    # axis and the H accumulation axis (auto tile selection picks the sizes).
    B, N, dim, hidden_dim = 2, 256, 128, 512
    x = jax.random.normal(kx, (B, N, dim), jnp.float32)
    params = init_params(kp, dim, hidden_dim)
    ref = feedforward_ref(x, params)

    # Default bf16 matmul operands (f32 accumulation): loose tolerance vs f32 ref.
    out = jax.block_until_ready(feedforward_pallas(x, params))
    assert out.shape == (B, N, dim)
    assert out.dtype == x.dtype
    assert jnp.allclose(out, ref, atol=2e-2, rtol=2e-2), "bf16 mismatch vs reference"

    # f32 matmul operands + explicit (small) tiles: tight tolerance vs f32 ref.
    out32 = jax.block_until_ready(
        feedforward_pallas(x, params, tile_m=128, tile_h=256,
                           matmul_dtype=jnp.float32))
    assert jnp.allclose(out32, ref, atol=2e-3, rtol=2e-3), "f32 mismatch vs reference"

    # Ragged / non-128-aligned shapes exercise the zero-padding path.
    B2, N2, dim2, hidden2 = 2, 10, 48, 80
    x2 = jax.random.normal(kx2, (B2, N2, dim2), jnp.float32)
    params2 = init_params(kp2, dim2, hidden2)
    out2 = jax.block_until_ready(
        feedforward_pallas(x2, params2, matmul_dtype=jnp.float32))
    ref2 = feedforward_ref(x2, params2)
    assert out2.shape == (B2, N2, dim2)
    assert jnp.allclose(out2, ref2, atol=2e-3, rtol=2e-3), "padded-path mismatch"

    print("KERNEL_OK")
</pallas_src>

<mosaic_0001>
module attributes {stable_mosaic.version = 11 : i64} {
  func.func @_ff_kernel(%arg0: i32, %arg1: i32, %arg2: memref<512x128xf32, #tpu.memory_space<vmem>>, %arg3: memref<1x128xf32, #tpu.memory_space<vmem>>, %arg4: memref<1x128xf32, #tpu.memory_space<vmem>>, %arg5: memref<128x512xbf16, #tpu.memory_space<vmem>>, %arg6: memref<1x512xf32, #tpu.memory_space<vmem>>, %arg7: memref<512x128xbf16, #tpu.memory_space<vmem>>, %arg8: memref<1x128xf32, #tpu.memory_space<vmem>>, %arg9: memref<512x128xf32, #tpu.memory_space<vmem>>, %arg10: memref<512x128xbf16, #tpu.memory_space<vmem>>, %arg11: memref<512x128xf32, #tpu.memory_space<vmem>>) attributes {dimension_semantics = [#tpu.dimension_semantics<parallel>, #tpu.dimension_semantics<arbitrary>], iteration_bounds = array<i64: 1, 1>, scalar_prefetch = 0 : i64, scratch_operands = 2 : i64, tpu.core_type = #tpu.core_type<tc>, window_params = [{transform_indices = @transform_0, window_bounds = array<i64: 512, 128>}, {pipeline_mode = #tpu.pipeline_mode<synchronous>, transform_indices = @transform_1, window_bounds = array<i64: 1, 128>}, {pipeline_mode = #tpu.pipeline_mode<synchronous>, transform_indices = @transform_2, window_bounds = array<i64: 1, 128>}, {transform_indices = @transform_3, window_bounds = array<i64: 128, 512>}, {transform_indices = @transform_4, window_bounds = array<i64: 1, 512>}, {transform_indices = @transform_5, window_bounds = array<i64: 512, 128>}, {pipeline_mode = #tpu.pipeline_mode<synchronous>, transform_indices = @transform_6, window_bounds = array<i64: 1, 128>}, {transform_indices = @transform_7, window_bounds = array<i64: 512, 128>}]} {
    %c0_i32 = arith.constant 0 : i32
    %0 = arith.cmpi eq, %arg1, %c0_i32 : i32
    %1 = arith.extui %0 : i1 to i32
    %c0_i32_0 = arith.constant 0 : i32
    %2 = arith.cmpi ne, %1, %c0_i32_0 : i32
    scf.if %2 {
      %c0_18 = arith.constant 0 : index
      %c0_19 = arith.constant 0 : index
      %26 = vector.load %arg2[%c0_18, %c0_19] : memref<512x128xf32, #tpu.memory_space<vmem>>, vector<512x128xf32>
      %cst_20 = arith.constant dense<0.000000e+00> : vector<512xf32>
      %27 = vector.multi_reduction <add>, %26, %cst_20 [1] : vector<512x128xf32> to vector<512xf32>
      %28 = vector.shape_cast %27 : vector<512xf32> to vector<512x1xf32>
      %29 = arith.mulf %26, %26 : vector<512x128xf32>
      %cst_21 = arith.constant dense<0.000000e+00> : vector<512xf32>
      %30 = vector.multi_reduction <add>, %29, %cst_21 [1] : vector<512x128xf32> to vector<512xf32>
      %31 = vector.shape_cast %30 : vector<512xf32> to vector<512x1xf32>
      %cst_22 = arith.constant 7.812500e-03 : f32
      %32 = vector.broadcast %cst_22 : f32 to vector<512x1xf32>
      %33 = arith.mulf %28, %32 : vector<512x1xf32>
      %cst_23 = arith.constant 7.812500e-03 : f32
      %34 = vector.broadcast %cst_23 : f32 to vector<512x1xf32>
      %35 = arith.mulf %31, %34 : vector<512x1xf32>
      %36 = arith.mulf %33, %33 : vector<512x1xf32>
      %37 = arith.subf %35, %36 : vector<512x1xf32>
      %cst_24 = arith.constant 0.000000e+00 : f32
      %38 = vector.broadcast %cst_24 : f32 to vector<512x1xf32>
      %39 = arith.maximumf %37, %38 : vector<512x1xf32>
      %40 = vector.broadcast %33 : vector<512x1xf32> to vector<512x128xf32>
      %41 = arith.subf %26, %40 : vector<512x128xf32>
      %cst_25 = arith.constant 9.99999974E-6 : f32
      %42 = vector.broadcast %cst_25 : f32 to vector<512x1xf32>
      %43 = arith.addf %39, %42 : vector<512x1xf32>
      %44 = math.rsqrt %43 : vector<512x1xf32>
      %45 = vector.broadcast %44 : vector<512x1xf32> to vector<512x128xf32>
      %46 = arith.mulf %41, %45 : vector<512x128xf32>
      %c0_26 = arith.constant 0 : index
      %c0_27 = arith.constant 0 : index
      %47 = vector.load %arg3[%c0_26, %c0_27] : memref<1x128xf32, #tpu.memory_space<vmem>>, vector<1x128xf32>
      %48 = vector.broadcast %47 : vector<1x128xf32> to vector<512x128xf32>
      %49 = arith.mulf %46, %48 : vector<512x128xf32>
      %c0_28 = arith.constant 0 : index
      %c0_29 = arith.constant 0 : index
      %50 = vector.load %arg4[%c0_28, %c0_29] : memref<1x128xf32, #tpu.memory_space<vmem>>, vector<1x128xf32>
      %51 = vector.broadcast %50 : vector<1x128xf32> to vector<512x128xf32>
      %52 = arith.addf %49, %51 : vector<512x128xf32>
      %53 = arith.truncf %52 : vector<512x128xf32> to vector<512x128xbf16>
      %c0_30 = arith.constant 0 : index
      %c0_31 = arith.constant 0 : index
      %54 = vector.load %arg10[%c0_30, %c0_31] : memref<512x128xbf16, #tpu.memory_space<vmem>>, vector<512x128xbf16>
      tpu.vector_store %arg10[%c0_30, %c0_31], %53 {strides = array<i32>} : memref<512x128xbf16, #tpu.memory_space<vmem>>, vector<512x128xbf16>,
      %cst_32 = arith.constant 0.000000e+00 : f32
      %55 = vector.broadcast %cst_32 : f32 to vector<512x128xf32>
      %c0_33 = arith.constant 0 : index
      %c0_34 = arith.constant 0 : index
      %56 = vector.load %arg11[%c0_33, %c0_34] : memref<512x128xf32, #tpu.memory_space<vmem>>, vector<512x128xf32>
      tpu.vector_store %arg11[%c0_33, %c0_34], %55 {strides = array<i32>} : memref<512x128xf32, #tpu.memory_space<vmem>>, vector<512x128xf32>,
    } else {
    }
    %c0 = arith.constant 0 : index
    %c0_1 = arith.constant 0 : index
    %3 = vector.load %arg10[%c0, %c0_1] : memref<512x128xbf16, #tpu.memory_space<vmem>>, vector<512x128xbf16>
    %c0_2 = arith.constant 0 : index
    %c0_3 = arith.constant 0 : index
    %4 = vector.load %arg5[%c0_2, %c0_3] : memref<128x512xbf16, #tpu.memory_space<vmem>>, vector<128x512xbf16>
    %cst = arith.constant dense<0.000000e+00> : vector<512x512xf32>
    %5 = tpu.matmul %3, %4, %cst {dimension_numbers = #tpu.dot_dimension_numbers<[1], [0], [0], [1], [0, 0, 1, 1], [], []>} : vector<512x128xbf16>, vector<128x512xbf16>, vector<512x512xf32> -> vector<512x512xf32>
    %c0_4 = arith.constant 0 : index
    %c0_5 = arith.constant 0 : index
    %6 = vector.load %arg6[%c0_4, %c0_5] : memref<1x512xf32, #tpu.memory_space<vmem>>, vector<1x512xf32>
    %7 = vector.broadcast %6 : vector<1x512xf32> to vector<512x512xf32>
    %8 = arith.addf %5, %7 : vector<512x512xf32>
    %cst_6 = arith.constant 5.000000e-01 : f32
    %9 = vector.broadcast %cst_6 : f32 to vector<512x512xf32>
    %10 = arith.mulf %9, %8 : vector<512x512xf32>
    %cst_7 = arith.constant 0.707106769 : f32
    %11 = vector.broadcast %cst_7 : f32 to vector<512x512xf32>
    %12 = arith.mulf %8, %11 : vector<512x512xf32>
    %13 = math.erf %12 : vector<512x512xf32>
    %cst_8 = arith.constant 1.000000e+00 : f32
    %14 = vector.broadcast %cst_8 : f32 to vector<512x512xf32>
    %15 = arith.addf %14, %13 : vector<512x512xf32>
    %16 = arith.mulf %10, %15 : vector<512x512xf32>
    %c0_9 = arith.constant 0 : index
    %c0_10 = arith.constant 0 : index
    %17 = vector.load %arg11[%c0_9, %c0_10] : memref<512x128xf32, #tpu.memory_space<vmem>>, vector<512x128xf32>
    %18 = arith.truncf %16 : vector<512x512xf32> to vector<512x512xbf16>
    %c0_11 = arith.constant 0 : index
    %c0_12 = arith.constant 0 : index
    %19 = vector.load %arg7[%c0_11, %c0_12] : memref<512x128xbf16, #tpu.memory_space<vmem>>, vector<512x128xbf16>
    %cst_13 = arith.constant dense<0.000000e+00> : vector<512x128xf32>
    %20 = tpu.matmul %18, %19, %cst_13 {dimension_numbers = #tpu.dot_dimension_numbers<[1], [0], [0], [1], [0, 0, 1, 1], [], []>} : vector<512x512xbf16>, vector<512x128xbf16>, vector<512x128xf32> -> vector<512x128xf32>
    %21 = arith.addf %17, %20 : vector<512x128xf32>
    %c0_14 = arith.constant 0 : index
    %c0_15 = arith.constant 0 : index
    %22 = vector.load %arg11[%c0_14, %c0_15] : memref<512x128xf32, #tpu.memory_space<vmem>>, vector<512x128xf32>
    tpu.vector_store %arg11[%c0_14, %c0_15], %21 {strides = array<i32>} : memref<512x128xf32, #tpu.memory_space<vmem>>, vector<512x128xf32>,
    %c0_i32_16 = arith.constant 0 : i32
    %23 = arith.cmpi eq, %arg1, %c0_i32_16 : i32
    %24 = arith.extui %23 : i1 to i32
    %c0_i32_17 = arith.constant 0 : i32
    %25 = arith.cmpi ne, %24, %c0_i32_17 : i32
    scf.if %25 {
      %c0_18 = arith.constant 0 : index
      %c0_19 = arith.constant 0 : index
      %26 = vector.load %arg11[%c0_18, %c0_19] : memref<512x128xf32, #tpu.memory_space<vmem>>, vector<512x128xf32>
      %c0_20 = arith.constant 0 : index
      %c0_21 = arith.constant 0 : index
      %27 = vector.load %arg8[%c0_20, %c0_21] : memref<1x128xf32, #tpu.memory_space<vmem>>, vector<1x128xf32>
      %28 = vector.broadcast %27 : vector<1x128xf32> to vector<512x128xf32>
      %29 = arith.addf %26, %28 : vector<512x128xf32>
      %c0_22 = arith.constant 0 : index
      %c0_23 = arith.constant 0 : index
      %30 = vector.load %arg9[%c0_22, %c0_23] : memref<512x128xf32, #tpu.memory_space<vmem>>, vector<512x128xf32>
      tpu.vector_store %arg9[%c0_22, %c0_23], %29 {strides = array<i32>} : memref<512x128xf32, #tpu.memory_space<vmem>>, vector<512x128xf32>,
    } else {
    }
    return
  }
  func.func @transform_0(%arg0: i32, %arg1: i32) -> (i32, i32) {
    %c0_i32 = arith.constant 0 : i32
    %c0_i32_0 = arith.constant 0 : i32
    return %arg0, %c0_i32 : i32, i32
  }
  func.func @transform_1(%arg0: i32, %arg1: i32) -> (i32, i32) {
    %c0_i32 = arith.constant 0 : i32
    %c0_i32_0 = arith.constant 0 : i32
    %c0_i32_1 = arith.constant 0 : i32
    return %c0_i32, %c0_i32_0 : i32, i32
  }
  func.func @transform_2(%arg0: i32, %arg1: i32) -> (i32, i32) {
    %c0_i32 = arith.constant 0 : i32
    %c0_i32_0 = arith.constant 0 : i32
    %c0_i32_1 = arith.constant 0 : i32
    return %c0_i32, %c0_i32_0 : i32, i32
  }
  func.func @transform_3(%arg0: i32, %arg1: i32) -> (i32, i32) {
    %c0_i32 = arith.constant 0 : i32
    %c0_i32_0 = arith.constant 0 : i32
    return %c0_i32, %arg1 : i32, i32
  }
  func.func @transform_4(%arg0: i32, %arg1: i32) -> (i32, i32) {
    %c0_i32 = arith.constant 0 : i32
    %c0_i32_0 = arith.constant 0 : i32
    return %c0_i32, %arg1 : i32, i32
  }
  func.func @transform_5(%arg0: i32, %arg1: i32) -> (i32, i32) {
    %c0_i32 = arith.constant 0 : i32
    %c0_i32_0 = arith.constant 0 : i32
    return %arg1, %c0_i32 : i32, i32
  }
  func.func @transform_6(%arg0: i32, %arg1: i32) -> (i32, i32) {
    %c0_i32 = arith.constant 0 : i32
    %c0_i32_0 = arith.constant 0 : i32
    %c0_i32_1 = arith.constant 0 : i32
    return %c0_i32, %c0_i32_0 : i32, i32
  }
  func.func @transform_7(%arg0: i32, %arg1: i32) -> (i32, i32) {
    %c0_i32 = arith.constant 0 : i32
    %c0_i32_0 = arith.constant 0 : i32
    return %arg0, %c0_i32 : i32, i32
  }
}

</mosaic_0001>

<bundles_post_ra>
// kernel: tpu_custom_call.1
= control target key start
LH: loop header
LB: loop body
LE: loop exit
PB: predicated region body
PF: predicated region fallthrough
CT: control target
= control target key end

     0   :  { %12 = vsyncpa [#allocation5], 0  ;;  %s9476_s0 = inlined_call_operand.hbm [shape: f32[512,128], index: 0, kind: input, shape index: {}]   ;;  %s9477_s1 = inlined_call_operand.vmem [shape: f32[1,128], index: 1, kind: input, shape index: {}]   ;;  %s9478_s2 = inlined_call_operand.vmem [shape: f32[1,128], index: 2, kind: input, shape index: {}]   ;;  %s9479_s3 = inlined_call_operand.hbm [shape: bf16[128,512], index: 3, kind: input, shape index: {}]   ;;  %s9480_s4 = inlined_call_operand.vmem [shape: f32[1,512], index: 4, kind: input, shape index: {}]   ;;  %s9481_s5 = inlined_call_operand.hbm [shape: bf16[512,128], index: 5, kind: input, shape index: {}]   ;;  %s9482_s6 = inlined_call_operand.vmem [shape: f32[1,128], index: 6, kind: input, shape index: {}]   ;;  %s9483_s7 = inlined_call_operand.hbm [shape: f32[512,128], index: 7, kind: output, shape index: {}]  }
   0x1   :  { %13 = vsyncpa [#allocation8], 0 }
   0x2   :  { %14 = vsyncpa [#allocation6], 0  ;;  %s5854_s24 = smov [#allocation7]   ;;  %s5760_s28 = scalar_lea.hbm %s9479_s3, 4096 }
   0x3   :  { %s36_s25 = sshll.u32 %s5854_s24, 4  ;;  %p5761_p0 = scmp.ne.s32.totalorder %s9479_s3, %s5760_s28  ;;  %s37_s25 = int_to_ptr.vmem [resolvable:$true] %s36_s25 }
   0x4   :  { %p5764_p1 = scmp.lt.u32.totalorder %s5760_s28, %s9479_s3 }
   0x6   :  { %p5766_p2 = pnand %p5764_p1, %p5761_p0 }
   0x8   :  { %5769 = shalt.err (!%p5766_p2)
}
   0x9   :  { %s5770_s10 = scalar_lea.vmem %s37_s25, 4096  ;;  %p5775_p4 = scmp.lt.s32.totalorder %s37_s25, %s37_s25 }
   0xa   :  { %p5771_p3 = scmp.ne.s32.totalorder %s37_s25, %s5770_s10  ;;  %p5776_p5 = scmp.lt.s32.totalorder %s5770_s10, %s5770_s10 }
   0xc   :  { %p5777_p6 = por %p5776_p5, %p5775_p4 }
   0xe   :  { %p5778_p7 = pnand %p5777_p6, %p5771_p3 }
  0x10   :  { %5781 = shalt.err (!%p5778_p7)
}
  0x11   :  { %s5855_s11 = smov 256   ;;  %s5856_s12 = smov 16  }
  0x12   :  { %42 = dma.hbm_to_vmem [thread:$0]  %s9479_s3, 4096, %s37_s25, [#allocation8], %s5855_s11, %s5855_s11, %s5856_s12  }
  0x13   :  { %s5857_s15 = smov [#allocation4]   ;;  %s5782_s19 = scalar_lea.hbm %s9476_s0, 8192 }
  0x14   :  { %s20_s16 = sshll.u32 %s5857_s15, 4  ;;  %p5783_p8 = scmp.ne.s32.totalorder %s9476_s0, %s5782_s19  ;;  %s21_s16 = int_to_ptr.vmem [resolvable:$true] %s20_s16 }
  0x15   :  { %p5786_p9 = scmp.lt.u32.totalorder %s5782_s19, %s9476_s0 }
  0x17   :  { %p5788_p10 = pnand %p5786_p9, %p5783_p8 }
  0x19   :  { %5791 = shalt.err (!%p5788_p10)
}
  0x1a   :  { %s5792_s24 = scalar_lea.vmem %s21_s16, 8192  ;;  %p5797_p12 = scmp.lt.s32.totalorder %s21_s16, %s21_s16 }
  0x1b   :  { %p5793_p11 = scmp.ne.s32.totalorder %s21_s16, %s5792_s24  ;;  %p5798_p13 = scmp.lt.s32.totalorder %s5792_s24, %s5792_s24 }
  0x1d   :  { %p5799_p0 = por %p5798_p13, %p5797_p12 }
  0x1f   :  { %p5800_p1 = pnand %p5799_p0, %p5793_p11 }
  0x21   :  { %5803 = shalt.err (!%p5800_p1)
}
  0x22   :  { %s5858_s3 = smov 128   ;;  %s5859_s25 = smov 8  }
  0x23   :  { %26 = dma.hbm_to_vmem [thread:$0]  %s9476_s0, 8192, %s21_s16, [#allocation5], %s5858_s3, %s5858_s3, %s5859_s25  }
  0x24   :  { %s5860_s28 = smov [#allocation9]   ;;  %s5804_s9 = scalar_lea.hbm %s9481_s5, 4096 }
  0x25   :  { %s50_s29 = sshll.u32 %s5860_s28, 4  ;;  %p5805_p2 = scmp.ne.s32.totalorder %s9481_s5, %s5804_s9  ;;  %s51_s29 = int_to_ptr.vmem [resolvable:$true] %s50_s29 }
  0x26   :  { %p5808_p3 = scmp.lt.u32.totalorder %s5804_s9, %s9481_s5 }
  0x28   :  { %p5810_p4 = pnand %p5808_p3, %p5805_p2 }
  0x2a   :  { %5813 = shalt.err (!%p5810_p4)
}
  0x2b   :  { %s5814_s14 = scalar_lea.vmem %s51_s29, 4096  ;;  %p5819_p6 = scmp.lt.s32.totalorder %s51_s29, %s51_s29 }
  0x2c   :  { %p5815_p5 = scmp.ne.s32.totalorder %s51_s29, %s5814_s14  ;;  %p5820_p7 = scmp.lt.s32.totalorder %s5814_s14, %s5814_s14 }
  0x2e   :  { %p5821_p8 = por %p5820_p7, %p5819_p6 }
  0x30   :  { %p5822_p9 = pnand %p5821_p8, %p5815_p5 }
  0x32   :  { %5825 = shalt.err (!%p5822_p9)
}
  0x33   :  { %s5861_s0 = smov 64   ;;  %s5862_s15 = smov 4  }
  0x34   :  { %56 = dma.hbm_to_vmem [thread:$0]  %s9481_s5, 4096, %s51_s29, [#allocation8], %s5861_s0, %s5861_s0, %s5862_s15  }
  0x35   :  { %5848 = dma.done.wait [#allocation5], 8192  }
  0x36   :  { %5849 = vsyncadd [#allocation5], 4294959104 }
  0x37   :  { %5850 = dma.done.wait [#allocation8], 8192  }
  0x38   :  { %5851 = vsyncadd [#allocation8], 4294959104  ;;  %v5944_v0 = vld [vmem:[#allocation4] sm:$0xff]  ;;  %v5946_v1 = vld [vmem:[#allocation4 + $0x8] sm:$0xff]  ;;  %v9484_v58 = vmov 0  }
  0x39   :  { %137 = vadd.xlane.f32.xlu0 %v5944_v0  ;;  %v265_v2 = vmul.f32 %v5944_v0, %v5944_v0  ;;  %v266_v3 = vmul.f32 %v5946_v1, %v5946_v1  ;;  %v5954_v4 = vld [vmem:[#allocation4 + $0x10] sm:$0xff]  ;;  %v5956_v5 = vld [vmem:[#allocation4 + $0x18] sm:$0xff]  ;;  %v5964_v8 = vld [vmem:[#allocation4 + $0x20] sm:$0xff]  ;;  %1581 = vmatprep.mubr.bf16.mxu0 %v9484_v58 }
  0x3a   :  { %v267_v6 = vmul.f32 %v5954_v4, %v5954_v4  ;;  %v268_v7 = vmul.f32 %v5956_v5, %v5956_v5  ;;  %v4987_v9 = vld [vmem:[#allocation7 + $0x4] ss:$16 sps:$4 sm:$0xff]   ;;  %v4989_v10 = vld [vmem:[#allocation7 + $0xc] ss:$16 sps:$4 sm:$0xff]   ;;  %v4991_v11 = vld [vmem:[#allocation7] ss:$16 sps:$4 sm:$0xff]   ;;  %v269_v14 = vmul.f32 %v5964_v8, %v5964_v8  ;;  %1934 = vmatprep.mubr.bf16.mxu1 %v9484_v58 }
  0x3b   :  { %329 = vadd.xlane.f32.xlu1 %v265_v2  ;;  %v4992_v12 = vld [vmem:[#allocation7 + $0x8] ss:$16 sps:$4 sm:$0xff]   ;;  %1549 = vmatprep.subr.bf16.mxu0 %v4987_v9  ;;  %v4993_v15 = vld [vmem:[#allocation7 + $0x24] ss:$16 sps:$4 sm:$0xff]   ;;  %v4995_v16 = vld [vmem:[#allocation7 + $0x2c] ss:$16 sps:$4 sm:$0xff]  }
  0x3c   :  { %v5966_v13 = vld [vmem:[#allocation4 + $0x28] sm:$0xff]  ;;  %1902 = vmatprep.subr.bf16.mxu1 %v4989_v10  ;;  %1550 = vmatpush1.bf16.msra.mxu0 %v4991_v11  ;;  %v4997_v18 = vld [vmem:[#allocation7 + $0x20] ss:$16 sps:$4 sm:$0xff]   ;;  %v5976_v21 = vld [vmem:[#allocation4 + $0x38] sm:$0xff] }
  0x3d   :  { %139 = vadd.xlane.f32.xlu0 %v5946_v1  ;;  %1903 = vmatpush1.bf16.msra.mxu1 %v4992_v12  ;;  %v270_v17 = vmul.f32 %v5966_v13, %v5966_v13  ;;  %v4998_v19 = vld [vmem:[#allocation7 + $0x28] ss:$16 sps:$4 sm:$0xff]   ;;  %v5974_v20 = vld [vmem:[#allocation4 + $0x30] sm:$0xff]  ;;  %v5001_v23 = vld [vmem:[#allocation7 + $0x4c] ss:$16 sps:$4 sm:$0xff]   ;;  %v272_v27 = vmul.f32 %v5976_v21, %v5976_v21 }
  0x3e   :  { %1551 = vmatprep.subr.bf16.mxu0 %v4993_v15  ;;  %1904 = vmatprep.subr.bf16.mxu1 %v4995_v16  ;;  %v4999_v22 = vld [vmem:[#allocation7 + $0x44] ss:$16 sps:$4 sm:$0xff]   ;;  %v5003_v24 = vld [vmem:[#allocation7 + $0x40] ss:$16 sps:$4 sm:$0xff]   ;;  %v5004_v25 = vld [vmem:[#allocation7 + $0x48] ss:$16 sps:$4 sm:$0xff]   ;;  %v271_v26 = vmul.f32 %v5974_v20, %v5974_v20 }
  0x3f   :  { %331 = vadd.xlane.f32.xlu1 %v266_v3  ;;  %v5005_v28 = vld [vmem:[#allocation7 + $0x64] ss:$16 sps:$4 sm:$0xff]   ;;  %v5007_v29 = vld [vmem:[#allocation7 + $0x6c] ss:$16 sps:$4 sm:$0xff]   ;;  %v5009_v31 = vld [vmem:[#allocation7 + $0x60] ss:$16 sps:$4 sm:$0xff]  }
  0x40   :  { %1552 = vmatpush1.bf16.msra.mxu0 %v4997_v18  ;;  %v5984_v30 = vld [vmem:[#allocation4 + $0x40] sm:$0xff]  ;;  %v5010_v32 = vld [vmem:[#allocation7 + $0x68] ss:$16 sps:$4 sm:$0xff]   ;;  %v5013_v35 = vld [vmem:[#allocation7 + $0x8c] ss:$16 sps:$4 sm:$0xff]  }
  0x41   :  { %141 = vadd.xlane.f32.xlu0 %v5954_v4  ;;  %1905 = vmatpush1.bf16.msra.mxu1 %v4998_v19  ;;  %v5986_v33 = vld [vmem:[#allocation4 + $0x48] sm:$0xff]  ;;  %v5011_v34 = vld [vmem:[#allocation7 + $0x84] ss:$16 sps:$4 sm:$0xff]   ;;  %v5015_v36 = vld [vmem:[#allocation7 + $0x80] ss:$16 sps:$4 sm:$0xff]   ;;  %v273_v38 = vmul.f32 %v5984_v30, %v5984_v30 }
  0x42   :  { %1553 = vmatprep.subr.bf16.mxu0 %v4999_v22  ;;  %1906 = vmatprep.subr.bf16.mxu1 %v5001_v23  ;;  %v5016_v37 = vld [vmem:[#allocation7 + $0x88] ss:$16 sps:$4 sm:$0xff]   ;;  %v274_v39 = vmul.f32 %v5986_v33, %v5986_v33  ;;  %v5017_v40 = vld [vmem:[#allocation7 + $0xa4] ss:$16 sps:$4 sm:$0xff]   ;;  %v5019_v41 = vld [vmem:[#allocation7 + $0xac] ss:$16 sps:$4 sm:$0xff]  }
  0x43   :  { %143 = vadd.xlane.f32.xlu1 %v5956_v5  ;;  %v5021_v42 = vld [vmem:[#allocation7 + $0xa0] ss:$16 sps:$4 sm:$0xff]   ;;  %v5022_v43 = vld [vmem:[#allocation7 + $0xa8] ss:$16 sps:$4 sm:$0xff]   ;;  %v5023_v45 = vld [vmem:[#allocation7 + $0xc4] ss:$16 sps:$4 sm:$0xff]  }
  0x44   :  { %1554 = vmatpush1.bf16.msra.mxu0 %v5003_v24  ;;  %v5994_v44 = vld [vmem:[#allocation4 + $0x50] sm:$0xff]  ;;  %v5025_v46 = vld [vmem:[#allocation7 + $0xcc] ss:$16 sps:$4 sm:$0xff]   ;;  %v5028_v49 = vld [vmem:[#allocation7 + $0xc8] ss:$16 sps:$4 sm:$0xff]  }
  0x45   :  { %333 = vadd.xlane.f32.xlu0 %v267_v6  ;;  %1907 = vmatpush1.bf16.msra.mxu1 %v5004_v25  ;;  %v5996_v47 = vld [vmem:[#allocation4 + $0x58] sm:$0xff]  ;;  %v5027_v48 = vld [vmem:[#allocation7 + $0xc0] ss:$16 sps:$4 sm:$0xff]   ;;  %v275_v50 = vmul.f32 %v5994_v44, %v5994_v44  ;;  %v5029_v52 = vld [vmem:[#allocation7 + $0xe4] ss:$16 sps:$4 sm:$0xff]  }
  0x46   :  { %1555 = vmatprep.subr.bf16.mxu0 %v5005_v28  ;;  %1908 = vmatprep.subr.bf16.mxu1 %v5007_v29  ;;  %v276_v51 = vmul.f32 %v5996_v47, %v5996_v47  ;;  %v5031_v53 = vld [vmem:[#allocation7 + $0xec] ss:$16 sps:$4 sm:$0xff]   ;;  %v6004_v54 = vld [vmem:[#allocation4 + $0x60] sm:$0xff]  ;;  %v5034_v56 = vld [vmem:[#allocation7 + $0xe8] ss:$16 sps:$4 sm:$0xff]  }
  0x47   :  { %335 = vadd.xlane.f32.xlu1 %v268_v7  ;;  %v5033_v55 = vld [vmem:[#allocation7 + $0xe0] ss:$16 sps:$4 sm:$0xff]   ;;  %v6006_v57 = vld [vmem:[#allocation4 + $0x68] sm:$0xff]  ;;  %v277_v59 = vmul.f32 %v6004_v54, %v6004_v54  ;;  %v88_v62 = vld [vmem:[#allocation4 + $0x78] sm:$0xff] }
  0x48   :  { %1556 = vmatpush1.bf16.msra.mxu0 %v5009_v31  ;;  %v278_v60 = vmul.f32 %v6006_v57, %v6006_v57  ;;  %v6018_v61 = vld [vmem:[#allocation4 + $0x70] sm:$0xff]  ;;  %v280_v2 = vmul.f32 %v88_v62, %v88_v62  ;;  %v89_v3 = vld [vmem:[#allocation4 + $0x80] sm:$0xff]  ;;  %v90_v6 = vld [vmem:[#allocation4 + $0x88] sm:$0xff] }
  0x49   :  { %145 = vadd.xlane.f32.xlu0 %v5964_v8  ;;  %1909 = vmatpush1.bf16.msra.mxu1 %v5010_v32  ;;  %v279_v63 = vmul.f32 %v6018_v61, %v6018_v61  ;;  %v281_v7 = vmul.f32 %v89_v3, %v89_v3  ;;  %v282_v9 = vmul.f32 %v90_v6, %v90_v6  ;;  %v91_v10 = vld [vmem:[#allocation4 + $0x90] sm:$0xff]  ;;  %v92_v11 = vld [vmem:[#allocation4 + $0x98] sm:$0xff]  ;;  %v93_v15 = vld [vmem:[#allocation4 + $0xa0] sm:$0xff] }
  0x4a   :  { %1557 = vmatprep.subr.bf16.mxu0 %v5011_v34  ;;  %1910 = vmatprep.subr.bf16.mxu1 %v5013_v35  ;;  %v283_v12 = vmul.f32 %v91_v10, %v91_v10  ;;  %v94_v16 = vld [vmem:[#allocation4 + $0xa8] sm:$0xff]  ;;  %v95_v19 = vld [vmem:[#allocation4 + $0xb0] sm:$0xff]  ;;  %v96_v22 = vld [vmem:[#allocation4 + $0xb8] sm:$0xff] }
  0x4b   :  { %147 = vadd.xlane.f32.xlu1 %v5966_v13  ;;  %v286_v18 = vmul.f32 %v94_v16, %v94_v16  ;;  %v287_v23 = vmul.f32 %v95_v19, %v95_v19  ;;  %v288_v24 = vmul.f32 %v96_v22, %v96_v22  ;;  %v97_v25 = vld [vmem:[#allocation4 + $0xc0] sm:$0xff]  ;;  %v99_v29 = vld [vmem:[#allocation4 + $0xd0] sm:$0xff]  ;;  %v100_v31 = vld [vmem:[#allocation4 + $0xd8] sm:$0xff] }
  0x4c   :  { %1558 = vmatpush1.bf16.msra.mxu0 %v5015_v36  ;;  %v291_v32 = vmul.f32 %v99_v29, %v99_v29  ;;  %v292_v34 = vmul.f32 %v100_v31, %v100_v31  ;;  %v101_v35 = vld [vmem:[#allocation4 + $0xe0] sm:$0xff]  ;;  %v102_v36 = vld [vmem:[#allocation4 + $0xe8] sm:$0xff] }
  0x4d   :  { %337 = vadd.xlane.f32.xlu0 %v269_v14  ;;  %1911 = vmatpush1.bf16.msra.mxu1 %v5016_v37  ;;  %v284_v14 = vmul.f32 %v92_v11, %v92_v11  ;;  %v293_v37 = vmul.f32 %v101_v35, %v101_v35 }
  0x4e   :  { %1559 = vmatprep.subr.bf16.mxu0 %v5017_v40  ;;  %1912 = vmatprep.subr.bf16.mxu1 %v5019_v41  ;;  %v104_v40 = vld [vmem:[#allocation4 + $0xf8] sm:$0xff] }
  0x4f   :  { %339 = vadd.xlane.f32.xlu1 %v270_v17  ;;  %v285_v17 = vmul.f32 %v93_v15, %v93_v15 }
  0x50   :  { %1560 = vmatpush1.bf16.msra.mxu0 %v5021_v42  ;;  %v296_v42 = vmul.f32 %v104_v40, %v104_v40 }
  0x51   :  { %149 = vadd.xlane.f32.xlu0 %v5974_v20  ;;  %1913 = vmatpush1.bf16.msra.mxu1 %v5022_v43  ;;  %v105_v43 = vld [vmem:[#allocation4 + $0x100] sm:$0xff] }
  0x52   :  { %1561 = vmatprep.subr.bf16.mxu0 %v5023_v45  ;;  %1914 = vmatprep.subr.bf16.mxu1 %v5025_v46  ;;  %v106_v45 = vld [vmem:[#allocation4 + $0x108] sm:$0xff]  ;;  %v297_v46 = vmul.f32 %v105_v43, %v105_v43 }
  0x53   :  { %151 = vadd.xlane.f32.xlu1 %v5976_v21 }
  0x54   :  { %1562 = vmatpush1.bf16.msra.mxu0 %v5027_v48  ;;  %v298_v48 = vmul.f32 %v106_v45, %v106_v45 }
  0x55   :  { %341 = vadd.xlane.f32.xlu0 %v271_v26  ;;  %1915 = vmatpush1.bf16.msra.mxu1 %v5028_v49  ;;  %v98_v26 = vld [vmem:[#allocation4 + $0xc8] sm:$0xff]  ;;  %v107_v49 = vld [vmem:[#allocation4 + $0x110] sm:$0xff] }
  0x56   :  { %1563 = vmatprep.subr.bf16.mxu0 %v5029_v52  ;;  %1916 = vmatprep.subr.bf16.mxu1 %v5031_v53  ;;  %v290_v28 = vmul.f32 %v98_v26, %v98_v26 }
  0x57   :  { %343 = vadd.xlane.f32.xlu1 %v272_v27  ;;  %v289_v27 = vmul.f32 %v97_v25, %v97_v25 }
  0x58   :  { %1564 = vmatpush1.bf16.msra.mxu0 %v5033_v55  ;;  %v109_v55 = vld [vmem:[#allocation4 + $0x120] sm:$0xff] }
  0x59   :  { %153 = vadd.xlane.f32.xlu0 %v5984_v30  ;;  %1917 = vmatpush1.bf16.msra.mxu1 %v5034_v56 }
  0x5a   :  { %3983 = vmatprep.subr.bf16.mxu0 %v9484_v58  ;;  %4272 = vmatprep.subr.bf16.mxu1 %v9484_v58 }
  0x5b   :  { %155 = vadd.xlane.f32.xlu1 %v5986_v33 }
  0x5d   :  { %345 = vadd.xlane.f32.xlu0 %v273_v38  ;;  %v294_v38 = vmul.f32 %v102_v36, %v102_v36 }
  0x5f   :  { %347 = vadd.xlane.f32.xlu1 %v274_v39  ;;  %v103_v39 = vld [vmem:[#allocation4 + $0xf0] sm:$0xff] }
  0x60   :  { %v295_v41 = vmul.f32 %v103_v39, %v103_v39 }
  0x61   :  { %157 = vadd.xlane.f32.xlu0 %v5994_v44 }
  0x63   :  { %159 = vadd.xlane.f32.xlu1 %v5996_v47 }
  0x65   :  { %349 = vadd.xlane.f32.xlu0 %v275_v50  ;;  %v108_v50 = vld [vmem:[#allocation4 + $0x118] sm:$0xff] }
  0x66   :  { %v300_v52 = vmul.f32 %v108_v50, %v108_v50 }
  0x67   :  { %351 = vadd.xlane.f32.xlu1 %v276_v51  ;;  %v299_v51 = vmul.f32 %v107_v49, %v107_v49 }
  0x69   :  { %161 = vadd.xlane.f32.xlu0 %v6004_v54 }
  0x6b   :  { %163 = vadd.xlane.f32.xlu1 %v6006_v57 }
  0x6d   :  { %353 = vadd.xlane.f32.xlu0 %v277_v59 }
  0x6f   :  { %355 = vadd.xlane.f32.xlu1 %v278_v60  ;;  %v110_v60 = vld [vmem:[#allocation4 + $0x128] sm:$0xff] }
  0x71   :  { %165 = vadd.xlane.f32.xlu0 %v6018_v61 }
  0x73   :  { %167 = vadd.xlane.f32.xlu1 %v88_v62 }
  0x75   :  { %357 = vadd.xlane.f32.xlu0 %v279_v63 }
  0x77   :  { %359 = vadd.xlane.f32.xlu1 %v280_v2  ;;  %v301_v2 = vmul.f32 %v109_v55, %v109_v55 }
  0x79   :  { %169 = vadd.xlane.f32.xlu0 %v89_v3 }
  0x7b   :  { %171 = vadd.xlane.f32.xlu1 %v90_v6 }
  0x7d   :  { %361 = vadd.xlane.f32.xlu0 %v281_v7 }
  0x7f   :  { %363 = vadd.xlane.f32.xlu1 %v282_v9  ;;  %v302_v9 = vmul.f32 %v110_v60, %v110_v60 }
  0x81   :  { %173 = vadd.xlane.f32.xlu0 %v91_v10 }
  0x83   :  { %175 = vadd.xlane.f32.xlu1 %v92_v11 }
  0x85   :  { %365 = vadd.xlane.f32.xlu0 %v283_v12 }
  0x87   :  { %367 = vadd.xlane.f32.xlu1 %v284_v14 }
  0x89   :  { %177 = vadd.xlane.f32.xlu0 %v93_v15 }
  0x8b   :  { %179 = vadd.xlane.f32.xlu1 %v94_v16  ;;  %v111_v16 = vld [vmem:[#allocation4 + $0x130] sm:$0xff] }
  0x8d   :  { %369 = vadd.xlane.f32.xlu0 %v285_v17 }
  0x8f   :  { %371 = vadd.xlane.f32.xlu1 %v286_v18 }
  0x91   :  { %181 = vadd.xlane.f32.xlu0 %v95_v19 }
  0x93   :  { %183 = vadd.xlane.f32.xlu1 %v96_v22 }
  0x95   :  { %373 = vadd.xlane.f32.xlu0 %v287_v23  ;;  %v112_v23 = vld [vmem:[#allocation4 + $0x138] sm:$0xff] }
  0x97   :  { %375 = vadd.xlane.f32.xlu1 %v288_v24 }
  0x99   :  { %185 = vadd.xlane.f32.xlu0 %v97_v25 }
  0x9b   :  { %187 = vadd.xlane.f32.xlu1 %v98_v26  ;;  %v303_v26 = vmul.f32 %v111_v16, %v111_v16 }
  0x9d   :  { %377 = vadd.xlane.f32.xlu0 %v289_v27 }
  0x9f   :  { %379 = vadd.xlane.f32.xlu1 %v290_v28 }
  0xa1   :  { %189 = vadd.xlane.f32.xlu0 %v99_v29 }
  0xa3   :  { %191 = vadd.xlane.f32.xlu1 %v100_v31 }
  0xa5   :  { %381 = vadd.xlane.f32.xlu0 %v291_v32  ;;  %v304_v32 = vmul.f32 %v112_v23, %v112_v23 }
  0xa7   :  { %383 = vadd.xlane.f32.xlu1 %v292_v34 }
  0xa9   :  { %193 = vadd.xlane.f32.xlu0 %v101_v35 }
  0xab   :  { %195 = vadd.xlane.f32.xlu1 %v102_v36 }
  0xad   :  { %385 = vadd.xlane.f32.xlu0 %v293_v37 }
  0xaf   :  { %387 = vadd.xlane.f32.xlu1 %v294_v38 }
  0xb1   :  { %197 = vadd.xlane.f32.xlu0 %v103_v39  ;;  %v113_v39 = vld [vmem:[#allocation4 + $0x140] sm:$0xff] }
  0xb3   :  { %199 = vadd.xlane.f32.xlu1 %v104_v40 }
  0xb5   :  { %389 = vadd.xlane.f32.xlu0 %v295_v41 }
  0xb7   :  { %391 = vadd.xlane.f32.xlu1 %v296_v42 }
  0xb9   :  { %201 = vadd.xlane.f32.xlu0 %v105_v43 }
  0xbb   :  { %203 = vadd.xlane.f32.xlu1 %v106_v45  ;;  %v114_v45 = vld [vmem:[#allocation4 + $0x148] sm:$0xff] }
  0xbd   :  { %393 = vadd.xlane.f32.xlu0 %v297_v46 }
  0xbf   :  { %395 = vadd.xlane.f32.xlu1 %v298_v48 }
  0xc1   :  { %205 = vadd.xlane.f32.xlu0 %v107_v49 }
  0xc3   :  { %207 = vadd.xlane.f32.xlu1 %v108_v50  ;;  %v305_v50 = vmul.f32 %v113_v39, %v113_v39 }
  0xc5   :  { %397 = vadd.xlane.f32.xlu0 %v299_v51 }
  0xc6   :  { %v138_v53 = vpop.xlane.xlu0 %137 }
  0xc7   :  { %v6023_v56 = vmul.f32 0.0078125, %v138_v53  ;;  %399 = vadd.xlane.f32.xlu1 %v300_v52 }
  0xc8   :  { %v330_v59 = vpop.xlane.xlu1 %329 }
  0xc9   :  { %v585_v62 = vmul.f32 %v6023_v56, %v6023_v56  ;;  %v521_v63 = vmul.f32 0.0078125, %v330_v59  ;;  %209 = vadd.xlane.f32.xlu0 %v109_v55  ;;  %v777_v51 = vsub.f32 %v5944_v0, %v6023_v56  ;;  %v6052_v0 = vld [vmem:[%s9477_s1] ss:$0 sm:$0xff] }
  0xca   :  { %v140_v3 = vpop.xlane.xlu0 %139 }
  0xcb   :  { %v649_v6 = vsub.f32 %v521_v63, %v585_v62  ;;  %v6027_v7 = vmul.f32 0.0078125, %v140_v3  ;;  %211 = vadd.xlane.f32.xlu1 %v110_v60  ;;  %v306_v62 = vmul.f32 %v114_v45, %v114_v45 }
  0xcc   :  { %v332_v10 = vpop.xlane.xlu1 %331 }
  0xcd   :  { %v713_v11 = vmax.f32 %v649_v6, 0.0  ;;  %v586_v12 = vmul.f32 %v6027_v7, %v6027_v7  ;;  %v522_v14 = vmul.f32 0.0078125, %v332_v10  ;;  %401 = vadd.xlane.f32.xlu0 %v301_v2  ;;  %v778_v56 = vsub.f32 %v5946_v1, %v6027_v7  ;;  %v6064_v7 = vld [vmem:[%s9478_s2] ss:$0 sm:$0xff] }
  0xce   :  { %v142_v15 = vpop.xlane.xlu0 %141 }
  0xcf   :  { %v841_v17 = vadd.f32 1e-05, %v713_v11  ;;  %v650_v18 = vsub.f32 %v522_v14, %v586_v12  ;;  %v6031_v19 = vmul.f32 0.0078125, %v142_v15  ;;  %403 = vadd.xlane.f32.xlu1 %v302_v9  ;;  %v115_v11 = vld [vmem:[#allocation4 + $0x150] sm:$0xff] }
  0xd0   :  { %v144_v22 = vpop.xlane.xlu1 %143  ;;  %v307_v1 = vmul.f32 %v115_v11, %v115_v11 }
  0xd1   :  { %5067 = vrsqrt.f32 %v841_v17  ;;  %v714_v24 = vmax.f32 %v650_v18, 0.0  ;;  %v587_v25 = vmul.f32 %v6031_v19, %v6031_v19  ;;  %213 = vadd.xlane.f32.xlu0 %v111_v16  ;;  %v6035_v27 = vmul.f32 0.0078125, %v144_v22  ;;  %v116_v18 = vld [vmem:[#allocation4 + $0x158] sm:$0xff] }
  0xd2   :  { %v334_v28 = vpop.xlane.xlu0 %333 }
  0xd3   :  { %v842_v29 = vadd.f32 1e-05, %v714_v24  ;;  %v523_v31 = vmul.f32 0.0078125, %v334_v28  ;;  %215 = vadd.xlane.f32.xlu1 %v112_v23  ;;  %v588_v35 = vmul.f32 %v6035_v27, %v6035_v27 }
  0xd4   :  { %v336_v34 = vpop.xlane.xlu1 %335 }
  0xd5   :  { %5069 = vrsqrt.f32 %v842_v29  ;;  %v651_v36 = vsub.f32 %v523_v31, %v587_v25  ;;  %v524_v37 = vmul.f32 0.0078125, %v336_v34  ;;  %405 = vadd.xlane.f32.xlu0 %v303_v26 }
  0xd6   :  { %v146_v38 = vpop.xlane.xlu0 %145 }
  0xd7   :  { %v715_v40 = vmax.f32 %v651_v36, 0.0  ;;  %v652_v41 = vsub.f32 %v524_v37, %v588_v35  ;;  %v6039_v42 = vmul.f32 0.0078125, %v146_v38  ;;  %407 = vadd.xlane.f32.xlu1 %v304_v32  ;;  %v308_v35 = vmul.f32 %v116_v18, %v116_v18 }
  0xd8   :  { %v148_v43 = vpop.xlane.xlu1 %147  ;;  %v779_v36 = vsub.f32 %v5954_v4, %v6031_v19 }
  0xd9   :  { %v843_v46 = vadd.f32 1e-05, %v715_v40  ;;  %v716_v48 = vmax.f32 %v652_v41, 0.0  ;;  %v589_v49 = vmul.f32 %v6039_v42, %v6039_v42  ;;  %217 = vadd.xlane.f32.xlu0 %v113_v39  ;;  %v6045_v52 = vmul.f32 0.0078125, %v148_v43 }
  0xda   :  { %v338_v53 = vpop.xlane.xlu0 %337 }
  0xdb   :  { %v5068_v55 = vpop.eup %5067  ;;  %5071 = vrsqrt.f32 %v843_v46  ;;  %v844_v59 = vadd.f32 1e-05, %v716_v48  ;;  %v525_v60 = vmul.f32 0.0078125, %v338_v53  ;;  %219 = vadd.xlane.f32.xlu1 %v114_v45  ;;  %v590_v3 = vmul.f32 %v6045_v52, %v6045_v52  ;;  %v5035_v46 = vld [vmem:[#allocation9] sm:$0xff]  }
  0xdc   :  { %v340_v63 = vpop.xlane.xlu1 %339  ;;  %v969_v2 = vmul.f32 %v5068_v55, %v777_v51  ;;  %v5036_v48 = vld [vmem:[#allocation9 + $0x80] sm:$0xff]  }
  0xdd   :  { %5073 = vrsqrt.f32 %v844_v59  ;;  %v653_v6 = vsub.f32 %v525_v60, %v589_v49  ;;  %v526_v9 = vmul.f32 0.0078125, %v340_v63  ;;  %409 = vadd.xlane.f32.xlu0 %v305_v50  ;;  %v780_v49 = vsub.f32 %v5956_v5, %v6035_v27  ;;  %v117_v60 = vld [vmem:[#allocation4 + $0x160] sm:$0xff]  ;;  %v118_v63 = vld [vmem:[#allocation4 + $0x168] sm:$0xff] }
  0xde   :  { %v150_v10 = vpop.xlane.xlu0 %149  ;;  %v1040_v23 = vmul.f32 %v6052_v0, %v969_v2  ;;  %v5037_v27 = vld [vmem:[#allocation9 + $0x8] sm:$0xff]  }
  0xdf   :  { %v5070_v12 = vpop.eup %5069  ;;  %v717_v14 = vmax.f32 %v653_v6, 0.0  ;;  %v654_v15 = vsub.f32 %v526_v9, %v590_v3  ;;  %v6056_v16 = vmul.f32 0.0078125, %v150_v10  ;;  %411 = vadd.xlane.f32.xlu1 %v306_v62 }
  0xe0   :  { %v152_v17 = vpop.xlane.xlu1 %151  ;;  %v970_v22 = vmul.f32 %v5070_v12, %v778_v56  ;;  %v1111_v38 = vadd.f32 %v6064_v7, %v1040_v23  ;;  %v5038_v56 = vld [vmem:[#allocation9 + $0x88] sm:$0xff]   ;;  %v309_v12 = vmul.f32 %v117_v60, %v117_v60 }
  0xe1   :  { %v845_v24 = vadd.f32 1e-05, %v717_v14  ;;  %v718_v25 = vmax.f32 %v654_v15, 0.0  ;;  %v591_v26 = vmul.f32 %v6056_v16, %v6056_v16  ;;  %221 = vadd.xlane.f32.xlu0 %v115_v11  ;;  %v6066_v28 = vmul.f32 0.0078125, %v152_v17 }
  0xe2   :  { %v342_v29 = vpop.xlane.xlu0 %341  ;;  %v1041_v31 = vmul.f32 %v6052_v0, %v970_v22  ;;  %v781_v22 = vsub.f32 %v5964_v8, %v6039_v42  ;;  %v782_v8 = vsub.f32 %v5966_v13, %v6045_v52  ;;  %v120_v52 = vld [vmem:[#allocation4 + $0x178] sm:$0xff] }
  0xe3   :  { %5075 = vrsqrt.f32 %v845_v24  ;;  %v846_v32 = vadd.f32 1e-05, %v718_v25  ;;  %v527_v34 = vmul.f32 0.0078125, %v342_v29  ;;  %223 = vadd.xlane.f32.xlu1 %v116_v18  ;;  %v592_v41 = vmul.f32 %v6066_v28, %v6066_v28 }
  0xe4   :  { %v344_v37 = vpop.xlane.xlu1 %343  ;;  %v1112_v39 = vadd.f32 %v6064_v7, %v1041_v31  ;;  %v310_v18 = vmul.f32 %v118_v63, %v118_v63 }
  0xe5   :  { %v5072_v40 = vpop.eup %5071  ;;  %5077 = vrsqrt.f32 %v846_v32  ;;  %v655_v43 = vsub.f32 %v527_v34, %v591_v26  ;;  %v528_v45 = vmul.f32 0.0078125, %v344_v37  ;;  %413 = vadd.xlane.f32.xlu0 %v307_v1 }
  0xe6   :  { %v154_v50 = vpop.xlane.xlu0 %153  ;;  %v1175_v4 = vpack.c.bf16 %v1112_v39, %v1111_v38  ;;  %v971_v19 = vmul.f32 %v5072_v40, %v779_v36  ;;  %v119_v40 = vld [vmem:[#allocation4 + $0x170] sm:$0xff] }
  0xe7   :  { %v5074_v51 = vpop.eup %5073  ;;  %v719_v53 = vmax.f32 %v655_v43, 0.0  ;;  %v656_v55 = vsub.f32 %v528_v45, %v592_v41  ;;  %v6077_v59 = vmul.f32 0.0078125, %v154_v50  ;;  %415 = vadd.xlane.f32.xlu1 %v308_v35  ;;  %v5039_v35 = vld [vmem:[#allocation9 + $0x10] sm:$0xff]  }
  0xe8   :  { %1582 = vmatmul.mubr.bf16.vlgmr.msra.gmra.mrb[0].mxu0 %v1175_v4  ;;  %1935 = vmatmul.mubr.bf16.vlgmr.msra.gmra.mrb[0].mxu1 %v1175_v4  ;;  %v156_v62 = vpop.xlane.xlu1 %155  ;;  %v972_v2 = vmul.f32 %v5074_v51, %v780_v49  ;;  %v1042_v3 = vmul.f32 %v6052_v0, %v971_v19  ;;  %v5040_v41 = vld [vmem:[#allocation9 + $0x90] sm:$0xff]   ;;  %v311_v19 = vmul.f32 %v119_v40, %v119_v40 }
  0xe9   :  { %v847_v6 = vadd.f32 1e-05, %v719_v53  ;;  %v720_v9 = vmax.f32 %v656_v55, 0.0  ;;  %v593_v5 = vmul.f32 %v6077_v59, %v6077_v59  ;;  %3984 = vmatpush1.bf16.msra.mxu0 %v5035_v46  ;;  %4273 = vmatpush1.bf16.msra.mxu1 %v5036_v48  ;;  %v6082_v10 = vmul.f32 0.0078125, %v156_v62  ;;  %v5041_v53 = vld [vmem:[#allocation9 + $0x18] sm:$0xff]  }
  0xea   :  { %225 = vadd.xlane.f32.xlu0 %v117_v60  ;;  %v346_v11 = vpop.xlane.xlu0 %345  ;;  %1591 = vmatprep.mubr.bf16.mxu0 %v9484_v58  ;;  %v1043_v14 = vmul.f32 %v6052_v0, %v972_v2  ;;  %v1113_v24 = vadd.f32 %v6064_v7, %v1042_v3  ;;  %v312_v62 = vmul.f32 %v120_v52, %v120_v52 }
  0xeb   :  { %5079 = vrsqrt.f32 %v847_v6  ;;  %v848_v15 = vadd.f32 1e-05, %v720_v9  ;;  %v529_v17 = vmul.f32 0.0078125, %v346_v11  ;;  %227 = vadd.xlane.f32.xlu1 %v118_v63  ;;  %1944 = vmatprep.mubr.bf16.mxu1 %v9484_v58  ;;  %v594_v1 = vmul.f32 %v6082_v10, %v6082_v10  ;;  %v5042_v63 = vld [vmem:[#allocation9 + $0x98] sm:$0xff]  }
  0xec   :  { %v348_v23 = vpop.xlane.xlu1 %347  ;;  %v1114_v25 = vadd.f32 %v6064_v7, %v1043_v14  ;;  %3985 = vmatprep.subr.bf16.mxu0 %v9484_v58  ;;  %4274 = vmatprep.subr.bf16.mxu1 %v9484_v58  ;;  %v783_v2 = vsub.f32 %v5974_v20, %v6056_v16 }
  0xed   :  { %v5076_v26 = vpop.eup %5075  ;;  %5081 = vrsqrt.f32 %v848_v15  ;;  %v657_v29 = vsub.f32 %v529_v17, %v593_v5  ;;  %v530_v31 = vmul.f32 0.0078125, %v348_v23  ;;  %3986 = vmatpush1.bf16.msra.mxu0 %v5037_v27  ;;  %4275 = vmatpush1.bf16.msra.mxu1 %v5038_v56  ;;  %v121_v23 = vld [vmem:[#allocation4 + $0x180] sm:$0xff] }
  0xee   :  { %417 = vadd.xlane.f32.xlu0 %v309_v12  ;;  %v158_v42 = vpop.xlane.xlu0 %157  ;;  %v1176_v32 = vpack.c.bf16 %v1114_v25, %v1113_v24  ;;  %v973_v34 = vmul.f32 %v5076_v26, %v781_v22  ;;  %3987 = vmatprep.subr.bf16.mxu0 %v9484_v58  ;;  %v784_v12 = vsub.f32 %v5976_v21, %v6066_v28  ;;  %v122_v25 = vld [vmem:[#allocation4 + $0x188] sm:$0xff]  ;;  %v5043_v28 = vld [vmem:[#allocation9 + $0x20] sm:$0xff]  }
  0xef   :  { %v5078_v36 = vpop.eup %5077  ;;  %v721_v37 = vmax.f32 %v657_v29, 0.0  ;;  %v658_v38 = vsub.f32 %v530_v31, %v594_v1  ;;  %v6098_v39 = vmul.f32 0.0078125, %v158_v42  ;;  %419 = vadd.xlane.f32.xlu1 %v310_v18  ;;  %4276 = vmatprep.subr.bf16.mxu1 %v9484_v58  ;;  %v5044_v1 = vld [vmem:[#allocation9 + $0xa0] sm:$0xff]  }
  0xf0   :  { %1592 = vmatmul.mubr.bf16.gmra.mrb[4].mxu0 %v1176_v32  ;;  %1945 = vmatmul.mubr.bf16.gmra.mrb[4].mxu1 %v1176_v32  ;;  %v160_v13 = vpop.xlane.xlu1 %159  ;;  %v974_v43 = vmul.f32 %v5078_v36, %v782_v8  ;;  %v1044_v45 = vmul.f32 %v6052_v0, %v973_v34  ;;  %v313_v34 = vmul.f32 %v121_v23, %v121_v23 }
  0xf1   :  { %v849_v46 = vadd.f32 1e-05, %v721_v37  ;;  %v722_v48 = vmax.f32 %v658_v38, 0.0  ;;  %v595_v49 = vmul.f32 %v6098_v39, %v6098_v39  ;;  %1601 = vmatprep.mubr.bf16.mxu0 %v9484_v58  ;;  %1954 = vmatprep.mubr.bf16.mxu1 %v9484_v58  ;;  %v6106_v50 = vmul.f32 0.0078125, %v160_v13 }
  0xf2   :  { %229 = vadd.xlane.f32.xlu0 %v119_v40  ;;  %v350_v4 = vpop.xlane.xlu0 %349  ;;  %v1045_v51 = vmul.f32 %v6052_v0, %v974_v43  ;;  %3988 = vmatpush1.bf16.msra.mxu0 %v5039_v35  ;;  %v1115_v6 = vadd.f32 %v6064_v7, %v1044_v45  ;;  %v314_v38 = vmul.f32 %v122_v25, %v122_v25 }
  0xf3   :  { %5083 = vrsqrt.f32 %v849_v46  ;;  %v850_v55 = vadd.f32 1e-05, %v722_v48  ;;  %v531_v60 = vmul.f32 0.0078125, %v350_v4  ;;  %231 = vadd.xlane.f32.xlu1 %v120_v52  ;;  %4277 = vmatpush1.bf16.msra.mxu1 %v5040_v41  ;;  %v596_v27 = vmul.f32 %v6106_v50, %v6106_v50 }
  0xf4   :  { %v352_v3 = vpop.xlane.xlu1 %351  ;;  %v1116_v9 = vadd.f32 %v6064_v7, %v1045_v51  ;;  %3989 = vmatprep.subr.bf16.mxu0 %v9484_v58  ;;  %4278 = vmatprep.subr.bf16.mxu1 %v9484_v58  ;;  %v785_v40 = vsub.f32 %v5984_v30, %v6077_v59  ;;  %v786_v30 = vsub.f32 %v5986_v33, %v6082_v10 }
  0xf5   :  { %v5080_v5 = vpop.eup %5079  ;;  %5085 = vrsqrt.f32 %v850_v55  ;;  %v659_v56 = vsub.f32 %v531_v60, %v595_v49  ;;  %v532_v11 = vmul.f32 0.0078125, %v352_v3  ;;  %v124_v3 = vld [vmem:[#allocation4 + $0x198] sm:$0xff] }
  0xf6   :  { %421 = vadd.xlane.f32.xlu0 %v311_v19  ;;  %v162_v20 = vpop.xlane.xlu0 %161  ;;  %v1177_v16 = vpack.c.bf16 %v1116_v9, %v1115_v6  ;;  %v975_v14 = vmul.f32 %v5080_v5, %v783_v2  ;;  %3990 = vmatpush1.bf16.msra.mxu0 %v5041_v53  ;;  %v5045_v19 = vld [vmem:[#allocation9 + $0x28] sm:$0xff]  }
  0xf7   :  { %v5082_v15 = vpop.eup %5081  ;;  %v723_v17 = vmax.f32 %v659_v56, 0.0  ;;  %v660_v18 = vsub.f32 %v532_v11, %v596_v27  ;;  %v6119_v22 = vmul.f32 0.0078125, %v162_v20  ;;  %423 = vadd.xlane.f32.xlu1 %v312_v62  ;;  %4279 = vmatpush1.bf16.msra.mxu1 %v5042_v63  ;;  %v123_v62 = vld [vmem:[#allocation4 + $0x190] sm:$0xff]  ;;  %v5046_v63 = vld [vmem:[#allocation9 + $0xa8] sm:$0xff]  }
  0xf8   :  { %1602 = vmatmul.mubr.bf16.gmra.mrb[8].mxu0 %v1177_v16  ;;  %1955 = vmatmul.mubr.bf16.gmra.mrb[8].mxu1 %v1177_v16  ;;  %v164_v24 = vpop.xlane.xlu1 %163  ;;  %v976_v26 = vmul.f32 %v5082_v15, %v784_v12  ;;  %v1046_v21 = vmul.f32 %v6052_v0, %v975_v14  ;;  %v315_v11 = vmul.f32 %v123_v62, %v123_v62  ;;  %v5047_v20 = vld [vmem:[#allocation9 + $0x30] sm:$0xff]  }
  0xf9   :  { %v851_v29 = vadd.f32 1e-05, %v723_v17  ;;  %v724_v31 = vmax.f32 %v660_v18, 0.0  ;;  %v597_v8 = vmul.f32 %v6119_v22, %v6119_v22  ;;  %1611 = vmatprep.mubr.bf16.mxu0 %v9484_v58  ;;  %1964 = vmatprep.mubr.bf16.mxu1 %v9484_v58  ;;  %v6126_v42 = vmul.f32 0.0078125, %v164_v24  ;;  %v5048_v17 = vld [vmem:[#allocation9 + $0xb0] sm:$0xff]  }
  0xfa   :  { %233 = vadd.xlane.f32.xlu0 %v121_v23  ;;  %v354_v32 = vpop.xlane.xlu0 %353  ;;  %v1047_v35 = vmul.f32 %v6052_v0, %v976_v26  ;;  %3991 = vmatprep.subr.bf16.mxu0 %v9484_v58  ;;  %v1117_v13 = vadd.f32 %v6064_v7, %v1046_v21  ;;  %v316_v15 = vmul.f32 %v124_v3, %v124_v3 }
  0xfb   :  { %5087 = vrsqrt.f32 %v851_v29  ;;  %v852_v36 = vadd.f32 1e-05, %v724_v31  ;;  %v533_v37 = vmul.f32 0.0078125, %v354_v32  ;;  %235 = vadd.xlane.f32.xlu1 %v122_v25  ;;  %4280 = vmatprep.subr.bf16.mxu1 %v9484_v58  ;;  %v598_v45 = vmul.f32 %v6126_v42, %v6126_v42 }
  0xfc   :  { %v356_v41 = vpop.xlane.xlu1 %355  ;;  %v1118_v52 = vadd.f32 %v6064_v7, %v1047_v35  ;;  %3992 = vmatpush1.bf16.msra.mxu0 %v5043_v28  ;;  %4281 = vmatpush1.bf16.msra.mxu1 %v5044_v1  ;;  %v787_v18 = vsub.f32 %v5994_v44, %v6098_v39  ;;  %v788_v29 = vsub.f32 %v5996_v47, %v6106_v50  ;;  %v5049_v50 = vld [vmem:[#allocation9 + $0x38] sm:$0xff]  }
  0xfd   :  { %v5084_v43 = vpop.eup %5083  ;;  %5089 = vrsqrt.f32 %v852_v36  ;;  %v661_v46 = vsub.f32 %v533_v37, %v597_v8  ;;  %v534_v48 = vmul.f32 0.0078125, %v356_v41  ;;  %3993 = vmatprep.subr.bf16.mxu0 %v9484_v58  ;;  %4282 = vmatprep.subr.bf16.mxu1 %v9484_v58  ;;  %v125_v36 = vld [vmem:[#allocation4 + $0x1a0] sm:$0xff]  ;;  %v5050_v41 = vld [vmem:[#allocation9 + $0xb8] sm:$0xff]  }
  0xfe   :  { %425 = vadd.xlane.f32.xlu0 %v313_v34  ;;  %v166_v59 = vpop.xlane.xlu0 %165  ;;  %v1178_v49 = vpack.c.bf16 %v1118_v52, %v1117_v13  ;;  %v977_v4 = vmul.f32 %v5084_v43, %v785_v40 }
  0xff   :  { %v5086_v51 = vpop.eup %5085  ;;  %v725_v53 = vmax.f32 %v661_v46, 0.0  ;;  %v662_v55 = vsub.f32 %v534_v48, %v598_v45  ;;  %v6141_v60 = vmul.f32 0.0078125, %v166_v59  ;;  %427 = vadd.xlane.f32.xlu1 %v314_v38  ;;  %v126_v38 = vld [vmem:[#allocation4 + $0x1a8] sm:$0xff]  ;;  %v317_v48 = vmul.f32 %v125_v36, %v125_v36 }
 0x100   :  { %1612 = vmatmul.mubr.bf16.gmra.mrb[12].mxu0 %v1178_v49  ;;  %1965 = vmatmul.mubr.bf16.gmra.mrb[12].mxu1 %v1178_v49  ;;  %v168_v2 = vpop.xlane.xlu1 %167  ;;  %v978_v6 = vmul.f32 %v5086_v51, %v786_v30  ;;  %v1048_v33 = vmul.f32 %v6052_v0, %v977_v4  ;;  %v318_v4 = vmul.f32 %v126_v38, %v126_v38 }
 0x101   :  { %v853_v10 = vadd.f32 1e-05, %v725_v53  ;;  %v726_v9 = vmax.f32 %v662_v55, 0.0  ;;  %v599_v5 = vmul.f32 %v6141_v60, %v6141_v60  ;;  %1621 = vmatprep.mubr.bf16.mxu0 %v9484_v58  ;;  %1974 = vmatprep.mubr.bf16.mxu1 %v9484_v58  ;;  %v6148_v27 = vmul.f32 0.0078125, %v168_v2 }
 0x102   :  { %237 = vadd.xlane.f32.xlu0 %v123_v62  ;;  %v358_v56 = vpop.xlane.xlu0 %357  ;;  %v1049_v12 = vmul.f32 %v6052_v0, %v978_v6  ;;  %3994 = vmatpush1.bf16.msra.mxu0 %v5045_v19  ;;  %v1119_v24 = vadd.f32 %v6064_v7, %v1048_v33  ;;  %v789_v19 = vsub.f32 %v6004_v54, %v6119_v22 }
 0x103   :  { %5091 = vrsqrt.f32 %v853_v10  ;;  %v854_v16 = vadd.f32 1e-05, %v726_v9  ;;  %v535_v14 = vmul.f32 0.0078125, %v358_v56  ;;  %239 = vadd.xlane.f32.xlu1 %v124_v3  ;;  %4283 = vmatpush1.bf16.msra.mxu1 %v5046_v63  ;;  %v600_v21 = vmul.f32 %v6148_v27, %v6148_v27  ;;  %v5051_v10 = vld [vmem:[#allocation9 + $0x40] sm:$0xff]  }
 0x104   :  { %v360_v23 = vpop.xlane.xlu1 %359  ;;  %v1120_v25 = vadd.f32 %v6064_v7, %v1049_v12  ;;  %3995 = vmatprep.subr.bf16.mxu0 %v9484_v58  ;;  %4284 = vmatprep.subr.bf16.mxu1 %v9484_v58  ;;  %v790_v54 = vsub.f32 %v6006_v57, %v6126_v42  ;;  %v127_v12 = vld [vmem:[#allocation4 + $0x1b0] sm:$0xff] }
 0x105   :  { %v5088_v26 = vpop.eup %5087  ;;  %5093 = vrsqrt.f32 %v854_v16  ;;  %v663_v28 = vsub.f32 %v535_v14, %v599_v5  ;;  %v536_v1 = vmul.f32 0.0078125, %v360_v23  ;;  %v128_v14 = vld [vmem:[#allocation4 + $0x1b8] sm:$0xff] }
 0x106   :  { %429 = vadd.xlane.f32.xlu0 %v315_v11  ;;  %v170_v44 = vpop.xlane.xlu0 %169  ;;  %v1179_v39 = vpack.c.bf16 %v1120_v25, %v1119_v24  ;;  %v979_v31 = vmul.f32 %v5088_v26, %v787_v18  ;;  %3996 = vmatpush1.bf16.msra.mxu0 %v5047_v20  ;;  %v5052_v20 = vld [vmem:[#allocation9 + $0xc0] sm:$0xff]   ;;  %v319_v25 = vmul.f32 %v127_v12, %v127_v12 }
 0x107   :  { %v5090_v8 = vpop.eup %5089  ;;  %v727_v32 = vmax.f32 %v663_v28, 0.0  ;;  %v664_v34 = vsub.f32 %v536_v1, %v600_v21  ;;  %v6161_v35 = vmul.f32 0.0078125, %v170_v44  ;;  %431 = vadd.xlane.f32.xlu1 %v316_v15  ;;  %4285 = vmatpush1.bf16.msra.mxu1 %v5048_v17  ;;  %v5053_v21 = vld [vmem:[#allocation9 + $0x48] sm:$0xff]  }
 0x108   :  { %1622 = vmatmul.mubr.bf16.gmra.mrb[16].mxu0 %v1179_v39  ;;  %1975 = vmatmul.mubr.bf16.gmra.mrb[16].mxu1 %v1179_v39  ;;  %v172_v37 = vpop.xlane.xlu1 %171  ;;  %v980_v40 = vmul.f32 %v5090_v8, %v788_v29  ;;  %v1050_v47 = vmul.f32 %v6052_v0, %v979_v31  ;;  %v320_v29 = vmul.f32 %v128_v14, %v128_v14  ;;  %v5054_v44 = vld [vmem:[#allocation9 + $0xc8] sm:$0xff]  }
 0x109   :  { %v855_v13 = vadd.f32 1e-05, %v727_v32  ;;  %v728_v52 = vmax.f32 %v664_v34, 0.0  ;;  %v601_v43 = vmul.f32 %v6161_v35, %v6161_v35  ;;  %1631 = vmatprep.mubr.bf16.mxu0 %v9484_v58  ;;  %1984 = vmatprep.mubr.bf16.mxu1 %v9484_v58  ;;  %v6168_v45 = vmul.f32 0.0078125, %v172_v37 }
 0x10a   :  { %241 = vadd.xlane.f32.xlu0 %v125_v36  ;;  %v362_v46 = vpop.xlane.xlu0 %361  ;;  %v1051_v30 = vmul.f32 %v6052_v0, %v980_v40  ;;  %3997 = vmatprep.subr.bf16.mxu0 %v9484_v58  ;;  %v1121_v53 = vadd.f32 %v6064_v7, %v1050_v47  ;;  %v791_v39 = vsub.f32 %v6018_v61, %v6141_v60  ;;  %v5707_v40 = vld [vmem:[#allocation4 + $0x78] sm:$0xff] }
 0x10b   :  { %5095 = vrsqrt.f32 %v855_v13  ;;  %v856_v59 = vadd.f32 1e-05, %v728_v52  ;;  %v537_v49 = vmul.f32 0.0078125, %v362_v46  ;;  %243 = vadd.xlane.f32.xlu1 %v126_v38  ;;  %4286 = vmatprep.subr.bf16.mxu1 %v9484_v58  ;;  %v602_v63 = vmul.f32 %v6168_v45, %v6168_v45  ;;  %v129_v46 = vld [vmem:[#allocation4 + $0x1c0] sm:$0xff] }
 0x10c   :  { %v364_v51 = vpop.xlane.xlu1 %363  ;;  %v1122_v55 = vadd.f32 %v6064_v7, %v1051_v30  ;;  %3998 = vmatpush1.bf16.msra.mxu0 %v5049_v50  ;;  %4287 = vmatpush1.bf16.msra.mxu1 %v5050_v41  ;;  %v792_v47 = vsub.f32 %v5707_v40, %v6148_v27  ;;  %v130_v30 = vld [vmem:[#allocation4 + $0x1c8] sm:$0xff] }
 0x10d   :  { %v5092_v62 = vpop.eup %5091  ;;  %5097 = vrsqrt.f32 %v856_v59  ;;  %v665_v2 = vsub.f32 %v537_v49, %v601_v43  ;;  %v538_v3 = vmul.f32 0.0078125, %v364_v51  ;;  %3999 = vmatprep.subr.bf16.mxu0 %v9484_v58  ;;  %4288 = vmatprep.subr.bf16.mxu1 %v9484_v58  ;;  %v5055_v49 = vld [vmem:[#allocation9 + $0x50] sm:$0xff]  }
 0x10e   :  { %433 = vadd.xlane.f32.xlu0 %v317_v48  ;;  %v174_v22 = vpop.xlane.xlu0 %173  ;;  %v1180_v6 = vpack.c.bf16 %v1122_v55, %v1121_v53  ;;  %v981_v33 = vmul.f32 %v5092_v62, %v789_v19 }
 0x10f   :  { %v5094_v9 = vpop.eup %5093  ;;  %v729_v5 = vmax.f32 %v665_v2, 0.0  ;;  %v666_v56 = vsub.f32 %v538_v3, %v602_v63  ;;  %v6183_v11 = vmul.f32 0.0078125, %v174_v22  ;;  %435 = vadd.xlane.f32.xlu1 %v318_v4  ;;  %v5056_v4 = vld [vmem:[#allocation9 + $0xd0] sm:$0xff]   ;;  %v321_v63 = vmul.f32 %v129_v46, %v129_v46 }
 0x110   :  { %1632 = vmatmul.mubr.bf16.gmra.mrb[20].mxu0 %v1180_v6  ;;  %1985 = vmatmul.mubr.bf16.gmra.mrb[20].mxu1 %v1180_v6  ;;  %v176_v16 = vpop.xlane.xlu1 %175  ;;  %v982_v15 = vmul.f32 %v5094_v9, %v790_v54  ;;  %v1052_v57 = vmul.f32 %v6052_v0, %v981_v33  ;;  %v322_v22 = vmul.f32 %v130_v30, %v130_v30  ;;  %v5708_v6 = vld [vmem:[#allocation4 + $0x80] sm:$0xff] }
 0x111   :  { %v857_v42 = vadd.f32 1e-05, %v729_v5  ;;  %v730_v17 = vmax.f32 %v666_v56, 0.0  ;;  %v603_v18 = vmul.f32 %v6183_v11, %v6183_v11  ;;  %1641 = vmatprep.mubr.bf16.mxu0 %v9484_v58  ;;  %1994 = vmatprep.mubr.bf16.mxu1 %v9484_v58  ;;  %v6190_v23 = vmul.f32 0.0078125, %v176_v16 }
 0x112   :  { %245 = vadd.xlane.f32.xlu0 %v127_v12  ;;  %v366_v24 = vpop.xlane.xlu0 %365  ;;  %v1053_v26 = vmul.f32 %v6052_v0, %v982_v15  ;;  %4000 = vmatpush1.bf16.msra.mxu0 %v5051_v10  ;;  %v1123_v8 = vadd.f32 %v6064_v7, %v1052_v57  ;;  %v793_v33 = vsub.f32 %v5708_v6, %v6161_v35 }
 0x113   :  { %5099 = vrsqrt.f32 %v857_v42  ;;  %v858_v28 = vadd.f32 1e-05, %v730_v17  ;;  %v539_v1 = vmul.f32 0.0078125, %v366_v24  ;;  %247 = vadd.xlane.f32.xlu1 %v128_v14  ;;  %4289 = vmatpush1.bf16.msra.mxu1 %v5052_v20  ;;  %v604_v36 = vmul.f32 %v6190_v23, %v6190_v23  ;;  %v5709_v14 = vld [vmem:[#allocation4 + $0x88] sm:$0xff]  ;;  %v5057_v17 = vld [vmem:[#allocation9 + $0x58] sm:$0xff]  }
 0x114   :  { %v368_v31 = vpop.xlane.xlu1 %367  ;;  %v1124_v32 = vadd.f32 %v6064_v7, %v1053_v26  ;;  %4001 = vmatprep.subr.bf16.mxu0 %v9484_v58  ;;  %4290 = vmatprep.subr.bf16.mxu1 %v9484_v58  ;;  %v794_v35 = vsub.f32 %v5709_v14, %v6168_v45  ;;  %v5712_v14 = vld [vmem:[#allocation4 + $0xa0] sm:$0xff] }
 0x115   :  { %v5096_v34 = vpop.eup %5095  ;;  %5101 = vrsqrt.f32 %v858_v28  ;;  %v667_v37 = vsub.f32 %v539_v1, %v603_v18  ;;  %v540_v38 = vmul.f32 0.0078125, %v368_v31  ;;  %v5058_v28 = vld [vmem:[#allocation9 + $0xd8] sm:$0xff]  }
 0x116   :  { %437 = vadd.xlane.f32.xlu0 %v319_v25  ;;  %v178_v61 = vpop.xlane.xlu0 %177  ;;  %v1181_v60 = vpack.c.bf16 %v1124_v32, %v1123_v8  ;;  %v983_v50 = vmul.f32 %v5096_v34, %v791_v39  ;;  %4002 = vmatpush1.bf16.msra.mxu0 %v5053_v21  ;;  %v131_v21 = vld [vmem:[#allocation4 + $0x1d0] sm:$0xff] }
 0x117   :  { %v5098_v41 = vpop.eup %5097  ;;  %v731_v13 = vmax.f32 %v667_v37, 0.0  ;;  %v668_v52 = vsub.f32 %v540_v38, %v604_v36  ;;  %v6202_v43 = vmul.f32 0.0078125, %v178_v61  ;;  %439 = vadd.xlane.f32.xlu1 %v320_v29  ;;  %4291 = vmatpush1.bf16.msra.mxu1 %v5054_v44  ;;  %v132_v29 = vld [vmem:[#allocation4 + $0x1d8] sm:$0xff]  ;;  %v323_v36 = vmul.f32 %v131_v21, %v131_v21  ;;  %v5710_v61 = vld [vmem:[#allocation4 + $0x90] sm:$0xff] }
 0x118   :  { %1642 = vmatmul.mubr.bf16.gmra.mrb[24].mxu0 %v1181_v60  ;;  %1995 = vmatmul.mubr.bf16.gmra.mrb[24].mxu1 %v1181_v60  ;;  %v180_v48 = vpop.xlane.xlu1 %179  ;;  %v984_v59 = vmul.f32 %v5098_v41, %v792_v47  ;;  %v1054_v27 = vmul.f32 %v6052_v0, %v983_v50  ;;  %v324_v47 = vmul.f32 %v132_v29, %v132_v29 }
 0x119   :  { %v859_v19 = vadd.f32 1e-05, %v731_v13  ;;  %v732_v51 = vmax.f32 %v668_v52, 0.0  ;;  %v605_v53 = vmul.f32 %v6202_v43, %v6202_v43  ;;  %1651 = vmatprep.mubr.bf16.mxu0 %v9484_v58  ;;  %2004 = vmatprep.mubr.bf16.mxu1 %v9484_v58  ;;  %v6209_v55 = vmul.f32 0.0078125, %v180_v48 }
 0x11a   :  { %249 = vadd.xlane.f32.xlu0 %v129_v46  ;;  %v370_v62 = vpop.xlane.xlu0 %369  ;;  %v1055_v2 = vmul.f32 %v6052_v0, %v984_v59  ;;  %4003 = vmatprep.subr.bf16.mxu0 %v9484_v58  ;;  %v1125_v9 = vadd.f32 %v6064_v7, %v1054_v27  ;;  %v795_v60 = vsub.f32 %v5710_v61, %v6183_v11  ;;  %v5711_v59 = vld [vmem:[#allocation4 + $0x98] sm:$0xff] }
 0x11b   :  { %5103 = vrsqrt.f32 %v859_v19  ;;  %v860_v3 = vadd.f32 1e-05, %v732_v51  ;;  %v541_v54 = vmul.f32 0.0078125, %v370_v62  ;;  %251 = vadd.xlane.f32.xlu1 %v130_v30  ;;  %4292 = vmatprep.subr.bf16.mxu1 %v9484_v58  ;;  %v606_v12 = vmul.f32 %v6209_v55, %v6209_v55 }
 0x11c   :  { %v372_v10 = vpop.xlane.xlu1 %371  ;;  %v1126_v5 = vadd.f32 %v6064_v7, %v1055_v2  ;;  %4004 = vmatpush1.bf16.msra.mxu0 %v5055_v49  ;;  %4293 = vmatpush1.bf16.msra.mxu1 %v5056_v4  ;;  %v796_v27 = vsub.f32 %v5711_v59, %v6190_v23  ;;  %v5714_v59 = vld [vmem:[#allocation4 + $0xb0] sm:$0xff] }
 0x11d   :  { %v5100_v56 = vpop.eup %5099  ;;  %5105 = vrsqrt.f32 %v860_v3  ;;  %v669_v20 = vsub.f32 %v541_v54, %v605_v53  ;;  %v542_v16 = vmul.f32 0.0078125, %v372_v10  ;;  %4005 = vmatprep.subr.bf16.mxu0 %v9484_v58  ;;  %4294 = vmatprep.subr.bf16.mxu1 %v9484_v58  ;;  %v134_v3 = vld [vmem:[#allocation4 + $0x1e8] sm:$0xff] }
 0x11e   :  { %441 = vadd.xlane.f32.xlu0 %v321_v63  ;;  %v182_v15 = vpop.xlane.xlu0 %181  ;;  %v1182_v57 = vpack.c.bf16 %v1126_v5, %v1125_v9  ;;  %v985_v42 = vmul.f32 %v5100_v56, %v793_v33  ;;  %v133_v63 = vld [vmem:[#allocation4 + $0x1e0] sm:$0xff] }
 0x11f   :  { %v5102_v18 = vpop.eup %5101  ;;  %v733_v24 = vmax.f32 %v669_v20, 0.0  ;;  %v670_v25 = vsub.f32 %v542_v16, %v606_v12  ;;  %v6222_v26 = vmul.f32 0.0078125, %v182_v15  ;;  %443 = vadd.xlane.f32.xlu1 %v322_v22  ;;  %v325_v5 = vmul.f32 %v133_v63, %v133_v63 }
 0x120   :  { %1652 = vmatmul.mubr.bf16.gmra.mrb[28].mxu0 %v1182_v57  ;;  %2005 = vmatmul.mubr.bf16.gmra.mrb[28].mxu1 %v1182_v57  ;;  %v184_v1 = vpop.xlane.xlu1 %183  ;;  %v986_v44 = vmul.f32 %v5102_v18, %v794_v35  ;;  %v1056_v45 = vmul.f32 %v6052_v0, %v985_v42  ;;  %v326_v16 = vmul.f32 %v134_v3, %v134_v3 }
 0x121   :  { %v861_v39 = vadd.f32 1e-05, %v733_v24  ;;  %v734_v31 = vmax.f32 %v670_v25, 0.0  ;;  %v607_v8 = vmul.f32 %v6222_v26, %v6222_v26  ;;  %1661 = vmatprep.mubr.bf16.mxu0 %v9484_v58  ;;  %2014 = vmatprep.mubr.bf16.mxu1 %v9484_v58  ;;  %v6229_v32 = vmul.f32 0.0078125, %v184_v1 }
 0x122   :  { %253 = vadd.xlane.f32.xlu0 %v131_v21  ;;  %v374_v34 = vpop.xlane.xlu0 %373  ;;  %v1057_v37 = vmul.f32 %v6052_v0, %v986_v44  ;;  %4006 = vmatpush1.bf16.msra.mxu0 %v5057_v17  ;;  %v1127_v41 = vadd.f32 %v6064_v7, %v1056_v45  ;;  %v797_v35 = vsub.f32 %v5712_v14, %v6202_v43  ;;  %v5059_v21 = vld [vmem:[#allocation9 + $0x60] sm:$0xff]  }
 0x123   :  { %5107 = vrsqrt.f32 %v861_v39  ;;  %v862_v38 = vadd.f32 1e-05, %v734_v31  ;;  %v543_v40 = vmul.f32 0.0078125, %v374_v34  ;;  %255 = vadd.xlane.f32.xlu1 %v132_v29  ;;  %4295 = vmatpush1.bf16.msra.mxu1 %v5058_v28  ;;  %v608_v46 = vmul.f32 %v6229_v32, %v6229_v32  ;;  %v5713_v28 = vld [vmem:[#allocation4 + $0xa8] sm:$0xff]  ;;  %v5060_v45 = vld [vmem:[#allocation9 + $0xe0] sm:$0xff]  }
 0x124   :  { %v376_v50 = vpop.xlane.xlu1 %375  ;;  %v1128_v13 = vadd.f32 %v6064_v7, %v1057_v37  ;;  %4007 = vmatprep.subr.bf16.mxu0 %v9484_v58  ;;  %4296 = vmatprep.subr.bf16.mxu1 %v9484_v58  ;;  %v798_v1 = vsub.f32 %v5713_v28, %v6209_v55 }
 0x125   :  { %v5104_v52 = vpop.eup %5103  ;;  %5109 = vrsqrt.f32 %v862_v38  ;;  %v671_v48 = vsub.f32 %v543_v40, %v607_v8  ;;  %v544_v30 = vmul.f32 0.0078125, %v376_v50  ;;  %v136_v38 = vld [vmem:[#allocation4 + $0x1f8] sm:$0xff] }
 0x126   :  { %445 = vadd.xlane.f32.xlu0 %v323_v36  ;;  %v186_v11 = vpop.xlane.xlu0 %185  ;;  %v1183_v49 = vpack.c.bf16 %v1128_v13, %v1127_v41  ;;  %v987_v4 = vmul.f32 %v5104_v52, %v795_v60  ;;  %v135_v36 = vld [vmem:[#allocation4 + $0x1f0] sm:$0xff]  ;;  %4008 = vmatpush1.bf16.msra.mxu0 %v5059_v21 }
 0x127   :  { %v5106_v19 = vpop.eup %5105  ;;  %v735_v51 = vmax.f32 %v671_v48, 0.0  ;;  %v672_v53 = vsub.f32 %v544_v30, %v608_v46  ;;  %v6240_v62 = vmul.f32 0.0078125, %v186_v11  ;;  %447 = vadd.xlane.f32.xlu1 %v324_v47  ;;  %v327_v13 = vmul.f32 %v135_v36, %v135_v36  ;;  %4297 = vmatpush1.bf16.msra.mxu1 %v5060_v45  ;;  %v5062_v45 = vld [vmem:[#allocation9 + $0xe8] sm:$0xff]  }
 0x128   :  { %1662 = vmatmul.mubr.bf16.gmra.mrb[32].mxu0 %v1183_v49  ;;  %2015 = vmatmul.mubr.bf16.gmra.mrb[32].mxu1 %v1183_v49  ;;  %v188_v2 = vpop.xlane.xlu1 %187  ;;  %v988_v54 = vmul.f32 %v5106_v19, %v796_v27  ;;  %v1058_v22 = vmul.f32 %v6052_v0, %v987_v4  ;;  %v328_v30 = vmul.f32 %v136_v38, %v136_v38 }
 0x129   :  { %v863_v6 = vadd.f32 1e-05, %v735_v51  ;;  %v736_v23 = vmax.f32 %v672_v53, 0.0  ;;  %v609_v33 = vmul.f32 %v6240_v62, %v6240_v62  ;;  %1671 = vmatprep.mubr.bf16.mxu0 %v9484_v58  ;;  %2024 = vmatprep.mubr.bf16.mxu1 %v9484_v58  ;;  %v6247_v10 = vmul.f32 0.0078125, %v188_v2 }
 0x12a   :  { %257 = vadd.xlane.f32.xlu0 %v133_v63  ;;  %v378_v9 = vpop.xlane.xlu0 %377  ;;  %v1059_v56 = vmul.f32 %v6052_v0, %v988_v54  ;;  %v1129_v57 = vadd.f32 %v6064_v7, %v1058_v22  ;;  %4009 = vmatprep.subr.bf16.mxu0 %v9484_v58  ;;  %v799_v27 = vsub.f32 %v5714_v59, %v6222_v26  ;;  %v5715_v63 = vld [vmem:[#allocation4 + $0xb8] sm:$0xff] }
 0x12b   :  { %5111 = vrsqrt.f32 %v863_v6  ;;  %v864_v12 = vadd.f32 1e-05, %v736_v23  ;;  %v545_v20 = vmul.f32 0.0078125, %v378_v9  ;;  %259 = vadd.xlane.f32.xlu1 %v134_v3  ;;  %v610_v18 = vmul.f32 %v6247_v10, %v6247_v10  ;;  %4298 = vmatprep.subr.bf16.mxu1 %v9484_v58 }
 0x12c   :  { %v380_v15 = vpop.xlane.xlu1 %379  ;;  %v1130_v42 = vadd.f32 %v6064_v7, %v1059_v56  ;;  %v800_v2 = vsub.f32 %v5715_v63, %v6229_v32  ;;  %4299 = vmatpush1.bf16.msra.mxu1 %v5062_v45  ;;  %v5723_v45 = vld [vmem:[#allocation4 + $0xe8] sm:$0xff] }
 0x12d   :  { %v5108_v17 = vpop.eup %5107  ;;  %5113 = vrsqrt.f32 %v864_v12  ;;  %v673_v24 = vsub.f32 %v545_v20, %v609_v33  ;;  %v546_v25 = vmul.f32 0.0078125, %v380_v15  ;;  %4300 = vmatprep.subr.bf16.mxu1 %v9484_v58 }
 0x12e   :  { %449 = vadd.xlane.f32.xlu0 %v325_v5  ;;  %v190_v29 = vpop.xlane.xlu0 %189  ;;  %v1184_v44 = vpack.c.bf16 %v1130_v42, %v1129_v57  ;;  %v989_v43 = vmul.f32 %v5108_v17, %v797_v35  ;;  %v6279_v5 = vld [vmem:[%s9477_s1] ss:$0 sm:$0xff] }
 0x12f   :  { %v5110_v39 = vpop.eup %5109  ;;  %v737_v31 = vmax.f32 %v673_v24, 0.0  ;;  %v674_v8 = vsub.f32 %v546_v25, %v610_v18  ;;  %v6256_v34 = vmul.f32 0.0078125, %v190_v29  ;;  %451 = vadd.xlane.f32.xlu1 %v326_v16  ;;  %v5717_v42 = vld [vmem:[#allocation4 + $0xc0] sm:$0xff] }
 0x130   :  { %1672 = vmatmul.mubr.bf16.gmra.mrb[36].mxu0 %v1184_v44  ;;  %2025 = vmatmul.mubr.bf16.gmra.mrb[36].mxu1 %v1184_v44  ;;  %v192_v37 = vpop.xlane.xlu1 %191  ;;  %v990_v40 = vmul.f32 %v5110_v39, %v798_v1  ;;  %v1060_v55 = vmul.f32 %v6052_v0, %v989_v43  ;;  %v801_v17 = vsub.f32 %v5717_v42, %v6240_v62  ;;  %v6293_v24 = vld [vmem:[%s9478_s2] ss:$0 sm:$0xff]  ;;  %v5061_v43 = vld [vmem:[#allocation9 + $0x68] sm:$0xff]  }
 0x131   :  { %v865_v47 = vadd.f32 1e-05, %v737_v31  ;;  %v738_v61 = vmax.f32 %v674_v8, 0.0  ;;  %v611_v60 = vmul.f32 %v6256_v34, %v6256_v34  ;;  %1681 = vmatprep.mubr.bf16.mxu0 %v9484_v58  ;;  %2034 = vmatprep.mubr.bf16.mxu1 %v9484_v58  ;;  %v6263_v50 = vmul.f32 0.0078125, %v192_v37  ;;  %v5719_v62 = vld [vmem:[#allocation4 + $0xc8] sm:$0xff] }
 0x132   :  { %261 = vadd.xlane.f32.xlu0 %v135_v36  ;;  %v382_v41 = vpop.xlane.xlu0 %381  ;;  %v1061_v52 = vmul.f32 %v6052_v0, %v990_v40  ;;  %v1131_v49 = vadd.f32 %v6064_v7, %v1060_v55  ;;  %v802_v39 = vsub.f32 %v5719_v62, %v6247_v10  ;;  %4010 = vmatpush1.bf16.msra.mxu0 %v5061_v43 }
 0x133   :  { %5115 = vrsqrt.f32 %v865_v47  ;;  %v866_v46 = vadd.f32 1e-05, %v738_v61  ;;  %v547_v48 = vmul.f32 0.0078125, %v382_v41  ;;  %263 = vadd.xlane.f32.xlu1 %v136_v38  ;;  %v612_v0 = vmul.f32 %v6263_v50, %v6263_v50  ;;  %4011 = vmatprep.subr.bf16.mxu0 %v9484_v58 }
 0x134   :  { %v384_v11 = vpop.xlane.xlu1 %383  ;;  %v1132_v4 = vadd.f32 %v6064_v7, %v1061_v52 }
 0x135   :  { %v5112_v19 = vpop.eup %5111  ;;  %5117 = vrsqrt.f32 %v866_v46  ;;  %v675_v51 = vsub.f32 %v547_v48, %v611_v60  ;;  %v548_v53 = vmul.f32 0.0078125, %v384_v11 }
 0x136   :  { %453 = vadd.xlane.f32.xlu0 %v327_v13  ;;  %v194_v3 = vpop.xlane.xlu0 %193  ;;  %v1185_v26 = vpack.c.bf16 %v1132_v4, %v1131_v49  ;;  %v991_v54 = vmul.f32 %v5112_v19, %v799_v27  ;;  %v5720_v27 = vld [vmem:[#allocation4 + $0xd0] sm:$0xff] }
 0x137   :  { %v5114_v22 = vpop.eup %5113  ;;  %v739_v6 = vmax.f32 %v675_v51, 0.0  ;;  %v676_v23 = vsub.f32 %v548_v53, %v612_v0  ;;  %v6274_v7 = vmul.f32 0.0078125, %v194_v3  ;;  %455 = vadd.xlane.f32.xlu1 %v328_v30  ;;  %v803_v11 = vsub.f32 %v5720_v27, %v6256_v34 }
 0x138   :  { %1682 = vmatmul.mubr.bf16.gmra.mrb[40].mxu0 %v1185_v26  ;;  %2035 = vmatmul.mubr.bf16.gmra.mrb[40].mxu1 %v1185_v26  ;;  %v196_v33 = vpop.xlane.xlu1 %195  ;;  %v992_v9 = vmul.f32 %v5114_v22, %v800_v2  ;;  %v1062_v32 = vmul.f32 %v6279_v5, %v991_v54  ;;  %v5721_v2 = vld [vmem:[#allocation4 + $0xd8] sm:$0xff] }
 0x139   :  { %v867_v56 = vadd.f32 1e-05, %v739_v6  ;;  %v740_v12 = vmax.f32 %v676_v23, 0.0  ;;  %v613_v20 = vmul.f32 %v6274_v7, %v6274_v7  ;;  %1691 = vmatprep.mubr.bf16.mxu0 %v9484_v58  ;;  %2044 = vmatprep.mubr.bf16.mxu1 %v9484_v58  ;;  %v6286_v16 = vmul.f32 0.0078125, %v196_v33 }
 0x13a   :  { %v386_v14 = vpop.xlane.xlu0 %385  ;;  %v1063_v35 = vmul.f32 %v6279_v5, %v992_v9  ;;  %v1133_v25 = vadd.f32 %v6293_v24, %v1062_v32  ;;  %v804_v3 = vsub.f32 %v5721_v2, %v6263_v50 }
 0x13b   :  { %5119 = vrsqrt.f32 %v867_v56  ;;  %v868_v15 = vadd.f32 1e-05, %v740_v12  ;;  %v549_v57 = vmul.f32 0.0078125, %v386_v14  ;;  %v614_v1 = vmul.f32 %v6286_v16, %v6286_v16 }
 0x13c   :  { %v388_v18 = vpop.xlane.xlu1 %387  ;;  %v1134_v21 = vadd.f32 %v6293_v24, %v1063_v35  ;;  %v806_v62 = vsub.f32 %v5723_v45, %v6286_v16 }
 0x13d   :  { %v5116_v28 = vpop.eup %5115  ;;  %5121 = vrsqrt.f32 %v868_v15  ;;  %v677_v29 = vsub.f32 %v549_v57, %v613_v20  ;;  %v550_v44 = vmul.f32 0.0078125, %v388_v18 }
 0x13e   :  { %v198_v31 = vpop.xlane.xlu0 %197  ;;  %v1186_v8 = vpack.c.bf16 %v1134_v21, %v1133_v25  ;;  %v993_v36 = vmul.f32 %v5116_v28, %v801_v17  ;;  %v5722_v17 = vld [vmem:[#allocation4 + $0xe0] sm:$0xff] }
 0x13f   :  { %v5118_v37 = vpop.eup %5117  ;;  %v741_v38 = vmax.f32 %v677_v29, 0.0  ;;  %v678_v40 = vsub.f32 %v550_v44, %v614_v1  ;;  %v6300_v55 = vmul.f32 0.0078125, %v198_v31  ;;  %v805_v18 = vsub.f32 %v5722_v17, %v6274_v7 }
 0x140   :  { %1692 = vmatmul.mubr.bf16.gmra.mrb[44].mxu0 %v1186_v8  ;;  %2045 = vmatmul.mubr.bf16.gmra.mrb[44].mxu1 %v1186_v8  ;;  %v200_v47 = vpop.xlane.xlu1 %199  ;;  %v994_v61 = vmul.f32 %v5118_v37, %v802_v39  ;;  %v1064_v60 = vmul.f32 %v6279_v5, %v993_v36 }
 0x141   :  { %v869_v41 = vadd.f32 1e-05, %v741_v38  ;;  %v742_v13 = vmax.f32 %v678_v40, 0.0  ;;  %v615_v10 = vmul.f32 %v6300_v55, %v6300_v55  ;;  %1701 = vmatprep.mubr.bf16.mxu0 %v9484_v58  ;;  %2054 = vmatprep.mubr.bf16.mxu1 %v9484_v58  ;;  %v6307_v52 = vmul.f32 0.0078125, %v200_v47 }
 0x142   :  { %v390_v46 = vpop.xlane.xlu0 %389  ;;  %v1065_v48 = vmul.f32 %v6279_v5, %v994_v61  ;;  %v1135_v4 = vadd.f32 %v6293_v24, %v1064_v60 }
 0x143   :  { %5123 = vrsqrt.f32 %v869_v41  ;;  %v870_v30 = vadd.f32 1e-05, %v742_v13  ;;  %v551_v59 = vmul.f32 0.0078125, %v390_v46  ;;  %v616_v51 = vmul.f32 %v6307_v52, %v6307_v52 }
 0x144   :  { %v392_v49 = vpop.xlane.xlu1 %391  ;;  %v1136_v19 = vadd.f32 %v6293_v24, %v1065_v48 }
 0x145   :  { %v5120_v0 = vpop.eup %5119  ;;  %5125 = vrsqrt.f32 %v870_v30  ;;  %v679_v53 = vsub.f32 %v551_v59, %v615_v10  ;;  %v552_v63 = vmul.f32 0.0078125, %v392_v49  ;;  %v5724_v59 = vld [vmem:[#allocation4 + $0xf0] sm:$0xff] }
 0x146   :  { %v202_v26 = vpop.xlane.xlu0 %201  ;;  %v1187_v54 = vpack.c.bf16 %v1136_v19, %v1135_v4  ;;  %v995_v22 = vmul.f32 %v5120_v0, %v803_v11  ;;  %v807_v27 = vsub.f32 %v5724_v59, %v6300_v55 }
 0x147   :  { %v5122_v6 = vpop.eup %5121  ;;  %v743_v34 = vmax.f32 %v679_v53, 0.0  ;;  %v680_v23 = vsub.f32 %v552_v63, %v616_v51  ;;  %v6318_v33 = vmul.f32 0.0078125, %v202_v26  ;;  %v5725_v63 = vld [vmem:[#allocation4 + $0xf8] sm:$0xff] }
 0x148   :  { %1702 = vmatmul.mubr.bf16.gmra.mrb[48].mxu0 %v1187_v54  ;;  %2055 = vmatmul.mubr.bf16.gmra.mrb[48].mxu1 %v1187_v54  ;;  %v204_v9 = vpop.xlane.xlu1 %203  ;;  %v996_v32 = vmul.f32 %v5122_v6, %v804_v3  ;;  %v1066_v56 = vmul.f32 %v6279_v5, %v995_v22  ;;  %v808_v2 = vsub.f32 %v5725_v63, %v6307_v52 }
 0x149   :  { %v871_v12 = vadd.f32 1e-05, %v743_v34  ;;  %v744_v20 = vmax.f32 %v680_v23, 0.0  ;;  %v617_v14 = vmul.f32 %v6318_v33, %v6318_v33  ;;  %1711 = vmatprep.mubr.bf16.mxu0 %v9484_v58  ;;  %2064 = vmatprep.mubr.bf16.mxu1 %v9484_v58  ;;  %v6325_v50 = vmul.f32 0.0078125, %v204_v9 }
 0x14a   :  { %v394_v35 = vpop.xlane.xlu0 %393  ;;  %v1067_v15 = vmul.f32 %v6279_v5, %v996_v32  ;;  %v1137_v21 = vadd.f32 %v6293_v24, %v1066_v56 }
 0x14b   :  { %5127 = vrsqrt.f32 %v871_v12  ;;  %v872_v57 = vadd.f32 1e-05, %v744_v20  ;;  %v553_v42 = vmul.f32 0.0078125, %v394_v35  ;;  %v618_v29 = vmul.f32 %v6325_v50, %v6325_v50 }
 0x14c   :  { %v396_v25 = vpop.xlane.xlu1 %395  ;;  %v1138_v28 = vadd.f32 %v6293_v24, %v1067_v15 }
 0x14d   :  { %v5124_v1 = vpop.eup %5123  ;;  %5129 = vrsqrt.f32 %v872_v57  ;;  %v681_v44 = vsub.f32 %v553_v42, %v617_v14  ;;  %v554_v43 = vmul.f32 0.0078125, %v396_v25  ;;  %v5726_v42 = vld [vmem:[#allocation4 + $0x100] sm:$0xff] }
 0x14e   :  { %v206_v39 = vpop.xlane.xlu0 %205  ;;  %v1188_v31 = vpack.c.bf16 %v1138_v28, %v1137_v21  ;;  %v997_v8 = vmul.f32 %v5124_v1, %v805_v18  ;;  %v809_v17 = vsub.f32 %v5726_v42, %v6318_v33 }
 0x14f   :  { %v5126_v36 = vpop.eup %5125  ;;  %v745_v7 = vmax.f32 %v681_v44, 0.0  ;;  %v682_v37 = vsub.f32 %v554_v43, %v618_v29  ;;  %v6334_v38 = vmul.f32 0.0078125, %v206_v39  ;;  %v5727_v43 = vld [vmem:[#allocation4 + $0x108] sm:$0xff] }
 0x150   :  { %1712 = vmatmul.mubr.bf16.gmra.mrb[52].mxu0 %v1188_v31  ;;  %2065 = vmatmul.mubr.bf16.gmra.mrb[52].mxu1 %v1188_v31  ;;  %v208_v40 = vpop.xlane.xlu1 %207  ;;  %v998_v47 = vmul.f32 %v5126_v36, %v806_v62  ;;  %v1068_v61 = vmul.f32 %v6279_v5, %v997_v8  ;;  %v810_v45 = vsub.f32 %v5727_v43, %v6325_v50 }
 0x151   :  { %v873_v60 = vadd.f32 1e-05, %v745_v7  ;;  %v746_v41 = vmax.f32 %v682_v37, 0.0  ;;  %v619_v13 = vmul.f32 %v6334_v38, %v6334_v38  ;;  %1721 = vmatprep.mubr.bf16.mxu0 %v9484_v58  ;;  %2074 = vmatprep.mubr.bf16.mxu1 %v9484_v58  ;;  %v6341_v16 = vmul.f32 0.0078125, %v208_v40 }
 0x152   :  { %v398_v10 = vpop.xlane.xlu0 %397  ;;  %v1069_v46 = vmul.f32 %v6279_v5, %v998_v47  ;;  %v1139_v49 = vadd.f32 %v6293_v24, %v1068_v61 }
 0x153   :  { %5131 = vrsqrt.f32 %v873_v60  ;;  %v874_v48 = vadd.f32 1e-05, %v746_v41  ;;  %v555_v30 = vmul.f32 0.0078125, %v398_v10  ;;  %v620_v0 = vmul.f32 %v6341_v16, %v6341_v16 }
 0x154   :  { %v400_v11 = vpop.xlane.xlu1 %399  ;;  %v1140_v4 = vadd.f32 %v6293_v24, %v1069_v46 }
 0x155   :  { %v5128_v19 = vpop.eup %5127  ;;  %5133 = vrsqrt.f32 %v874_v48  ;;  %v683_v51 = vsub.f32 %v555_v30, %v619_v13  ;;  %v556_v53 = vmul.f32 0.0078125, %v400_v11  ;;  %v5728_v30 = vld [vmem:[#allocation4 + $0x110] sm:$0xff] }
 0x156   :  { %v210_v3 = vpop.xlane.xlu0 %209  ;;  %v1189_v26 = vpack.c.bf16 %v1140_v4, %v1139_v49  ;;  %v999_v54 = vmul.f32 %v5128_v19, %v807_v27  ;;  %v811_v59 = vsub.f32 %v5728_v30, %v6334_v38  ;;  %v5064_v38 = vld [vmem:[#allocation9 + $0xf0] sm:$0xff]  }
 0x157   :  { %v5130_v22 = vpop.eup %5129  ;;  %v747_v55 = vmax.f32 %v683_v51, 0.0  ;;  %v684_v6 = vsub.f32 %v556_v53, %v620_v0  ;;  %v6350_v34 = vmul.f32 0.0078125, %v210_v3  ;;  %v5729_v53 = vld [vmem:[#allocation4 + $0x118] sm:$0xff]  ;;  %4301 = vmatpush1.bf16.msra.mxu1 %v5064_v38 }
 0x158   :  { %1722 = vmatmul.mubr.bf16.gmra.mrb[56].mxu0 %v1189_v26  ;;  %2075 = vmatmul.mubr.bf16.gmra.mrb[56].mxu1 %v1189_v26  ;;  %v212_v23 = vpop.xlane.xlu1 %211  ;;  %v1000_v9 = vmul.f32 %v5130_v22, %v808_v2  ;;  %v1070_v32 = vmul.f32 %v6279_v5, %v999_v54  ;;  %v812_v63 = vsub.f32 %v5729_v53, %v6341_v16  ;;  %v5063_v54 = vld [vmem:[#allocation9 + $0x70] sm:$0xff]  }
 0x159   :  { %v875_v56 = vadd.f32 1e-05, %v747_v55  ;;  %v748_v12 = vmax.f32 %v684_v6, 0.0  ;;  %v621_v20 = vmul.f32 %v6350_v34, %v6350_v34  ;;  %1731 = vmatprep.mubr.bf16.mxu0 %v9484_v58  ;;  %2084 = vmatprep.mubr.bf16.mxu1 %v9484_v58  ;;  %v6357_v52 = vmul.f32 0.0078125, %v212_v23 }
 0x15a   :  { %v402_v14 = vpop.xlane.xlu0 %401  ;;  %v1071_v35 = vmul.f32 %v6279_v5, %v1000_v9  ;;  %v1141_v25 = vadd.f32 %v6293_v24, %v1070_v32  ;;  %4012 = vmatpush1.bf16.msra.mxu0 %v5063_v54  ;;  %4302 = vmatprep.subr.bf16.mxu1 %v9484_v58 }
 0x15b   :  { %5135 = vrsqrt.f32 %v875_v56  ;;  %v876_v15 = vadd.f32 1e-05, %v748_v12  ;;  %v557_v57 = vmul.f32 0.0078125, %v402_v14  ;;  %v622_v1 = vmul.f32 %v6357_v52, %v6357_v52  ;;  %4013 = vmatprep.subr.bf16.mxu0 %v9484_v58 }
 0x15c   :  { %v404_v18 = vpop.xlane.xlu1 %403  ;;  %v1142_v21 = vadd.f32 %v6293_v24, %v1071_v35 }
 0x15d   :  { %v5132_v28 = vpop.eup %5131  ;;  %5137 = vrsqrt.f32 %v876_v15  ;;  %v685_v29 = vsub.f32 %v557_v57, %v621_v20  ;;  %v558_v44 = vmul.f32 0.0078125, %v404_v18 }
 0x15e   :  { %v214_v62 = vpop.xlane.xlu0 %213  ;;  %v1190_v39 = vpack.c.bf16 %v1142_v21, %v1141_v25  ;;  %v1001_v31 = vmul.f32 %v5132_v28, %v809_v17  ;;  %v5730_v17 = vld [vmem:[#allocation4 + $0x120] sm:$0xff] }
 0x15f   :  { %v5134_v8 = vpop.eup %5133  ;;  %v749_v33 = vmax.f32 %v685_v29, 0.0  ;;  %v686_v36 = vsub.f32 %v558_v44, %v622_v1  ;;  %v6366_v7 = vmul.f32 0.0078125, %v214_v62  ;;  %v813_v18 = vsub.f32 %v5730_v17, %v6350_v34 }
 0x160   :  { %1732 = vmatmul.mubr.bf16.gmra.mrb[60].mxu0 %v1190_v39  ;;  %2085 = vmatmul.mubr.bf16.gmra.mrb[60].mxu1 %v1190_v39  ;;  %v216_v37 = vpop.xlane.xlu1 %215  ;;  %v1002_v40 = vmul.f32 %v5134_v8, %v810_v45  ;;  %v1072_v47 = vmul.f32 %v6279_v5, %v1001_v31  ;;  %v5731_v45 = vld [vmem:[#allocation4 + $0x128] sm:$0xff] }
 0x161   :  { %v877_v61 = vadd.f32 1e-05, %v749_v33  ;;  %v750_v60 = vmax.f32 %v686_v36, 0.0  ;;  %v623_v41 = vmul.f32 %v6366_v7, %v6366_v7  ;;  %1741 = vmatprep.mubr.bf16.mxu0 %v9484_v58  ;;  %2094 = vmatprep.mubr.bf16.mxu1 %v9484_v58  ;;  %v6373_v50 = vmul.f32 0.0078125, %v216_v37 }
 0x162   :  { %v406_v13 = vpop.xlane.xlu0 %405  ;;  %v1073_v10 = vmul.f32 %v6279_v5, %v1002_v40  ;;  %v1143_v11 = vadd.f32 %v6293_v24, %v1072_v47  ;;  %v814_v62 = vsub.f32 %v5731_v45, %v6357_v52 }
 0x163   :  { %5139 = vrsqrt.f32 %v877_v61  ;;  %v878_v46 = vadd.f32 1e-05, %v750_v60  ;;  %v559_v48 = vmul.f32 0.0078125, %v406_v13  ;;  %v624_v19 = vmul.f32 %v6373_v50, %v6373_v50 }
 0x164   :  { %v408_v27 = vpop.xlane.xlu1 %407  ;;  %v1144_v49 = vadd.f32 %v6293_v24, %v1073_v10 }
 0x165   :  { %v5136_v4 = vpop.eup %5135  ;;  %5141 = vrsqrt.f32 %v878_v46  ;;  %v687_v0 = vsub.f32 %v559_v48, %v623_v41  ;;  %v560_v51 = vmul.f32 0.0078125, %v408_v27 }
 0x166   :  { %v218_v2 = vpop.xlane.xlu0 %217  ;;  %v1191_v3 = vpack.c.bf16 %v1144_v49, %v1143_v11  ;;  %v1003_v26 = vmul.f32 %v5136_v4, %v811_v59  ;;  %v5732_v59 = vld [vmem:[#allocation4 + $0x130] sm:$0xff] }
 0x167   :  { %v5138_v22 = vpop.eup %5137  ;;  %v751_v55 = vmax.f32 %v687_v0, 0.0  ;;  %v688_v6 = vsub.f32 %v560_v51, %v624_v19  ;;  %v6382_v23 = vmul.f32 0.0078125, %v218_v2  ;;  %v815_v27 = vsub.f32 %v5732_v59, %v6366_v7  ;;  %v5065_v59 = vld [vmem:[#allocation9 + $0x78] sm:$0xff]  }
 0x168   :  { %1742 = vmatmul.mubr.bf16.gmra.mrb[64].mxu0 %v1191_v3  ;;  %2095 = vmatmul.mubr.bf16.gmra.mrb[64].mxu1 %v1191_v3  ;;  %v220_v9 = vpop.xlane.xlu1 %219  ;;  %v1004_v32 = vmul.f32 %v5138_v22, %v812_v63  ;;  %v1074_v56 = vmul.f32 %v6279_v5, %v1003_v26  ;;  %v5733_v63 = vld [vmem:[#allocation4 + $0x138] sm:$0xff] }
 0x169   :  { %v879_v12 = vadd.f32 1e-05, %v751_v55  ;;  %v752_v20 = vmax.f32 %v688_v6, 0.0  ;;  %v625_v16 = vmul.f32 %v6382_v23, %v6382_v23  ;;  %1751 = vmatprep.mubr.bf16.mxu0 %v9484_v58  ;;  %2104 = vmatprep.mubr.bf16.mxu1 %v9484_v58  ;;  %v6389_v14 = vmul.f32 0.0078125, %v220_v9 }
 0x16a   :  { %v410_v35 = vpop.xlane.xlu0 %409  ;;  %v1075_v15 = vmul.f32 %v6279_v5, %v1004_v32  ;;  %v1145_v21 = vadd.f32 %v6293_v24, %v1074_v56  ;;  %v816_v2 = vsub.f32 %v5733_v63, %v6373_v50  ;;  %4014 = vmatpush1.bf16.msra.mxu0 %v5065_v59 }
 0x16b   :  { %5143 = vrsqrt.f32 %v879_v12  ;;  %v880_v57 = vadd.f32 1e-05, %v752_v20  ;;  %v561_v42 = vmul.f32 0.0078125, %v410_v35  ;;  %v626_v29 = vmul.f32 %v6389_v14, %v6389_v14 }
 0x16c   :  { %v412_v25 = vpop.xlane.xlu1 %411  ;;  %v1146_v28 = vadd.f32 %v6293_v24, %v1075_v15 }
 0x16d   :  { %v5140_v1 = vpop.eup %5139  ;;  %5145 = vrsqrt.f32 %v880_v57  ;;  %v689_v44 = vsub.f32 %v561_v42, %v625_v16  ;;  %v562_v43 = vmul.f32 0.0078125, %v412_v25  ;;  %v5734_v57 = vld [vmem:[#allocation4 + $0x140] sm:$0xff] }
 0x16e   :  { %v222_v39 = vpop.xlane.xlu0 %221  ;;  %v1192_v31 = vpack.c.bf16 %v1146_v28, %v1145_v21  ;;  %v1005_v8 = vmul.f32 %v5140_v1, %v813_v18  ;;  %v817_v42 = vsub.f32 %v5734_v57, %v6382_v23 }
 0x16f   :  { %v5142_v33 = vpop.eup %5141  ;;  %v753_v34 = vmax.f32 %v689_v44, 0.0  ;;  %v690_v36 = vsub.f32 %v562_v43, %v626_v29  ;;  %v6400_v37 = vmul.f32 0.0078125, %v222_v39  ;;  %v5735_v44 = vld [vmem:[#allocation4 + $0x148] sm:$0xff] }
 0x170   :  { %1752 = vmatmul.mubr.bf16.gmra.mrb[68].mxu0 %v1192_v31  ;;  %2105 = vmatmul.mubr.bf16.gmra.mrb[68].mxu1 %v1192_v31  ;;  %v224_v40 = vpop.xlane.xlu1 %223  ;;  %v1006_v47 = vmul.f32 %v5142_v33, %v814_v62  ;;  %v1076_v61 = vmul.f32 %v6279_v5, %v1005_v8  ;;  %v818_v43 = vsub.f32 %v5735_v44, %v6389_v14 }
 0x171   :  { %v881_v60 = vadd.f32 1e-05, %v753_v34  ;;  %v754_v41 = vmax.f32 %v690_v36, 0.0  ;;  %v627_v13 = vmul.f32 %v6400_v37, %v6400_v37  ;;  %1761 = vmatprep.mubr.bf16.mxu0 %v9484_v58  ;;  %2114 = vmatprep.mubr.bf16.mxu1 %v9484_v58  ;;  %v6407_v52 = vmul.f32 0.0078125, %v224_v40 }
 0x172   :  { %v414_v10 = vpop.xlane.xlu0 %413  ;;  %v1077_v46 = vmul.f32 %v6279_v5, %v1006_v47  ;;  %v1147_v49 = vadd.f32 %v6293_v24, %v1076_v61 }
 0x173   :  { %5147 = vrsqrt.f32 %v881_v60  ;;  %v882_v48 = vadd.f32 1e-05, %v754_v41  ;;  %v563_v30 = vmul.f32 0.0078125, %v414_v10  ;;  %v628_v0 = vmul.f32 %v6407_v52, %v6407_v52  ;;  %v5736_v10 = vld [vmem:[#allocation4 + $0x150] sm:$0xff] }
 0x174   :  { %v416_v11 = vpop.xlane.xlu1 %415  ;;  %v1148_v4 = vadd.f32 %v6293_v24, %v1077_v46  ;;  %v819_v46 = vsub.f32 %v5736_v10, %v6400_v37  ;;  %v5737_v37 = vld [vmem:[#allocation4 + $0x158] sm:$0xff] }
 0x175   :  { %v5144_v19 = vpop.eup %5143  ;;  %5149 = vrsqrt.f32 %v882_v48  ;;  %v691_v51 = vsub.f32 %v563_v30, %v627_v13  ;;  %v564_v53 = vmul.f32 0.0078125, %v416_v11  ;;  %v820_v63 = vsub.f32 %v5737_v37, %v6407_v52 }
 0x176   :  { %v1193_v3 = vpack.c.bf16 %v1148_v4, %v1147_v49  ;;  %v1007_v26 = vmul.f32 %v5144_v19, %v815_v27  ;;  %v5066_v27 = vld [vmem:[#allocation9 + $0xf8] sm:$0xff]  }
 0x177   :  { %v5146_v54 = vpop.eup %5145  ;;  %v755_v38 = vmax.f32 %v691_v51, 0.0  ;;  %v692_v7 = vsub.f32 %v564_v53, %v628_v0  ;;  %v226_v22 = vpop.xlane.xlu0 %225  ;;  %4303 = vmatpush1.bf16.msra.mxu1 %v5066_v27 }
 0x178   :  { %v6416_v55 = vmul.f32 0.0078125, %v226_v22  ;;  %1762 = vmatmul.mubr.bf16.gmra.mrb[72].mxu0 %v1193_v3  ;;  %2115 = vmatmul.mubr.bf16.gmra.mrb[72].mxu1 %v1193_v3  ;;  %v228_v6 = vpop.xlane.xlu1 %227  ;;  %v1008_v9 = vmul.f32 %v5146_v54, %v816_v2  ;;  %v1078_v32 = vmul.f32 %v6279_v5, %v1007_v26 }
 0x179   :  { %v883_v56 = vadd.f32 1e-05, %v755_v38  ;;  %v756_v12 = vmax.f32 %v692_v7, 0.0  ;;  %v6419_v20 = vmul.f32 0.0078125, %v228_v6  ;;  %1771 = vmatprep.mubr.bf16.mxu0 %v9484_v58  ;;  %2124 = vmatprep.mubr.bf16.mxu1 %v9484_v58 }
 0x17a   :  { %v629_v50 = vmul.f32 %v6416_v55, %v6416_v55  ;;  %v1079_v16 = vmul.f32 %v6279_v5, %v1008_v9  ;;  %v1149_v25 = vadd.f32 %v6293_v24, %v1078_v32 }
 0x17b   :  { %5151 = vrsqrt.f32 %v883_v56  ;;  %v884_v35 = vadd.f32 1e-05, %v756_v12  ;;  %v418_v15 = vpop.xlane.xlu0 %417  ;;  %v630_v1 = vmul.f32 %v6419_v20, %v6419_v20 }
 0x17c   :  { %v565_v17 = vmul.f32 0.0078125, %v418_v15  ;;  %v420_v18 = vpop.xlane.xlu1 %419  ;;  %v1150_v21 = vadd.f32 %v6293_v24, %v1079_v16 }
 0x17d   :  { %v5148_v28 = vpop.eup %5147  ;;  %5153 = vrsqrt.f32 %v884_v35  ;;  %v566_v29 = vmul.f32 0.0078125, %v420_v18 }
 0x17e   :  { %v693_v45 = vsub.f32 %v565_v17, %v629_v50  ;;  %v1194_v62 = vpack.c.bf16 %v1150_v21, %v1149_v25  ;;  %v1009_v39 = vmul.f32 %v5148_v28, %v817_v42  ;;  %v5738_v21 = vld [vmem:[#allocation4 + $0x160] sm:$0xff] }
 0x17f   :  { %v5150_v31 = vpop.eup %5149  ;;  %v694_v23 = vsub.f32 %v566_v29, %v630_v1  ;;  %v230_v8 = vpop.xlane.xlu0 %229  ;;  %v821_v28 = vsub.f32 %v5738_v21, %v6416_v55 }
 0x180   :  { %v757_v33 = vmax.f32 %v693_v45, 0.0  ;;  %v6432_v34 = vmul.f32 0.0078125, %v230_v8  ;;  %1772 = vmatmul.mubr.bf16.gmra.mrb[76].mxu0 %v1194_v62  ;;  %2125 = vmatmul.mubr.bf16.gmra.mrb[76].mxu1 %v1194_v62  ;;  %v232_v36 = vpop.xlane.xlu1 %231  ;;  %v1010_v40 = vmul.f32 %v5150_v31, %v818_v43  ;;  %v1080_v47 = vmul.f32 %v6279_v5, %v1009_v39  ;;  %v5739_v43 = vld [vmem:[#allocation4 + $0x168] sm:$0xff] }
 0x181   :  { %v758_v61 = vmax.f32 %v694_v23, 0.0  ;;  %v6435_v60 = vmul.f32 0.0078125, %v232_v36  ;;  %1781 = vmatprep.mubr.bf16.mxu0 %v9484_v58  ;;  %2134 = vmatprep.mubr.bf16.mxu1 %v9484_v58  ;;  %v822_v45 = vsub.f32 %v5739_v43, %v6419_v20 }
 0x182   :  { %v885_v14 = vadd.f32 1e-05, %v757_v33  ;;  %v631_v41 = vmul.f32 %v6432_v34, %v6432_v34  ;;  %v1081_v13 = vmul.f32 %v6279_v5, %v1010_v40  ;;  %v1151_v4 = vadd.f32 %v6293_v24, %v1080_v47 }
 0x183   :  { %v886_v48 = vadd.f32 1e-05, %v758_v61  ;;  %v422_v30 = vpop.xlane.xlu0 %421  ;;  %v632_v51 = vmul.f32 %v6435_v60, %v6435_v60 }
 0x184   :  { %5155 = vrsqrt.f32 %v885_v14  ;;  %v567_v11 = vmul.f32 0.0078125, %v422_v30  ;;  %v424_v49 = vpop.xlane.xlu1 %423  ;;  %v1152_v19 = vadd.f32 %v6293_v24, %v1081_v13 }
 0x185   :  { %v5152_v0 = vpop.eup %5151  ;;  %5157 = vrsqrt.f32 %v886_v48  ;;  %v568_v53 = vmul.f32 0.0078125, %v424_v49  ;;  %v5740_v49 = vld [vmem:[#allocation4 + $0x170] sm:$0xff] }
 0x186   :  { %v695_v2 = vsub.f32 %v567_v11, %v631_v41  ;;  %v1195_v3 = vpack.c.bf16 %v1152_v19, %v1151_v4  ;;  %v1011_v26 = vmul.f32 %v5152_v0, %v819_v46  ;;  %v823_v4 = vsub.f32 %v5740_v49, %v6432_v34 }
 0x187   :  { %v5154_v54 = vpop.eup %5153  ;;  %v696_v38 = vsub.f32 %v568_v53, %v632_v51  ;;  %v234_v7 = vpop.xlane.xlu0 %233  ;;  %v5741_v53 = vld [vmem:[#allocation4 + $0x178] sm:$0xff] }
 0x188   :  { %v759_v22 = vmax.f32 %v695_v2, 0.0  ;;  %v6448_v6 = vmul.f32 0.0078125, %v234_v7  ;;  %1782 = vmatmul.mubr.bf16.gmra.mrb[80].mxu0 %v1195_v3  ;;  %2135 = vmatmul.mubr.bf16.gmra.mrb[80].mxu1 %v1195_v3  ;;  %v236_v9 = vpop.xlane.xlu1 %235  ;;  %v1012_v32 = vmul.f32 %v5154_v54, %v820_v63  ;;  %v1082_v56 = vmul.f32 %v6279_v5, %v1011_v26 }
 0x189   :  { %v760_v12 = vmax.f32 %v696_v38, 0.0  ;;  %v6451_v50 = vmul.f32 0.0078125, %v236_v9  ;;  %1791 = vmatprep.mubr.bf16.mxu0 %v9484_v58  ;;  %2144 = vmatprep.mubr.bf16.mxu1 %v9484_v58  ;;  %v824_v37 = vsub.f32 %v5741_v53, %v6435_v60 }
 0x18a   :  { %v887_v52 = vadd.f32 1e-05, %v759_v22  ;;  %v633_v16 = vmul.f32 %v6448_v6, %v6448_v6  ;;  %v1083_v35 = vmul.f32 %v6279_v5, %v1012_v32  ;;  %v1153_v18 = vadd.f32 %v6293_v24, %v1082_v56 }
 0x18b   :  { %v888_v15 = vadd.f32 1e-05, %v760_v12  ;;  %v426_v57 = vpop.xlane.xlu0 %425  ;;  %v634_v1 = vmul.f32 %v6451_v50, %v6451_v50 }
 0x18c   :  { %5159 = vrsqrt.f32 %v887_v52  ;;  %v569_v42 = vmul.f32 0.0078125, %v426_v57  ;;  %v428_v17 = vpop.xlane.xlu1 %427  ;;  %v1154_v25 = vadd.f32 %v6293_v24, %v1083_v35 }
 0x18d   :  { %5161 = vrsqrt.f32 %v888_v15  ;;  %v570_v29 = vmul.f32 0.0078125, %v428_v17 }
 0x18e   :  { %v5156_v44 = vpop.eup %5155  ;;  %v697_v62 = vsub.f32 %v569_v42, %v633_v16  ;;  %v1196_v39 = vpack.c.bf16 %v1154_v25, %v1153_v18  ;;  %v5742_v25 = vld [vmem:[#allocation4 + $0x180] sm:$0xff] }
 0x18f   :  { %v5158_v31 = vpop.eup %5157  ;;  %v698_v23 = vsub.f32 %v570_v29, %v634_v1  ;;  %v238_v8 = vpop.xlane.xlu0 %237  ;;  %v1013_v33 = vmul.f32 %v5156_v44, %v821_v28  ;;  %v825_v21 = vsub.f32 %v5742_v25, %v6448_v6  ;;  %v5743_v44 = vld [vmem:[#allocation4 + $0x188] sm:$0xff] }
 0x190   :  { %v761_v36 = vmax.f32 %v697_v62, 0.0  ;;  %v6464_v40 = vmul.f32 0.0078125, %v238_v8  ;;  %1792 = vmatmul.mubr.bf16.gmra.mrb[84].mxu0 %v1196_v39  ;;  %2145 = vmatmul.mubr.bf16.gmra.mrb[84].mxu1 %v1196_v39  ;;  %v240_v55 = vpop.xlane.xlu1 %239  ;;  %v1014_v47 = vmul.f32 %v5158_v31, %v822_v45  ;;  %v826_v43 = vsub.f32 %v5743_v44, %v6451_v50  ;;  %v5747_v44 = vld [vmem:[#allocation4 + $0x1a8] sm:$0xff] }
 0x191   :  { %v762_v61 = vmax.f32 %v698_v23, 0.0  ;;  %v6466_v14 = vmul.f32 0.0078125, %v240_v55  ;;  %1801 = vmatprep.mubr.bf16.mxu0 %v9484_v58  ;;  %2154 = vmatprep.mubr.bf16.mxu1 %v9484_v58  ;;  %v1084_v20 = vmul.f32 %v6279_v5, %v1013_v33 }
 0x192   :  { %v889_v41 = vadd.f32 1e-05, %v761_v36  ;;  %v635_v13 = vmul.f32 %v6464_v40, %v6464_v40  ;;  %v1085_v10 = vmul.f32 %v6279_v5, %v1014_v47 }
 0x193   :  { %v890_v46 = vadd.f32 1e-05, %v762_v61  ;;  %v430_v48 = vpop.xlane.xlu0 %429  ;;  %v1155_v27 = vadd.f32 %v6293_v24, %v1084_v20  ;;  %v636_v19 = vmul.f32 %v6466_v14, %v6466_v14 }
 0x194   :  { %5163 = vrsqrt.f32 %v889_v41  ;;  %v571_v30 = vmul.f32 0.0078125, %v430_v48  ;;  %v432_v59 = vpop.xlane.xlu1 %431  ;;  %v1156_v11 = vadd.f32 %v6293_v24, %v1085_v10 }
 0x195   :  { %5165 = vrsqrt.f32 %v890_v46  ;;  %v572_v0 = vmul.f32 0.0078125, %v432_v59 }
 0x196   :  { %v5160_v51 = vpop.eup %5159  ;;  %v699_v63 = vsub.f32 %v571_v30, %v635_v13  ;;  %v1197_v2 = vpack.c.bf16 %v1156_v11, %v1155_v27  ;;  %v5744_v11 = vld [vmem:[#allocation4 + $0x190] sm:$0xff] }
 0x197   :  { %v5162_v3 = vpop.eup %5161  ;;  %v700_v26 = vsub.f32 %v572_v0, %v636_v19  ;;  %v242_v54 = vpop.xlane.xlu0 %241  ;;  %v1015_v38 = vmul.f32 %v5160_v51, %v823_v4  ;;  %v827_v49 = vsub.f32 %v5744_v11, %v6464_v40  ;;  %v5745_v51 = vld [vmem:[#allocation4 + $0x198] sm:$0xff] }
 0x198   :  { %v763_v7 = vmax.f32 %v699_v63, 0.0  ;;  %v6480_v22 = vmul.f32 0.0078125, %v242_v54  ;;  %1802 = vmatmul.mubr.bf16.gmra.mrb[88].mxu0 %v1197_v2  ;;  %2155 = vmatmul.mubr.bf16.gmra.mrb[88].mxu1 %v1197_v2  ;;  %v244_v34 = vpop.xlane.xlu1 %243  ;;  %v1016_v9 = vmul.f32 %v5162_v3, %v824_v37  ;;  %v828_v53 = vsub.f32 %v5745_v51, %v6466_v14 }
 0x199   :  { %v764_v32 = vmax.f32 %v700_v26, 0.0  ;;  %v6482_v56 = vmul.f32 0.0078125, %v244_v34  ;;  %1811 = vmatprep.mubr.bf16.mxu0 %v9484_v58  ;;  %2164 = vmatprep.mubr.bf16.mxu1 %v9484_v58  ;;  %v1086_v60 = vmul.f32 %v6279_v5, %v1015_v38  ;;  %v1369_v38 = vlaneseq }
 0x19a   :  { %v891_v12 = vadd.f32 1e-05, %v763_v7  ;;  %v637_v52 = vmul.f32 %v6480_v22, %v6480_v22  ;;  %v1087_v16 = vmul.f32 %v6279_v5, %v1016_v9 }
 0x19b   :  { %v892_v35 = vadd.f32 1e-05, %v764_v32  ;;  %v434_v15 = vpop.xlane.xlu0 %433  ;;  %v1157_v17 = vadd.f32 %v6293_v24, %v1086_v60  ;;  %v638_v28 = vmul.f32 %v6482_v56, %v6482_v56 }
 0x19c   :  { %5167 = vrsqrt.f32 %v891_v12  ;;  %v573_v57 = vmul.f32 0.0078125, %v434_v15  ;;  %v436_v42 = vpop.xlane.xlu1 %435  ;;  %v1158_v18 = vadd.f32 %v6293_v24, %v1087_v16 }
 0x19d   :  { %5169 = vrsqrt.f32 %v892_v35  ;;  %v574_v1 = vmul.f32 0.0078125, %v436_v42 }
 0x19e   :  { %v5164_v29 = vpop.eup %5163  ;;  %v701_v45 = vsub.f32 %v573_v57, %v637_v52  ;;  %v1198_v62 = vpack.c.bf16 %v1158_v18, %v1157_v17  ;;  %v6522_v57 = vshrl.u32 %v1369_v38, 7 }
 0x19f   :  { %v5166_v39 = vpop.eup %5165  ;;  %v702_v31 = vsub.f32 %v574_v1, %v638_v28  ;;  %v246_v23 = vpop.xlane.xlu0 %245  ;;  %v1017_v8 = vmul.f32 %v5164_v29, %v825_v21  ;;  %v5746_v21 = vld [vmem:[#allocation4 + $0x1a0] sm:$0xff] }
 0x1a0   :  { %v765_v33 = vmax.f32 %v701_v45, 0.0  ;;  %v6496_v36 = vmul.f32 0.0078125, %v246_v23  ;;  %1812 = vmatmul.mubr.bf16.gmra.mrb[92].mxu0 %v1198_v62  ;;  %2165 = vmatmul.mubr.bf16.gmra.mrb[92].mxu1 %v1198_v62  ;;  %v248_v6 = vpop.xlane.xlu1 %247  ;;  %v1018_v55 = vmul.f32 %v5166_v39, %v826_v43  ;;  %v829_v28 = vsub.f32 %v5746_v21, %v6480_v22 }
 0x1a1   :  { %v766_v47 = vmax.f32 %v702_v31, 0.0  ;;  %v6498_v61 = vmul.f32 0.0078125, %v248_v6  ;;  %1821 = vmatprep.mubr.bf16.mxu0 %v9484_v58  ;;  %2174 = vmatprep.mubr.bf16.mxu1 %v9484_v58  ;;  %v1088_v50 = vmul.f32 %v6279_v5, %v1017_v8  ;;  %v830_v43 = vsub.f32 %v5747_v44, %v6482_v56 }
 0x1a2   :  { %v893_v20 = vadd.f32 1e-05, %v765_v33  ;;  %v639_v41 = vmul.f32 %v6496_v36, %v6496_v36  ;;  %v1089_v13 = vmul.f32 %v6279_v5, %v1018_v55  ;;  %v1367_v55 = vld [vmem:[%s9480_s4] sm:$0xf]  ;;  %v1379_v56 = vsub.s32 2, %v6522_v57 }
 0x1a3   :  { %v894_v10 = vadd.f32 1e-05, %v766_v47  ;;  %v438_v46 = vpop.xlane.xlu0 %437  ;;  %v1159_v59 = vadd.f32 %v6293_v24, %v1088_v50  ;;  %v640_v4 = vmul.f32 %v6498_v61, %v6498_v61  ;;  %v6544_v50 = vld [vmem:[%s9477_s1] ss:$0 sm:$0xff] }
 0x1a4   :  { %5171 = vrsqrt.f32 %v893_v20  ;;  %v575_v48 = vmul.f32 0.0078125, %v438_v46  ;;  %v440_v30 = vpop.xlane.xlu1 %439  ;;  %v1160_v27 = vadd.f32 %v6293_v24, %v1089_v13  ;;  %v6561_v51 = vrot.slane %v1367_v55, %v1379_v56 }
 0x1a5   :  { %5173 = vrsqrt.f32 %v894_v10  ;;  %v576_v19 = vmul.f32 0.0078125, %v440_v30 }
 0x1a6   :  { %v5168_v0 = vpop.eup %5167  ;;  %v703_v37 = vsub.f32 %v575_v48, %v639_v41  ;;  %v1199_v63 = vpack.c.bf16 %v1160_v27, %v1159_v59  ;;  %v1375_v41 = vsub.s32 1, %v6522_v57  ;;  %v1383_v27 = vsub.s32 3, %v6522_v57 }
 0x1a7   :  { %v5170_v2 = vpop.eup %5169  ;;  %v704_v3 = vsub.f32 %v576_v19, %v640_v4  ;;  %v250_v26 = vpop.xlane.xlu0 %249  ;;  %v1019_v54 = vmul.f32 %v5168_v0, %v827_v49  ;;  %v6557_v4 = vld [vmem:[%s9478_s2] ss:$0 sm:$0xff] }
 0x1a8   :  { %v767_v7 = vmax.f32 %v703_v37, 0.0  ;;  %v6512_v34 = vmul.f32 0.0078125, %v250_v26  ;;  %1822 = vmatmul.mubr.bf16.gmra.mrb[96].mxu0 %v1199_v63  ;;  %2175 = vmatmul.mubr.bf16.gmra.mrb[96].mxu1 %v1199_v63  ;;  %v252_v40 = vpop.xlane.xlu1 %251  ;;  %v1020_v9 = vmul.f32 %v5170_v2, %v828_v53  ;;  %v5750_v53 = vld [vmem:[#allocation4 + $0x1b0] sm:$0xff] }
 0x1a9   :  { %v768_v32 = vmax.f32 %v704_v3, 0.0  ;;  %v6514_v60 = vmul.f32 0.0078125, %v252_v40  ;;  %1831 = vmatprep.mubr.bf16.mxu0 %v9484_v58  ;;  %2184 = vmatprep.mubr.bf16.mxu1 %v9484_v58  ;;  %v1090_v14 = vmul.f32 %v6279_v5, %v1019_v54  ;;  %v831_v37 = vsub.f32 %v5750_v53, %v6496_v36  ;;  %v5751_v54 = vld [vmem:[#allocation4 + $0x1b8] sm:$0xff] }
 0x1aa   :  { %v895_v12 = vadd.f32 1e-05, %v767_v7  ;;  %v641_v52 = vmul.f32 %v6512_v34, %v6512_v34  ;;  %v1091_v16 = vmul.f32 %v6279_v5, %v1020_v9  ;;  %v6566_v3 = vrot.slane %v1367_v55, %v1375_v41 }
 0x1ab   :  { %v896_v35 = vadd.f32 1e-05, %v768_v32  ;;  %v442_v15 = vpop.xlane.xlu0 %441  ;;  %v1161_v18 = vadd.f32 %v6293_v24, %v1090_v14  ;;  %v642_v1 = vmul.f32 %v6514_v60, %v6514_v60  ;;  %v832_v38 = vsub.f32 %v5751_v54, %v6498_v61 }
 0x1ac   :  { %5175 = vrsqrt.f32 %v895_v12  ;;  %v577_v42 = vmul.f32 0.0078125, %v442_v15  ;;  %v444_v17 = vpop.xlane.xlu1 %443  ;;  %v1162_v25 = vadd.f32 %v6293_v24, %v1091_v16  ;;  %v1371_v24 = vsub.s32 0, %v6522_v57 }
 0x1ad   :  { %5177 = vrsqrt.f32 %v896_v35  ;;  %v578_v29 = vmul.f32 0.0078125, %v444_v17  ;;  %v6569_v16 = vrot.slane %v1367_v55, %v1383_v27  ;;  %v6571_v35 = vld [vmem:[#allocation4 + $0x1c0] sm:$0xff] }
 0x1ae   :  { %v5172_v5 = vpop.eup %5171  ;;  %v705_v45 = vsub.f32 %v577_v42, %v641_v52  ;;  %v1200_v62 = vpack.c.bf16 %v1162_v25, %v1161_v18  ;;  %v6551_v59 = vrot.slane %v1367_v55, %v1371_v24  ;;  %v6577_v18 = vld [vmem:[#allocation4 + $0x1c8] sm:$0xff]  ;;  %v6597_v24 = vld [vmem:[#allocation4 + $0x1e0] sm:$0xff] }
 0x1af   :  { %v5174_v39 = vpop.eup %5173  ;;  %v706_v31 = vsub.f32 %v578_v29, %v642_v1  ;;  %v254_v23 = vpop.xlane.xlu0 %253  ;;  %v1021_v8 = vmul.f32 %v5172_v5, %v829_v28  ;;  %v6586_v29 = vld [vmem:[#allocation4 + $0x1d0] sm:$0xff] }
 0x1b0   :  { %v6531_v33 = vmul.f32 0.0078125, %v254_v23  ;;  %1832 = vmatmul.mubr.bf16.gmra.mrb[100].mxu0 %v1200_v62  ;;  %2185 = vmatmul.mubr.bf16.gmra.mrb[100].mxu1 %v1200_v62  ;;  %v256_v22 = vpop.xlane.xlu1 %255  ;;  %v1022_v6 = vmul.f32 %v5174_v39, %v830_v43  ;;  %v769_v13 = vmax.f32 %v705_v45, 0.0  ;;  %v6592_v45 = vld [vmem:[#allocation4 + $0x1d8] sm:$0xff] }
 0x1b1   :  { %v6537_v47 = vmul.f32 0.0078125, %v256_v22  ;;  %1841 = vmatprep.mubr.bf16.mxu0 %v9484_v58  ;;  %2194 = vmatprep.mubr.bf16.mxu1 %v9484_v58  ;;  %v1092_v20 = vmul.f32 %v6544_v50, %v1021_v8  ;;  %v770_v48 = vmax.f32 %v706_v31, 0.0 }
 0x1b2   :  { %v643_v10 = vmul.f32 %v6531_v33, %v6531_v33  ;;  %v1093_v46 = vmul.f32 %v6544_v50, %v1022_v6  ;;  %v897_v7 = vadd.f32 1e-05, %v769_v13  ;;  %v6604_v13 = vld [vmem:[#allocation4 + $0x1e8] sm:$0xff] }
 0x1b3   :  { %v446_v30 = vpop.xlane.xlu0 %445  ;;  %v1163_v19 = vadd.f32 %v6557_v4, %v1092_v20  ;;  %v644_v63 = vmul.f32 %v6537_v47, %v6537_v47  ;;  %v898_v14 = vadd.f32 1e-05, %v770_v48  ;;  %9496 = vst [vmem:[#allocation15_spill] sm:$0xff] %v6604_v13 }
 0x1b4   :  { %v579_v11 = vmul.f32 0.0078125, %v446_v30  ;;  %v448_v49 = vpop.xlane.xlu1 %447  ;;  %v1164_v0 = vadd.f32 %v6557_v4, %v1093_v46  ;;  %5179 = vrsqrt.f32 %v897_v7 }
 0x1b5   :  { %v580_v2 = vmul.f32 0.0078125, %v448_v49  ;;  %5181 = vrsqrt.f32 %v898_v14 }
 0x1b6   :  { %v5176_v26 = vpop.eup %5175  ;;  %v707_v40 = vsub.f32 %v579_v11, %v643_v10  ;;  %v1201_v9 = vpack.c.bf16 %v1164_v0, %v1163_v19 }
 0x1b7   :  { %v5178_v32 = vpop.eup %5177  ;;  %v708_v12 = vsub.f32 %v580_v2, %v644_v63  ;;  %v258_v52 = vpop.xlane.xlu0 %257  ;;  %v1023_v36 = vmul.f32 %v5176_v26, %v831_v37 }
 0x1b8   :  { %v771_v57 = vmax.f32 %v707_v40, 0.0  ;;  %v6575_v42 = vmul.f32 0.0078125, %v258_v52  ;;  %1842 = vmatmul.mubr.bf16.gmra.mrb[104].mxu0 %v1201_v9  ;;  %2195 = vmatmul.mubr.bf16.gmra.mrb[104].mxu1 %v1201_v9  ;;  %v260_v61 = vpop.xlane.xlu1 %259  ;;  %v1024_v17 = vmul.f32 %v5178_v32, %v832_v38 }
 0x1b9   :  { %v772_v21 = vmax.f32 %v708_v12, 0.0  ;;  %v6581_v28 = vmul.f32 0.0078125, %v260_v61  ;;  %1851 = vmatprep.mubr.bf16.mxu0 %v9484_v58  ;;  %2204 = vmatprep.mubr.bf16.mxu1 %v9484_v58  ;;  %v1094_v1 = vmul.f32 %v6544_v50, %v1023_v36 }
 0x1ba   :  { %v899_v44 = vadd.f32 1e-05, %v771_v57  ;;  %v645_v43 = vmul.f32 %v6575_v42, %v6575_v42  ;;  %v1095_v8 = vmul.f32 %v6544_v50, %v1024_v17 }
 0x1bb   :  { %9495 = vst [vmem:[#allocation14_spill] sm:$0xff] %v6581_v28  ;;  %v900_v39 = vadd.f32 1e-05, %v772_v21  ;;  %v450_v31 = vpop.xlane.xlu0 %449  ;;  %v1583_v23 = vpop.f32.mrb[0].mxu0  ;;  %v646_v6 = vmul.f32 %v6581_v28, %v6581_v28  ;;  %v1165_v11 = vadd.f32 %v6557_v4, %v1094_v1 }
 0x1bc   :  { %v581_v55 = vmul.f32 0.0078125, %v450_v31  ;;  %v1584_v56 = vadd.f32 %v1583_v23, %v6551_v59  ;;  %v1936_v20 = vpop.f32.mrb[0].mxu1  ;;  %v1585_v41 = vpop.f32.mrb[1].mxu0  ;;  %5183 = vrsqrt.f32 %v899_v44  ;;  %v1166_v54 = vadd.f32 %v6557_v4, %v1095_v8 }
 0x1bd   :  { %v1937_v46 = vadd.f32 %v1936_v20, %v6561_v51  ;;  %v1586_v48 = vadd.f32 %v1585_v41, %v6566_v3  ;;  %v1938_v30 = vpop.f32.mrb[1].mxu1  ;;  %v452_v27 = vpop.xlane.xlu1 %451  ;;  %5185 = vrsqrt.f32 %v900_v39 }
 0x1be   :  { %v709_v49 = vsub.f32 %v581_v55, %v645_v43  ;;  %v2511_v19 = vmul.f32 0.70710677, %v1584_v56  ;;  %v1939_v0 = vadd.f32 %v1938_v30, %v6569_v16  ;;  %v1587_v53 = vpop.f32.mrb[2].mxu0  ;;  %v1940_v37 = vpop.f32.mrb[2].mxu1  ;;  %v6613_v7 = vmul.f32 0.5, %v1584_v56 }
 0x1bf   :  { %v2513_v63 = vmul.f32 0.70710677, %v1937_v46  ;;  %v2512_v2 = vmul.f32 0.70710677, %v1586_v48  ;;  %v262_v26 = vpop.xlane.xlu0 %261  ;;  %v1589_v9 = vpop.f32.mrb[3].mxu0  ;;  %v582_v14 = vmul.f32 0.0078125, %v452_v27  ;;  %v1588_v12 = vadd.f32 %v1587_v53, %v6551_v59 }
 0x1c0   :  { %v773_v38 = vmax.f32 %v709_v49, 0.0  ;;  %5187 = verf.f32 %v2511_v19  ;;  %v2514_v40 = vmul.f32 0.70710677, %v1939_v0  ;;  %v1942_v32 = vpop.f32.mrb[3].mxu1  ;;  %v1941_v52 = vadd.f32 %v1940_v37, %v6561_v51  ;;  %v6622_v31 = vpop.eup %5179 }
 0x1c1   :  { %5189 = verf.f32 %v2513_v63  ;;  %v6617_v57 = vmul.f32 0.0078125, %v262_v26  ;;  %v1590_v61 = vadd.f32 %v1589_v9, %v6566_v3  ;;  %v264_v17 = vpop.xlane.xlu1 %263  ;;  %v6620_v21 = vmul.f32 0.5, %v1937_v46  ;;  %v6628_v41 = vpop.eup %5181 }
 0x1c2   :  { %v901_v36 = vadd.f32 1e-05, %v773_v38  ;;  %5191 = verf.f32 %v2512_v2  ;;  %v710_v1 = vsub.f32 %v582_v14, %v646_v6  ;;  %v2515_v44 = vmul.f32 0.70710677, %v1588_v12 }
 0x1c3   :  { %9497 = vst [vmem:[#allocation16_spill] sm:$0xff] %v6617_v57  ;;  %5193 = verf.f32 %v2514_v40  ;;  %v454_v43 = vpop.xlane.xlu0 %453  ;;  %v1593_v39 = vpop.f32.mrb[4].mxu0  ;;  %v6624_v23 = vmul.f32 0.5, %v1586_v48  ;;  %v6626_v8 = vmul.f32 0.5, %v1939_v0  ;;  %v2517_v55 = vmul.f32 0.70710677, %v1941_v52 }
 0x1c4   :  { %5195 = vrsqrt.f32 %v901_v36  ;;  %v1946_v56 = vpop.f32.mrb[4].mxu1  ;;  %v1595_v20 = vpop.f32.mrb[5].mxu0  ;;  %v774_v30 = vmax.f32 %v710_v1, 0.0  ;;  %v6630_v46 = vmul.f32 0.5, %v1588_v12  ;;  %v647_v6 = vmul.f32 %v6617_v57, %v6617_v57  ;;  %v6653_v12 = vld [vmem:[#allocation4 + $0x1f0] sm:$0xff] }
 0x1c5   :  { %5197 = verf.f32 %v2515_v44  ;;  %v1948_v27 = vpop.f32.mrb[5].mxu1  ;;  %v2516_v49 = vmul.f32 0.70710677, %v1590_v61  ;;  %v1943_v48 = vadd.f32 %v1942_v32, %v6569_v16  ;;  %v1202_v19 = vpack.c.bf16 %v1166_v54, %v1165_v11  ;;  %v6635_v0 = vpop.f32.mrb[6].mxu0  ;;  %9499 = vst [vmem:[#allocation18_spill] sm:$0xff] %v6653_v12 }
 0x1c6   :  { %5199 = verf.f32 %v2517_v55  ;;  %v6637_v53 = vpop.f32.mrb[6].mxu1  ;;  %v902_v37 = vadd.f32 1e-05, %v774_v30  ;;  %v6639_v63 = vmul.f32 0.0078125, %v264_v17  ;;  %v583_v2 = vmul.f32 0.0078125, %v454_v43  ;;  %v6642_v38 = vpop.f32.mrb[7].mxu0 }
 0x1c7   :  { %v1594_v26 = vadd.f32 %v1593_v39, %v6551_v59  ;;  %v6644_v40 = vpop.f32.mrb[7].mxu1  ;;  %v6646_v9 = vpop.eup %5183  ;;  %v6648_v14 = vmul.f32 0.5, %v1941_v52  ;;  %5201 = verf.f32 %v2516_v49  ;;  %v2518_v11 = vmul.f32 0.70710677, %v1943_v48  ;;  %1852 = vmatmul.mubr.bf16.gmra.mrb[108].mxu0 %v1202_v19  ;;  %2205 = vmatmul.mubr.bf16.gmra.mrb[108].mxu1 %v1202_v19 }
 0x1c8   :  { %9498 = vst [vmem:[#allocation17_spill] sm:$0xff] %v6639_v63  ;;  %v1947_v54 = vadd.f32 %v1946_v56, %v6561_v51  ;;  %v6651_v32 = vpop.eup %5185  ;;  %5203 = vrsqrt.f32 %v902_v37  ;;  %v6657_v17 = vmul.f32 0.5, %v1590_v61  ;;  %v711_v1 = vsub.f32 %v583_v2, %v647_v6  ;;  %v456_v44 = vpop.xlane.xlu1 %455  ;;  %1861 = vmatprep.mubr.bf16.mxu0 %v9484_v58  ;;  %2214 = vmatprep.mubr.bf16.mxu1 %v9484_v58 }
 0x1c9   :  { %v6661_v43 = vmul.f32 0.5, %v1943_v48  ;;  %5205 = verf.f32 %v2518_v11  ;;  %v648_v39 = vmul.f32 %v6639_v63, %v6639_v63  ;;  %v2519_v55 = vmul.f32 0.70710677, %v1594_v26 }
 0x1ca   :  { %v5188_v52 = vpop.eup %5187  ;;  %v775_v49 = vmax.f32 %v711_v1, 0.0  ;;  %v2521_v19 = vmul.f32 0.70710677, %v1947_v54  ;;  %v1596_v61 = vadd.f32 %v1595_v20, %v6566_v3  ;;  %v1949_v48 = vadd.f32 %v1948_v27, %v6569_v16 }
 0x1cb   :  { %v5190_v56 = vpop.eup %5189  ;;  %v3023_v30 = vadd.f32 1.0, %v5188_v52  ;;  %v6666_v6 = vpop.f32.mrb[8].mxu0  ;;  %5207 = verf.f32 %v2519_v55  ;;  %v584_v11 = vmul.f32 0.0078125, %v456_v44  ;;  %v6675_v1 = vmul.f32 0.5, %v1594_v26  ;;  %v6688_v44 = vld [vmem:[#allocation4 + $0x1f8] sm:$0xff] }
 0x1cc   :  { %v6668_v37 = vpop.f32.mrb[8].mxu1  ;;  %v5192_v2 = vpop.eup %5191  ;;  %v3025_v36 = vadd.f32 1.0, %v5190_v56  ;;  %v6677_v5 = vmul.f32 0.5, %v1947_v54  ;;  %5209 = verf.f32 %v2521_v19  ;;  %v2520_v26 = vmul.f32 0.70710677, %v1596_v61 }
 0x1cd   :  { %v6671_v10 = vpop.f32.mrb[9].mxu0  ;;  %v6673_v22 = vpop.f32.mrb[9].mxu1  ;;  %v3024_v52 = vadd.f32 1.0, %v5192_v2  ;;  %v6686_v27 = vmul.f32 %v3023_v30, %v6613_v7  ;;  %v903_v2 = vadd.f32 1e-05, %v775_v49  ;;  %v6699_v12 = vmul.f32 0.5, %v1596_v61 }
 0x1ce   :  { %v5194_v62 = vpop.eup %5193  ;;  %v6679_v20 = vpop.f32.mrb[10].mxu0  ;;  %v6697_v15 = vmul.f32 %v3025_v36, %v6620_v21  ;;  %v2522_v7 = vmul.f32 0.70710677, %v1949_v48  ;;  %5211 = verf.f32 %v2520_v26  ;;  %v712_v49 = vsub.f32 %v584_v11, %v648_v39 }
 0x1cf   :  { %v6681_v58 = vpop.f32.mrb[10].mxu1  ;;  %v6683_v56 = vpop.eup %5195  ;;  %9500 = vst [vmem:[#allocation19_spill] sm:$0xff] %v6686_v27  ;;  %v3026_v57 = vadd.f32 1.0, %v5194_v62  ;;  %v6702_v28 = vmul.f32 %v3024_v52, %v6624_v23  ;;  %v1598_v63 = vadd.f32 %v6635_v0, %v6551_v59  ;;  %v1951_v21 = vadd.f32 %v6637_v53, %v6561_v51 }
 0x1d0   :  { %v6692_v25 = vpop.f32.mrb[11].mxu0  ;;  %v6694_v54 = vpop.f32.mrb[11].mxu1  ;;  %9501 = vst [vmem:[#allocation20_spill] sm:$0xff] %v6697_v15  ;;  %5213 = verf.f32 %v2522_v7  ;;  %v776_v61 = vmax.f32 %v712_v49, 0.0  ;;  %v1600_v23 = vadd.f32 %v6642_v38, %v6566_v3  ;;  %v1953_v0 = vadd.f32 %v6644_v40, %v6569_v16 }
 0x1d1   :  { %v5198_v19 = vpop.eup %5197  ;;  %9502 = vst [vmem:[#allocation21_spill] sm:$0xff] %v6702_v28  ;;  %5215 = vrsqrt.f32 %v903_v2  ;;  %v2523_v26 = vmul.f32 0.70710677, %v1598_v63  ;;  %v6726_v2 = vmul.f32 0.5, %v1949_v48  ;;  %v2525_v7 = vmul.f32 0.70710677, %v1951_v21 }
 0x1d2   :  { %v5200_v30 = vpop.eup %5199  ;;  %v3027_v13 = vadd.f32 1.0, %v5198_v19  ;;  %v904_v38 = vadd.f32 1e-05, %v776_v61  ;;  %v6744_v61 = vmul.f32 0.5, %v1951_v21  ;;  %v2524_v27 = vmul.f32 0.70710677, %v1600_v23 }
 0x1d3   :  { %v3029_v55 = vadd.f32 1.0, %v5200_v30  ;;  %v5202_v36 = vpop.eup %5201  ;;  %v6720_v53 = vpop.f32.mrb[12].mxu0  ;;  %5217 = verf.f32 %v2523_v26  ;;  %v2526_v26 = vmul.f32 0.70710677, %v1953_v0 }
 0x1d4   :  { %v6709_v62 = vmul.f32 %v3027_v13, %v6630_v46  ;;  %v6713_v52 = vpop.eup %5203  ;;  %v3028_v11 = vadd.f32 1.0, %v5202_v36  ;;  %v6722_v19 = vpop.f32.mrb[12].mxu1  ;;  %5219 = vrsqrt.f32 %v904_v38 }
 0x1d5   :  { %v6716_v39 = vmul.f32 %v3029_v55, %v6648_v14  ;;  %v5206_v13 = vpop.eup %5205  ;;  %v6728_v30 = vpop.f32.mrb[13].mxu0  ;;  %v6731_v14 = vmul.f32 %v3026_v57, %v6626_v8  ;;  %v6735_v55 = vmul.f32 0.5, %v1598_v63  ;;  %5221 = verf.f32 %v2525_v7 }
 0x1d6   :  { %9503 = vst [vmem:[#allocation22_spill] sm:$0xff] %v6709_v62  ;;  %v6737_v49 = vpop.f32.mrb[13].mxu1  ;;  %v6739_v36 = vpop.f32.mrb[14].mxu0  ;;  %v6742_v48 = vmul.f32 %v3028_v11, %v6657_v17  ;;  %v3030_v63 = vadd.f32 1.0, %v5206_v13  ;;  %5223 = verf.f32 %v2524_v27  ;;  %v9507_v17 = vsub.f32 %v6571_v35, %v6512_v34 }
 0x1d7   :  { %9504 = vst [vmem:[#allocation23_spill] sm:$0xff] %v6716_v39  ;;  %9505 = vst [vmem:[#allocation24_spill] sm:$0xff] %v6731_v14  ;;  %v5208_v46 = vpop.eup %5207  ;;  %v6746_v57 = vpop.f32.mrb[14].mxu1  ;;  %v9508_v11 = vsub.f32 %v6577_v18, %v6514_v60  ;;  %v6760_v14 = vmul.f32 0.5, %v1600_v23  ;;  %5225 = verf.f32 %v2526_v26  ;;  %v1604_v13 = vadd.f32 %v6666_v6, %v6551_v59 }
 0x1d8   :  { %9506 = vst [vmem:[#allocation25_spill] sm:$0xff] %v6742_v48  ;;  %v6748_v8 = vpop.f32.mrb[15].mxu0  ;;  %v5210_v40 = vpop.eup %5209  ;;  %v3031_v15 = vadd.f32 1.0, %v5208_v46  ;;  %v1025_v21 = vmul.f32 %v6622_v31, %v9507_v17  ;;  %v1957_v46 = vadd.f32 %v6668_v37, %v6561_v51  ;;  %v6766_v7 = vmul.f32 0.5, %v1953_v0 }
 0x1d9   :  { %v6750_v39 = vpop.f32.mrb[15].mxu1  ;;  %v3033_v62 = vadd.f32 1.0, %v5210_v40  ;;  %v1026_v38 = vmul.f32 %v6628_v41, %v9508_v11  ;;  %v5212_v27 = vpop.eup %5211  ;;  %v1606_v60 = vadd.f32 %v6671_v10, %v6566_v3  ;;  %v6773_v31 = vmul.f32 %v3030_v63, %v6661_v43 }
 0x1da   :  { %v1096_v34 = vmul.f32 %v6544_v50, %v1025_v21  ;;  %v5214_v18 = vpop.eup %5213  ;;  %v6776_v41 = vmul.f32 %v3031_v15, %v6675_v1  ;;  %v2527_v37 = vmul.f32 0.70710677, %v1604_v13  ;;  %v3032_v40 = vadd.f32 1.0, %v5212_v27 }
 0x1db   :  { %v1097_v35 = vmul.f32 %v6544_v50, %v1026_v38  ;;  %9509 = vst [vmem:[#allocation26_spill] sm:$0xff] %v6773_v31  ;;  %v6779_v6 = vmul.f32 %v3033_v62, %v6677_v5  ;;  %v6781_v23 = vpop.f32.mrb[16].mxu0  ;;  %v6783_v0 = vpop.eup %5215  ;;  %v2529_v17 = vmul.f32 0.70710677, %v1957_v46  ;;  %v3034_v15 = vadd.f32 1.0, %v5214_v18 }
 0x1dc   :  { %9510 = vst [vmem:[#allocation27_spill] sm:$0xff] %v6776_v41  ;;  %v1167_v26 = vadd.f32 %v6557_v4, %v1096_v34  ;;  %v6787_v21 = vpop.f32.mrb[16].mxu1  ;;  %v6789_v43 = vpop.f32.mrb[17].mxu0  ;;  %v6791_v1 = vmul.f32 0.5, %v1604_v13  ;;  %5227 = verf.f32 %v2527_v37  ;;  %v2528_v5 = vmul.f32 0.70710677, %v1606_v60 }
 0x1dd   :  { %9511 = vst [vmem:[#allocation28_spill] sm:$0xff] %v6779_v6  ;;  %v1168_v10 = vadd.f32 %v6557_v4, %v1097_v35  ;;  %v6793_v62 = vpop.f32.mrb[17].mxu1  ;;  %v6795_v63 = vpop.f32.mrb[18].mxu0  ;;  %v6797_v38 = vmul.f32 0.5, %v1957_v46  ;;  %5229 = verf.f32 %v2529_v17  ;;  %v1959_v27 = vadd.f32 %v6673_v22, %v6569_v16 }
 0x1de   :  { %v6801_v34 = vpop.f32.mrb[18].mxu1  ;;  %v6803_v35 = vpop.f32.mrb[19].mxu0  ;;  %5231 = verf.f32 %v2528_v5  ;;  %v1608_v13 = vadd.f32 %v6679_v20, %v6551_v59  ;;  %v1961_v37 = vadd.f32 %v6681_v58, %v6561_v51  ;;  %v1610_v46 = vadd.f32 %v6692_v25, %v6566_v3 }
 0x1df   :  { %v1203_v11 = vpack.c.bf16 %v1168_v10, %v1167_v26  ;;  %v5218_v18 = vpop.eup %5217  ;;  %v6811_v26 = vpop.f32.mrb[19].mxu1  ;;  %v6816_v22 = vmul.f32 %v3032_v40, %v6699_v12  ;;  %v2530_v5 = vmul.f32 0.70710677, %v1959_v27  ;;  %v1963_v20 = vadd.f32 %v6694_v54, %v6569_v16 }
 0x1e0   :  { %v6813_v10 = vpop.eup %5219  ;;  %v3035_v17 = vadd.f32 1.0, %v5218_v18  ;;  %v6821_v58 = vmul.f32 %v3034_v15, %v6726_v2  ;;  %v6823_v41 = vmul.f32 0.5, %v1606_v60  ;;  %v2531_v25 = vmul.f32 0.70710677, %v1608_v13 }
 0x1e1   :  { %9512 = vst [vmem:[#allocation29_spill] sm:$0xff] %v6813_v10  ;;  %9513 = vst [vmem:[#allocation30_spill] sm:$0xff] %v6816_v22  ;;  %1862 = vmatmul.mubr.bf16.gmra.mrb[112].mxu0 %v1203_v11  ;;  %2215 = vmatmul.mubr.bf16.gmra.mrb[112].mxu1 %v1203_v11  ;;  %v5222_v6 = vpop.eup %5221  ;;  %v2533_v31 = vmul.f32 0.70710677, %v1961_v37  ;;  %v9515_v48 = vmov 0   ;;  %v6827_v40 = vmul.f32 0.5, %v1959_v27  ;;  %5233 = verf.f32 %v2530_v5 }
 0x1e2   :  { %9514 = vst [vmem:[#allocation31_spill] sm:$0xff] %v6821_v58  ;;  %1871 = vmatprep.mubr.bf16.mxu0 %v9515_v48  ;;  %2224 = vmatprep.mubr.bf16.mxu1 %v9515_v48  ;;  %v5224_v12 = vpop.eup %5223  ;;  %v6829_v11 = vmul.f32 0.5, %v1608_v13  ;;  %v6831_v18 = vmul.f32 0.5, %v1961_v37  ;;  %v6834_v2 = vmul.f32 %v3035_v17, %v6735_v55  ;;  %v3037_v60 = vadd.f32 1.0, %v5222_v6 }
 0x1e3   :  { %v5226_v54 = vpop.eup %5225  ;;  %5235 = verf.f32 %v2531_v25  ;;  %v2532_v15 = vmul.f32 0.70710677, %v1610_v46  ;;  %v6836_v58 = vpop.f32.mrb[20].mxu0  ;;  %v3036_v28 = vadd.f32 1.0, %v5224_v12  ;;  %v6840_v27 = vmul.f32 0.5, %v1610_v46 }
 0x1e4   :  { %9516 = vst [vmem:[#allocation32_spill] sm:$0xff] %v6834_v2  ;;  %v6838_v22 = vpop.f32.mrb[20].mxu1  ;;  %5237 = verf.f32 %v2533_v31  ;;  %v2534_v5 = vmul.f32 0.70710677, %v1963_v20  ;;  %v6842_v13 = vpop.f32.mrb[21].mxu0  ;;  %v3038_v10 = vadd.f32 1.0, %v5226_v54  ;;  %v9517_v55 = vsub.f32 %v6586_v29, %v6531_v33 }
 0x1e5   :  { %v6844_v37 = vpop.f32.mrb[21].mxu1  ;;  %5239 = verf.f32 %v2532_v15  ;;  %v9518_v17 = vsub.f32 %v6592_v45, %v6537_v47  ;;  %v6854_v31 = vpop.f32.mrb[22].mxu0  ;;  %v6858_v12 = vmul.f32 0.5, %v1963_v20  ;;  %v1614_v54 = vadd.f32 %v6720_v53, %v6551_v59 }
 0x1e6   :  { %v1027_v6 = vmul.f32 %v6646_v9, %v9517_v55  ;;  %v6856_v46 = vpop.f32.mrb[22].mxu1  ;;  %5241 = verf.f32 %v2534_v5  ;;  %v1967_v33 = vadd.f32 %v6722_v19, %v6561_v51  ;;  %v6864_v29 = vpop.f32.mrb[23].mxu0  ;;  %v6869_v45 = vmul.f32 %v3037_v60, %v6744_v61 }
 0x1e7   :  { %v1028_v25 = vmul.f32 %v6651_v32, %v9518_v17  ;;  %v6866_v9 = vpop.f32.mrb[23].mxu1  ;;  %v5228_v47 = vpop.eup %5227  ;;  %v1616_v15 = vadd.f32 %v6728_v30, %v6566_v3  ;;  %v6876_v53 = vmul.f32 %v3036_v28, %v6760_v14  ;;  %v2535_v55 = vmul.f32 0.70710677, %v1614_v54 }
 0x1e8   :  { %9519 = vst [vmem:[#allocation33_spill] sm:$0xff] %v6866_v9  ;;  %9520 = vst [vmem:[#allocation34_spill] sm:$0xff] %v6869_v45  ;;  %v1098_v32 = vmul.f32 %v6544_v50, %v1027_v6  ;;  %v5230_v5 = vpop.eup %5229  ;;  %v3039_v19 = vadd.f32 1.0, %v5228_v47  ;;  %v1969_v17 = vadd.f32 %v6737_v49, %v6569_v16  ;;  %v6881_v61 = vmul.f32 %v3038_v10, %v6766_v7 }
 0x1e9   :  { %v1099_v20 = vmul.f32 %v6544_v50, %v1028_v25  ;;  %9521 = vst [vmem:[#allocation35_spill] sm:$0xff] %v6876_v53  ;;  %v5232_v2 = vpop.eup %5231  ;;  %v2537_v25 = vmul.f32 0.70710677, %v1967_v33  ;;  %v3041_v45 = vadd.f32 1.0, %v5230_v5  ;;  %v6885_v30 = vmul.f32 0.5, %v1614_v54 }
 0x1ea   :  { %v1169_v60 = vadd.f32 %v6557_v4, %v1098_v32  ;;  %5243 = verf.f32 %v2535_v55  ;;  %v6887_v28 = vmul.f32 0.5, %v1967_v33  ;;  %v3040_v14 = vadd.f32 1.0, %v5232_v2 }
 0x1eb   :  { %v1170_v6 = vadd.f32 %v6557_v4, %v1099_v20  ;;  %5245 = verf.f32 %v2537_v25  ;;  %v2536_v53 = vmul.f32 0.70710677, %v1616_v15  ;;  %v6889_v49 = vpop.f32.mrb[24].mxu0  ;;  %v6891_v9 = vpop.f32.mrb[24].mxu1  ;;  %v6894_v10 = vmul.f32 %v3039_v19, %v6791_v1 }
 0x1ec   :  { %v5234_v7 = vpop.eup %5233  ;;  %v6896_v32 = vmul.f32 0.5, %v1616_v15  ;;  %v2538_v20 = vmul.f32 0.70710677, %v1969_v17  ;;  %v1618_v54 = vadd.f32 %v6739_v36, %v6551_v59  ;;  %v6900_v33 = vpop.f32.mrb[25].mxu0  ;;  %v1620_v1 = vadd.f32 %v6748_v8, %v6566_v3 }
 0x1ed   :  { %v1204_v47 = vpack.c.bf16 %v1170_v6, %v1169_v60  ;;  %9522 = vst [vmem:[#allocation36_spill] sm:$0xff] %v6894_v10  ;;  %v6902_v2 = vpop.f32.mrb[25].mxu1  ;;  %v5236_v5 = vpop.eup %5235  ;;  %v3042_v55 = vadd.f32 1.0, %v5234_v7  ;;  %5247 = verf.f32 %v2536_v53  ;;  %v1971_v60 = vadd.f32 %v6746_v57, %v6561_v51 }
 0x1ee   :  { %v6908_v15 = vpop.f32.mrb[26].mxu0  ;;  %v6910_v19 = vpop.f32.mrb[26].mxu1  ;;  %v6913_v6 = vmul.f32 %v3041_v45, %v6797_v38  ;;  %v3043_v25 = vadd.f32 1.0, %v5236_v5  ;;  %5249 = verf.f32 %v2538_v20  ;;  %v2539_v7 = vmul.f32 0.70710677, %v1618_v54 }
 0x1ef   :  { %1872 = vmatmul.mubr.bf16.gmra.mrb[116].mxu0 %v1204_v47  ;;  %2225 = vmatmul.mubr.bf16.gmra.mrb[116].mxu1 %v1204_v47  ;;  %9523 = vst [vmem:[#allocation37_spill] sm:$0xff] %v6908_v15  ;;  %9524 = vst [vmem:[#allocation38_spill] sm:$0xff] %v6910_v19  ;;  %v5238_v36 = vpop.eup %5237  ;;  %v6917_v53 = vpop.f32.mrb[27].mxu0  ;;  %v6922_v47 = vmul.f32 %v3040_v14, %v6823_v41  ;;  %v6924_v10 = vmul.f32 0.5, %v1969_v17  ;;  %v6926_v19 = vmul.f32 0.5, %v1618_v54  ;;  %v9530_v54 = vld [vmem:[#allocation15_spill] sm:$0xff] }
 0x1f0   :  { %9525 = vst [vmem:[#allocation39_spill] sm:$0xff] %v6913_v6  ;;  %1881 = vmatprep.mubr.bf16.mxu0 %v9515_v48  ;;  %2234 = vmatprep.mubr.bf16.mxu1 %v9515_v48  ;;  %9526 = vst [vmem:[#allocation40_spill] sm:$0xff] %v6917_v53  ;;  %v6919_v57 = vpop.f32.mrb[27].mxu1  ;;  %v5240_v8 = vpop.eup %5239  ;;  %v2541_v38 = vmul.f32 0.70710677, %v1971_v60  ;;  %v6929_v20 = vmul.f32 %v3042_v55, %v6827_v40  ;;  %v3045_v5 = vadd.f32 1.0, %v5238_v36  ;;  %5251 = verf.f32 %v2539_v7 }
 0x1f1   :  { %9527 = vst [vmem:[#allocation41_spill] sm:$0xff] %v6919_v57  ;;  %v5242_v45 = vpop.eup %5241  ;;  %v6931_v6 = vmul.f32 0.5, %v1971_v60  ;;  %v3044_v53 = vadd.f32 1.0, %v5240_v8  ;;  %v2540_v57 = vmul.f32 0.70710677, %v1620_v1  ;;  %v6934_v41 = vmul.f32 %v3043_v25, %v6829_v11  ;;  %v9531_v55 = vld [vmem:[#allocation14_spill] sm:$0xff] }
 0x1f2   :  { %v3046_v15 = vadd.f32 1.0, %v5242_v45  ;;  %5253 = verf.f32 %v2541_v38  ;;  %v1973_v17 = vadd.f32 %v6750_v39, %v6569_v16  ;;  %v9529_v14 = vsub.f32 %v6597_v24, %v6575_v42 }
 0x1f3   :  { %9528 = vst [vmem:[#allocation42_spill] sm:$0xff] %v6934_v41  ;;  %v9532_v36 = vsub.f32 %v9530_v54, %v9531_v55  ;;  %v6946_v7 = vmul.f32 0.5, %v1620_v1  ;;  %5255 = verf.f32 %v2540_v57  ;;  %v1624_v11 = vadd.f32 %v6781_v23, %v6551_v59  ;;  %v6952_v39 = vpop.f32.mrb[28].mxu0  ;;  %v6954_v8 = vpop.f32.mrb[28].mxu1 }
 0x1f4   :  { %v1029_v40 = vmul.f32 %v6683_v56, %v9529_v14  ;;  %v1977_v25 = vadd.f32 %v6787_v21, %v6561_v51  ;;  %v5244_v42 = vpop.eup %5243  ;;  %v6957_v24 = vmul.f32 %v3045_v5, %v6831_v18  ;;  %v2542_v56 = vmul.f32 0.70710677, %v1973_v17  ;;  %v6961_v57 = vpop.f32.mrb[29].mxu0 }
 0x1f5   :  { %v1030_v60 = vmul.f32 %v6713_v52, %v9532_v36  ;;  %v6963_v38 = vpop.f32.mrb[29].mxu1  ;;  %v5246_v23 = vpop.eup %5245  ;;  %v6966_v21 = vmul.f32 %v3044_v53, %v6840_v27  ;;  %v6969_v45 = vmul.f32 %v3046_v15, %v6858_v12  ;;  %v3047_v14 = vadd.f32 1.0, %v5244_v42 }
 0x1f6   :  { %9533 = vst [vmem:[#allocation15_spill] sm:$0xff] %v6957_v24  ;;  %v1100_v52 = vmul.f32 %v6544_v50, %v1029_v40  ;;  %v2543_v54 = vmul.f32 0.70710677, %v1624_v11  ;;  %v6971_v18 = vpop.f32.mrb[30].mxu0  ;;  %v3049_v5 = vadd.f32 1.0, %v5246_v23  ;;  %5257 = verf.f32 %v2542_v56  ;;  %v6975_v36 = vpop.f32.mrb[30].mxu1 }
 0x1f7   :  { %v1101_v1 = vmul.f32 %v6544_v50, %v1030_v60  ;;  %9534 = vst [vmem:[#allocation14_spill] sm:$0xff] %v6975_v36  ;;  %v6977_v60 = vpop.f32.mrb[31].mxu0  ;;  %v5248_v24 = vpop.eup %5247  ;;  %v6979_v27 = vmul.f32 0.5, %v1973_v17  ;;  %v2545_v12 = vmul.f32 0.70710677, %v1977_v25  ;;  %v1626_v15 = vadd.f32 %v6789_v43, %v6566_v3 }
 0x1f8   :  { %v1171_v40 = vadd.f32 %v6557_v4, %v1100_v52  ;;  %9535 = vst [vmem:[#allocation43_spill] sm:$0xff] %v6977_v60  ;;  %5259 = verf.f32 %v2543_v54  ;;  %v6983_v53 = vpop.f32.mrb[31].mxu1  ;;  %v5250_v42 = vpop.eup %5249  ;;  %v3048_v56 = vadd.f32 1.0, %v5248_v24  ;;  %v6985_v52 = vmul.f32 0.5, %v1624_v11 }
 0x1f9   :  { %v1172_v55 = vadd.f32 %v6557_v4, %v1101_v1  ;;  %v1979_v1 = vadd.f32 %v6793_v62, %v6569_v16  ;;  %v3050_v41 = vadd.f32 1.0, %v5250_v42  ;;  %v6989_v60 = vmul.f32 0.5, %v1977_v25 }
 0x1fa   :  { %5261 = verf.f32 %v2545_v12  ;;  %v2544_v17 = vmul.f32 0.70710677, %v1626_v15  ;;  %v5252_v54 = vpop.eup %5251  ;;  %v6992_v36 = vmul.f32 %v3047_v14, %v6885_v30  ;;  %v6995_v43 = vmul.f32 %v3049_v5, %v6887_v28 }
 0x1fb   :  { %v1205_v23 = vpack.c.bf16 %v1172_v55, %v1171_v40  ;;  %v2546_v24 = vmul.f32 0.70710677, %v1979_v1  ;;  %v1628_v11 = vadd.f32 %v6795_v63, %v6551_v59  ;;  %v3051_v62 = vadd.f32 1.0, %v5252_v54  ;;  %v7005_v30 = vpop.f32.mrb[32].mxu0  ;;  %v7007_v28 = vpop.f32.mrb[32].mxu1 }
 0x1fc   :  { %9536 = vst [vmem:[#allocation44_spill] sm:$0xff] %v6992_v36  ;;  %9537 = vst [vmem:[#allocation45_spill] sm:$0xff] %v6995_v43  ;;  %v5254_v40 = vpop.eup %5253  ;;  %v6999_v55 = vmul.f32 0.5, %v1626_v15  ;;  %5263 = verf.f32 %v2544_v17  ;;  %v1981_v25 = vadd.f32 %v6801_v34, %v6561_v51  ;;  %v7010_v14 = vmul.f32 %v3048_v56, %v6896_v32  ;;  %v7012_v12 = vpop.f32.mrb[33].mxu0  ;;  %v9545_v43 = vld [vmem:[#allocation18_spill] sm:$0xff]  ;;  %v9546_v36 = vld [vmem:[#allocation16_spill] sm:$0xff] }
 0x1fd   :  { %1882 = vmatmul.mubr.bf16.gmra.mrb[120].mxu0 %v1205_v23  ;;  %2235 = vmatmul.mubr.bf16.gmra.mrb[120].mxu1 %v1205_v23  ;;  %v3053_v63 = vadd.f32 1.0, %v5254_v40  ;;  %5265 = verf.f32 %v2546_v24  ;;  %v2547_v5 = vmul.f32 0.70710677, %v1628_v11  ;;  %9538 = vst [vmem:[#allocation46_spill] sm:$0xff] %v7012_v12  ;;  %v7014_v15 = vpop.f32.mrb[33].mxu1  ;;  %v5256_v42 = vpop.eup %5255  ;;  %v7017_v34 = vmul.f32 %v3050_v41, %v6924_v10 }
 0x1fe   :  { %1891 = vmatprep.mubr.bf16.mxu0 %v9515_v48  ;;  %2244 = vmatprep.mubr.bf16.mxu1 %v9515_v48  ;;  %9539 = vst [vmem:[#allocation47_spill] sm:$0xff] %v7014_v15  ;;  %v7019_v23 = vmul.f32 0.5, %v1979_v1  ;;  %v2549_v48 = vmul.f32 0.70710677, %v1981_v25  ;;  %v1630_v17 = vadd.f32 %v6803_v35, %v6566_v3  ;;  %v7023_v54 = vpop.f32.mrb[34].mxu0  ;;  %v7025_v32 = vpop.f32.mrb[34].mxu1  ;;  %v7028_v56 = vmul.f32 %v3051_v62, %v6926_v19 }
 0x1ff   :  { %9540 = vst [vmem:[#allocation48_spill] sm:$0xff] %v7023_v54  ;;  %9541 = vst [vmem:[#allocation49_spill] sm:$0xff] %v7025_v32  ;;  %v7030_v24 = vmul.f32 0.5, %v1628_v11  ;;  %5267 = verf.f32 %v2547_v5  ;;  %v1983_v10 = vadd.f32 %v6811_v26, %v6569_v16  ;;  %v7034_v41 = vpop.f32.mrb[35].mxu0  ;;  %v7036_v1 = vpop.f32.mrb[35].mxu1  ;;  %v3052_v40 = vadd.f32 1.0, %v5256_v42 }
 0x200   :  { %9542 = vst [vmem:[#allocation50_spill] sm:$0xff] %v7028_v56  ;;  %9543 = vst [vmem:[#allocation51_spill] sm:$0xff] %v7034_v41  ;;  %5269 = verf.f32 %v2549_v48  ;;  %v2548_v35 = vmul.f32 0.70710677, %v1630_v17  ;;  %v9547_v54 = vsub.f32 %v9545_v43, %v9546_v36  ;;  %v5258_v19 = vpop.eup %5257  ;;  %v7043_v11 = vmul.f32 %v3053_v63, %v6931_v6  ;;  %v9549_v26 = vld [vmem:[#allocation17_spill] sm:$0xff]  ;;  %v9555_v63 = vld [vmem:[#allocation26_spill] sm:$0xff] }
 0x201   :  { %9544 = vst [vmem:[#allocation52_spill] sm:$0xff] %v7036_v1  ;;  %v7045_v62 = vmul.f32 0.5, %v1981_v25  ;;  %v2550_v5 = vmul.f32 0.70710677, %v1983_v10  ;;  %v9550_v56 = vsub.f32 %v6688_v44, %v9549_v26  ;;  %v9551_v41 = vld [vmem:[#allocation29_spill] sm:$0xff]  ;;  %v3054_v48 = vadd.f32 1.0, %v5258_v19 }
 0x202   :  { %v1031_v32 = vmul.f32 %v6783_v0, %v9547_v54  ;;  %9548 = vst [vmem:[#allocation18_spill] sm:$0xff] %v7043_v11  ;;  %v5260_v42 = vpop.eup %5259  ;;  %5271 = verf.f32 %v2548_v35  ;;  %v9552_v36 = vld [vmem:[#allocation21_spill] sm:$0xff]  ;;  %v9554_v25 = vld [vmem:[#allocation24_spill] sm:$0xff]  ;;  %v7058_v44 = vmul.f32 %v3052_v40, %v6946_v7  ;;  %v1636_v7 = vadd.f32 %v6842_v13, %v6566_v3 }
 0x203   :  { %v1032_v1 = vmul.f32 %v9551_v41, %v9550_v56  ;;  %v9553_v43 = vld [vmem:[#allocation25_spill] sm:$0xff]  ;;  %v3055_v54 = vadd.f32 1.0, %v5260_v42  ;;  %5273 = verf.f32 %v2550_v5  ;;  %v3602_v11 = vpack.c.bf16 %v9555_v63, %v9554_v25  ;;  %v7066_v35 = vpop.f32.mrb[36].mxu0  ;;  %v7068_v19 = vpop.f32.mrb[36].mxu1 }
 0x204   :  { %v1102_v15 = vmul.f32 %v6544_v50, %v1031_v32  ;;  %v3600_v0 = vpack.c.bf16 %v9553_v43, %v9552_v36  ;;  %v5262_v12 = vpop.eup %5261  ;;  %v7060_v56 = vmul.f32 0.5, %v1630_v17  ;;  %v1634_v41 = vadd.f32 %v6836_v58, %v6551_v59  ;;  %v7076_v17 = vpop.f32.mrb[37].mxu0 }
 0x205   :  { %v1103_v6 = vmul.f32 %v6544_v50, %v1032_v1  ;;  %v1987_v32 = vadd.f32 %v6838_v22, %v6561_v51  ;;  %v7070_v50 = vmul.f32 0.5, %v1983_v10  ;;  %v7078_v40 = vpop.f32.mrb[37].mxu1  ;;  %v7081_v22 = vmul.f32 %v3054_v48, %v6979_v27  ;;  %v7088_v13 = vpop.f32.mrb[38].mxu0 }
 0x206   :  { %v1173_v1 = vadd.f32 %v6557_v4, %v1102_v15  ;;  %9556 = vst [vmem:[#allocation16_spill] sm:$0xff] %v7078_v40  ;;  %v5264_v58 = vpop.eup %5263  ;;  %v3057_v26 = vadd.f32 1.0, %v5262_v12  ;;  %v2551_v42 = vmul.f32 0.70710677, %v1634_v41  ;;  %v7084_v43 = vmul.f32 %v3055_v54, %v6985_v52  ;;  %v7090_v25 = vpop.f32.mrb[38].mxu1 }
 0x207   :  { %v1174_v5 = vadd.f32 %v6557_v4, %v1103_v6  ;;  %v2553_v36 = vmul.f32 0.70710677, %v1987_v32  ;;  %v5266_v10 = vpop.eup %5265  ;;  %v3056_v15 = vadd.f32 1.0, %v5264_v58  ;;  %v7086_v6 = vmul.f32 0.5, %v1634_v41  ;;  %v7094_v12 = vpop.f32.mrb[39].mxu0 }
 0x208   :  { %9557 = vst [vmem:[#allocation17_spill] sm:$0xff] %v7084_v43  ;;  %v3058_v63 = vadd.f32 1.0, %v5266_v10  ;;  %5275 = verf.f32 %v2551_v42  ;;  %v2552_v40 = vmul.f32 0.70710677, %v1636_v7  ;;  %v1989_v27 = vadd.f32 %v6844_v37, %v6569_v16  ;;  %v7096_v48 = vpop.f32.mrb[39].mxu1 }
 0x209   :  { %v1206_v4 = vpack.c.bf16 %v1174_v5, %v1173_v1  ;;  %v5268_v52 = vpop.eup %5267  ;;  %v7098_v54 = vmul.f32 0.5, %v1987_v32  ;;  %5277 = verf.f32 %v2553_v36  ;;  %v1638_v41 = vadd.f32 %v6854_v31, %v6551_v59 }
 0x20a   :  { %v1991_v1 = vadd.f32 %v6856_v46, %v6561_v51  ;;  %v5270_v5 = vpop.eup %5269  ;;  %v7105_v58 = vmul.f32 %v3057_v26, %v6989_v60  ;;  %v3059_v37 = vadd.f32 1.0, %v5268_v52  ;;  %v7107_v42 = vmul.f32 0.5, %v1636_v7 }
 0x20b   :  { %1892 = vmatmul.mubr.bf16.gmra.mrb[124].mxu0 %v1206_v4  ;;  %2245 = vmatmul.mubr.bf16.gmra.mrb[124].mxu1 %v1206_v4  ;;  %5279 = verf.f32 %v2552_v40  ;;  %v7110_v32 = vmul.f32 %v3056_v15, %v6999_v55  ;;  %v3061_v36 = vadd.f32 1.0, %v5270_v5  ;;  %v2554_v10 = vmul.f32 0.70710677, %v1989_v27  ;;  %v7121_v7 = vpop.f32.mrb[40].mxu1 }
 0x20c   :  { %9558 = vst [vmem:[#allocation29_spill] sm:$0xff] %v7105_v58  ;;  %4015 = vmatprep.mubr.bf16.mxu0 %v3600_v0  ;;  %4304 = vmatprep.mubr.bf16.mxu1 %v3602_v11  ;;  %v2555_v4 = vmul.f32 0.70710677, %v1638_v41  ;;  %v5272_v31 = vpop.eup %5271  ;;  %v7113_v43 = vmul.f32 %v3058_v63, %v7019_v23  ;;  %v7115_v46 = vmul.f32 0.5, %v1989_v27  ;;  %v2557_v60 = vmul.f32 0.70710677, %v1991_v1 }
 0x20d   :  { %v1640_v0 = vadd.f32 %v6864_v29, %v6566_v3  ;;  %v7119_v11 = vpop.f32.mrb[40].mxu0  ;;  %9560 = vst [vmem:[#allocation25_spill] sm:$0xff] %v7121_v7  ;;  %v5274_v40 = vpop.eup %5273  ;;  %v7124_v55 = vmul.f32 %v3059_v37, %v7030_v24  ;;  %5281 = verf.f32 %v2554_v10  ;;  %v7126_v26 = vmul.f32 0.5, %v1638_v41  ;;  %v9561_v23 = vld [vmem:[#allocation33_spill] sm:$0xff] }
 0x20e   :  { %9559 = vst [vmem:[#allocation21_spill] sm:$0xff] %v7119_v11  ;;  %v1993_v15 = vadd.f32 %v9561_v23, %v6569_v16  ;;  %v7130_v63 = vpop.f32.mrb[41].mxu0  ;;  %v7132_v27 = vpop.f32.mrb[41].mxu1  ;;  %v3060_v52 = vadd.f32 1.0, %v5272_v31  ;;  %v3062_v29 = vadd.f32 1.0, %v5274_v40  ;;  %5283 = verf.f32 %v2555_v4  ;;  %v9569_v4 = vld [vmem:[#allocation30_spill] sm:$0xff] }
 0x20f   :  { %9562 = vst [vmem:[#allocation24_spill] sm:$0xff] %v7130_v63  ;;  %9563 = vst [vmem:[#allocation26_spill] sm:$0xff] %v7132_v27  ;;  %v2556_v5 = vmul.f32 0.70710677, %v1640_v0  ;;  %v7134_v11 = vpop.f32.mrb[42].mxu0  ;;  %v7136_v7 = vpop.f32.mrb[42].mxu1  ;;  %v7139_v24 = vmul.f32 %v3061_v36, %v7045_v62  ;;  %5285 = verf.f32 %v2557_v60 }
 0x210   :  { %9564 = vst [vmem:[#allocation33_spill] sm:$0xff] %v7134_v11  ;;  %9565 = vst [vmem:[#allocation53_spill] sm:$0xff] %v7136_v7  ;;  %v7141_v41 = vmul.f32 0.5, %v1991_v1  ;;  %v2558_v37 = vmul.f32 0.70710677, %v1993_v15  ;;  %v7143_v10 = vpop.f32.mrb[43].mxu0 }
 0x211   :  { %9566 = vst [vmem:[#allocation54_spill] sm:$0xff] %v7139_v24  ;;  %9567 = vst [vmem:[#allocation55_spill] sm:$0xff] %v7143_v10  ;;  %v7145_v23 = vpop.f32.mrb[43].mxu1  ;;  %v7147_v27 = vmul.f32 0.5, %v1640_v0  ;;  %5287 = verf.f32 %v2556_v5  ;;  %v9570_v31 = vld [vmem:[#allocation35_spill] sm:$0xff]  ;;  %v9572_v62 = vld [vmem:[#allocation22_spill] sm:$0xff]  ;;  %v1644_v0 = vadd.f32 %v6889_v49, %v6551_v59  ;;  %v1997_v5 = vadd.f32 %v6891_v9, %v6561_v51 }
 0x212   :  { %9568 = vst [vmem:[#allocation56_spill] sm:$0xff] %v7145_v23  ;;  %v3604_v40 = vpack.c.bf16 %v9570_v31, %v9569_v4  ;;  %v9571_v11 = vld [vmem:[#allocation31_spill] sm:$0xff]  ;;  %5289 = verf.f32 %v2558_v37  ;;  %v9576_v63 = vld [vmem:[#allocation20_spill] sm:$0xff]  ;;  %v1646_v4 = vadd.f32 %v6900_v33, %v6566_v3  ;;  %v5276_v31 = vpop.eup %5275  ;;  %v7171_v37 = vmul.f32 0.5, %v1993_v15 }
 0x213   :  { %v3606_v7 = vpack.c.bf16 %v6881_v61, %v9571_v11  ;;  %v9573_v36 = vld [vmem:[#allocation19_spill] sm:$0xff]  ;;  %v7166_v61 = vmul.f32 %v3060_v52, %v7060_v56  ;;  %v7169_v11 = vmul.f32 %v3062_v29, %v7070_v50  ;;  %v1999_v49 = vadd.f32 %v6902_v2, %v6569_v16 }
 0x214   :  { %v9574_v1 = vpack.c.bf16 %v9572_v62, %v9573_v36  ;;  %v9575_v60 = vld [vmem:[#allocation23_spill] sm:$0xff]  ;;  %v2559_v9 = vmul.f32 0.70710677, %v1644_v0  ;;  %v9578_v62 = vld [vmem:[#allocation37_spill] sm:$0xff]  ;;  %v9579_v36 = vld [vmem:[#allocation38_spill] sm:$0xff]  ;;  %v7179_v50 = vmul.f32 0.5, %v1644_v0 }
 0x215   :  { %v9577_v24 = vpack.c.bf16 %v9575_v60, %v9576_v63  ;;  %v5278_v63 = vpop.eup %5277  ;;  %v1648_v33 = vadd.f32 %v9578_v62, %v6551_v59  ;;  %v2001_v56 = vadd.f32 %v9579_v36, %v6561_v51  ;;  %v2561_v15 = vmul.f32 0.70710677, %v1997_v5  ;;  %v7188_v60 = vpop.f32.mrb[44].mxu0 }
 0x216   :  { %4016 = vmatmul.mubr.bf16.vlgmr.msra.gmra.mrb[128].mxu0 %v9574_v1  ;;  %v5280_v52 = vpop.eup %5279  ;;  %v3065_v1 = vadd.f32 1.0, %v5278_v63  ;;  %v2560_v29 = vmul.f32 0.70710677, %v1646_v4  ;;  %5291 = verf.f32 %v2559_v9  ;;  %v7184_v2 = vmul.f32 0.5, %v1997_v5  ;;  %9581 = vst [vmem:[#allocation35_spill] sm:$0xff] %v7188_v60  ;;  %v7194_v63 = vpop.f32.mrb[45].mxu0 }
 0x217   :  { %4305 = vmatmul.mubr.bf16.vlgmr.msra.gmra.mrb[128].mxu1 %v9577_v24  ;;  %4023 = vmatprep.mubr.bf16.mxu0 %v3604_v40  ;;  %v3063_v24 = vadd.f32 1.0, %v5276_v31  ;;  %v7186_v40 = vmul.f32 0.5, %v1646_v4  ;;  %v7190_v31 = vpop.f32.mrb[44].mxu1  ;;  %v3064_v62 = vadd.f32 1.0, %v5280_v52  ;;  %5293 = verf.f32 %v2561_v15  ;;  %9583 = vst [vmem:[#allocation22_spill] sm:$0xff] %v7194_v63  ;;  %v7203_v9 = vpop.f32.mrb[46].mxu0 }
 0x218   :  { %4312 = vmatprep.mubr.bf16.mxu1 %v3606_v7  ;;  %9582 = vst [vmem:[#allocation31_spill] sm:$0xff] %v7190_v31  ;;  %v7192_v36 = vmul.f32 0.5, %v1999_v49  ;;  %v2562_v0 = vmul.f32 0.70710677, %v1999_v49  ;;  %v7196_v23 = vpop.f32.mrb[45].mxu1  ;;  %5295 = verf.f32 %v2560_v29  ;;  %v7201_v5 = vmul.f32 0.5, %v1648_v33 }
 0x219   :  { %v7182_v7 = vmul.f32 %v3063_v24, %v7086_v6  ;;  %9584 = vst [vmem:[#allocation19_spill] sm:$0xff] %v7196_v23  ;;  %v5282_v6 = vpop.eup %5281  ;;  %v7199_v24 = vmul.f32 %v3065_v1, %v7098_v54  ;;  %v2563_v4 = vmul.f32 0.70710677, %v1648_v33  ;;  %9586 = vst [vmem:[#allocation20_spill] sm:$0xff] %v7203_v9  ;;  %v7205_v31 = vpop.f32.mrb[46].mxu1  ;;  %v9588_v63 = vld [vmem:[#allocation40_spill] sm:$0xff] }
 0x21a   :  { %9587 = vst [vmem:[#allocation37_spill] sm:$0xff] %v7205_v31  ;;  %v5284_v52 = vpop.eup %5283  ;;  %v3066_v15 = vadd.f32 1.0, %v5282_v6  ;;  %5297 = verf.f32 %v2562_v0  ;;  %v2565_v49 = vmul.f32 0.70710677, %v2001_v56  ;;  %v1650_v60 = vadd.f32 %v9588_v63, %v6566_v3  ;;  %v7209_v23 = vpop.f32.mrb[47].mxu0  ;;  %v9591_v33 = vld [vmem:[#allocation41_spill] sm:$0xff] }
 0x21b   :  { %9580 = vst [vmem:[#allocation30_spill] sm:$0xff] %v7182_v7  ;;  %9585 = vst [vmem:[#allocation23_spill] sm:$0xff] %v7199_v24  ;;  %v7211_v7 = vpop.f32.mrb[47].mxu1  ;;  %v5286_v54 = vpop.eup %5285  ;;  %v3067_v1 = vadd.f32 1.0, %v5284_v52  ;;  %5299 = verf.f32 %v2563_v4  ;;  %v2003_v29 = vadd.f32 %v9591_v33, %v6569_v16  ;;  %v9592_v9 = vld [vmem:[#allocation27_spill] sm:$0xff]  ;;  %v9593_v24 = vld [vmem:[#allocation32_spill] sm:$0xff]  ;;  %v7218_v0 = vmul.f32 %v3064_v62, %v7107_v42 }
 0x21c   :  { %9589 = vst [vmem:[#allocation38_spill] sm:$0xff] %v7209_v23  ;;  %9590 = vst [vmem:[#allocation40_spill] sm:$0xff] %v7211_v7  ;;  %v3603_v31 = vpack.c.bf16 %v9593_v24, %v9592_v9  ;;  %v5288_v10 = vpop.eup %5287  ;;  %v3069_v6 = vadd.f32 1.0, %v5286_v54  ;;  %v7220_v58 = vmul.f32 0.5, %v2001_v56  ;;  %5301 = verf.f32 %v2565_v49  ;;  %v9594_v42 = vld [vmem:[#allocation28_spill] sm:$0xff]  ;;  %v9595_v62 = vld [vmem:[#allocation34_spill] sm:$0xff] }
 0x21d   :  { %v5290_v63 = vpop.eup %5289  ;;  %v7223_v7 = vmul.f32 %v3066_v15, %v7115_v46  ;;  %v3068_v52 = vadd.f32 1.0, %v5288_v10  ;;  %v7225_v4 = vmul.f32 0.5, %v1650_v60  ;;  %v2564_v23 = vmul.f32 0.70710677, %v1650_v60  ;;  %v7232_v56 = vpop.f32.mrb[48].mxu0 }
 0x21e   :  { %4024 = vmatmul.mubr.bf16.gmra.mrb[132].mxu0 %v3603_v31  ;;  %v7228_v33 = vmul.f32 %v3067_v1, %v7126_v26  ;;  %v3070_v24 = vadd.f32 1.0, %v5290_v63  ;;  %v2566_v9 = vmul.f32 0.70710677, %v2003_v29  ;;  %v3605_v54 = vpack.c.bf16 %v9595_v62, %v9594_v42  ;;  %v7234_v49 = vpop.f32.mrb[48].mxu1  ;;  %v7243_v60 = vpop.f32.mrb[49].mxu0 }
 0x21f   :  { %v7237_v46 = vmul.f32 %v3069_v6, %v7141_v41  ;;  %5303 = verf.f32 %v2564_v23  ;;  %v3608_v10 = vpack.c.bf16 %v6966_v21, %v6922_v47  ;;  %v3610_v26 = vpack.c.bf16 %v6969_v45, %v6929_v20  ;;  %9596 = vst [vmem:[#allocation41_spill] sm:$0xff] %v7243_v60  ;;  %v7245_v31 = vpop.f32.mrb[49].mxu1  ;;  %v7254_v1 = vpop.f32.mrb[50].mxu0 }
 0x220   :  { %9597 = vst [vmem:[#allocation27_spill] sm:$0xff] %v7245_v31  ;;  %v7248_v15 = vmul.f32 %v3068_v52, %v7147_v27  ;;  %5305 = verf.f32 %v2566_v9  ;;  %4313 = vmatmul.mubr.bf16.gmra.mrb[132].mxu1 %v3605_v54  ;;  %v1654_v41 = vadd.f32 %v6952_v39, %v6551_v59  ;;  %v2007_v23 = vadd.f32 %v6954_v8, %v6561_v51  ;;  %v7256_v47 = vpop.f32.mrb[50].mxu1  ;;  %v5292_v20 = vpop.eup %5291 }
 0x221   :  { %9598 = vst [vmem:[#allocation32_spill] sm:$0xff] %v7254_v1  ;;  %9599 = vst [vmem:[#allocation28_spill] sm:$0xff] %v7256_v47  ;;  %v7259_v21 = vmul.f32 %v3070_v24, %v7171_v37  ;;  %v7261_v45 = vmul.f32 0.5, %v2003_v29  ;;  %4031 = vmatprep.mubr.bf16.mxu0 %v3608_v10  ;;  %4320 = vmatprep.mubr.bf16.mxu1 %v3610_v26  ;;  %v1656_v27 = vadd.f32 %v6961_v57, %v6566_v3  ;;  %v7267_v6 = vpop.f32.mrb[51].mxu0  ;;  %v7269_v8 = vpop.f32.mrb[51].mxu1 }
 0x222   :  { %v2009_v39 = vadd.f32 %v6963_v38, %v6569_v16  ;;  %9600 = vst [vmem:[#allocation34_spill] sm:$0xff] %v7267_v6  ;;  %9601 = vst [vmem:[#allocation57_spill] sm:$0xff] %v7269_v8  ;;  %v5294_v63 = vpop.eup %5293  ;;  %v3071_v52 = vadd.f32 1.0, %v5292_v20  ;;  %v7271_v9 = vmul.f32 0.5, %v1654_v41  ;;  %v2567_v37 = vmul.f32 0.70710677, %v1654_v41 }
 0x223   :  { %v1658_v29 = vadd.f32 %v6971_v18, %v6551_v59  ;;  %v5296_v24 = vpop.eup %5295  ;;  %v3073_v42 = vadd.f32 1.0, %v5294_v63  ;;  %v7275_v62 = vmul.f32 0.5, %v2007_v23  ;;  %v2569_v57 = vmul.f32 0.70710677, %v2007_v23 }
 0x224   :  { %v2568_v54 = vmul.f32 0.70710677, %v1656_v27  ;;  %v5298_v10 = vpop.eup %5297  ;;  %v7278_v38 = vmul.f32 %v3071_v52, %v7179_v50  ;;  %v3072_v26 = vadd.f32 1.0, %v5296_v24  ;;  %5307 = verf.f32 %v2567_v37  ;;  %v7290_v50 = vpop.f32.mrb[52].mxu0 }
 0x225   :  { %v7280_v8 = vmul.f32 0.5, %v1656_v27  ;;  %v5300_v20 = vpop.eup %5299  ;;  %v3074_v6 = vadd.f32 1.0, %v5298_v10  ;;  %5309 = verf.f32 %v2569_v57  ;;  %v7282_v41 = vmul.f32 0.5, %v2009_v39  ;;  %9602 = vst [vmem:[#allocation58_spill] sm:$0xff] %v7290_v50  ;;  %v7292_v52 = vpop.f32.mrb[52].mxu1 }
 0x226   :  { %v2570_v18 = vmul.f32 0.70710677, %v2009_v39  ;;  %v5302_v47 = vpop.eup %5301  ;;  %v7285_v63 = vmul.f32 %v3073_v42, %v7184_v2  ;;  %v7288_v23 = vmul.f32 %v3072_v26, %v7186_v40  ;;  %v3075_v1 = vadd.f32 1.0, %v5300_v20  ;;  %9603 = vst [vmem:[#allocation59_spill] sm:$0xff] %v7292_v52  ;;  %v7296_v57 = vpop.f32.mrb[53].mxu0  ;;  %v9606_v40 = vld [vmem:[#allocation14_spill] sm:$0xff] }
 0x227   :  { %5311 = verf.f32 %v2568_v54  ;;  %v3077_v27 = vadd.f32 1.0, %v5302_v47  ;;  %v7294_v37 = vmul.f32 0.5, %v1658_v29  ;;  %v2571_v24 = vmul.f32 0.70710677, %v1658_v29  ;;  %9604 = vst [vmem:[#allocation60_spill] sm:$0xff] %v7296_v57  ;;  %v7298_v39 = vpop.f32.mrb[53].mxu1 }
 0x228   :  { %5313 = verf.f32 %v2570_v18  ;;  %9605 = vst [vmem:[#allocation61_spill] sm:$0xff] %v7298_v39  ;;  %v7301_v2 = vmul.f32 %v3074_v6, %v7192_v36  ;;  %v2011_v42 = vadd.f32 %v9606_v40, %v6561_v51  ;;  %v9607_v54 = vld [vmem:[#allocation43_spill] sm:$0xff]  ;;  %v2013_v47 = vadd.f32 %v6983_v53, %v6569_v16  ;;  %v7309_v26 = vpop.f32.mrb[54].mxu0  ;;  %v7311_v20 = vpop.f32.mrb[54].mxu1  ;;  %v9610_v36 = vld [vmem:[#allocation36_spill] sm:$0xff]  ;;  %v9611_v6 = vld [vmem:[#allocation42_spill] sm:$0xff] }
 0x229   :  { %v1660_v10 = vadd.f32 %v9607_v54, %v6566_v3  ;;  %9608 = vst [vmem:[#allocation14_spill] sm:$0xff] %v7309_v26  ;;  %9609 = vst [vmem:[#allocation43_spill] sm:$0xff] %v7311_v20  ;;  %v5304_v29 = vpop.eup %5303  ;;  %v7314_v18 = vmul.f32 %v3075_v1, %v7201_v5  ;;  %5315 = verf.f32 %v2571_v24  ;;  %v3607_v39 = vpack.c.bf16 %v9611_v6, %v9610_v36  ;;  %v9612_v57 = vld [vmem:[#allocation39_spill] sm:$0xff]  ;;  %v7320_v50 = vpop.f32.mrb[55].mxu0 }
 0x22a   :  { %v9613_v40 = vld [vmem:[#allocation15_spill] sm:$0xff]  ;;  %9614 = vst [vmem:[#allocation36_spill] sm:$0xff] %v7320_v50  ;;  %v7322_v54 = vpop.f32.mrb[55].mxu1  ;;  %v5306_v53 = vpop.eup %5305  ;;  %v7325_v26 = vmul.f32 %v3077_v27, %v7220_v58  ;;  %v3076_v20 = vadd.f32 1.0, %v5304_v29  ;;  %v7327_v31 = vmul.f32 0.5, %v2011_v42  ;;  %v3612_v6 = vpack.c.bf16 %v7058_v44, %v7010_v14  ;;  %v9616_v14 = vld [vmem:[#allocation46_spill] sm:$0xff] }
 0x22b   :  { %v3609_v52 = vpack.c.bf16 %v9613_v40, %v9612_v57  ;;  %9615 = vst [vmem:[#allocation42_spill] sm:$0xff] %v7322_v54  ;;  %v2573_v5 = vmul.f32 0.70710677, %v2011_v42  ;;  %v3078_v1 = vadd.f32 1.0, %v5306_v53  ;;  %v7329_v24 = vmul.f32 0.5, %v1660_v10  ;;  %4032 = vmatmul.mubr.bf16.gmra.mrb[136].mxu0 %v3607_v39  ;;  %v9617_v44 = vld [vmem:[#allocation47_spill] sm:$0xff] }
 0x22c   :  { %v2572_v60 = vmul.f32 0.70710677, %v1660_v10  ;;  %v2574_v36 = vmul.f32 0.70710677, %v2013_v47  ;;  %v7331_v57 = vmul.f32 0.5, %v2013_v47  ;;  %v3614_v58 = vpack.c.bf16 %v7081_v22, %v7017_v34  ;;  %4039 = vmatprep.mubr.bf16.mxu0 %v3612_v6 }
 0x22d   :  { %4321 = vmatmul.mubr.bf16.gmra.mrb[136].mxu1 %v3609_v52  ;;  %5317 = verf.f32 %v2573_v5  ;;  %v7338_v27 = vmul.f32 %v3076_v20, %v7225_v4  ;;  %v1664_v42 = vadd.f32 %v7005_v30, %v6551_v59  ;;  %v2017_v39 = vadd.f32 %v7007_v28, %v6561_v51  ;;  %v7351_v4 = vpop.f32.mrb[56].mxu0 }
 0x22e   :  { %5319 = verf.f32 %v2572_v60  ;;  %v5308_v52 = vpop.eup %5307  ;;  %v7345_v10 = vmul.f32 %v3078_v1, %v7261_v45  ;;  %4328 = vmatprep.mubr.bf16.mxu1 %v3614_v58  ;;  %v1666_v34 = vadd.f32 %v9616_v14, %v6566_v3  ;;  %v2019_v22 = vadd.f32 %v9617_v44, %v6569_v16  ;;  %9618 = vst [vmem:[#allocation39_spill] sm:$0xff] %v7351_v4  ;;  %v7353_v60 = vpop.f32.mrb[56].mxu1  ;;  %v9620_v45 = vld [vmem:[#allocation48_spill] sm:$0xff] }
 0x22f   :  { %5321 = verf.f32 %v2574_v36  ;;  %9619 = vst [vmem:[#allocation15_spill] sm:$0xff] %v7353_v60  ;;  %v5310_v30 = vpop.eup %5309  ;;  %v3079_v47 = vadd.f32 1.0, %v5308_v52  ;;  %v7355_v28 = vmul.f32 0.5, %v1664_v42  ;;  %v2575_v20 = vmul.f32 0.70710677, %v1664_v42  ;;  %v7359_v40 = vpop.f32.mrb[57].mxu0 }
 0x230   :  { %v1668_v29 = vadd.f32 %v9620_v45, %v6551_v59  ;;  %9621 = vst [vmem:[#allocation46_spill] sm:$0xff] %v7359_v40  ;;  %v3081_v5 = vadd.f32 1.0, %v5310_v30  ;;  %v7361_v1 = vmul.f32 0.5, %v2017_v39  ;;  %v2577_v36 = vmul.f32 0.70710677, %v2017_v39  ;;  %v7368_v42 = vpop.f32.mrb[57].mxu1 }
 0x231   :  { %v5312_v53 = vpop.eup %5311  ;;  %v2576_v6 = vmul.f32 0.70710677, %v1666_v34  ;;  %v7364_v14 = vmul.f32 %v3079_v47, %v7271_v9  ;;  %5323 = verf.f32 %v2575_v20  ;;  %v7366_v52 = vmul.f32 0.5, %v1666_v34  ;;  %9622 = vst [vmem:[#allocation47_spill] sm:$0xff] %v7368_v42  ;;  %v7370_v60 = vpop.f32.mrb[58].mxu0 }
 0x232   :  { %v5314_v58 = vpop.eup %5313  ;;  %v3080_v44 = vadd.f32 1.0, %v5312_v53  ;;  %9623 = vst [vmem:[#allocation48_spill] sm:$0xff] %v7370_v60  ;;  %5325 = verf.f32 %v2577_v36  ;;  %v7372_v40 = vmul.f32 0.5, %v2019_v22  ;;  %v2578_v30 = vmul.f32 0.70710677, %v2019_v22  ;;  %v7374_v4 = vpop.f32.mrb[58].mxu1 }
 0x233   :  { %v3082_v45 = vadd.f32 1.0, %v5314_v58  ;;  %9624 = vst [vmem:[#allocation62_spill] sm:$0xff] %v7374_v4  ;;  %v7376_v39 = vpop.f32.mrb[59].mxu0  ;;  %v5316_v54 = vpop.eup %5315  ;;  %v7379_v9 = vmul.f32 %v3081_v5, %v7275_v62  ;;  %5327 = verf.f32 %v2576_v6  ;;  %v2579_v47 = vmul.f32 0.70710677, %v1668_v29  ;;  %v9628_v22 = vld [vmem:[#allocation49_spill] sm:$0xff] }
 0x234   :  { %9625 = vst [vmem:[#allocation63_spill] sm:$0xff] %v7376_v39  ;;  %v7382_v34 = vmul.f32 %v3080_v44, %v7280_v8  ;;  %v7384_v20 = vpop.f32.mrb[59].mxu1  ;;  %v3083_v53 = vadd.f32 1.0, %v5316_v54  ;;  %5329 = verf.f32 %v2578_v30  ;;  %v7386_v36 = vmul.f32 0.5, %v1668_v29  ;;  %v9629_v39 = vld [vmem:[#allocation51_spill] sm:$0xff]  ;;  %v9630_v62 = vld [vmem:[#allocation52_spill] sm:$0xff] }
 0x235   :  { %9626 = vst [vmem:[#allocation64_spill] sm:$0xff] %v7379_v9  ;;  %9627 = vst [vmem:[#allocation65_spill] sm:$0xff] %v7384_v20  ;;  %v2021_v58 = vadd.f32 %v9628_v22, %v6561_v51  ;;  %5331 = verf.f32 %v2579_v47  ;;  %v1670_v4 = vadd.f32 %v9629_v39, %v6566_v3  ;;  %v2023_v5 = vadd.f32 %v9630_v62, %v6569_v16  ;;  %v9631_v8 = vld [vmem:[#allocation44_spill] sm:$0xff]  ;;  %v9632_v44 = vld [vmem:[#allocation50_spill] sm:$0xff]  ;;  %v7404_v42 = vpop.f32.mrb[60].mxu0  ;;  %v7406_v39 = vpop.f32.mrb[60].mxu1 }
 0x236   :  { %v3611_v6 = vpack.c.bf16 %v9632_v44, %v9631_v8  ;;  %v7397_v20 = vmul.f32 %v3082_v45, %v7282_v41  ;;  %v7400_v54 = vmul.f32 %v3083_v53, %v7294_v37  ;;  %v9633_v30 = vld [vmem:[#allocation45_spill] sm:$0xff]  ;;  %v9634_v22 = vld [vmem:[#allocation18_spill] sm:$0xff]  ;;  %9635 = vst [vmem:[#allocation49_spill] sm:$0xff] %v7406_v39  ;;  %v7412_v41 = vpop.f32.mrb[61].mxu0 }
 0x237   :  { %v5318_v60 = vpop.eup %5317  ;;  %v2581_v29 = vmul.f32 0.70710677, %v2021_v58  ;;  %v3613_v47 = vpack.c.bf16 %v9634_v22, %v9633_v30  ;;  %v7408_v9 = vmul.f32 0.5, %v2021_v58  ;;  %v7410_v8 = vmul.f32 0.5, %v1670_v4  ;;  %9636 = vst [vmem:[#allocation51_spill] sm:$0xff] %v7412_v41  ;;  %v7416_v22 = vpop.f32.mrb[61].mxu1 }
 0x238   :  { %v5320_v50 = vpop.eup %5319  ;;  %v3085_v62 = vadd.f32 1.0, %v5318_v60  ;;  %v2580_v44 = vmul.f32 0.70710677, %v1670_v4  ;;  %4040 = vmatmul.mubr.bf16.gmra.mrb[140].mxu0 %v3611_v6  ;;  %v2582_v53 = vmul.f32 0.70710677, %v2023_v5  ;;  %v3616_v30 = vpack.c.bf16 %v7166_v61, %v7110_v32  ;;  %9637 = vst [vmem:[#allocation52_spill] sm:$0xff] %v7416_v22 }
 0x239   :  { %v5322_v37 = vpop.eup %5321  ;;  %v3084_v45 = vadd.f32 1.0, %v5320_v50  ;;  %5333 = verf.f32 %v2581_v29  ;;  %4329 = vmatmul.mubr.bf16.gmra.mrb[140].mxu1 %v3613_v47  ;;  %v7418_v39 = vpop.f32.mrb[62].mxu0  ;;  %v7420_v58 = vmul.f32 0.5, %v2023_v5  ;;  %v3618_v4 = vpack.c.bf16 %v7169_v11, %v7113_v43 }
 0x23a   :  { %9638 = vst [vmem:[#allocation44_spill] sm:$0xff] %v7418_v39  ;;  %v3086_v60 = vadd.f32 1.0, %v5322_v37  ;;  %5335 = verf.f32 %v2580_v44  ;;  %v7424_v6 = vpop.f32.mrb[62].mxu1  ;;  %v7426_v50 = vpop.f32.mrb[63].mxu0  ;;  %v7429_v29 = vmul.f32 %v3085_v62, %v7327_v31  ;;  %4047 = vmatprep.mubr.bf16.mxu0 %v3616_v30  ;;  %v1674_v32 = vadd.f32 %v7066_v35, %v6551_v59  ;;  %v9642_v62 = vld [vmem:[#allocation16_spill] sm:$0xff] }
 0x23b   :  { %9639 = vst [vmem:[#allocation50_spill] sm:$0xff] %v7424_v6  ;;  %9640 = vst [vmem:[#allocation45_spill] sm:$0xff] %v7426_v50  ;;  %5337 = verf.f32 %v2582_v53  ;;  %v2027_v61 = vadd.f32 %v7068_v19, %v6561_v51  ;;  %v7435_v5 = vpop.f32.mrb[63].mxu1  ;;  %v5324_v47 = vpop.eup %5323  ;;  %v7438_v43 = vmul.f32 %v3084_v45, %v7329_v24  ;;  %4336 = vmatprep.mubr.bf16.mxu1 %v3618_v4 }
 0x23c   :  { %9641 = vst [vmem:[#allocation18_spill] sm:$0xff] %v7435_v5  ;;  %v7441_v11 = vmul.f32 %v3086_v60, %v7331_v57  ;;  %v1676_v31 = vadd.f32 %v7076_v17, %v6566_v3  ;;  %v2029_v44 = vadd.f32 %v9642_v62, %v6569_v16  ;;  %v5326_v35 = vpop.eup %5325  ;;  %v3087_v37 = vadd.f32 1.0, %v5324_v47  ;;  %v7458_v47 = vpop.f32.mrb[64].mxu0 }
 0x23d   :  { %v7447_v53 = vmul.f32 0.5, %v1674_v32  ;;  %v2583_v19 = vmul.f32 0.70710677, %v1674_v32  ;;  %v1678_v30 = vadd.f32 %v7088_v13, %v6551_v59  ;;  %v5328_v24 = vpop.eup %5327  ;;  %v3089_v45 = vadd.f32 1.0, %v5326_v35  ;;  %9643 = vst [vmem:[#allocation16_spill] sm:$0xff] %v7458_v47  ;;  %v7460_v32 = vpop.f32.mrb[64].mxu1 }
 0x23e   :  { %v7451_v5 = vmul.f32 0.5, %v2027_v61  ;;  %v2585_v57 = vmul.f32 0.70710677, %v2027_v61  ;;  %v2584_v60 = vmul.f32 0.70710677, %v1676_v31  ;;  %v5330_v4 = vpop.eup %5329  ;;  %v7454_v17 = vmul.f32 %v3087_v37, %v7355_v28  ;;  %9644 = vst [vmem:[#allocation66_spill] sm:$0xff] %v7460_v32 }
 0x23f   :  { %v3088_v50 = vadd.f32 1.0, %v5328_v24  ;;  %5339 = verf.f32 %v2583_v19  ;;  %v7456_v62 = vmul.f32 0.5, %v1676_v31  ;;  %v5332_v6 = vpop.eup %5331  ;;  %v3090_v13 = vadd.f32 1.0, %v5330_v4  ;;  %v7464_v61 = vpop.f32.mrb[65].mxu0 }
 0x240   :  { %5341 = verf.f32 %v2585_v57  ;;  %v7462_v35 = vmul.f32 0.5, %v2029_v44  ;;  %v2586_v39 = vmul.f32 0.70710677, %v2029_v44  ;;  %9645 = vst [vmem:[#allocation67_spill] sm:$0xff] %v7464_v61  ;;  %v7466_v22 = vpop.f32.mrb[65].mxu1  ;;  %v7469_v28 = vmul.f32 %v3089_v45, %v7361_v1  ;;  %v7474_v19 = vpop.f32.mrb[66].mxu0 }
 0x241   :  { %9646 = vst [vmem:[#allocation68_spill] sm:$0xff] %v7466_v22  ;;  %v7472_v31 = vmul.f32 %v3088_v50, %v7366_v52  ;;  %v3091_v37 = vadd.f32 1.0, %v5332_v6  ;;  %5343 = verf.f32 %v2584_v60  ;;  %9647 = vst [vmem:[#allocation69_spill] sm:$0xff] %v7474_v19  ;;  %v7476_v24 = vpop.f32.mrb[66].mxu1  ;;  %v7478_v57 = vmul.f32 0.5, %v1678_v30  ;;  %v7482_v22 = vpop.f32.mrb[67].mxu0 }
 0x242   :  { %9648 = vst [vmem:[#allocation70_spill] sm:$0xff] %v7476_v24  ;;  %5345 = verf.f32 %v2586_v39  ;;  %v2587_v44 = vmul.f32 0.70710677, %v1678_v30  ;;  %v2031_v4 = vadd.f32 %v7090_v25, %v6561_v51  ;;  %9649 = vst [vmem:[#allocation71_spill] sm:$0xff] %v7482_v22  ;;  %v7484_v1 = vpop.f32.mrb[67].mxu1  ;;  %v7487_v52 = vmul.f32 %v3090_v13, %v7372_v40  ;;  %v9651_v50 = vld [vmem:[#allocation17_spill] sm:$0xff] }
 0x243   :  { %9650 = vst [vmem:[#allocation72_spill] sm:$0xff] %v7484_v1  ;;  %v5334_v45 = vpop.eup %5333  ;;  %v1680_v6 = vadd.f32 %v7094_v12, %v6566_v3  ;;  %v2033_v39 = vadd.f32 %v7096_v48, %v6569_v16  ;;  %v3615_v30 = vpack.c.bf16 %v7124_v55, %v9651_v50  ;;  %v7496_v25 = vmul.f32 %v3091_v37, %v7386_v36  ;;  %v9652_v37 = vld [vmem:[#allocation29_spill] sm:$0xff]  ;;  %v7512_v50 = vpop.f32.mrb[68].mxu0 }
 0x244   :  { %v5336_v60 = vpop.eup %5335  ;;  %v3093_v22 = vadd.f32 1.0, %v5334_v45  ;;  %5347 = verf.f32 %v2587_v44  ;;  %v2589_v1 = vmul.f32 0.70710677, %v2031_v4  ;;  %v7498_v40 = vmul.f32 0.5, %v2031_v4  ;;  %v9653_v44 = vld [vmem:[#allocation54_spill] sm:$0xff]  ;;  %9654 = vst [vmem:[#allocation17_spill] sm:$0xff] %v7512_v50 }
 0x245   :  { %v5338_v24 = vpop.eup %5337  ;;  %v3092_v19 = vadd.f32 1.0, %v5336_v60  ;;  %v7500_v13 = vmul.f32 0.5, %v1680_v6  ;;  %v2588_v12 = vmul.f32 0.70710677, %v1680_v6  ;;  %4048 = vmatmul.mubr.bf16.gmra.mrb[144].mxu0 %v3615_v30  ;;  %v2590_v55 = vmul.f32 0.70710677, %v2033_v39 }
 0x246   :  { %v7503_v48 = vmul.f32 %v3093_v22, %v7408_v9  ;;  %v3094_v61 = vadd.f32 1.0, %v5338_v24  ;;  %5349 = verf.f32 %v2589_v1  ;;  %v3617_v45 = vpack.c.bf16 %v9653_v44, %v9652_v37  ;;  %v7514_v6 = vpop.f32.mrb[68].mxu1  ;;  %v7523_v24 = vpop.f32.mrb[69].mxu0 }
 0x247   :  { %v7506_v36 = vmul.f32 %v3092_v19, %v7410_v8  ;;  %5351 = verf.f32 %v2588_v12  ;;  %v3620_v4 = vpack.c.bf16 %v7248_v15, %v7218_v0  ;;  %9655 = vst [vmem:[#allocation29_spill] sm:$0xff] %v7514_v6  ;;  %v3622_v22 = vpack.c.bf16 %v7259_v21, %v7223_v7  ;;  %v9656_v8 = vld [vmem:[#allocation21_spill] sm:$0xff]  ;;  %9657 = vst [vmem:[#allocation54_spill] sm:$0xff] %v7523_v24  ;;  %v7525_v1 = vpop.f32.mrb[69].mxu1  ;;  %v9661_v7 = vld [vmem:[#allocation26_spill] sm:$0xff]  ;;  %v7535_v12 = vpop.f32.mrb[70].mxu0 }
 0x248   :  { %v7517_v9 = vmul.f32 %v3094_v61, %v7420_v58  ;;  %5353 = verf.f32 %v2590_v55  ;;  %v1684_v19 = vadd.f32 %v9656_v8, %v6551_v59  ;;  %9658 = vst [vmem:[#allocation21_spill] sm:$0xff] %v7525_v1  ;;  %v7527_v0 = vmul.f32 0.5, %v2033_v39  ;;  %4337 = vmatmul.mubr.bf16.gmra.mrb[144].mxu1 %v3617_v45  ;;  %v9659_v15 = vld [vmem:[#allocation25_spill] sm:$0xff]  ;;  %v9660_v61 = vld [vmem:[#allocation24_spill] sm:$0xff]  ;;  %v7537_v55 = vpop.f32.mrb[70].mxu1 }
 0x249   :  { %v5340_v30 = vpop.eup %5339  ;;  %4055 = vmatprep.mubr.bf16.mxu0 %v3620_v4  ;;  %v2037_v58 = vadd.f32 %v9659_v15, %v6561_v51  ;;  %v1686_v60 = vadd.f32 %v9660_v61, %v6566_v3  ;;  %v2039_v21 = vadd.f32 %v9661_v7, %v6569_v16  ;;  %9662 = vst [vmem:[#allocation25_spill] sm:$0xff] %v7535_v12  ;;  %9663 = vst [vmem:[#allocation24_spill] sm:$0xff] %v7537_v55  ;;  %v9664_v4 = vld [vmem:[#allocation33_spill] sm:$0xff]  ;;  %v7543_v15 = vpop.f32.mrb[71].mxu0 }
 0x24a   :  { %v5342_v37 = vpop.eup %5341  ;;  %v3095_v44 = vadd.f32 1.0, %v5340_v30  ;;  %4344 = vmatprep.mubr.bf16.mxu1 %v3622_v22  ;;  %v7539_v39 = vmul.f32 0.5, %v1684_v19  ;;  %v2591_v45 = vmul.f32 0.70710677, %v1684_v19  ;;  %v1688_v8 = vadd.f32 %v9664_v4, %v6551_v59  ;;  %9665 = vst [vmem:[#allocation26_spill] sm:$0xff] %v7543_v15  ;;  %v7545_v1 = vpop.f32.mrb[71].mxu1 }
 0x24b   :  { %9666 = vst [vmem:[#allocation33_spill] sm:$0xff] %v7545_v1  ;;  %v5344_v61 = vpop.eup %5343  ;;  %v3097_v24 = vadd.f32 1.0, %v5342_v37  ;;  %v7547_v7 = vmul.f32 0.5, %v2037_v58  ;;  %v2593_v12 = vmul.f32 0.70710677, %v2037_v58  ;;  %v7549_v6 = vmul.f32 0.5, %v1686_v60 }
 0x24c   :  { %v5346_v55 = vpop.eup %5345  ;;  %v7552_v22 = vmul.f32 %v3095_v44, %v7447_v53  ;;  %v3096_v30 = vadd.f32 1.0, %v5344_v61  ;;  %5355 = verf.f32 %v2591_v45  ;;  %v2592_v19 = vmul.f32 0.70710677, %v1686_v60 }
 0x24d   :  { %v7555_v4 = vmul.f32 %v3097_v24, %v7451_v5  ;;  %v3098_v15 = vadd.f32 1.0, %v5346_v55  ;;  %5357 = verf.f32 %v2593_v12  ;;  %v7557_v1 = vmul.f32 0.5, %v2039_v21  ;;  %v9667_v5 = vld [vmem:[#allocation53_spill] sm:$0xff]  ;;  %v7569_v55 = vpop.f32.mrb[72].mxu0  ;;  %v7571_v12 = vpop.f32.mrb[72].mxu1 }
 0x24e   :  { %v5348_v37 = vpop.eup %5347  ;;  %v7560_v50 = vmul.f32 %v3096_v30, %v7456_v62  ;;  %5359 = verf.f32 %v2592_v19  ;;  %v2594_v58 = vmul.f32 0.70710677, %v2039_v21  ;;  %v7562_v32 = vmul.f32 0.5, %v1688_v8  ;;  %9668 = vst [vmem:[#allocation53_spill] sm:$0xff] %v7569_v55  ;;  %9669 = vst [vmem:[#allocation73_spill] sm:$0xff] %v7571_v12  ;;  %v9670_v62 = vld [vmem:[#allocation55_spill] sm:$0xff] }
 0x24f   :  { %v7565_v53 = vmul.f32 %v3098_v15, %v7462_v35  ;;  %v3099_v44 = vadd.f32 1.0, %v5348_v37  ;;  %v2595_v60 = vmul.f32 0.70710677, %v1688_v8  ;;  %v2041_v24 = vadd.f32 %v9667_v5, %v6561_v51  ;;  %v9671_v21 = vld [vmem:[#allocation56_spill] sm:$0xff]  ;;  %v9672_v19 = vld [vmem:[#allocation30_spill] sm:$0xff]  ;;  %v7579_v15 = vpop.f32.mrb[73].mxu0 }
 0x250   :  { %v5350_v45 = vpop.eup %5349  ;;  %5361 = verf.f32 %v2594_v58  ;;  %v1690_v61 = vadd.f32 %v9670_v62, %v6566_v3  ;;  %v2043_v30 = vadd.f32 %v9671_v21, %v6569_v16  ;;  %v3619_v35 = vpack.c.bf16 %v7228_v33, %v9672_v19  ;;  %9673 = vst [vmem:[#allocation55_spill] sm:$0xff] %v7579_v15  ;;  %v7581_v8 = vpop.f32.mrb[73].mxu1 }
 0x251   :  { %9674 = vst [vmem:[#allocation56_spill] sm:$0xff] %v7581_v8  ;;  %v5352_v37 = vpop.eup %5351  ;;  %v7584_v5 = vmul.f32 %v3099_v44, %v7478_v57  ;;  %v3101_v12 = vadd.f32 1.0, %v5350_v45  ;;  %5363 = verf.f32 %v2595_v60  ;;  %v7586_v58 = vmul.f32 0.5, %v2041_v24  ;;  %v7588_v55 = vpop.f32.mrb[74].mxu0 }
 0x252   :  { %9675 = vst [vmem:[#allocation30_spill] sm:$0xff] %v7588_v55  ;;  %v7590_v62 = vpop.f32.mrb[74].mxu1  ;;  %v5354_v21 = vpop.eup %5353  ;;  %v3100_v47 = vadd.f32 1.0, %v5352_v37  ;;  %v2597_v41 = vmul.f32 0.70710677, %v2041_v24  ;;  %v7592_v33 = vmul.f32 0.5, %v1690_v61  ;;  %4056 = vmatmul.mubr.bf16.gmra.mrb[148].mxu0 %v3619_v35 }
 0x253   :  { %9676 = vst [vmem:[#allocation74_spill] sm:$0xff] %v7590_v62  ;;  %v2596_v19 = vmul.f32 0.70710677, %v1690_v61  ;;  %v7595_v8 = vmul.f32 %v3101_v12, %v7498_v40  ;;  %v3102_v57 = vadd.f32 1.0, %v5354_v21  ;;  %v7597_v44 = vmul.f32 0.5, %v2043_v30  ;;  %v7599_v45 = vpop.f32.mrb[75].mxu0 }
 0x254   :  { %v2598_v60 = vmul.f32 0.70710677, %v2043_v30  ;;  %9677 = vst [vmem:[#allocation75_spill] sm:$0xff] %v7599_v45  ;;  %v7601_v15 = vpop.f32.mrb[75].mxu1  ;;  %v7604_v62 = vmul.f32 %v3100_v47, %v7500_v13  ;;  %5365 = verf.f32 %v2597_v41  ;;  %v9679_v24 = vld [vmem:[#allocation23_spill] sm:$0xff]  ;;  %v3624_v61 = vpack.c.bf16 %v7338_v27, %v7288_v23  ;;  %v9682_v47 = vld [vmem:[#allocation22_spill] sm:$0xff] }
 0x255   :  { %9678 = vst [vmem:[#allocation76_spill] sm:$0xff] %v7601_v15  ;;  %v3621_v37 = vpack.c.bf16 %v7237_v46, %v9679_v24  ;;  %v7611_v40 = vmul.f32 %v3102_v57, %v7527_v0  ;;  %5367 = verf.f32 %v2596_v19  ;;  %v3626_v12 = vpack.c.bf16 %v7345_v10, %v7301_v2  ;;  %v9680_v30 = vld [vmem:[#allocation35_spill] sm:$0xff]  ;;  %v9684_v57 = vld [vmem:[#allocation20_spill] sm:$0xff]  ;;  %v7627_v24 = vpop.f32.mrb[76].mxu0 }
 0x256   :  { %v1694_v35 = vadd.f32 %v9680_v30, %v6551_v59  ;;  %v5356_v21 = vpop.eup %5355  ;;  %5369 = verf.f32 %v2598_v60  ;;  %4063 = vmatprep.mubr.bf16.mxu0 %v3624_v61  ;;  %v9681_v41 = vld [vmem:[#allocation31_spill] sm:$0xff]  ;;  %v1696_v23 = vadd.f32 %v9682_v47, %v6566_v3  ;;  %v1698_v60 = vadd.f32 %v9684_v57, %v6551_v59  ;;  %9685 = vst [vmem:[#allocation23_spill] sm:$0xff] %v7627_v24 }
 0x257   :  { %4345 = vmatmul.mubr.bf16.gmra.mrb[148].mxu1 %v3621_v37  ;;  %v2047_v46 = vadd.f32 %v9681_v41, %v6561_v51  ;;  %v9683_v27 = vld [vmem:[#allocation19_spill] sm:$0xff]  ;;  %v5358_v0 = vpop.eup %5357  ;;  %v3103_v19 = vadd.f32 1.0, %v5356_v21  ;;  %v7629_v37 = vpop.f32.mrb[76].mxu1 }
 0x258   :  { %v2049_v13 = vadd.f32 %v9683_v27, %v6569_v16  ;;  %4352 = vmatprep.mubr.bf16.mxu1 %v3626_v12  ;;  %v7623_v2 = vmul.f32 0.5, %v1694_v35  ;;  %v2599_v10 = vmul.f32 0.70710677, %v1694_v35  ;;  %9686 = vst [vmem:[#allocation35_spill] sm:$0xff] %v7629_v37  ;;  %v5360_v61 = vpop.eup %5359  ;;  %v3105_v30 = vadd.f32 1.0, %v5358_v0  ;;  %v7635_v27 = vpop.f32.mrb[77].mxu0 }
 0x259   :  { %v7631_v41 = vmul.f32 0.5, %v2047_v46  ;;  %v2601_v47 = vmul.f32 0.70710677, %v2047_v46  ;;  %v7633_v15 = vmul.f32 0.5, %v1696_v23  ;;  %9687 = vst [vmem:[#allocation31_spill] sm:$0xff] %v7635_v27  ;;  %v7638_v12 = vmul.f32 %v3103_v19, %v7539_v39  ;;  %v7640_v57 = vpop.f32.mrb[77].mxu1 }
 0x25a   :  { %v3104_v35 = vadd.f32 1.0, %v5360_v61  ;;  %5371 = verf.f32 %v2599_v10  ;;  %v2600_v21 = vmul.f32 0.70710677, %v1696_v23  ;;  %9688 = vst [vmem:[#allocation22_spill] sm:$0xff] %v7640_v57  ;;  %v7642_v24 = vpop.f32.mrb[78].mxu0  ;;  %v5362_v37 = vpop.eup %5361  ;;  %v7645_v0 = vmul.f32 %v3105_v30, %v7547_v7 }
 0x25b   :  { %9689 = vst [vmem:[#allocation19_spill] sm:$0xff] %v7642_v24  ;;  %5373 = verf.f32 %v2601_v47  ;;  %v7647_v46 = vmul.f32 0.5, %v2049_v13  ;;  %v2602_v45 = vmul.f32 0.70710677, %v2049_v13  ;;  %v7649_v55 = vpop.f32.mrb[78].mxu1  ;;  %v7651_v27 = vpop.f32.mrb[79].mxu0 }
 0x25c   :  { %9690 = vst [vmem:[#allocation20_spill] sm:$0xff] %v7649_v55  ;;  %9691 = vst [vmem:[#allocation77_spill] sm:$0xff] %v7651_v27  ;;  %v5364_v39 = vpop.eup %5363  ;;  %v7654_v19 = vmul.f32 %v3104_v35, %v7549_v6  ;;  %v3106_v23 = vadd.f32 1.0, %v5362_v37  ;;  %5375 = verf.f32 %v2600_v21  ;;  %v7656_v10 = vmul.f32 0.5, %v1698_v60  ;;  %v7658_v61 = vpop.f32.mrb[79].mxu1  ;;  %v9693_v47 = vld [vmem:[#allocation37_spill] sm:$0xff] }
 0x25d   :  { %9692 = vst [vmem:[#allocation78_spill] sm:$0xff] %v7658_v61  ;;  %v3107_v7 = vadd.f32 1.0, %v5364_v39  ;;  %5377 = verf.f32 %v2602_v45  ;;  %v2603_v30 = vmul.f32 0.70710677, %v1698_v60  ;;  %v2051_v13 = vadd.f32 %v9693_v47, %v6561_v51  ;;  %v9694_v27 = vld [vmem:[#allocation38_spill] sm:$0xff]  ;;  %v9695_v6 = vld [vmem:[#allocation40_spill] sm:$0xff] }
 0x25e   :  { %v7663_v55 = vmul.f32 %v3106_v23, %v7557_v1  ;;  %v1700_v24 = vadd.f32 %v9694_v27, %v6566_v3  ;;  %v2053_v37 = vadd.f32 %v9695_v6, %v6569_v16  ;;  %v3623_v35 = vpack.c.bf16 %v7314_v18, %v7278_v38  ;;  %v5366_v21 = vpop.eup %5365  ;;  %v7680_v6 = vpop.f32.mrb[80].mxu0 }
 0x25f   :  { %v7672_v39 = vmul.f32 %v3107_v7, %v7562_v32  ;;  %5379 = verf.f32 %v2603_v30  ;;  %v7674_v45 = vmul.f32 0.5, %v2051_v13  ;;  %v2605_v60 = vmul.f32 0.70710677, %v2051_v13  ;;  %v5368_v47 = vpop.eup %5367  ;;  %9696 = vst [vmem:[#allocation37_spill] sm:$0xff] %v7680_v6  ;;  %v7684_v7 = vpop.f32.mrb[80].mxu1 }
 0x260   :  { %v3109_v1 = vadd.f32 1.0, %v5366_v21  ;;  %v7676_v23 = vmul.f32 0.5, %v1700_v24  ;;  %v2604_v61 = vmul.f32 0.70710677, %v1700_v24  ;;  %v7678_v27 = vmul.f32 0.5, %v2053_v37  ;;  %4064 = vmatmul.mubr.bf16.gmra.mrb[152].mxu0 %v3623_v35  ;;  %v5370_v57 = vpop.eup %5369  ;;  %9697 = vst [vmem:[#allocation38_spill] sm:$0xff] %v7684_v7 }
 0x261   :  { %v3108_v38 = vadd.f32 1.0, %v5368_v47  ;;  %5381 = verf.f32 %v2605_v60  ;;  %v2606_v18 = vmul.f32 0.70710677, %v2053_v37  ;;  %v3625_v32 = vpack.c.bf16 %v7325_v26, %v7285_v63  ;;  %v7686_v30 = vpop.f32.mrb[81].mxu0  ;;  %v7693_v21 = vpop.f32.mrb[81].mxu1  ;;  %v9703_v60 = vld [vmem:[#allocation27_spill] sm:$0xff] }
 0x262   :  { %9698 = vst [vmem:[#allocation40_spill] sm:$0xff] %v7686_v30  ;;  %v7689_v13 = vmul.f32 %v3109_v1, %v7586_v58  ;;  %v3110_v24 = vadd.f32 1.0, %v5370_v57  ;;  %5383 = verf.f32 %v2604_v61  ;;  %v3628_v35 = vpack.c.bf16 %v7438_v43, %v7382_v34  ;;  %9699 = vst [vmem:[#allocation79_spill] sm:$0xff] %v7693_v21  ;;  %v7695_v47 = vpop.f32.mrb[82].mxu0  ;;  %v7704_v58 = vpop.f32.mrb[82].mxu1 }
 0x263   :  { %9700 = vst [vmem:[#allocation80_spill] sm:$0xff] %v7695_v47  ;;  %v7698_v37 = vmul.f32 %v3108_v38, %v7592_v33  ;;  %5385 = verf.f32 %v2606_v18  ;;  %4353 = vmatmul.mubr.bf16.gmra.mrb[152].mxu1 %v3625_v32  ;;  %v3630_v63 = vpack.c.bf16 %v7441_v11, %v7397_v20  ;;  %v1704_v26 = vadd.f32 %v7232_v56, %v6551_v59  ;;  %v9702_v33 = vld [vmem:[#allocation41_spill] sm:$0xff]  ;;  %v7715_v20 = vpop.f32.mrb[83].mxu0 }
 0x264   :  { %9701 = vst [vmem:[#allocation81_spill] sm:$0xff] %v7704_v58  ;;  %v5372_v57 = vpop.eup %5371  ;;  %v7707_v34 = vmul.f32 %v3110_v24, %v7597_v44  ;;  %4071 = vmatprep.mubr.bf16.mxu0 %v3628_v35  ;;  %v2057_v43 = vadd.f32 %v7234_v49, %v6561_v51  ;;  %v1706_v61 = vadd.f32 %v9702_v33, %v6566_v3  ;;  %9704 = vst [vmem:[#allocation41_spill] sm:$0xff] %v7715_v20  ;;  %v9705_v44 = vld [vmem:[#allocation32_spill] sm:$0xff]  ;;  %v7721_v24 = vpop.f32.mrb[83].mxu1 }
 0x265   :  { %v2059_v1 = vadd.f32 %v9703_v60, %v6569_v16  ;;  %v5374_v11 = vpop.eup %5373  ;;  %v3111_v56 = vadd.f32 1.0, %v5372_v57  ;;  %4360 = vmatprep.mubr.bf16.mxu1 %v3630_v63  ;;  %v7717_v38 = vmul.f32 0.5, %v1704_v26  ;;  %v2607_v18 = vmul.f32 0.70710677, %v1704_v26  ;;  %9706 = vst [vmem:[#allocation27_spill] sm:$0xff] %v7721_v24 }
 0x266   :  { %v1708_v32 = vadd.f32 %v9705_v44, %v6551_v59  ;;  %v5376_v49 = vpop.eup %5375  ;;  %v3113_v35 = vadd.f32 1.0, %v5374_v11  ;;  %v7723_v58 = vmul.f32 0.5, %v2057_v43  ;;  %v2609_v33 = vmul.f32 0.70710677, %v2057_v43  ;;  %v7735_v11 = vpop.f32.mrb[84].mxu0 }
 0x267   :  { %v7725_v47 = vmul.f32 0.5, %v1706_v61  ;;  %v5378_v60 = vpop.eup %5377  ;;  %v7728_v20 = vmul.f32 %v3111_v56, %v7623_v2  ;;  %v3112_v63 = vadd.f32 1.0, %v5376_v49  ;;  %5387 = verf.f32 %v2607_v18  ;;  %9707 = vst [vmem:[#allocation32_spill] sm:$0xff] %v7735_v11  ;;  %v7742_v56 = vpop.f32.mrb[84].mxu1  ;;  %v9709_v49 = vld [vmem:[#allocation28_spill] sm:$0xff] }
 0x268   :  { %v2608_v57 = vmul.f32 0.70710677, %v1706_v61  ;;  %v7731_v26 = vmul.f32 %v3113_v35, %v7631_v41  ;;  %v3114_v44 = vadd.f32 1.0, %v5378_v60  ;;  %5389 = verf.f32 %v2609_v33  ;;  %9708 = vst [vmem:[#allocation82_spill] sm:$0xff] %v7742_v56  ;;  %v7749_v33 = vpop.f32.mrb[85].mxu0 }
 0x269   :  { %v7733_v24 = vmul.f32 0.5, %v2059_v1  ;;  %v5380_v21 = vpop.eup %5379  ;;  %v7738_v43 = vmul.f32 %v3112_v63, %v7633_v15  ;;  %v2610_v30 = vmul.f32 0.70710677, %v2059_v1  ;;  %v7740_v2 = vmul.f32 0.5, %v1708_v32  ;;  %9710 = vst [vmem:[#allocation28_spill] sm:$0xff] %v7749_v33  ;;  %v9711_v15 = vld [vmem:[#allocation34_spill] sm:$0xff] }
 0x26a   :  { %5391 = verf.f32 %v2608_v57  ;;  %v7745_v61 = vmul.f32 %v3114_v44, %v7647_v46  ;;  %v3115_v41 = vadd.f32 1.0, %v5380_v21  ;;  %v2611_v18 = vmul.f32 0.70710677, %v1708_v32  ;;  %v9712_v1 = vld [vmem:[#allocation57_spill] sm:$0xff]  ;;  %v7757_v46 = vpop.f32.mrb[85].mxu1 }
 0x26b   :  { %v2061_v35 = vadd.f32 %v9709_v49, %v6561_v51  ;;  %v5382_v60 = vpop.eup %5381  ;;  %5393 = verf.f32 %v2610_v30  ;;  %v1710_v63 = vadd.f32 %v9711_v15, %v6566_v3  ;;  %v2063_v57 = vadd.f32 %v9712_v1, %v6569_v16  ;;  %9713 = vst [vmem:[#allocation34_spill] sm:$0xff] %v7757_v46  ;;  %v7764_v30 = vpop.f32.mrb[86].mxu0 }
 0x26c   :  { %v3627_v56 = vpack.c.bf16 %v7400_v54, %v7364_v14  ;;  %v5384_v21 = vpop.eup %5383  ;;  %v7760_v32 = vmul.f32 %v3115_v41, %v7656_v10  ;;  %v3117_v44 = vadd.f32 1.0, %v5382_v60  ;;  %5395 = verf.f32 %v2611_v18  ;;  %9714 = vst [vmem:[#allocation57_spill] sm:$0xff] %v7764_v30  ;;  %v7773_v41 = vpop.f32.mrb[86].mxu1  ;;  %v9716_v60 = vld [vmem:[#allocation64_spill] sm:$0xff] }
 0x26d   :  { %v7762_v49 = vmul.f32 0.5, %v2061_v35  ;;  %v5386_v33 = vpop.eup %5385  ;;  %v3116_v15 = vadd.f32 1.0, %v5384_v21  ;;  %v2613_v11 = vmul.f32 0.70710677, %v2061_v35  ;;  %v7766_v7 = vmul.f32 0.5, %v1710_v63  ;;  %9715 = vst [vmem:[#allocation83_spill] sm:$0xff] %v7773_v41 }
 0x26e   :  { %v2612_v1 = vmul.f32 0.70710677, %v1710_v63  ;;  %4072 = vmatmul.mubr.bf16.gmra.mrb[156].mxu0 %v3627_v56  ;;  %v7769_v14 = vmul.f32 %v3117_v44, %v7674_v45  ;;  %v3118_v54 = vadd.f32 1.0, %v5386_v33  ;;  %v7771_v46 = vmul.f32 0.5, %v2063_v57  ;;  %v9717_v33 = vld [vmem:[#allocation58_spill] sm:$0xff]  ;;  %v7789_v21 = vpop.f32.mrb[87].mxu0 }
 0x26f   :  { %v2614_v10 = vmul.f32 0.70710677, %v2063_v57  ;;  %v7776_v18 = vmul.f32 %v3116_v15, %v7676_v23  ;;  %5397 = verf.f32 %v2613_v11  ;;  %v3629_v35 = vpack.c.bf16 %v7429_v29, %v9716_v60  ;;  %9718 = vst [vmem:[#allocation64_spill] sm:$0xff] %v7789_v21  ;;  %v9719_v29 = vld [vmem:[#allocation59_spill] sm:$0xff]  ;;  %v7797_v15 = vpop.f32.mrb[87].mxu1 }
 0x270   :  { %v3632_v63 = vpack.c.bf16 %v7506_v36, %v7472_v31  ;;  %v7783_v56 = vmul.f32 %v3118_v54, %v7678_v27  ;;  %5399 = verf.f32 %v2612_v1  ;;  %v3634_v45 = vpack.c.bf16 %v7517_v9, %v7487_v52  ;;  %v9720_v31 = vld [vmem:[#allocation60_spill] sm:$0xff]  ;;  %v9721_v27 = vld [vmem:[#allocation61_spill] sm:$0xff]  ;;  %9722 = vst [vmem:[#allocation58_spill] sm:$0xff] %v7797_v15 }
 0x271   :  { %v1714_v57 = vadd.f32 %v9717_v33, %v6551_v59  ;;  %v5388_v23 = vpop.eup %5387  ;;  %5401 = verf.f32 %v2614_v10  ;;  %4361 = vmatmul.mubr.bf16.gmra.mrb[156].mxu1 %v3629_v35  ;;  %v2067_v11 = vadd.f32 %v9719_v29, %v6561_v51  ;;  %v1716_v36 = vadd.f32 %v9720_v31, %v6566_v3  ;;  %v9723_v10 = vld [vmem:[#allocation14_spill] sm:$0xff]  ;;  %v7803_v35 = vpop.f32.mrb[88].mxu0 }
 0x272   :  { %4079 = vmatprep.mubr.bf16.mxu0 %v3632_v63  ;;  %v2069_v44 = vadd.f32 %v9721_v27, %v6569_v16  ;;  %v5390_v52 = vpop.eup %5389  ;;  %v3119_v9 = vadd.f32 1.0, %v5388_v23  ;;  %4368 = vmatprep.mubr.bf16.mxu1 %v3634_v45  ;;  %v1718_v60 = vadd.f32 %v9723_v10, %v6551_v59  ;;  %9724 = vst [vmem:[#allocation59_spill] sm:$0xff] %v7803_v35 }
 0x273   :  { %v7799_v1 = vmul.f32 0.5, %v1714_v57  ;;  %v2615_v54 = vmul.f32 0.70710677, %v1714_v57  ;;  %v3121_v33 = vadd.f32 1.0, %v5390_v52  ;;  %v7805_v29 = vmul.f32 0.5, %v2067_v11 }
 0x274   :  { %v5392_v63 = vpop.eup %5391  ;;  %v2617_v31 = vmul.f32 0.70710677, %v2067_v11  ;;  %v7807_v21 = vmul.f32 0.5, %v1716_v36  ;;  %v7810_v27 = vmul.f32 %v3119_v9, %v7717_v38  ;;  %v2616_v45 = vmul.f32 0.70710677, %v1716_v36  ;;  %v7822_v38 = vpop.f32.mrb[88].mxu1 }
 0x275   :  { %v3120_v23 = vadd.f32 1.0, %v5392_v63  ;;  %5403 = verf.f32 %v2615_v54  ;;  %v5394_v15 = vpop.eup %5393  ;;  %v7813_v57 = vmul.f32 %v3121_v33, %v7723_v58  ;;  %v7815_v10 = vmul.f32 0.5, %v2069_v44  ;;  %9725 = vst [vmem:[#allocation60_spill] sm:$0xff] %v7822_v38  ;;  %v9726_v58 = vld [vmem:[#allocation43_spill] sm:$0xff]  ;;  %v7826_v63 = vpop.f32.mrb[89].mxu0 }
 0x276   :  { %5405 = verf.f32 %v2617_v31  ;;  %v2618_v35 = vmul.f32 0.70710677, %v2069_v44  ;;  %v5396_v52 = vpop.eup %5395  ;;  %v3122_v11 = vadd.f32 1.0, %v5394_v15  ;;  %v7820_v30 = vmul.f32 0.5, %v1718_v60  ;;  %9727 = vst [vmem:[#allocation61_spill] sm:$0xff] %v7826_v63  ;;  %v9729_v15 = vld [vmem:[#allocation42_spill] sm:$0xff] }
 0x277   :  { %v7818_v41 = vmul.f32 %v3120_v23, %v7725_v47  ;;  %5407 = verf.f32 %v2616_v45  ;;  %v3123_v9 = vadd.f32 1.0, %v5396_v52  ;;  %v2619_v36 = vmul.f32 0.70710677, %v1718_v60  ;;  %v9728_v47 = vld [vmem:[#allocation36_spill] sm:$0xff]  ;;  %v7837_v45 = vpop.f32.mrb[89].mxu1 }
 0x278   :  { %5409 = verf.f32 %v2618_v35  ;;  %v2071_v54 = vadd.f32 %v9726_v58, %v6561_v51  ;;  %v7829_v44 = vmul.f32 %v3122_v11, %v7733_v24  ;;  %v1720_v33 = vadd.f32 %v9728_v47, %v6566_v3  ;;  %9730 = vst [vmem:[#allocation14_spill] sm:$0xff] %v7837_v45 }
 0x279   :  { %v2073_v31 = vadd.f32 %v9729_v15, %v6569_v16  ;;  %v3631_v23 = vpack.c.bf16 %v7496_v25, %v7454_v17  ;;  %v5398_v60 = vpop.eup %5397  ;;  %v7840_v35 = vmul.f32 %v3123_v9, %v7740_v2  ;;  %5411 = verf.f32 %v2619_v36  ;;  %v7848_v15 = vpop.f32.mrb[90].mxu0 }
 0x27a   :  { %v7842_v52 = vmul.f32 0.5, %v2071_v54  ;;  %v2621_v24 = vmul.f32 0.70710677, %v2071_v54  ;;  %v5400_v11 = vpop.eup %5399  ;;  %v3125_v58 = vadd.f32 1.0, %v5398_v60  ;;  %v7844_v63 = vmul.f32 0.5, %v1720_v33  ;;  %9731 = vst [vmem:[#allocation43_spill] sm:$0xff] %v7848_v15 }
 0x27b   :  { %v2620_v47 = vmul.f32 0.70710677, %v1720_v33  ;;  %v7846_v38 = vmul.f32 0.5, %v2073_v31  ;;  %4080 = vmatmul.mubr.bf16.gmra.mrb[160].mxu0 %v3631_v23  ;;  %v5402_v17 = vpop.eup %5401  ;;  %v3124_v25 = vadd.f32 1.0, %v5400_v11  ;;  %v2622_v45 = vmul.f32 0.70710677, %v2073_v31 }
 0x27c   :  { %5413 = verf.f32 %v2621_v24  ;;  %v3633_v2 = vpack.c.bf16 %v7503_v48, %v7469_v28  ;;  %v7852_v9 = vpop.f32.mrb[90].mxu1  ;;  %v7855_v36 = vmul.f32 %v3125_v58, %v7762_v49  ;;  %v3126_v54 = vadd.f32 1.0, %v5402_v17  ;;  %v9733_v28 = vld [vmem:[#allocation39_spill] sm:$0xff]  ;;  %v7875_v58 = vpop.f32.mrb[91].mxu0 }
 0x27d   :  { %9732 = vst [vmem:[#allocation36_spill] sm:$0xff] %v7852_v9  ;;  %5415 = verf.f32 %v2620_v47  ;;  %v3636_v33 = vpack.c.bf16 %v7604_v62, %v7560_v50  ;;  %v7860_v23 = vmul.f32 %v3124_v25, %v7766_v7  ;;  %v3638_v31 = vpack.c.bf16 %v7611_v40, %v7565_v53  ;;  %v9734_v24 = vld [vmem:[#allocation15_spill] sm:$0xff]  ;;  %v9735_v50 = vld [vmem:[#allocation46_spill] sm:$0xff]  ;;  %9737 = vst [vmem:[#allocation42_spill] sm:$0xff] %v7875_v58 }
 0x27e   :  { %5417 = verf.f32 %v2622_v45  ;;  %4369 = vmatmul.mubr.bf16.gmra.mrb[160].mxu1 %v3633_v2  ;;  %v1724_v48 = vadd.f32 %v9733_v28, %v6551_v59  ;;  %v7867_v49 = vmul.f32 %v3126_v54, %v7771_v46  ;;  %v2077_v11 = vadd.f32 %v9734_v24, %v6561_v51  ;;  %v9736_v7 = vld [vmem:[#allocation47_spill] sm:$0xff]  ;;  %v9738_v46 = vld [vmem:[#allocation48_spill] sm:$0xff]  ;;  %v7881_v2 = vpop.f32.mrb[91].mxu1 }
 0x27f   :  { %v5404_v60 = vpop.eup %5403  ;;  %4087 = vmatprep.mubr.bf16.mxu0 %v3636_v33  ;;  %v1726_v62 = vadd.f32 %v9735_v50, %v6566_v3  ;;  %v2079_v45 = vadd.f32 %v9736_v7, %v6569_v16  ;;  %4376 = vmatprep.mubr.bf16.mxu1 %v3638_v31  ;;  %v1728_v25 = vadd.f32 %v9738_v46, %v6551_v59  ;;  %v7887_v7 = vpop.f32.mrb[92].mxu0 }
 0x280   :  { %v5406_v53 = vpop.eup %5405  ;;  %v3127_v40 = vadd.f32 1.0, %v5404_v60  ;;  %v7877_v47 = vmul.f32 0.5, %v1724_v48  ;;  %v2623_v17 = vmul.f32 0.70710677, %v1724_v48  ;;  %9739 = vst [vmem:[#allocation39_spill] sm:$0xff] %v7881_v2  ;;  %v7883_v28 = vmul.f32 0.5, %v2077_v11 }
 0x281   :  { %v5408_v54 = vpop.eup %5407  ;;  %v3129_v33 = vadd.f32 1.0, %v5406_v53  ;;  %v2625_v24 = vmul.f32 0.70710677, %v2077_v11  ;;  %v7885_v50 = vmul.f32 0.5, %v1726_v62  ;;  %9740 = vst [vmem:[#allocation15_spill] sm:$0xff] %v7887_v7  ;;  %v7895_v53 = vmul.f32 0.5, %v2079_v45 }
 0x282   :  { %v5410_v58 = vpop.eup %5409  ;;  %v7890_v31 = vmul.f32 %v3127_v40, %v7799_v1  ;;  %v3128_v60 = vadd.f32 1.0, %v5408_v54  ;;  %5419 = verf.f32 %v2623_v17  ;;  %v2624_v48 = vmul.f32 0.70710677, %v1726_v62  ;;  %v7902_v1 = vpop.f32.mrb[92].mxu1 }
 0x283   :  { %v7893_v46 = vmul.f32 %v3129_v33, %v7805_v29  ;;  %v3130_v2 = vadd.f32 1.0, %v5410_v58  ;;  %5421 = verf.f32 %v2625_v24  ;;  %v5412_v9 = vpop.eup %5411  ;;  %v2626_v7 = vmul.f32 0.70710677, %v2079_v45  ;;  %9741 = vst [vmem:[#allocation46_spill] sm:$0xff] %v7902_v1  ;;  %v9742_v58 = vld [vmem:[#allocation62_spill] sm:$0xff]  ;;  %v7909_v54 = vpop.f32.mrb[93].mxu0 }
 0x284   :  { %v7898_v11 = vmul.f32 %v3128_v60, %v7807_v21  ;;  %5423 = verf.f32 %v2624_v48  ;;  %v7900_v15 = vmul.f32 0.5, %v1728_v25  ;;  %v3131_v62 = vadd.f32 1.0, %v5412_v9  ;;  %9743 = vst [vmem:[#allocation47_spill] sm:$0xff] %v7909_v54  ;;  %v9744_v21 = vld [vmem:[#allocation63_spill] sm:$0xff]  ;;  %v9745_v45 = vld [vmem:[#allocation65_spill] sm:$0xff] }
 0x285   :  { %v7905_v40 = vmul.f32 %v3130_v2, %v7815_v10  ;;  %v2627_v29 = vmul.f32 0.70710677, %v1728_v25  ;;  %v2081_v17 = vadd.f32 %v9742_v58, %v6561_v51  ;;  %5425 = verf.f32 %v2626_v7  ;;  %v7917_v10 = vpop.f32.mrb[93].mxu1  ;;  %v7924_v7 = vpop.f32.mrb[94].mxu0 }
 0x286   :  { %v5414_v33 = vpop.eup %5413  ;;  %v1730_v24 = vadd.f32 %v9744_v21, %v6566_v3  ;;  %v2083_v60 = vadd.f32 %v9745_v45, %v6569_v16  ;;  %v3635_v48 = vpack.c.bf16 %v7584_v5, %v7552_v22  ;;  %9746 = vst [vmem:[#allocation48_spill] sm:$0xff] %v7917_v10  ;;  %v7920_v25 = vmul.f32 %v3131_v62, %v7820_v30  ;;  %v7933_v62 = vpop.f32.mrb[94].mxu1 }
 0x287   :  { %v5416_v9 = vpop.eup %5415  ;;  %v3133_v2 = vadd.f32 1.0, %v5414_v33  ;;  %5427 = verf.f32 %v2627_v29  ;;  %v7922_v58 = vmul.f32 0.5, %v2081_v17  ;;  %v2629_v1 = vmul.f32 0.70710677, %v2081_v17  ;;  %9747 = vst [vmem:[#allocation62_spill] sm:$0xff] %v7933_v62 }
 0x288   :  { %v5418_v54 = vpop.eup %5417  ;;  %v3132_v21 = vadd.f32 1.0, %v5416_v9  ;;  %v7926_v6 = vmul.f32 0.5, %v1730_v24  ;;  %v2628_v45 = vmul.f32 0.70710677, %v1730_v24  ;;  %4088 = vmatmul.mubr.bf16.gmra.mrb[164].mxu0 %v3635_v48  ;;  %v7931_v10 = vmul.f32 0.5, %v2083_v60  ;;  %v7957_v48 = vpop.f32.mrb[95].mxu1 }
 0x289   :  { %v7929_v22 = vmul.f32 %v3133_v2, %v7842_v52  ;;  %v3134_v5 = vadd.f32 1.0, %v5418_v54  ;;  %v2630_v30 = vmul.f32 0.70710677, %v2083_v60  ;;  %5429 = verf.f32 %v2629_v1  ;;  %v7949_v60 = vpop.f32.mrb[95].mxu0  ;;  %9752 = vst [vmem:[#allocation65_spill] sm:$0xff] %v7957_v48  ;;  %v9753_v2 = vld [vmem:[#allocation44_spill] sm:$0xff] }
 0x28a   :  { %v7936_v29 = vmul.f32 %v3132_v21, %v7844_v63  ;;  %v3637_v17 = vpack.c.bf16 %v7595_v8, %v7555_v4  ;;  %v3640_v33 = vpack.c.bf16 %v7698_v37, %v7654_v19  ;;  %5431 = verf.f32 %v2628_v45  ;;  %9748 = vst [vmem:[#allocation63_spill] sm:$0xff] %v7949_v60  ;;  %v9749_v4 = vld [vmem:[#allocation49_spill] sm:$0xff]  ;;  %v9750_v19 = vld [vmem:[#allocation51_spill] sm:$0xff]  ;;  %v7963_v45 = vpop.f32.mrb[96].mxu0 }
 0x28b   :  { %v7943_v24 = vmul.f32 %v3134_v5, %v7846_v38  ;;  %v3642_v52 = vpack.c.bf16 %v7707_v34, %v7663_v55  ;;  %v1734_v54 = vadd.f32 %v7404_v42, %v6551_v59  ;;  %5433 = verf.f32 %v2630_v30  ;;  %v9751_v38 = vld [vmem:[#allocation52_spill] sm:$0xff]  ;;  %9754 = vst [vmem:[#allocation49_spill] sm:$0xff] %v7963_v45 }
 0x28c   :  { %v5420_v63 = vpop.eup %5419  ;;  %4377 = vmatmul.mubr.bf16.gmra.mrb[164].mxu1 %v3637_v17  ;;  %4095 = vmatprep.mubr.bf16.mxu0 %v3640_v33  ;;  %v2087_v8 = vadd.f32 %v9749_v4, %v6561_v51  ;;  %v1736_v37 = vadd.f32 %v9750_v19, %v6566_v3  ;;  %v2089_v1 = vadd.f32 %v9751_v38, %v6569_v16 }
 0x28d   :  { %v5422_v55 = vpop.eup %5421  ;;  %v3135_v34 = vadd.f32 1.0, %v5420_v63  ;;  %4384 = vmatprep.mubr.bf16.mxu1 %v3642_v52  ;;  %v7959_v42 = vmul.f32 0.5, %v1734_v54  ;;  %v2631_v9 = vmul.f32 0.70710677, %v1734_v54  ;;  %v1738_v21 = vadd.f32 %v9753_v2, %v6551_v59 }
 0x28e   :  { %v5424_v5 = vpop.eup %5423  ;;  %v3137_v30 = vadd.f32 1.0, %v5422_v55  ;;  %v7965_v17 = vmul.f32 0.5, %v2087_v8  ;;  %v2633_v33 = vmul.f32 0.70710677, %v2087_v8  ;;  %v7967_v4 = vmul.f32 0.5, %v1736_v37 }
 0x28f   :  { %v7970_v19 = vmul.f32 %v3135_v34, %v7877_v47  ;;  %v3136_v63 = vadd.f32 1.0, %v5424_v5  ;;  %5435 = verf.f32 %v2631_v9  ;;  %v2632_v52 = vmul.f32 0.70710677, %v1736_v37  ;;  %v5426_v38 = vpop.eup %5425  ;;  %v7982_v47 = vpop.f32.mrb[96].mxu1 }
 0x290   :  { %v7973_v54 = vmul.f32 %v3137_v30, %v7883_v28  ;;  %5437 = verf.f32 %v2633_v33  ;;  %v7975_v2 = vmul.f32 0.5, %v2089_v1  ;;  %v2634_v45 = vmul.f32 0.70710677, %v2089_v1  ;;  %9755 = vst [vmem:[#allocation51_spill] sm:$0xff] %v7982_v47  ;;  %v9756_v28 = vld [vmem:[#allocation50_spill] sm:$0xff]  ;;  %v7986_v5 = vpop.f32.mrb[97].mxu0 }
 0x291   :  { %v5428_v55 = vpop.eup %5427  ;;  %v7978_v48 = vmul.f32 %v3136_v63, %v7885_v50  ;;  %v3138_v8 = vadd.f32 1.0, %v5426_v38  ;;  %5439 = verf.f32 %v2632_v52  ;;  %v7980_v60 = vmul.f32 0.5, %v1738_v21  ;;  %9757 = vst [vmem:[#allocation52_spill] sm:$0xff] %v7986_v5  ;;  %v9758_v50 = vld [vmem:[#allocation45_spill] sm:$0xff]  ;;  %v9759_v33 = vld [vmem:[#allocation18_spill] sm:$0xff]  ;;  %v7997_v38 = vpop.f32.mrb[97].mxu1 }
 0x292   :  { %v3139_v34 = vadd.f32 1.0, %v5428_v55  ;;  %5441 = verf.f32 %v2634_v45  ;;  %v2635_v37 = vmul.f32 0.70710677, %v1738_v21  ;;  %v2091_v9 = vadd.f32 %v9756_v28, %v6561_v51  ;;  %9760 = vst [vmem:[#allocation44_spill] sm:$0xff] %v7997_v38 }
 0x293   :  { %v7989_v1 = vmul.f32 %v3138_v8, %v7895_v53  ;;  %v1740_v30 = vadd.f32 %v9758_v50, %v6566_v3  ;;  %v2093_v63 = vadd.f32 %v9759_v33, %v6569_v16  ;;  %v3639_v52 = vpack.c.bf16 %v7672_v39, %v7638_v12  ;;  %v5430_v21 = vpop.eup %5429  ;;  %v8008_v33 = vpop.f32.mrb[98].mxu0 }
 0x294   :  { %v8000_v45 = vmul.f32 %v3139_v34, %v7900_v15  ;;  %5443 = verf.f32 %v2635_v37  ;;  %v8002_v55 = vmul.f32 0.5, %v2091_v9  ;;  %v2637_v53 = vmul.f32 0.70710677, %v2091_v9  ;;  %v5432_v8 = vpop.eup %5431  ;;  %9761 = vst [vmem:[#allocation50_spill] sm:$0xff] %v8008_v33  ;;  %v8012_v34 = vpop.f32.mrb[98].mxu1 }
 0x295   :  { %v3141_v28 = vadd.f32 1.0, %v5430_v21  ;;  %v8004_v5 = vmul.f32 0.5, %v1740_v30  ;;  %v2636_v50 = vmul.f32 0.70710677, %v1740_v30  ;;  %v8006_v47 = vmul.f32 0.5, %v2093_v63  ;;  %4096 = vmatmul.mubr.bf16.gmra.mrb[168].mxu0 %v3639_v52  ;;  %v5434_v12 = vpop.eup %5433  ;;  %9762 = vst [vmem:[#allocation45_spill] sm:$0xff] %v8012_v34 }
 0x296   :  { %v3140_v39 = vadd.f32 1.0, %v5432_v8  ;;  %5445 = verf.f32 %v2637_v53  ;;  %v2638_v38 = vmul.f32 0.70710677, %v2093_v63  ;;  %v3641_v15 = vpack.c.bf16 %v7689_v13, %v7645_v0  ;;  %v9763_v0 = vld [vmem:[#allocation16_spill] sm:$0xff]  ;;  %v9764_v53 = vld [vmem:[#allocation66_spill] sm:$0xff] }
 0x297   :  { %v8015_v37 = vmul.f32 %v3141_v28, %v7922_v58  ;;  %v3142_v9 = vadd.f32 1.0, %v5434_v12  ;;  %5447 = verf.f32 %v2636_v50  ;;  %v3644_v30 = vpack.c.bf16 %v7776_v18, %v7738_v43  ;;  %v9765_v43 = vld [vmem:[#allocation67_spill] sm:$0xff]  ;;  %v9766_v18 = vld [vmem:[#allocation68_spill] sm:$0xff]  ;;  %v8035_v28 = vpop.f32.mrb[99].mxu0 }
 0x298   :  { %v8020_v52 = vmul.f32 %v3140_v39, %v7926_v6  ;;  %5449 = verf.f32 %v2638_v38  ;;  %4385 = vmatmul.mubr.bf16.gmra.mrb[168].mxu1 %v3641_v15  ;;  %v3646_v63 = vpack.c.bf16 %v7783_v56, %v7745_v61  ;;  %v1744_v13 = vadd.f32 %v9763_v0, %v6551_v59  ;;  %9767 = vst [vmem:[#allocation18_spill] sm:$0xff] %v8035_v28  ;;  %v8041_v15 = vpop.f32.mrb[99].mxu1 }
 0x299   :  { %v5436_v21 = vpop.eup %5435  ;;  %v8027_v58 = vmul.f32 %v3142_v9, %v7931_v10  ;;  %4103 = vmatprep.mubr.bf16.mxu0 %v3644_v30  ;;  %v2097_v8 = vadd.f32 %v9764_v53, %v6561_v51  ;;  %v1746_v6 = vadd.f32 %v9765_v43, %v6566_v3  ;;  %v2099_v38 = vadd.f32 %v9766_v18, %v6569_v16  ;;  %v9768_v10 = vld [vmem:[#allocation69_spill] sm:$0xff]  ;;  %v8047_v18 = vpop.f32.mrb[100].mxu0 }
 0x29a   :  { %v5438_v61 = vpop.eup %5437  ;;  %v3143_v56 = vadd.f32 1.0, %v5436_v21  ;;  %4392 = vmatprep.mubr.bf16.mxu1 %v3646_v63  ;;  %v8037_v50 = vmul.f32 0.5, %v1744_v13  ;;  %v2639_v12 = vmul.f32 0.70710677, %v1744_v13  ;;  %v1748_v39 = vadd.f32 %v9768_v10, %v6551_v59  ;;  %9769 = vst [vmem:[#allocation16_spill] sm:$0xff] %v8041_v15  ;;  %9770 = vst [vmem:[#allocation66_spill] sm:$0xff] %v8047_v18 }
 0x29b   :  { %v5440_v9 = vpop.eup %5439  ;;  %v3145_v30 = vadd.f32 1.0, %v5438_v61  ;;  %v8043_v0 = vmul.f32 0.5, %v2097_v8  ;;  %v2641_v53 = vmul.f32 0.70710677, %v2097_v8  ;;  %v8045_v43 = vmul.f32 0.5, %v1746_v6 }
 0x29c   :  { %v5442_v28 = vpop.eup %5441  ;;  %v8050_v63 = vmul.f32 %v3143_v56, %v7959_v42  ;;  %v3144_v21 = vadd.f32 1.0, %v5440_v9  ;;  %5451 = verf.f32 %v2639_v12  ;;  %v2640_v13 = vmul.f32 0.70710677, %v1746_v6  ;;  %v8062_v42 = vpop.f32.mrb[100].mxu1 }
 0x29d   :  { %v8053_v10 = vmul.f32 %v3145_v30, %v7965_v17  ;;  %v3146_v15 = vadd.f32 1.0, %v5442_v28  ;;  %5453 = verf.f32 %v2641_v53  ;;  %v8055_v61 = vmul.f32 0.5, %v2099_v38  ;;  %9771 = vst [vmem:[#allocation67_spill] sm:$0xff] %v8062_v42  ;;  %v9772_v28 = vld [vmem:[#allocation70_spill] sm:$0xff]  ;;  %v8069_v9 = vpop.f32.mrb[101].mxu0 }
 0x29e   :  { %v5444_v34 = vpop.eup %5443  ;;  %v8058_v8 = vmul.f32 %v3144_v21, %v7967_v4  ;;  %5455 = verf.f32 %v2640_v13  ;;  %v2642_v18 = vmul.f32 0.70710677, %v2099_v38  ;;  %v8060_v33 = vmul.f32 0.5, %v1748_v39  ;;  %9773 = vst [vmem:[#allocation68_spill] sm:$0xff] %v8069_v9  ;;  %v9774_v4 = vld [vmem:[#allocation71_spill] sm:$0xff]  ;;  %v9775_v38 = vld [vmem:[#allocation72_spill] sm:$0xff] }
 0x29f   :  { %v8065_v56 = vmul.f32 %v3146_v15, %v7975_v2  ;;  %v3147_v6 = vadd.f32 1.0, %v5444_v34  ;;  %v2643_v17 = vmul.f32 0.70710677, %v1748_v39  ;;  %v2101_v12 = vadd.f32 %v9772_v28, %v6561_v51  ;;  %v8077_v2 = vpop.f32.mrb[101].mxu1 }
 0x2a0   :  { %v5446_v30 = vpop.eup %5445  ;;  %5457 = verf.f32 %v2642_v18  ;;  %v1750_v53 = vadd.f32 %v9774_v4, %v6566_v3  ;;  %v2103_v21 = vadd.f32 %v9775_v38, %v6569_v16  ;;  %v3643_v13 = vpack.c.bf16 %v7760_v32, %v7728_v20  ;;  %9776 = vst [vmem:[#allocation69_spill] sm:$0xff] %v8077_v2  ;;  %v8084_v18 = vpop.f32.mrb[102].mxu0 }
 0x2a1   :  { %v5448_v34 = vpop.eup %5447  ;;  %v8080_v39 = vmul.f32 %v3147_v6, %v7980_v60  ;;  %v3149_v15 = vadd.f32 1.0, %v5446_v30  ;;  %5459 = verf.f32 %v2643_v17  ;;  %v8082_v28 = vmul.f32 0.5, %v2101_v12  ;;  %9777 = vst [vmem:[#allocation70_spill] sm:$0xff] %v8084_v18  ;;  %v8093_v6 = vpop.f32.mrb[102].mxu1 }
 0x2a2   :  { %v5450_v9 = vpop.eup %5449  ;;  %v3148_v4 = vadd.f32 1.0, %v5448_v34  ;;  %v2645_v42 = vmul.f32 0.70710677, %v2101_v12  ;;  %v8086_v62 = vmul.f32 0.5, %v1750_v53  ;;  %v2644_v38 = vmul.f32 0.70710677, %v1750_v53  ;;  %4104 = vmatmul.mubr.bf16.gmra.mrb[172].mxu0 %v3643_v13 }
 0x2a3   :  { %v8089_v20 = vmul.f32 %v3149_v15, %v8002_v55  ;;  %v3150_v32 = vadd.f32 1.0, %v5450_v9  ;;  %v8091_v2 = vmul.f32 0.5, %v2103_v21  ;;  %v2646_v60 = vmul.f32 0.70710677, %v2103_v21  ;;  %9778 = vst [vmem:[#allocation71_spill] sm:$0xff] %v8093_v6  ;;  %v9779_v9 = vld [vmem:[#allocation17_spill] sm:$0xff] }
 0x2a4   :  { %v8096_v17 = vmul.f32 %v3148_v4, %v8004_v5  ;;  %5461 = verf.f32 %v2645_v42  ;;  %v3645_v12 = vpack.c.bf16 %v7769_v14, %v7731_v26  ;;  %v3648_v30 = vpack.c.bf16 %v7860_v23, %v7818_v41  ;;  %v8109_v13 = vpop.f32.mrb[103].mxu0  ;;  %v9781_v26 = vld [vmem:[#allocation29_spill] sm:$0xff]  ;;  %v9782_v41 = vld [vmem:[#allocation54_spill] sm:$0xff]  ;;  %v8117_v34 = vpop.f32.mrb[103].mxu1 }
 0x2a5   :  { %v8103_v53 = vmul.f32 %v3150_v32, %v8006_v47  ;;  %5463 = verf.f32 %v2644_v38  ;;  %v3650_v55 = vpack.c.bf16 %v7867_v49, %v7829_v44  ;;  %v1754_v21 = vadd.f32 %v9779_v9, %v6551_v59  ;;  %9780 = vst [vmem:[#allocation72_spill] sm:$0xff] %v8109_v13  ;;  %v9783_v47 = vld [vmem:[#allocation21_spill] sm:$0xff]  ;;  %9784 = vst [vmem:[#allocation17_spill] sm:$0xff] %v8117_v34 }
 0x2a6   :  { %v5452_v5 = vpop.eup %5451  ;;  %5465 = verf.f32 %v2646_v60  ;;  %4393 = vmatmul.mubr.bf16.gmra.mrb[172].mxu1 %v3645_v12  ;;  %4111 = vmatprep.mubr.bf16.mxu0 %v3648_v30  ;;  %v2107_v14 = vadd.f32 %v9781_v26, %v6561_v51  ;;  %v1756_v23 = vadd.f32 %v9782_v41, %v6566_v3  ;;  %v2109_v42 = vadd.f32 %v9783_v47, %v6569_v16  ;;  %v9785_v38 = vld [vmem:[#allocation25_spill] sm:$0xff]  ;;  %v8123_v60 = vpop.f32.mrb[104].mxu0 }
 0x2a7   :  { %v5454_v44 = vpop.eup %5453  ;;  %v3151_v49 = vadd.f32 1.0, %v5452_v5  ;;  %4400 = vmatprep.mubr.bf16.mxu1 %v3650_v55  ;;  %v8119_v15 = vmul.f32 0.5, %v1754_v21  ;;  %v2647_v4 = vmul.f32 0.70710677, %v1754_v21  ;;  %v1758_v32 = vadd.f32 %v9785_v38, %v6551_v59  ;;  %9786 = vst [vmem:[#allocation29_spill] sm:$0xff] %v8123_v60 }
 0x2a8   :  { %v5456_v12 = vpop.eup %5455  ;;  %v3153_v30 = vadd.f32 1.0, %v5454_v44  ;;  %v8125_v9 = vmul.f32 0.5, %v2107_v14  ;;  %v2649_v26 = vmul.f32 0.70710677, %v2107_v14  ;;  %v8127_v41 = vmul.f32 0.5, %v1756_v23 }
 0x2a9   :  { %v8130_v47 = vmul.f32 %v3151_v49, %v8037_v50  ;;  %v3152_v5 = vadd.f32 1.0, %v5456_v12  ;;  %5467 = verf.f32 %v2647_v4  ;;  %v2648_v55 = vmul.f32 0.70710677, %v1756_v23  ;;  %v8142_v50 = vpop.f32.mrb[104].mxu1  ;;  %v8146_v12 = vpop.f32.mrb[105].mxu0 }
 0x2aa   :  { %v5458_v34 = vpop.eup %5457  ;;  %v8133_v21 = vmul.f32 %v3153_v30, %v8043_v0  ;;  %5469 = verf.f32 %v2649_v26  ;;  %v8135_v38 = vmul.f32 0.5, %v2109_v42  ;;  %v2650_v60 = vmul.f32 0.70710677, %v2109_v42  ;;  %9787 = vst [vmem:[#allocation54_spill] sm:$0xff] %v8142_v50  ;;  %v9788_v0 = vld [vmem:[#allocation24_spill] sm:$0xff]  ;;  %9789 = vst [vmem:[#allocation21_spill] sm:$0xff] %v8146_v12 }
 0x2ab   :  { %v5460_v44 = vpop.eup %5459  ;;  %v8138_v13 = vmul.f32 %v3152_v5, %v8045_v43  ;;  %v3154_v14 = vadd.f32 1.0, %v5458_v34  ;;  %5471 = verf.f32 %v2648_v55  ;;  %v8140_v6 = vmul.f32 0.5, %v1758_v32  ;;  %v9790_v43 = vld [vmem:[#allocation26_spill] sm:$0xff]  ;;  %v9791_v34 = vld [vmem:[#allocation33_spill] sm:$0xff]  ;;  %v8157_v55 = vpop.f32.mrb[105].mxu1 }
 0x2ac   :  { %v3155_v49 = vadd.f32 1.0, %v5460_v44  ;;  %5473 = verf.f32 %v2650_v60  ;;  %v2651_v23 = vmul.f32 0.70710677, %v1758_v32  ;;  %v2111_v4 = vadd.f32 %v9788_v0, %v6561_v51  ;;  %9792 = vst [vmem:[#allocation25_spill] sm:$0xff] %v8157_v55 }
 0x2ad   :  { %v8149_v42 = vmul.f32 %v3154_v14, %v8055_v61  ;;  %v1760_v30 = vadd.f32 %v9790_v43, %v6566_v3  ;;  %v2113_v26 = vadd.f32 %v9791_v34, %v6569_v16  ;;  %v3647_v5 = vpack.c.bf16 %v7840_v35, %v7810_v27  ;;  %v8168_v34 = vpop.f32.mrb[106].mxu0 }
 0x2ae   :  { %v5462_v32 = vpop.eup %5461  ;;  %v8160_v60 = vmul.f32 %v3155_v49, %v8060_v33  ;;  %5475 = verf.f32 %v2651_v23  ;;  %v8162_v44 = vmul.f32 0.5, %v2111_v4  ;;  %v2653_v61 = vmul.f32 0.70710677, %v2111_v4  ;;  %9793 = vst [vmem:[#allocation24_spill] sm:$0xff] %v8168_v34  ;;  %v8172_v49 = vpop.f32.mrb[106].mxu1 }
 0x2af   :  { %v5464_v14 = vpop.eup %5463  ;;  %v3157_v0 = vadd.f32 1.0, %v5462_v32  ;;  %v8164_v12 = vmul.f32 0.5, %v1760_v30  ;;  %v2652_v43 = vmul.f32 0.70710677, %v1760_v30  ;;  %v8166_v50 = vmul.f32 0.5, %v2113_v26  ;;  %4112 = vmatmul.mubr.bf16.gmra.mrb[176].mxu0 %v3647_v5  ;;  %9794 = vst [vmem:[#allocation26_spill] sm:$0xff] %v8172_v49 }
 0x2b0   :  { %v5466_v27 = vpop.eup %5465  ;;  %v3156_v35 = vadd.f32 1.0, %v5464_v14  ;;  %5477 = verf.f32 %v2653_v61  ;;  %v2654_v55 = vmul.f32 0.70710677, %v2113_v26  ;;  %v3649_v33 = vpack.c.bf16 %v7855_v36, %v7813_v57  ;;  %v9795_v57 = vld [vmem:[#allocation53_spill] sm:$0xff] }
 0x2b1   :  { %v8175_v23 = vmul.f32 %v3157_v0, %v8082_v28  ;;  %v3158_v4 = vadd.f32 1.0, %v5466_v27  ;;  %5479 = verf.f32 %v2652_v43  ;;  %v3652_v30 = vpack.c.bf16 %v7936_v29, %v7898_v11  ;;  %v9796_v61 = vld [vmem:[#allocation73_spill] sm:$0xff]  ;;  %v9797_v11 = vld [vmem:[#allocation55_spill] sm:$0xff]  ;;  %v9798_v29 = vld [vmem:[#allocation56_spill] sm:$0xff]  ;;  %v8195_v0 = vpop.f32.mrb[107].mxu0 }
 0x2b2   :  { %v8180_v5 = vmul.f32 %v3156_v35, %v8086_v62  ;;  %5481 = verf.f32 %v2654_v55  ;;  %4401 = vmatmul.mubr.bf16.gmra.mrb[176].mxu1 %v3649_v33  ;;  %v3654_v26 = vpack.c.bf16 %v7943_v24, %v7905_v40  ;;  %v1764_v36 = vadd.f32 %v9795_v57, %v6551_v59  ;;  %9799 = vst [vmem:[#allocation33_spill] sm:$0xff] %v8195_v0  ;;  %v8201_v33 = vpop.f32.mrb[107].mxu1 }
 0x2b3   :  { %v5468_v32 = vpop.eup %5467  ;;  %v8187_v28 = vmul.f32 %v3158_v4, %v8091_v2  ;;  %4119 = vmatprep.mubr.bf16.mxu0 %v3652_v30  ;;  %v2117_v14 = vadd.f32 %v9796_v61, %v6561_v51  ;;  %v1766_v62 = vadd.f32 %v9797_v11, %v6566_v3  ;;  %v2119_v55 = vadd.f32 %v9798_v29, %v6569_v16  ;;  %v9800_v2 = vld [vmem:[#allocation30_spill] sm:$0xff]  ;;  %v8207_v29 = vpop.f32.mrb[108].mxu0 }
 0x2b4   :  { %v5470_v40 = vpop.eup %5469  ;;  %v3159_v24 = vadd.f32 1.0, %v5468_v32  ;;  %4408 = vmatprep.mubr.bf16.mxu1 %v3654_v26  ;;  %v8197_v43 = vmul.f32 0.5, %v1764_v36  ;;  %v2655_v27 = vmul.f32 0.70710677, %v1764_v36  ;;  %v1768_v35 = vadd.f32 %v9800_v2, %v6551_v59  ;;  %9801 = vst [vmem:[#allocation53_spill] sm:$0xff] %v8201_v33  ;;  %9802 = vst [vmem:[#allocation73_spill] sm:$0xff] %v8207_v29 }
 0x2b5   :  { %v5472_v4 = vpop.eup %5471  ;;  %v3161_v30 = vadd.f32 1.0, %v5470_v40  ;;  %v8203_v57 = vmul.f32 0.5, %v2117_v14  ;;  %v2657_v61 = vmul.f32 0.70710677, %v2117_v14  ;;  %v8205_v11 = vmul.f32 0.5, %v1766_v62 }
 0x2b6   :  { %v5474_v0 = vpop.eup %5473  ;;  %v8210_v26 = vmul.f32 %v3159_v24, %v8119_v15  ;;  %v3160_v32 = vadd.f32 1.0, %v5472_v4  ;;  %5483 = verf.f32 %v2655_v27  ;;  %v2656_v36 = vmul.f32 0.70710677, %v1766_v62  ;;  %v8222_v15 = vpop.f32.mrb[108].mxu1 }
 0x2b7   :  { %v8213_v2 = vmul.f32 %v3161_v30, %v8125_v9  ;;  %v3162_v33 = vadd.f32 1.0, %v5474_v0  ;;  %5485 = verf.f32 %v2657_v61  ;;  %v8215_v40 = vmul.f32 0.5, %v2119_v55  ;;  %9803 = vst [vmem:[#allocation55_spill] sm:$0xff] %v8222_v15  ;;  %v9804_v0 = vld [vmem:[#allocation74_spill] sm:$0xff]  ;;  %v8229_v4 = vpop.f32.mrb[109].mxu0 }
 0x2b8   :  { %v5476_v49 = vpop.eup %5475  ;;  %v8218_v14 = vmul.f32 %v3160_v32, %v8127_v41  ;;  %5487 = verf.f32 %v2656_v36  ;;  %v2658_v29 = vmul.f32 0.70710677, %v2119_v55  ;;  %v8220_v34 = vmul.f32 0.5, %v1768_v35  ;;  %9805 = vst [vmem:[#allocation56_spill] sm:$0xff] %v8229_v4  ;;  %v9806_v41 = vld [vmem:[#allocation75_spill] sm:$0xff]  ;;  %v9807_v55 = vld [vmem:[#allocation76_spill] sm:$0xff] }
 0x2b9   :  { %v8225_v24 = vmul.f32 %v3162_v33, %v8135_v38  ;;  %v3163_v62 = vadd.f32 1.0, %v5476_v49  ;;  %v2659_v9 = vmul.f32 0.70710677, %v1768_v35  ;;  %v2121_v27 = vadd.f32 %v9804_v0, %v6561_v51  ;;  %v8237_v38 = vpop.f32.mrb[109].mxu1 }
 0x2ba   :  { %v5478_v30 = vpop.eup %5477  ;;  %5489 = verf.f32 %v2658_v29  ;;  %v1770_v61 = vadd.f32 %v9806_v41, %v6566_v3  ;;  %v2123_v32 = vadd.f32 %v9807_v55, %v6569_v16  ;;  %v3651_v36 = vpack.c.bf16 %v7920_v25, %v7890_v31  ;;  %9808 = vst [vmem:[#allocation30_spill] sm:$0xff] %v8237_v38  ;;  %v8244_v29 = vpop.f32.mrb[110].mxu0 }
 0x2bb   :  { %v5480_v49 = vpop.eup %5479  ;;  %v8240_v35 = vmul.f32 %v3163_v62, %v8140_v6  ;;  %v3165_v33 = vadd.f32 1.0, %v5478_v30  ;;  %5491 = verf.f32 %v2659_v9  ;;  %v8242_v0 = vmul.f32 0.5, %v2121_v27  ;;  %9809 = vst [vmem:[#allocation74_spill] sm:$0xff] %v8244_v29  ;;  %v8253_v62 = vpop.f32.mrb[110].mxu1 }
 0x2bc   :  { %v5482_v4 = vpop.eup %5481  ;;  %v3164_v41 = vadd.f32 1.0, %v5480_v49  ;;  %v2661_v15 = vmul.f32 0.70710677, %v2121_v27  ;;  %v8246_v18 = vmul.f32 0.5, %v1770_v61  ;;  %v2660_v55 = vmul.f32 0.70710677, %v1770_v61  ;;  %4120 = vmatmul.mubr.bf16.gmra.mrb[180].mxu0 %v3651_v36 }
 0x2bd   :  { %v8249_v31 = vmul.f32 %v3165_v33, %v8162_v44  ;;  %v3166_v25 = vadd.f32 1.0, %v5482_v4  ;;  %v8251_v38 = vmul.f32 0.5, %v2123_v32  ;;  %v2662_v6 = vmul.f32 0.70710677, %v2123_v32  ;;  %9810 = vst [vmem:[#allocation75_spill] sm:$0xff] %v8253_v62  ;;  %v9811_v4 = vld [vmem:[#allocation23_spill] sm:$0xff] }
 0x2be   :  { %v8256_v9 = vmul.f32 %v3164_v41, %v8164_v12  ;;  %5493 = verf.f32 %v2661_v15  ;;  %v3653_v27 = vpack.c.bf16 %v7929_v22, %v7893_v46  ;;  %v3656_v30 = vpack.c.bf16 %v8020_v52, %v7978_v48  ;;  %v8269_v36 = vpop.f32.mrb[111].mxu0  ;;  %v9813_v46 = vld [vmem:[#allocation35_spill] sm:$0xff]  ;;  %v8277_v49 = vpop.f32.mrb[111].mxu1 }
 0x2bf   :  { %v8263_v61 = vmul.f32 %v3166_v25, %v8166_v50  ;;  %5495 = verf.f32 %v2660_v55  ;;  %v3658_v44 = vpack.c.bf16 %v8027_v58, %v7989_v1  ;;  %v1774_v32 = vadd.f32 %v9811_v4, %v6551_v59  ;;  %9812 = vst [vmem:[#allocation76_spill] sm:$0xff] %v8269_v36  ;;  %v9814_v48 = vld [vmem:[#allocation31_spill] sm:$0xff]  ;;  %v9815_v50 = vld [vmem:[#allocation22_spill] sm:$0xff]  ;;  %9816 = vst [vmem:[#allocation23_spill] sm:$0xff] %v8277_v49 }
 0x2c0   :  { %v5484_v12 = vpop.eup %5483  ;;  %5497 = verf.f32 %v2662_v6  ;;  %4409 = vmatmul.mubr.bf16.gmra.mrb[180].mxu1 %v3653_v27  ;;  %4127 = vmatprep.mubr.bf16.mxu0 %v3656_v30  ;;  %v2127_v22 = vadd.f32 %v9813_v46, %v6561_v51  ;;  %v1776_v52 = vadd.f32 %v9814_v48, %v6566_v3  ;;  %v2129_v15 = vadd.f32 %v9815_v50, %v6569_v16  ;;  %v9817_v55 = vld [vmem:[#allocation19_spill] sm:$0xff]  ;;  %v8283_v6 = vpop.f32.mrb[112].mxu0 }
 0x2c1   :  { %v5486_v1 = vpop.eup %5485  ;;  %v3167_v58 = vadd.f32 1.0, %v5484_v12  ;;  %4416 = vmatprep.mubr.bf16.mxu1 %v3658_v44  ;;  %v8279_v33 = vmul.f32 0.5, %v1774_v32  ;;  %v2663_v41 = vmul.f32 0.70710677, %v1774_v32  ;;  %v1778_v25 = vadd.f32 %v9817_v55, %v6551_v59  ;;  %9818 = vst [vmem:[#allocation35_spill] sm:$0xff] %v8283_v6 }
 0x2c2   :  { %v5488_v27 = vpop.eup %5487  ;;  %v3169_v30 = vadd.f32 1.0, %v5486_v1  ;;  %v8285_v4 = vmul.f32 0.5, %v2127_v22  ;;  %v2665_v46 = vmul.f32 0.70710677, %v2127_v22  ;;  %v8287_v48 = vmul.f32 0.5, %v1776_v52 }
 0x2c3   :  { %v8290_v50 = vmul.f32 %v3167_v58, %v8197_v43  ;;  %v3168_v12 = vadd.f32 1.0, %v5488_v27  ;;  %5499 = verf.f32 %v2663_v41  ;;  %v2664_v44 = vmul.f32 0.70710677, %v1776_v52  ;;  %v8302_v43 = vpop.f32.mrb[112].mxu1  ;;  %v8306_v27 = vpop.f32.mrb[113].mxu0 }
 0x2c4   :  { %v5490_v49 = vpop.eup %5489  ;;  %v8293_v32 = vmul.f32 %v3169_v30, %v8203_v57  ;;  %5501 = verf.f32 %v2665_v46  ;;  %v8295_v55 = vmul.f32 0.5, %v2129_v15  ;;  %v2666_v6 = vmul.f32 0.70710677, %v2129_v15  ;;  %9819 = vst [vmem:[#allocation31_spill] sm:$0xff] %v8302_v43  ;;  %v9820_v57 = vld [vmem:[#allocation20_spill] sm:$0xff]  ;;  %9821 = vst [vmem:[#allocation22_spill] sm:$0xff] %v8306_v27 }
 0x2c5   :  { %v5492_v1 = vpop.eup %5491  ;;  %v8298_v36 = vmul.f32 %v3168_v12, %v8205_v11  ;;  %v3170_v22 = vadd.f32 1.0, %v5490_v49  ;;  %5503 = verf.f32 %v2664_v44  ;;  %v8300_v62 = vmul.f32 0.5, %v1778_v25  ;;  %v9822_v11 = vld [vmem:[#allocation77_spill] sm:$0xff]  ;;  %v9823_v49 = vld [vmem:[#allocation78_spill] sm:$0xff]  ;;  %v8317_v44 = vpop.f32.mrb[113].mxu1 }
 0x2c6   :  { %v3171_v58 = vadd.f32 1.0, %v5492_v1  ;;  %5505 = verf.f32 %v2666_v6  ;;  %v2667_v52 = vmul.f32 0.70710677, %v1778_v25  ;;  %v2131_v41 = vadd.f32 %v9820_v57, %v6561_v51  ;;  %9824 = vst [vmem:[#allocation19_spill] sm:$0xff] %v8317_v44 }
 0x2c7   :  { %v8309_v15 = vmul.f32 %v3170_v22, %v8215_v40  ;;  %v1780_v30 = vadd.f32 %v9822_v11, %v6566_v3  ;;  %v2133_v46 = vadd.f32 %v9823_v49, %v6569_v16  ;;  %v3655_v12 = vpack.c.bf16 %v8000_v45, %v7970_v19  ;;  %v8328_v49 = vpop.f32.mrb[114].mxu0 }
 0x2c8   :  { %v5494_v25 = vpop.eup %5493  ;;  %v8320_v6 = vmul.f32 %v3171_v58, %v8220_v34  ;;  %5507 = verf.f32 %v2667_v52  ;;  %v8322_v1 = vmul.f32 0.5, %v2131_v41  ;;  %v2669_v40 = vmul.f32 0.70710677, %v2131_v41  ;;  %9825 = vst [vmem:[#allocation20_spill] sm:$0xff] %v8328_v49  ;;  %v8332_v58 = vpop.f32.mrb[114].mxu1 }
 0x2c9   :  { %v5496_v22 = vpop.eup %5495  ;;  %v3173_v57 = vadd.f32 1.0, %v5494_v25  ;;  %v8324_v27 = vmul.f32 0.5, %v1780_v30  ;;  %v2668_v11 = vmul.f32 0.70710677, %v1780_v30  ;;  %v8326_v43 = vmul.f32 0.5, %v2133_v46  ;;  %4128 = vmatmul.mubr.bf16.gmra.mrb[184].mxu0 %v3655_v12  ;;  %9826 = vst [vmem:[#allocation77_spill] sm:$0xff] %v8332_v58 }
 0x2ca   :  { %v5498_v19 = vpop.eup %5497  ;;  %v3172_v45 = vadd.f32 1.0, %v5496_v22  ;;  %5509 = verf.f32 %v2669_v40  ;;  %v2670_v44 = vmul.f32 0.70710677, %v2133_v46  ;;  %v3657_v34 = vpack.c.bf16 %v8015_v37, %v7973_v54  ;;  %v9827_v54 = vld [vmem:[#allocation37_spill] sm:$0xff]  ;;  %v9828_v40 = vld [vmem:[#allocation38_spill] sm:$0xff] }
 0x2cb   :  { %v8335_v52 = vmul.f32 %v3173_v57, %v8242_v0  ;;  %v3174_v41 = vadd.f32 1.0, %v5498_v19  ;;  %5511 = verf.f32 %v2668_v11  ;;  %v3660_v30 = vpack.c.bf16 %v8096_v17, %v8058_v8  ;;  %v9829_v8 = vld [vmem:[#allocation40_spill] sm:$0xff]  ;;  %v9830_v17 = vld [vmem:[#allocation79_spill] sm:$0xff]  ;;  %v8355_v57 = vpop.f32.mrb[115].mxu0 }
 0x2cc   :  { %v8340_v12 = vmul.f32 %v3172_v45, %v8246_v18  ;;  %5513 = verf.f32 %v2670_v44  ;;  %4417 = vmatmul.mubr.bf16.gmra.mrb[184].mxu1 %v3657_v34  ;;  %v3662_v46 = vpack.c.bf16 %v8103_v53, %v8065_v56  ;;  %v1784_v37 = vadd.f32 %v9827_v54, %v6551_v59  ;;  %9831 = vst [vmem:[#allocation78_spill] sm:$0xff] %v8355_v57  ;;  %v8361_v34 = vpop.f32.mrb[115].mxu1 }
 0x2cd   :  { %v5500_v25 = vpop.eup %5499  ;;  %v8347_v0 = vmul.f32 %v3174_v41, %v8251_v38  ;;  %4135 = vmatprep.mubr.bf16.mxu0 %v3660_v30  ;;  %v2137_v22 = vadd.f32 %v9828_v40, %v6561_v51  ;;  %v1786_v18 = vadd.f32 %v9829_v8, %v6566_v3  ;;  %v2139_v44 = vadd.f32 %v9830_v17, %v6569_v16  ;;  %v9832_v38 = vld [vmem:[#allocation80_spill] sm:$0xff]  ;;  %v8367_v17 = vpop.f32.mrb[116].mxu0 }
 0x2ce   :  { %v5502_v56 = vpop.eup %5501  ;;  %v3175_v53 = vadd.f32 1.0, %v5500_v25  ;;  %4424 = vmatprep.mubr.bf16.mxu1 %v3662_v46  ;;  %v8357_v11 = vmul.f32 0.5, %v1784_v37  ;;  %v2671_v19 = vmul.f32 0.70710677, %v1784_v37  ;;  %v1788_v45 = vadd.f32 %v9832_v38, %v6551_v59  ;;  %9833 = vst [vmem:[#allocation37_spill] sm:$0xff] %v8361_v34  ;;  %9834 = vst [vmem:[#allocation38_spill] sm:$0xff] %v8367_v17 }
 0x2cf   :  { %v5504_v41 = vpop.eup %5503  ;;  %v3177_v30 = vadd.f32 1.0, %v5502_v56  ;;  %v8363_v54 = vmul.f32 0.5, %v2137_v22  ;;  %v2673_v40 = vmul.f32 0.70710677, %v2137_v22  ;;  %v8365_v8 = vmul.f32 0.5, %v1786_v18 }
 0x2d0   :  { %v5506_v57 = vpop.eup %5505  ;;  %v8370_v46 = vmul.f32 %v3175_v53, %v8279_v33  ;;  %v3176_v25 = vadd.f32 1.0, %v5504_v41  ;;  %5515 = verf.f32 %v2671_v19  ;;  %v2672_v37 = vmul.f32 0.70710677, %v1786_v18  ;;  %v8382_v33 = vpop.f32.mrb[116].mxu1 }
 0x2d1   :  { %v8373_v38 = vmul.f32 %v3177_v30, %v8285_v4  ;;  %v3178_v34 = vadd.f32 1.0, %v5506_v57  ;;  %5517 = verf.f32 %v2673_v40  ;;  %v8375_v56 = vmul.f32 0.5, %v2139_v44  ;;  %9835 = vst [vmem:[#allocation40_spill] sm:$0xff] %v8382_v33  ;;  %v9836_v57 = vld [vmem:[#allocation81_spill] sm:$0xff]  ;;  %v8389_v41 = vpop.f32.mrb[117].mxu0 }
 0x2d2   :  { %v5508_v58 = vpop.eup %5507  ;;  %v8378_v22 = vmul.f32 %v3176_v25, %v8287_v48  ;;  %5519 = verf.f32 %v2672_v37  ;;  %v2674_v17 = vmul.f32 0.70710677, %v2139_v44  ;;  %v8380_v49 = vmul.f32 0.5, %v1788_v45  ;;  %9837 = vst [vmem:[#allocation79_spill] sm:$0xff] %v8389_v41  ;;  %v9838_v48 = vld [vmem:[#allocation41_spill] sm:$0xff]  ;;  %v9839_v44 = vld [vmem:[#allocation27_spill] sm:$0xff] }
 0x2d3   :  { %v8385_v53 = vmul.f32 %v3178_v34, %v8295_v55  ;;  %v3179_v18 = vadd.f32 1.0, %v5508_v58  ;;  %v2675_v4 = vmul.f32 0.70710677, %v1788_v45  ;;  %v2141_v19 = vadd.f32 %v9836_v57, %v6561_v51  ;;  %v8397_v55 = vpop.f32.mrb[117].mxu1 }
 0x2d4   :  { %v5510_v30 = vpop.eup %5509  ;;  %5521 = verf.f32 %v2674_v17  ;;  %v1790_v40 = vadd.f32 %v9838_v48, %v6566_v3  ;;  %v2143_v25 = vadd.f32 %v9839_v44, %v6569_v16  ;;  %v3659_v37 = vpack.c.bf16 %v8080_v39, %v8050_v63  ;;  %9840 = vst [vmem:[#allocation80_spill] sm:$0xff] %v8397_v55  ;;  %v8404_v17 = vpop.f32.mrb[118].mxu0 }
 0x2d5   :  { %v5512_v58 = vpop.eup %5511  ;;  %v8400_v45 = vmul.f32 %v3179_v18, %v8300_v62  ;;  %v3181_v34 = vadd.f32 1.0, %v5510_v30  ;;  %5523 = verf.f32 %v2675_v4  ;;  %v8402_v57 = vmul.f32 0.5, %v2141_v19  ;;  %9841 = vst [vmem:[#allocation81_spill] sm:$0xff] %v8404_v17  ;;  %v8413_v18 = vpop.f32.mrb[118].mxu1 }
 0x2d6   :  { %v5514_v41 = vpop.eup %5513  ;;  %v3180_v48 = vadd.f32 1.0, %v5512_v58  ;;  %v2677_v33 = vmul.f32 0.70710677, %v2141_v19  ;;  %v8406_v29 = vmul.f32 0.5, %v1790_v40  ;;  %v2676_v44 = vmul.f32 0.70710677, %v1790_v40  ;;  %4136 = vmatmul.mubr.bf16.gmra.mrb[188].mxu0 %v3659_v37 }
 0x2d7   :  { %v8409_v63 = vmul.f32 %v3181_v34, %v8322_v1  ;;  %v3182_v39 = vadd.f32 1.0, %v5514_v41  ;;  %v8411_v55 = vmul.f32 0.5, %v2143_v25  ;;  %v2678_v62 = vmul.f32 0.70710677, %v2143_v25  ;;  %9842 = vst [vmem:[#allocation41_spill] sm:$0xff] %v8413_v18  ;;  %v9843_v41 = vld [vmem:[#allocation32_spill] sm:$0xff] }
 0x2d8   :  { %v8416_v4 = vmul.f32 %v3180_v48, %v8324_v27  ;;  %5525 = verf.f32 %v2677_v33  ;;  %v3661_v19 = vpack.c.bf16 %v8089_v20, %v8053_v10  ;;  %v3664_v30 = vpack.c.bf16 %v8180_v5, %v8138_v13  ;;  %v8429_v37 = vpop.f32.mrb[119].mxu0  ;;  %v9845_v10 = vld [vmem:[#allocation82_spill] sm:$0xff]  ;;  %v9846_v13 = vld [vmem:[#allocation28_spill] sm:$0xff]  ;;  %v8437_v58 = vpop.f32.mrb[119].mxu1 }
 0x2d9   :  { %v8423_v40 = vmul.f32 %v3182_v39, %v8326_v43  ;;  %5527 = verf.f32 %v2676_v44  ;;  %v3666_v1 = vpack.c.bf16 %v8187_v28, %v8149_v42  ;;  %v1794_v25 = vadd.f32 %v9843_v41, %v6551_v59  ;;  %9844 = vst [vmem:[#allocation27_spill] sm:$0xff] %v8429_v37  ;;  %v9847_v43 = vld [vmem:[#allocation34_spill] sm:$0xff]  ;;  %9848 = vst [vmem:[#allocation32_spill] sm:$0xff] %v8437_v58  ;;  %v9849_v44 = vld [vmem:[#allocation57_spill] sm:$0xff] }
 0x2da   :  { %v5516_v27 = vpop.eup %5515  ;;  %5529 = verf.f32 %v2678_v62  ;;  %4425 = vmatmul.mubr.bf16.gmra.mrb[188].mxu1 %v3661_v19  ;;  %4143 = vmatprep.mubr.bf16.mxu0 %v3664_v30  ;;  %v2147_v20 = vadd.f32 %v9845_v10, %v6561_v51  ;;  %v1796_v5 = vadd.f32 %v9846_v13, %v6566_v3  ;;  %v2149_v33 = vadd.f32 %v9847_v43, %v6569_v16  ;;  %v8443_v62 = vpop.f32.mrb[120].mxu0 }
 0x2db   :  { %v5518_v42 = vpop.eup %5517  ;;  %v3183_v28 = vadd.f32 1.0, %v5516_v27  ;;  %4432 = vmatprep.mubr.bf16.mxu1 %v3666_v1  ;;  %v8439_v34 = vmul.f32 0.5, %v1794_v25  ;;  %v2679_v48 = vmul.f32 0.70710677, %v1794_v25  ;;  %v1798_v39 = vadd.f32 %v9849_v44, %v6551_v59  ;;  %9850 = vst [vmem:[#allocation82_spill] sm:$0xff] %v8443_v62 }
 0x2dc   :  { %v5520_v19 = vpop.eup %5519  ;;  %v3185_v30 = vadd.f32 1.0, %v5518_v42  ;;  %v8445_v41 = vmul.f32 0.5, %v2147_v20  ;;  %v2681_v10 = vmul.f32 0.70710677, %v2147_v20  ;;  %v8447_v13 = vmul.f32 0.5, %v1796_v5 }
 0x2dd   :  { %v8450_v43 = vmul.f32 %v3183_v28, %v8357_v11  ;;  %v3184_v27 = vadd.f32 1.0, %v5520_v19  ;;  %5531 = verf.f32 %v2679_v48  ;;  %v2680_v1 = vmul.f32 0.70710677, %v1796_v5  ;;  %v8462_v11 = vpop.f32.mrb[120].mxu1  ;;  %v8466_v19 = vpop.f32.mrb[121].mxu0 }
 0x2de   :  { %v5522_v58 = vpop.eup %5521  ;;  %v8453_v25 = vmul.f32 %v3185_v30, %v8363_v54  ;;  %5533 = verf.f32 %v2681_v10  ;;  %v8455_v44 = vmul.f32 0.5, %v2149_v33  ;;  %v2682_v62 = vmul.f32 0.70710677, %v2149_v33  ;;  %9851 = vst [vmem:[#allocation28_spill] sm:$0xff] %v8462_v11  ;;  %v9852_v54 = vld [vmem:[#allocation83_spill] sm:$0xff]  ;;  %9853 = vst [vmem:[#allocation34_spill] sm:$0xff] %v8466_v19 }
 0x2df   :  { %v5524_v42 = vpop.eup %5523  ;;  %v8458_v37 = vmul.f32 %v3184_v27, %v8365_v8  ;;  %v3186_v20 = vadd.f32 1.0, %v5522_v58  ;;  %5535 = verf.f32 %v2680_v1  ;;  %v8460_v18 = vmul.f32 0.5, %v1798_v39  ;;  %v9854_v8 = vld [vmem:[#allocation64_spill] sm:$0xff]  ;;  %v9855_v58 = vld [vmem:[#allocation58_spill] sm:$0xff]  ;;  %v8477_v1 = vpop.f32.mrb[121].mxu1 }
 0x2e0   :  { %v3187_v28 = vadd.f32 1.0, %v5524_v42  ;;  %5537 = verf.f32 %v2682_v62  ;;  %v2683_v5 = vmul.f32 0.70710677, %v1798_v39  ;;  %v2151_v48 = vadd.f32 %v9852_v54, %v6561_v51  ;;  %9856 = vst [vmem:[#allocation57_spill] sm:$0xff] %v8477_v1 }
 0x2e1   :  { %v8469_v33 = vmul.f32 %v3186_v20, %v8375_v56  ;;  %v1800_v30 = vadd.f32 %v9854_v8, %v6566_v3  ;;  %v2153_v10 = vadd.f32 %v9855_v58, %v6569_v16  ;;  %v3663_v27 = vpack.c.bf16 %v8160_v60, %v8130_v47  ;;  %v8488_v58 = vpop.f32.mrb[122].mxu0 }
 0x2e2   :  { %v5526_v39 = vpop.eup %5525  ;;  %v8480_v62 = vmul.f32 %v3187_v28, %v8380_v49  ;;  %5539 = verf.f32 %v2683_v5  ;;  %v8482_v42 = vmul.f32 0.5, %v2151_v48  ;;  %v2685_v56 = vmul.f32 0.70710677, %v2151_v48  ;;  %9857 = vst [vmem:[#allocation83_spill] sm:$0xff] %v8488_v58  ;;  %v8492_v28 = vpop.f32.mrb[122].mxu1 }
 0x2e3   :  { %v5528_v20 = vpop.eup %5527  ;;  %v3189_v54 = vadd.f32 1.0, %v5526_v39  ;;  %v8484_v19 = vmul.f32 0.5, %v1800_v30  ;;  %v2684_v8 = vmul.f32 0.70710677, %v1800_v30  ;;  %v8486_v11 = vmul.f32 0.5, %v2153_v10  ;;  %4144 = vmatmul.mubr.bf16.gmra.mrb[192].mxu0 %v3663_v27  ;;  %9858 = vst [vmem:[#allocation64_spill] sm:$0xff] %v8492_v28 }
 0x2e4   :  { %v5530_v47 = vpop.eup %5529  ;;  %v3188_v60 = vadd.f32 1.0, %v5528_v20  ;;  %5541 = verf.f32 %v2685_v56  ;;  %v2686_v1 = vmul.f32 0.70710677, %v2153_v10  ;;  %v3665_v49 = vpack.c.bf16 %v8175_v23, %v8133_v21  ;;  %v9859_v21 = vld [vmem:[#allocation59_spill] sm:$0xff]  ;;  %v9860_v56 = vld [vmem:[#allocation60_spill] sm:$0xff] }
 0x2e5   :  { %v8495_v5 = vmul.f32 %v3189_v54, %v8402_v57  ;;  %v3190_v48 = vadd.f32 1.0, %v5530_v47  ;;  %5543 = verf.f32 %v2684_v8  ;;  %v3668_v30 = vpack.c.bf16 %v8256_v9, %v8218_v14  ;;  %v9861_v14 = vld [vmem:[#allocation61_spill] sm:$0xff]  ;;  %v9862_v9 = vld [vmem:[#allocation14_spill] sm:$0xff]  ;;  %v8515_v54 = vpop.f32.mrb[123].mxu0 }
 0x2e6   :  { %v8500_v27 = vmul.f32 %v3188_v60, %v8406_v29  ;;  %5545 = verf.f32 %v2686_v1  ;;  %4433 = vmatmul.mubr.bf16.gmra.mrb[192].mxu1 %v3665_v49  ;;  %v3670_v10 = vpack.c.bf16 %v8263_v61, %v8225_v24  ;;  %v1804_v23 = vadd.f32 %v9859_v21, %v6551_v59  ;;  %9863 = vst [vmem:[#allocation58_spill] sm:$0xff] %v8515_v54  ;;  %v8521_v49 = vpop.f32.mrb[123].mxu1 }
 0x2e7   :  { %v5532_v39 = vpop.eup %5531  ;;  %v8507_v57 = vmul.f32 %v3190_v48, %v8411_v55  ;;  %4151 = vmatprep.mubr.bf16.mxu0 %v3668_v30  ;;  %v2157_v20 = vadd.f32 %v9860_v56, %v6561_v51  ;;  %v1806_v29 = vadd.f32 %v9861_v14, %v6566_v3  ;;  %v2159_v1 = vadd.f32 %v9862_v9, %v6569_v16  ;;  %v9864_v55 = vld [vmem:[#allocation43_spill] sm:$0xff]  ;;  %v8527_v9 = vpop.f32.mrb[124].mxu0 }
 0x2e8   :  { %v5534_v24 = vpop.eup %5533  ;;  %v3191_v61 = vadd.f32 1.0, %v5532_v39  ;;  %4440 = vmatprep.mubr.bf16.mxu1 %v3670_v10  ;;  %v8517_v8 = vmul.f32 0.5, %v1804_v23  ;;  %v2687_v47 = vmul.f32 0.70710677, %v1804_v23  ;;  %v1808_v60 = vadd.f32 %v9864_v55, %v6551_v59  ;;  %9865 = vst [vmem:[#allocation59_spill] sm:$0xff] %v8521_v49  ;;  %9866 = vst [vmem:[#allocation60_spill] sm:$0xff] %v8527_v9 }
 0x2e9   :  { %v5536_v48 = vpop.eup %5535  ;;  %v3193_v30 = vadd.f32 1.0, %v5534_v24  ;;  %v8523_v21 = vmul.f32 0.5, %v2157_v20  ;;  %v2689_v56 = vmul.f32 0.70710677, %v2157_v20  ;;  %v8525_v14 = vmul.f32 0.5, %v1806_v29 }
 0x2ea   :  { %v5538_v54 = vpop.eup %5537  ;;  %v8530_v10 = vmul.f32 %v3191_v61, %v8439_v34  ;;  %v3192_v39 = vadd.f32 1.0, %v5536_v48  ;;  %5547 = verf.f32 %v2687_v47  ;;  %v2688_v23 = vmul.f32 0.70710677, %v1806_v29  ;;  %v8542_v34 = vpop.f32.mrb[124].mxu1 }
 0x2eb   :  { %v8533_v55 = vmul.f32 %v3193_v30, %v8445_v41  ;;  %v3194_v49 = vadd.f32 1.0, %v5538_v54  ;;  %5549 = verf.f32 %v2689_v56  ;;  %v8535_v24 = vmul.f32 0.5, %v2159_v1  ;;  %9867 = vst [vmem:[#allocation61_spill] sm:$0xff] %v8542_v34  ;;  %v9868_v54 = vld [vmem:[#allocation36_spill] sm:$0xff]  ;;  %v8549_v48 = vpop.f32.mrb[125].mxu0 }
 0x2ec   :  { %v5540_v28 = vpop.eup %5539  ;;  %v8538_v20 = vmul.f32 %v3192_v39, %v8447_v13  ;;  %5551 = verf.f32 %v2688_v23  ;;  %v2690_v9 = vmul.f32 0.70710677, %v2159_v1  ;;  %v8540_v58 = vmul.f32 0.5, %v1808_v60  ;;  %9869 = vst [vmem:[#allocation14_spill] sm:$0xff] %v8549_v48  ;;  %v9870_v13 = vld [vmem:[#allocation42_spill] sm:$0xff]  ;;  %v9871_v1 = vld [vmem:[#allocation39_spill] sm:$0xff] }
 0x2ed   :  { %v8545_v61 = vmul.f32 %v3194_v49, %v8455_v44  ;;  %v3195_v29 = vadd.f32 1.0, %v5540_v28  ;;  %v2691_v41 = vmul.f32 0.70710677, %v1808_v60  ;;  %v2161_v47 = vadd.f32 %v9868_v54, %v6561_v51  ;;  %v8557_v44 = vpop.f32.mrb[125].mxu1 }
 0x2ee   :  { %v5542_v30 = vpop.eup %5541  ;;  %5553 = verf.f32 %v2690_v9  ;;  %v1810_v56 = vadd.f32 %v9870_v13, %v6566_v3  ;;  %v2163_v39 = vadd.f32 %v9871_v1, %v6569_v16  ;;  %v3667_v23 = vpack.c.bf16 %v8240_v35, %v8210_v26  ;;  %9872 = vst [vmem:[#allocation43_spill] sm:$0xff] %v8557_v44  ;;  %v8564_v9 = vpop.f32.mrb[126].mxu0 }
 0x2ef   :  { %v5544_v28 = vpop.eup %5543  ;;  %v8560_v60 = vmul.f32 %v3195_v29, %v8460_v18  ;;  %v3197_v49 = vadd.f32 1.0, %v5542_v30  ;;  %5555 = verf.f32 %v2691_v41  ;;  %v8562_v54 = vmul.f32 0.5, %v2161_v47  ;;  %v8573_v29 = vpop.f32.mrb[126].mxu1 }
 0x2f0   :  { %v5546_v48 = vpop.eup %5545  ;;  %v3196_v13 = vadd.f32 1.0, %v5544_v28  ;;  %v2693_v34 = vmul.f32 0.70710677, %v2161_v47  ;;  %v8566_v17 = vmul.f32 0.5, %v1810_v56  ;;  %v2692_v1 = vmul.f32 0.70710677, %v1810_v56  ;;  %4152 = vmatmul.mubr.bf16.gmra.mrb[196].mxu0 %v3667_v23 }
 0x2f1   :  { %v8569_v26 = vmul.f32 %v3197_v49, %v8482_v42  ;;  %v3198_v35 = vadd.f32 1.0, %v5546_v48  ;;  %v8571_v44 = vmul.f32 0.5, %v2163_v39  ;;  %v2694_v18 = vmul.f32 0.70710677, %v2163_v39  ;;  %9873 = vst [vmem:[#allocation36_spill] sm:$0xff] %v8573_v29  ;;  %v9874_v48 = vld [vmem:[#allocation15_spill] sm:$0xff] }
 0x2f2   :  { %v8576_v41 = vmul.f32 %v3196_v13, %v8484_v19  ;;  %5557 = verf.f32 %v2693_v34  ;;  %v3669_v47 = vpack.c.bf16 %v8249_v31, %v8213_v2  ;;  %v3672_v30 = vpack.c.bf16 %v8340_v12, %v8298_v36  ;;  %v8589_v23 = vpop.f32.mrb[127].mxu0  ;;  %v9876_v2 = vld [vmem:[#allocation46_spill] sm:$0xff]  ;;  %v9877_v36 = vld [vmem:[#allocation47_spill] sm:$0xff]  ;;  %v8597_v28 = vpop.f32.mrb[127].mxu1 }
 0x2f3   :  { %v8583_v56 = vmul.f32 %v3198_v35, %v8486_v11  ;;  %5559 = verf.f32 %v2692_v1  ;;  %v3674_v42 = vpack.c.bf16 %v8347_v0, %v8309_v15  ;;  %v1814_v39 = vadd.f32 %v9874_v48, %v6551_v59  ;;  %9875 = vst [vmem:[#allocation42_spill] sm:$0xff] %v8589_v23  ;;  %v9878_v11 = vld [vmem:[#allocation48_spill] sm:$0xff]  ;;  %9879 = vst [vmem:[#allocation39_spill] sm:$0xff] %v8597_v28  ;;  %v8603_v35 = vpop.f32.mrb[128].mxu0 }
 0x2f4   :  { %v5548_v19 = vpop.eup %5547  ;;  %5561 = verf.f32 %v2694_v18  ;;  %4441 = vmatmul.mubr.bf16.gmra.mrb[196].mxu1 %v3669_v47  ;;  %4159 = vmatprep.mubr.bf16.mxu0 %v3672_v30  ;;  %v2167_v31 = vadd.f32 %v9876_v2, %v6561_v51  ;;  %v1816_v12 = vadd.f32 %v9877_v36, %v6566_v3  ;;  %v2169_v34 = vadd.f32 %v9878_v11, %v6569_v16  ;;  %v8605_v18 = vpop.f32.mrb[128].mxu1 }
 0x2f5   :  { %v5550_v15 = vpop.eup %5549  ;;  %v3199_v0 = vadd.f32 1.0, %v5548_v19  ;;  %4448 = vmatprep.mubr.bf16.mxu1 %v3674_v42  ;;  %v8599_v49 = vmul.f32 0.5, %v1814_v39  ;;  %v2695_v13 = vmul.f32 0.70710677, %v1814_v39  ;;  %v1818_v1 = vadd.f32 %v7924_v7, %v6551_v59  ;;  %9880 = vst [vmem:[#allocation15_spill] sm:$0xff] %v8603_v35  ;;  %9881 = vst [vmem:[#allocation46_spill] sm:$0xff] %v8605_v18 }
 0x2f6   :  { %v5552_v47 = vpop.eup %5551  ;;  %v3201_v30 = vadd.f32 1.0, %v5550_v15  ;;  %v8607_v48 = vmul.f32 0.5, %v2167_v31  ;;  %v2697_v2 = vmul.f32 0.70710677, %v2167_v31  ;;  %v8609_v36 = vmul.f32 0.5, %v1816_v12  ;;  %v4019_v11 = vpop.f32.mrb[129].mxu0 }
 0x2f7   :  { %v8612_v42 = vmul.f32 %v3199_v0, %v8517_v8  ;;  %v3200_v19 = vadd.f32 1.0, %v5552_v47  ;;  %5563 = verf.f32 %v2695_v13  ;;  %v2696_v39 = vmul.f32 0.70710677, %v1816_v12  ;;  %v4308_v28 = vpop.f32.mrb[129].mxu1  ;;  %v8619_v23 = vpop.f32.mrb[130].mxu0 }
 0x2f8   :  { %v5554_v7 = vpop.eup %5553  ;;  %v8615_v35 = vmul.f32 %v3201_v30, %v8523_v21  ;;  %5565 = verf.f32 %v2697_v2  ;;  %v8617_v18 = vmul.f32 0.5, %v2169_v34  ;;  %v2698_v15 = vmul.f32 0.70710677, %v2169_v34  ;;  %9882 = vst [vmem:[#allocation47_spill] sm:$0xff] %v8619_v23  ;;  %v8621_v31 = vpop.f32.mrb[130].mxu1  ;;  %v9884_v30 = vld [vmem:[#allocation62_spill] sm:$0xff] }
 0x2f9   :  { %9883 = vst [vmem:[#allocation48_spill] sm:$0xff] %v8621_v31  ;;  %v5556_v11 = vpop.eup %5555  ;;  %v8624_v8 = vmul.f32 %v3200_v19, %v8525_v14  ;;  %v3202_v0 = vadd.f32 1.0, %v5554_v7  ;;  %5567 = verf.f32 %v2696_v39  ;;  %v8626_v12 = vmul.f32 0.5, %v1818_v1  ;;  %v4022_v28 = vpop.f32.mrb[131].mxu0  ;;  %v9887_v14 = vld [vmem:[#allocation63_spill] sm:$0xff]  ;;  %v9888_v39 = vld [vmem:[#allocation65_spill] sm:$0xff] }
 0x2fa   :  { %v4311_v13 = vpop.f32.mrb[131].mxu1  ;;  %v3203_v21 = vadd.f32 1.0, %v5556_v11  ;;  %5569 = verf.f32 %v2698_v15  ;;  %v2699_v47 = vmul.f32 0.70710677, %v1818_v1  ;;  %v2171_v34 = vadd.f32 %v9884_v30, %v6561_v51  ;;  %v8630_v2 = vpop.f32.mrb[132].mxu0 }
 0x2fb   :  { %9885 = vst [vmem:[#allocation62_spill] sm:$0xff] %v8630_v2  ;;  %v8632_v23 = vpop.f32.mrb[132].mxu1  ;;  %v8635_v31 = vmul.f32 %v3202_v0, %v8535_v24  ;;  %v1820_v19 = vadd.f32 %v9887_v14, %v6566_v3  ;;  %v2173_v7 = vadd.f32 %v9888_v39, %v6569_v16  ;;  %v3671_v15 = vpack.c.bf16 %v8320_v6, %v8290_v50  ;;  %v4027_v1 = vpop.f32.mrb[133].mxu0 }
 0x2fc   :  { %9886 = vst [vmem:[#allocation84_spill] sm:$0xff] %v8632_v23  ;;  %v4316_v11 = vpop.f32.mrb[133].mxu1  ;;  %v5558_v28 = vpop.eup %5557  ;;  %v8644_v13 = vmul.f32 %v3203_v21, %v8540_v58  ;;  %5571 = verf.f32 %v2699_v47  ;;  %v8646_v30 = vmul.f32 0.5, %v2171_v34  ;;  %v2701_v24 = vmul.f32 0.70710677, %v2171_v34 }
 0x2fd   :  { %v8648_v0 = vpop.f32.mrb[134].mxu0  ;;  %v8650_v23 = vpop.f32.mrb[134].mxu1  ;;  %v3205_v2 = vadd.f32 1.0, %v5558_v28  ;;  %v8652_v39 = vmul.f32 0.5, %v1820_v19  ;;  %v2700_v29 = vmul.f32 0.70710677, %v1820_v19  ;;  %4160 = vmatmul.mubr.bf16.gmra.mrb[200].mxu0 %v3671_v15  ;;  %v3673_v47 = vpack.c.bf16 %v8335_v52, %v8293_v32 }
 0x2fe   :  { %9889 = vst [vmem:[#allocation63_spill] sm:$0xff] %v8648_v0  ;;  %9890 = vst [vmem:[#allocation65_spill] sm:$0xff] %v8650_v23  ;;  %v5560_v14 = vpop.eup %5559  ;;  %v8654_v50 = vmul.f32 0.5, %v2173_v7  ;;  %v4030_v6 = vpop.f32.mrb[135].mxu0  ;;  %5573 = verf.f32 %v2701_v24  ;;  %v2702_v21 = vmul.f32 0.70710677, %v2173_v7  ;;  %v3676_v19 = vpack.c.bf16 %v8416_v4, %v8378_v22 }
 0x2ff   :  { %v5562_v1 = vpop.eup %5561  ;;  %v3204_v58 = vadd.f32 1.0, %v5560_v14  ;;  %v4319_v34 = vpop.f32.mrb[135].mxu1  ;;  %v8659_v11 = vmul.f32 %v3205_v2, %v8562_v54  ;;  %5575 = verf.f32 %v2700_v29  ;;  %4449 = vmatmul.mubr.bf16.gmra.mrb[200].mxu1 %v3673_v47  ;;  %v3678_v7 = vpack.c.bf16 %v8423_v40, %v8385_v53  ;;  %v9891_v15 = vld [vmem:[#allocation49_spill] sm:$0xff]  ;;  %v9892_v29 = vld [vmem:[#allocation51_spill] sm:$0xff]  ;;  %v9893_v22 = vld [vmem:[#allocation52_spill] sm:$0xff] }
 0x300   :  { %v3206_v23 = vadd.f32 1.0, %v5562_v1  ;;  %5577 = verf.f32 %v2702_v21  ;;  %v1824_v32 = vadd.f32 %v9891_v15, %v6551_v59  ;;  %4167 = vmatprep.mubr.bf16.mxu0 %v3676_v19  ;;  %v2177_v2 = vadd.f32 %v9892_v29, %v6561_v51  ;;  %v9894_v4 = vld [vmem:[#allocation44_spill] sm:$0xff]  ;;  %v8679_v14 = vpop.f32.mrb[136].mxu0  ;;  %v8681_v53 = vpop.f32.mrb[136].mxu1 }
 0x301   :  { %v8664_v28 = vmul.f32 %v3204_v58, %v8566_v17  ;;  %v5564_v52 = vpop.eup %5563  ;;  %v1826_v17 = vadd.f32 %v9893_v22, %v6566_v3  ;;  %v2179_v24 = vadd.f32 %v9894_v4, %v6569_v16  ;;  %9895 = vst [vmem:[#allocation49_spill] sm:$0xff] %v8679_v14  ;;  %9896 = vst [vmem:[#allocation51_spill] sm:$0xff] %v8681_v53  ;;  %4456 = vmatprep.mubr.bf16.mxu1 %v3678_v7  ;;  %v4035_v21 = vpop.f32.mrb[137].mxu0 }
 0x302   :  { %v8671_v54 = vmul.f32 %v3206_v23, %v8571_v44  ;;  %v5566_v40 = vpop.eup %5565  ;;  %v3207_v6 = vadd.f32 1.0, %v5564_v52  ;;  %v8683_v1 = vmul.f32 0.5, %v1824_v32  ;;  %v2703_v44 = vmul.f32 0.70710677, %v1824_v32  ;;  %v9897_v23 = vld [vmem:[#allocation50_spill] sm:$0xff]  ;;  %v4324_v47 = vpop.f32.mrb[137].mxu1 }
 0x303   :  { %v1828_v58 = vadd.f32 %v9897_v23, %v6551_v59  ;;  %v5568_v34 = vpop.eup %5567  ;;  %v3209_v19 = vadd.f32 1.0, %v5566_v40  ;;  %v8687_v15 = vmul.f32 0.5, %v2177_v2  ;;  %v2705_v29 = vmul.f32 0.70710677, %v2177_v2  ;;  %v8691_v4 = vpop.f32.mrb[138].mxu0 }
 0x304   :  { %v8689_v22 = vmul.f32 0.5, %v1826_v17  ;;  %9898 = vst [vmem:[#allocation52_spill] sm:$0xff] %v8691_v4  ;;  %v5570_v53 = vpop.eup %5569  ;;  %v8694_v7 = vmul.f32 %v3207_v6, %v8599_v49  ;;  %v3208_v52 = vadd.f32 1.0, %v5568_v34  ;;  %5579 = verf.f32 %v2703_v44  ;;  %v8696_v14 = vpop.f32.mrb[138].mxu1 }
 0x305   :  { %v2704_v32 = vmul.f32 0.70710677, %v1826_v17  ;;  %9899 = vst [vmem:[#allocation44_spill] sm:$0xff] %v8696_v14  ;;  %v4038_v23 = vpop.f32.mrb[139].mxu0  ;;  %v8699_v21 = vmul.f32 %v3209_v19, %v8607_v48  ;;  %v3210_v40 = vadd.f32 1.0, %v5570_v53  ;;  %5581 = verf.f32 %v2705_v29  ;;  %v4327_v47 = vpop.f32.mrb[139].mxu1 }
 0x306   :  { %v8701_v2 = vmul.f32 0.5, %v2179_v24  ;;  %v5572_v0 = vpop.eup %5571  ;;  %v8704_v4 = vmul.f32 %v3208_v52, %v8609_v36  ;;  %v2706_v49 = vmul.f32 0.70710677, %v2179_v24  ;;  %v8706_v6 = vmul.f32 0.5, %v1828_v58  ;;  %v9900_v48 = vld [vmem:[#allocation45_spill] sm:$0xff]  ;;  %v9901_v29 = vld [vmem:[#allocation18_spill] sm:$0xff] }
 0x307   :  { %5583 = verf.f32 %v2704_v32  ;;  %v8709_v17 = vmul.f32 %v3210_v40, %v8617_v18  ;;  %v3211_v44 = vadd.f32 1.0, %v5572_v0  ;;  %v2707_v34 = vmul.f32 0.70710677, %v1828_v58  ;;  %v9902_v36 = vld [vmem:[#allocation16_spill] sm:$0xff] }
 0x308   :  { %v2181_v53 = vadd.f32 %v9900_v48, %v6561_v51  ;;  %v5574_v19 = vpop.eup %5573  ;;  %5585 = verf.f32 %v2706_v49  ;;  %v1830_v23 = vadd.f32 %v9901_v29, %v6566_v3  ;;  %v2183_v52 = vadd.f32 %v9902_v36, %v6569_v16 }
 0x309   :  { %v3675_v24 = vpack.c.bf16 %v8400_v45, %v8370_v46  ;;  %v5576_v32 = vpop.eup %5575  ;;  %v8720_v18 = vmul.f32 %v3211_v44, %v8626_v12  ;;  %v3213_v0 = vadd.f32 1.0, %v5574_v19  ;;  %5587 = verf.f32 %v2707_v34  ;;  %v9903_v19 = vld [vmem:[#allocation66_spill] sm:$0xff] }
 0x30a   :  { %v8722_v58 = vmul.f32 0.5, %v2181_v53  ;;  %v5578_v40 = vpop.eup %5577  ;;  %v3212_v47 = vadd.f32 1.0, %v5576_v32  ;;  %v2709_v49 = vmul.f32 0.70710677, %v2181_v53  ;;  %v8724_v48 = vmul.f32 0.5, %v1830_v23 }
 0x30b   :  { %v2708_v29 = vmul.f32 0.70710677, %v1830_v23  ;;  %4168 = vmatmul.mubr.bf16.gmra.mrb[204].mxu0 %v3675_v24  ;;  %v8727_v36 = vmul.f32 %v3213_v0, %v8646_v30  ;;  %v3214_v14 = vadd.f32 1.0, %v5578_v40  ;;  %v8729_v46 = vmul.f32 0.5, %v2183_v52 }
 0x30c   :  { %v2710_v45 = vmul.f32 0.70710677, %v2183_v52  ;;  %v8732_v12 = vmul.f32 %v3212_v47, %v8652_v39  ;;  %5589 = verf.f32 %v2709_v49  ;;  %v3677_v44 = vpack.c.bf16 %v8409_v63, %v8373_v38  ;;  %v8745_v52 = vpop.f32.mrb[140].mxu0  ;;  %v9905_v38 = vld [vmem:[#allocation67_spill] sm:$0xff]  ;;  %v8753_v24 = vpop.f32.mrb[140].mxu1  ;;  %v9909_v47 = vld [vmem:[#allocation70_spill] sm:$0xff] }
 0x30d   :  { %v3680_v34 = vpack.c.bf16 %v8500_v27, %v8458_v37  ;;  %v8739_v53 = vmul.f32 %v3214_v14, %v8654_v50  ;;  %5591 = verf.f32 %v2708_v29  ;;  %v3682_v30 = vpack.c.bf16 %v8507_v57, %v8469_v33  ;;  %9904 = vst [vmem:[#allocation50_spill] sm:$0xff] %v8745_v52  ;;  %v9906_v37 = vld [vmem:[#allocation68_spill] sm:$0xff]  ;;  %v9907_v50 = vld [vmem:[#allocation69_spill] sm:$0xff]  ;;  %9908 = vst [vmem:[#allocation45_spill] sm:$0xff] %v8753_v24  ;;  %v4043_v33 = vpop.f32.mrb[141].mxu0  ;;  %v4332_v29 = vpop.f32.mrb[141].mxu1 }
 0x30e   :  { %v1834_v23 = vadd.f32 %v9903_v19, %v6551_v59  ;;  %v5580_v39 = vpop.eup %5579  ;;  %5593 = verf.f32 %v2710_v45  ;;  %4457 = vmatmul.mubr.bf16.gmra.mrb[204].mxu1 %v3677_v44  ;;  %v2187_v63 = vadd.f32 %v9905_v38, %v6561_v51  ;;  %v1836_v27 = vadd.f32 %v9906_v37, %v6566_v3  ;;  %v8759_v45 = vpop.f32.mrb[142].mxu0 }
 0x30f   :  { %4175 = vmatprep.mubr.bf16.mxu0 %v3680_v34  ;;  %v2189_v14 = vadd.f32 %v9907_v50, %v6569_v16  ;;  %v5582_v57 = vpop.eup %5581  ;;  %v3215_v32 = vadd.f32 1.0, %v5580_v39  ;;  %4464 = vmatprep.mubr.bf16.mxu1 %v3682_v30  ;;  %v1838_v49 = vadd.f32 %v9909_v47, %v6551_v59  ;;  %9910 = vst [vmem:[#allocation18_spill] sm:$0xff] %v8759_v45  ;;  %v8765_v50 = vpop.f32.mrb[142].mxu1 }
 0x310   :  { %v8755_v0 = vmul.f32 0.5, %v1834_v23  ;;  %v2711_v40 = vmul.f32 0.70710677, %v1834_v23  ;;  %v3217_v34 = vadd.f32 1.0, %v5582_v57  ;;  %v8761_v19 = vmul.f32 0.5, %v2187_v63  ;;  %9911 = vst [vmem:[#allocation16_spill] sm:$0xff] %v8765_v50 }
 0x311   :  { %v5584_v44 = vpop.eup %5583  ;;  %v2713_v38 = vmul.f32 0.70710677, %v2187_v63  ;;  %v8763_v37 = vmul.f32 0.5, %v1836_v27  ;;  %v8768_v30 = vmul.f32 %v3215_v32, %v8683_v1  ;;  %v2712_v23 = vmul.f32 0.70710677, %v1836_v27  ;;  %v4046_v33 = vpop.f32.mrb[143].mxu0 }
 0x312   :  { %v3216_v39 = vadd.f32 1.0, %v5584_v44  ;;  %5595 = verf.f32 %v2711_v40  ;;  %v4335_v47 = vpop.f32.mrb[143].mxu1  ;;  %v5586_v29 = vpop.eup %5585  ;;  %v8771_v45 = vmul.f32 %v3217_v34, %v8687_v15  ;;  %v8773_v57 = vmul.f32 0.5, %v2189_v14  ;;  %v9912_v40 = vld [vmem:[#allocation71_spill] sm:$0xff]  ;;  %v9913_v34 = vld [vmem:[#allocation72_spill] sm:$0xff] }
 0x313   :  { %5597 = verf.f32 %v2713_v38  ;;  %v2714_v63 = vmul.f32 0.70710677, %v2189_v14  ;;  %v5588_v24 = vpop.eup %5587  ;;  %v3218_v50 = vadd.f32 1.0, %v5586_v29  ;;  %v8778_v1 = vmul.f32 0.5, %v1838_v49  ;;  %v9914_v38 = vld [vmem:[#allocation17_spill] sm:$0xff] }
 0x314   :  { %v8776_v52 = vmul.f32 %v3216_v39, %v8689_v22  ;;  %5599 = verf.f32 %v2712_v23  ;;  %v3219_v32 = vadd.f32 1.0, %v5588_v24  ;;  %v2715_v27 = vmul.f32 0.70710677, %v1838_v49 }
 0x315   :  { %5601 = verf.f32 %v2714_v63  ;;  %v2191_v44 = vadd.f32 %v9912_v40, %v6561_v51  ;;  %v8783_v15 = vmul.f32 %v3218_v50, %v8701_v2  ;;  %v1840_v14 = vadd.f32 %v9913_v34, %v6566_v3 }
 0x316   :  { %v2193_v22 = vadd.f32 %v9914_v38, %v6569_v16  ;;  %v3679_v39 = vpack.c.bf16 %v8480_v62, %v8450_v43  ;;  %v5590_v23 = vpop.eup %5589  ;;  %v8792_v24 = vmul.f32 %v3219_v32, %v8706_v6  ;;  %5603 = verf.f32 %v2715_v27  ;;  %v9915_v38 = vld [vmem:[#allocation29_spill] sm:$0xff] }
 0x317   :  { %v8794_v49 = vmul.f32 0.5, %v2191_v44  ;;  %v2717_v33 = vmul.f32 0.70710677, %v2191_v44  ;;  %v5592_v47 = vpop.eup %5591  ;;  %v3221_v2 = vadd.f32 1.0, %v5590_v23  ;;  %v8796_v50 = vmul.f32 0.5, %v1840_v14  ;;  %v9919_v23 = vld [vmem:[#allocation25_spill] sm:$0xff] }
 0x318   :  { %v2716_v29 = vmul.f32 0.70710677, %v1840_v14  ;;  %v8798_v63 = vmul.f32 0.5, %v2193_v22  ;;  %4176 = vmatmul.mubr.bf16.gmra.mrb[208].mxu0 %v3679_v39  ;;  %v5594_v40 = vpop.eup %5593  ;;  %v3220_v34 = vadd.f32 1.0, %v5592_v47  ;;  %v2718_v43 = vmul.f32 0.70710677, %v2193_v22 }
 0x319   :  { %5605 = verf.f32 %v2717_v33  ;;  %v3681_v62 = vpack.c.bf16 %v8495_v5, %v8453_v25  ;;  %v8803_v6 = vmul.f32 %v3221_v2, %v8722_v58  ;;  %v3222_v32 = vadd.f32 1.0, %v5594_v40  ;;  %v8814_v25 = vpop.f32.mrb[144].mxu0 }
 0x31a   :  { %5607 = verf.f32 %v2716_v29  ;;  %v3684_v27 = vpack.c.bf16 %v8576_v41, %v8538_v20  ;;  %v8808_v44 = vmul.f32 %v3220_v34, %v8724_v48  ;;  %v3686_v14 = vpack.c.bf16 %v8583_v56, %v8545_v61  ;;  %9916 = vst [vmem:[#allocation66_spill] sm:$0xff] %v8814_v25  ;;  %v9917_v20 = vld [vmem:[#allocation54_spill] sm:$0xff]  ;;  %v9918_v48 = vld [vmem:[#allocation21_spill] sm:$0xff]  ;;  %v4051_v61 = vpop.f32.mrb[145].mxu0 }
 0x31b   :  { %5609 = verf.f32 %v2718_v43  ;;  %4465 = vmatmul.mubr.bf16.gmra.mrb[208].mxu1 %v3681_v62  ;;  %v1844_v22 = vadd.f32 %v9915_v38, %v6551_v59  ;;  %v8817_v58 = vmul.f32 %v3222_v32, %v8729_v46  ;;  %v2197_v41 = vadd.f32 %v9917_v20, %v6561_v51  ;;  %v9920_v46 = vld [vmem:[#allocation24_spill] sm:$0xff]  ;;  %v8829_v34 = vpop.f32.mrb[146].mxu0 }
 0x31c   :  { %v5596_v5 = vpop.eup %5595  ;;  %4183 = vmatprep.mubr.bf16.mxu0 %v3684_v27  ;;  %v1846_v39 = vadd.f32 %v9918_v48, %v6566_v3  ;;  %v2199_v33 = vadd.f32 %v9919_v23, %v6569_v16  ;;  %4472 = vmatprep.mubr.bf16.mxu1 %v3686_v14  ;;  %v1848_v40 = vadd.f32 %v9920_v46, %v6551_v59  ;;  %v4054_v20 = vpop.f32.mrb[147].mxu0 }
 0x31d   :  { %v5598_v56 = vpop.eup %5597  ;;  %v3223_v47 = vadd.f32 1.0, %v5596_v5  ;;  %v8825_v2 = vmul.f32 0.5, %v1844_v22  ;;  %v2719_v29 = vmul.f32 0.70710677, %v1844_v22  ;;  %9921 = vst [vmem:[#allocation67_spill] sm:$0xff] %v8829_v34  ;;  %v8831_v32 = vmul.f32 0.5, %v2197_v41 }
 0x31e   :  { %v5600_v43 = vpop.eup %5599  ;;  %v3225_v62 = vadd.f32 1.0, %v5598_v56  ;;  %v2721_v27 = vmul.f32 0.70710677, %v2197_v41  ;;  %v8833_v38 = vmul.f32 0.5, %v1846_v39  ;;  %v2720_v22 = vmul.f32 0.70710677, %v1846_v39 }
 0x31f   :  { %v5602_v48 = vpop.eup %5601  ;;  %v8836_v5 = vmul.f32 %v3223_v47, %v8755_v0  ;;  %v3224_v14 = vadd.f32 1.0, %v5600_v43  ;;  %5611 = verf.f32 %v2719_v29  ;;  %v8838_v23 = vpop.f32.mrb[144].mxu1  ;;  %v8843_v56 = vmul.f32 0.5, %v2199_v33 }
 0x320   :  { %9922 = vst [vmem:[#allocation68_spill] sm:$0xff] %v8838_v23  ;;  %v8841_v61 = vmul.f32 %v3225_v62, %v8761_v19  ;;  %v3226_v46 = vadd.f32 1.0, %v5602_v48  ;;  %5613 = verf.f32 %v2721_v27  ;;  %v4340_v41 = vpop.f32.mrb[145].mxu1  ;;  %v5604_v34 = vpop.eup %5603  ;;  %v2722_v0 = vmul.f32 0.70710677, %v2199_v33  ;;  %v9924_v62 = vld [vmem:[#allocation26_spill] sm:$0xff] }
 0x321   :  { %v8846_v20 = vmul.f32 %v3224_v14, %v8763_v37  ;;  %5615 = verf.f32 %v2720_v22  ;;  %v8848_v47 = vmul.f32 0.5, %v1848_v40  ;;  %v8850_v29 = vpop.f32.mrb[146].mxu1  ;;  %v3227_v19 = vadd.f32 1.0, %v5604_v34  ;;  %v9925_v37 = vld [vmem:[#allocation33_spill] sm:$0xff] }
 0x322   :  { %9923 = vst [vmem:[#allocation69_spill] sm:$0xff] %v8850_v29  ;;  %v8853_v39 = vmul.f32 %v3226_v46, %v8773_v57  ;;  %v2723_v43 = vmul.f32 0.70710677, %v1848_v40  ;;  %v2201_v27 = vadd.f32 %v9924_v62, %v6561_v51  ;;  %v4343_v48 = vpop.f32.mrb[147].mxu1  ;;  %5617 = verf.f32 %v2722_v0  ;;  %v9926_v33 = vld [vmem:[#allocation53_spill] sm:$0xff] }
 0x323   :  { %v5606_v41 = vpop.eup %5605  ;;  %v1850_v14 = vadd.f32 %v9925_v37, %v6566_v3  ;;  %v2203_v22 = vadd.f32 %v9926_v33, %v6569_v16  ;;  %v3683_v29 = vpack.c.bf16 %v8560_v60, %v8530_v10  ;;  %v8864_v57 = vmul.f32 %v3227_v19, %v8778_v1 }
 0x324   :  { %v5608_v23 = vpop.eup %5607  ;;  %v3229_v40 = vadd.f32 1.0, %v5606_v41  ;;  %5619 = verf.f32 %v2723_v43  ;;  %v8866_v34 = vmul.f32 0.5, %v2201_v27  ;;  %v2725_v0 = vmul.f32 0.70710677, %v2201_v27 }
 0x325   :  { %v5610_v46 = vpop.eup %5609  ;;  %v3228_v62 = vadd.f32 1.0, %v5608_v23  ;;  %v8868_v48 = vmul.f32 0.5, %v1850_v14  ;;  %v2724_v37 = vmul.f32 0.70710677, %v1850_v14  ;;  %4184 = vmatmul.mubr.bf16.gmra.mrb[212].mxu0 %v3683_v29  ;;  %v8873_v10 = vmul.f32 0.5, %v2203_v22  ;;  %v9927_v29 = vld [vmem:[#allocation73_spill] sm:$0xff] }
 0x326   :  { %v8871_v33 = vmul.f32 %v3229_v40, %v8794_v49  ;;  %v3230_v25 = vadd.f32 1.0, %v5610_v46  ;;  %v2726_v60 = vmul.f32 0.70710677, %v2203_v22  ;;  %5621 = verf.f32 %v2725_v0  ;;  %v8889_v41 = vpop.f32.mrb[148].mxu0  ;;  %v9932_v46 = vld [vmem:[#allocation74_spill] sm:$0xff] }
 0x327   :  { %v8876_v1 = vmul.f32 %v3228_v62, %v8796_v50  ;;  %v3685_v19 = vpack.c.bf16 %v8569_v26, %v8533_v55  ;;  %v3688_v23 = vpack.c.bf16 %v8664_v28, %v8624_v8  ;;  %5623 = verf.f32 %v2724_v37  ;;  %9928 = vst [vmem:[#allocation70_spill] sm:$0xff] %v8889_v41  ;;  %v9929_v55 = vld [vmem:[#allocation55_spill] sm:$0xff]  ;;  %v9930_v8 = vld [vmem:[#allocation56_spill] sm:$0xff]  ;;  %v4059_v14 = vpop.f32.mrb[149].mxu0 }
 0x328   :  { %v8883_v43 = vmul.f32 %v3230_v25, %v8798_v63  ;;  %v3690_v49 = vpack.c.bf16 %v8671_v54, %v8635_v31  ;;  %v1854_v27 = vadd.f32 %v9927_v29, %v6551_v59  ;;  %5625 = verf.f32 %v2726_v60  ;;  %v9931_v63 = vld [vmem:[#allocation30_spill] sm:$0xff]  ;;  %v8901_v0 = vpop.f32.mrb[150].mxu0 }
 0x329   :  { %v5612_v50 = vpop.eup %5611  ;;  %4473 = vmatmul.mubr.bf16.gmra.mrb[212].mxu1 %v3685_v19  ;;  %4191 = vmatprep.mubr.bf16.mxu0 %v3688_v23  ;;  %v2207_v26 = vadd.f32 %v9929_v55, %v6561_v51  ;;  %v1856_v28 = vadd.f32 %v9930_v8, %v6566_v3  ;;  %v2209_v25 = vadd.f32 %v9931_v63, %v6569_v16  ;;  %v4062_v55 = vpop.f32.mrb[151].mxu0 }
 0x32a   :  { %v5614_v31 = vpop.eup %5613  ;;  %v3231_v54 = vadd.f32 1.0, %v5612_v50  ;;  %4480 = vmatprep.mubr.bf16.mxu1 %v3690_v49  ;;  %v8897_v22 = vmul.f32 0.5, %v1854_v27  ;;  %v2727_v40 = vmul.f32 0.70710677, %v1854_v27  ;;  %v1858_v62 = vadd.f32 %v9932_v46, %v6551_v59  ;;  %9933 = vst [vmem:[#allocation71_spill] sm:$0xff] %v8901_v0  ;;  %v8910_v27 = vpop.f32.mrb[148].mxu1 }
 0x32b   :  { %v5616_v37 = vpop.eup %5615  ;;  %v3233_v60 = vadd.f32 1.0, %v5614_v31  ;;  %v8903_v19 = vmul.f32 0.5, %v2207_v26  ;;  %v2729_v23 = vmul.f32 0.70710677, %v2207_v26  ;;  %v8905_v29 = vmul.f32 0.5, %v1856_v28  ;;  %9934 = vst [vmem:[#allocation72_spill] sm:$0xff] %v8910_v27 }
 0x32c   :  { %v8908_v8 = vmul.f32 %v3231_v54, %v8825_v2  ;;  %v3232_v49 = vadd.f32 1.0, %v5616_v37  ;;  %5627 = verf.f32 %v2727_v40  ;;  %v2728_v50 = vmul.f32 0.70710677, %v1856_v28  ;;  %v5618_v63 = vpop.eup %5617  ;;  %v4348_v26 = vpop.f32.mrb[149].mxu1 }
 0x32d   :  { %v8913_v14 = vmul.f32 %v3233_v60, %v8831_v32  ;;  %5629 = verf.f32 %v2729_v23  ;;  %v8915_v31 = vmul.f32 0.5, %v2209_v25  ;;  %v2730_v46 = vmul.f32 0.70710677, %v2209_v25  ;;  %v8922_v28 = vpop.f32.mrb[150].mxu1  ;;  %v9936_v32 = vld [vmem:[#allocation75_spill] sm:$0xff]  ;;  %v9937_v26 = vld [vmem:[#allocation76_spill] sm:$0xff] }
 0x32e   :  { %v5620_v0 = vpop.eup %5619  ;;  %v8918_v55 = vmul.f32 %v3232_v49, %v8833_v38  ;;  %v3234_v2 = vadd.f32 1.0, %v5618_v63  ;;  %5631 = verf.f32 %v2728_v50  ;;  %v8920_v54 = vmul.f32 0.5, %v1858_v62  ;;  %9935 = vst [vmem:[#allocation17_spill] sm:$0xff] %v8922_v28  ;;  %v4351_v23 = vpop.f32.mrb[151].mxu1  ;;  %v9938_v49 = vld [vmem:[#allocation23_spill] sm:$0xff] }
 0x32f   :  { %v3235_v40 = vadd.f32 1.0, %v5620_v0  ;;  %5633 = verf.f32 %v2730_v46  ;;  %v2731_v37 = vmul.f32 0.70710677, %v1858_v62  ;;  %v2211_v60 = vadd.f32 %v9936_v32, %v6561_v51 }
 0x330   :  { %v8927_v25 = vmul.f32 %v3234_v2, %v8843_v56  ;;  %v1860_v38 = vadd.f32 %v9937_v26, %v6566_v3  ;;  %v2213_v50 = vadd.f32 %v9938_v49, %v6569_v16  ;;  %v3687_v63 = vpack.c.bf16 %v8644_v13, %v8612_v42  ;;  %v5622_v28 = vpop.eup %5621 }
 0x331   :  { %v8936_v0 = vmul.f32 %v3235_v40, %v8848_v47  ;;  %5635 = verf.f32 %v2731_v37  ;;  %v8938_v62 = vmul.f32 0.5, %v2211_v60  ;;  %v2733_v46 = vmul.f32 0.70710677, %v2211_v60  ;;  %v5624_v32 = vpop.eup %5623 }
 0x332   :  { %v3237_v56 = vadd.f32 1.0, %v5622_v28  ;;  %v8940_v2 = vmul.f32 0.5, %v1860_v38  ;;  %v2732_v23 = vmul.f32 0.70710677, %v1860_v38  ;;  %v8942_v26 = vmul.f32 0.5, %v2213_v50  ;;  %4192 = vmatmul.mubr.bf16.gmra.mrb[216].mxu0 %v3687_v63  ;;  %v5626_v49 = vpop.eup %5625  ;;  %v9939_v38 = vld [vmem:[#allocation35_spill] sm:$0xff] }
 0x333   :  { %v3236_v27 = vadd.f32 1.0, %v5624_v32  ;;  %5637 = verf.f32 %v2733_v46  ;;  %v2734_v42 = vmul.f32 0.70710677, %v2213_v50  ;;  %v3689_v13 = vpack.c.bf16 %v8659_v11, %v8615_v35  ;;  %v8958_v35 = vpop.f32.mrb[152].mxu0  ;;  %v9943_v63 = vld [vmem:[#allocation19_spill] sm:$0xff] }
 0x334   :  { %v8947_v47 = vmul.f32 %v3237_v56, %v8866_v34  ;;  %v3238_v40 = vadd.f32 1.0, %v5626_v49  ;;  %5639 = verf.f32 %v2732_v23  ;;  %v3692_v28 = vpack.c.bf16 %v8732_v12, %v8704_v4  ;;  %9940 = vst [vmem:[#allocation29_spill] sm:$0xff] %v8958_v35  ;;  %v9941_v4 = vld [vmem:[#allocation31_spill] sm:$0xff] }
 0x335   :  { %v8952_v37 = vmul.f32 %v3236_v27, %v8868_v48  ;;  %5641 = verf.f32 %v2734_v42  ;;  %4481 = vmatmul.mubr.bf16.gmra.mrb[216].mxu1 %v3689_v13  ;;  %v3694_v60 = vpack.c.bf16 %v8739_v53, %v8709_v17  ;;  %v1864_v50 = vadd.f32 %v9939_v38, %v6551_v59  ;;  %v9942_v48 = vld [vmem:[#allocation22_spill] sm:$0xff]  ;;  %v4067_v17 = vpop.f32.mrb[153].mxu0 }
 0x336   :  { %v5628_v11 = vpop.eup %5627  ;;  %v8961_v34 = vmul.f32 %v3238_v40, %v8873_v10  ;;  %4199 = vmatprep.mubr.bf16.mxu0 %v3692_v28  ;;  %v2217_v12 = vadd.f32 %v9941_v4, %v6561_v51  ;;  %v1866_v27 = vadd.f32 %v9942_v48, %v6566_v3  ;;  %v2219_v46 = vadd.f32 %v9943_v63, %v6569_v16  ;;  %v9944_v10 = vld [vmem:[#allocation20_spill] sm:$0xff]  ;;  %v8973_v42 = vpop.f32.mrb[154].mxu0 }
 0x337   :  { %v5630_v53 = vpop.eup %5629  ;;  %v3239_v32 = vadd.f32 1.0, %v5628_v11  ;;  %4488 = vmatprep.mubr.bf16.mxu1 %v3694_v60  ;;  %v8969_v56 = vmul.f32 0.5, %v1864_v50  ;;  %v2735_v23 = vmul.f32 0.70710677, %v1864_v50  ;;  %v1868_v49 = vadd.f32 %v9944_v10, %v6551_v59  ;;  %9945 = vst [vmem:[#allocation54_spill] sm:$0xff] %v8973_v42  ;;  %v8979_v48 = vpop.f32.mrb[152].mxu1 }
 0x338   :  { %v5632_v13 = vpop.eup %5631  ;;  %v3241_v40 = vadd.f32 1.0, %v5630_v53  ;;  %v8975_v28 = vmul.f32 0.5, %v2217_v12  ;;  %v2737_v38 = vmul.f32 0.70710677, %v2217_v12  ;;  %v8977_v4 = vmul.f32 0.5, %v1866_v27  ;;  %9946 = vst [vmem:[#allocation21_spill] sm:$0xff] %v8979_v48 }
 0x339   :  { %v5634_v63 = vpop.eup %5633  ;;  %v8982_v60 = vmul.f32 %v3239_v32, %v8897_v22  ;;  %v3240_v11 = vadd.f32 1.0, %v5632_v13  ;;  %5643 = verf.f32 %v2735_v23  ;;  %v2736_v50 = vmul.f32 0.70710677, %v1866_v27  ;;  %v4356_v17 = vpop.f32.mrb[153].mxu1 }
 0x33a   :  { %v4070_v10 = vpop.f32.mrb[155].mxu0  ;;  %v8985_v42 = vmul.f32 %v3241_v40, %v8903_v19  ;;  %v3242_v53 = vadd.f32 1.0, %v5634_v63  ;;  %5645 = verf.f32 %v2737_v38  ;;  %v8987_v35 = vmul.f32 0.5, %v2219_v46  ;;  %v8989_v12 = vpop.f32.mrb[154].mxu1  ;;  %v9948_v40 = vld [vmem:[#allocation77_spill] sm:$0xff]  ;;  %v9949_v17 = vld [vmem:[#allocation78_spill] sm:$0xff] }
 0x33b   :  { %9947 = vst [vmem:[#allocation25_spill] sm:$0xff] %v8989_v12  ;;  %v5636_v41 = vpop.eup %5635  ;;  %v8992_v48 = vmul.f32 %v3240_v11, %v8905_v29  ;;  %5647 = verf.f32 %v2736_v50  ;;  %v2738_v22 = vmul.f32 0.70710677, %v2219_v46  ;;  %v8994_v32 = vmul.f32 0.5, %v1868_v49  ;;  %v4359_v27 = vpop.f32.mrb[155].mxu1  ;;  %v9950_v29 = vld [vmem:[#allocation37_spill] sm:$0xff] }
 0x33c   :  { %v8997_v23 = vmul.f32 %v3242_v53, %v8915_v31  ;;  %v3243_v19 = vadd.f32 1.0, %v5636_v41  ;;  %v2739_v13 = vmul.f32 0.70710677, %v1868_v49  ;;  %v2221_v38 = vadd.f32 %v9948_v40, %v6561_v51 }
 0x33d   :  { %v5638_v63 = vpop.eup %5637  ;;  %5649 = verf.f32 %v2738_v22  ;;  %v1870_v10 = vadd.f32 %v9949_v17, %v6566_v3  ;;  %v2223_v11 = vadd.f32 %v9950_v29, %v6569_v16  ;;  %v3691_v46 = vpack.c.bf16 %v8720_v18, %v8694_v7 }
 0x33e   :  { %v5640_v50 = vpop.eup %5639  ;;  %v9008_v31 = vmul.f32 %v3243_v19, %v8920_v54  ;;  %v3245_v41 = vadd.f32 1.0, %v5638_v63  ;;  %5651 = verf.f32 %v2739_v13  ;;  %v9010_v49 = vmul.f32 0.5, %v2221_v38  ;;  %v9951_v63 = vld [vmem:[#allocation38_spill] sm:$0xff] }
 0x33f   :  { %v5642_v53 = vpop.eup %5641  ;;  %v3244_v27 = vadd.f32 1.0, %v5640_v50  ;;  %v2741_v22 = vmul.f32 0.70710677, %v2221_v38  ;;  %v9012_v40 = vmul.f32 0.5, %v1870_v10  ;;  %v2740_v17 = vmul.f32 0.70710677, %v1870_v10  ;;  %4200 = vmatmul.mubr.bf16.gmra.mrb[220].mxu0 %v3691_v46 }
 0x340   :  { %v9015_v29 = vmul.f32 %v3245_v41, %v8938_v62  ;;  %v3246_v12 = vadd.f32 1.0, %v5642_v53  ;;  %v9017_v7 = vmul.f32 0.5, %v2223_v11  ;;  %v2742_v18 = vmul.f32 0.70710677, %v2223_v11  ;;  %v9956_v53 = vld [vmem:[#allocation81_spill] sm:$0xff] }
 0x341   :  { %v9020_v54 = vmul.f32 %v3244_v27, %v8940_v2  ;;  %5653 = verf.f32 %v2741_v22  ;;  %v3693_v19 = vpack.c.bf16 %v8727_v36, %v8699_v21  ;;  %v3696_v13 = vpack.c.bf16 %v8808_v44, %v8776_v52  ;;  %v9033_v11 = vpop.f32.mrb[156].mxu0  ;;  %v9953_v21 = vld [vmem:[#allocation40_spill] sm:$0xff]  ;;  %v9954_v52 = vld [vmem:[#allocation79_spill] sm:$0xff] }
 0x342   :  { %v9027_v38 = vmul.f32 %v3246_v12, %v8942_v26  ;;  %5655 = verf.f32 %v2740_v17  ;;  %v3698_v62 = vpack.c.bf16 %v8817_v58, %v8783_v15  ;;  %v1874_v10 = vadd.f32 %v9951_v63, %v6551_v59  ;;  %9952 = vst [vmem:[#allocation24_spill] sm:$0xff] %v9033_v11  ;;  %v9955_v26 = vld [vmem:[#allocation80_spill] sm:$0xff]  ;;  %v4075_v46 = vpop.f32.mrb[157].mxu0 }
 0x343   :  { %v5644_v2 = vpop.eup %5643  ;;  %5657 = verf.f32 %v2742_v18  ;;  %4489 = vmatmul.mubr.bf16.gmra.mrb[220].mxu1 %v3693_v19  ;;  %4207 = vmatprep.mubr.bf16.mxu0 %v3696_v13  ;;  %v2227_v36 = vadd.f32 %v9953_v21, %v6561_v51  ;;  %v1876_v44 = vadd.f32 %v9954_v52, %v6566_v3  ;;  %v2229_v12 = vadd.f32 %v9955_v26, %v6569_v16  ;;  %v9045_v22 = vpop.f32.mrb[158].mxu0 }
 0x344   :  { %v5646_v15 = vpop.eup %5645  ;;  %v3247_v58 = vadd.f32 1.0, %v5644_v2  ;;  %4496 = vmatprep.mubr.bf16.mxu1 %v3698_v62  ;;  %v9041_v50 = vmul.f32 0.5, %v1874_v10  ;;  %v2743_v41 = vmul.f32 0.70710677, %v1874_v10  ;;  %v1878_v27 = vadd.f32 %v9956_v53, %v6551_v59  ;;  %9957 = vst [vmem:[#allocation26_spill] sm:$0xff] %v9045_v22  ;;  %v4078_v21 = vpop.f32.mrb[159].mxu0 }
 0x345   :  { %v5648_v17 = vpop.eup %5647  ;;  %v3249_v18 = vadd.f32 1.0, %v5646_v15  ;;  %v9047_v19 = vmul.f32 0.5, %v2227_v36  ;;  %v2745_v13 = vmul.f32 0.70710677, %v2227_v36  ;;  %v9049_v63 = vmul.f32 0.5, %v1876_v44  ;;  %v9054_v10 = vpop.f32.mrb[156].mxu1 }
 0x346   :  { %v9052_v52 = vmul.f32 %v3247_v58, %v8969_v56  ;;  %v3248_v62 = vadd.f32 1.0, %v5648_v17  ;;  %5659 = verf.f32 %v2743_v41  ;;  %v2744_v2 = vmul.f32 0.70710677, %v1876_v44  ;;  %9958 = vst [vmem:[#allocation33_spill] sm:$0xff] %v9054_v10  ;;  %v4364_v36 = vpop.f32.mrb[157].mxu1 }
 0x347   :  { %v5650_v26 = vpop.eup %5649  ;;  %v9057_v46 = vmul.f32 %v3249_v18, %v8975_v28  ;;  %5661 = verf.f32 %v2745_v13  ;;  %v9059_v15 = vmul.f32 0.5, %v2229_v12  ;;  %v2746_v53 = vmul.f32 0.70710677, %v2229_v12  ;;  %v9066_v44 = vpop.f32.mrb[158].mxu1  ;;  %v9960_v28 = vld [vmem:[#allocation41_spill] sm:$0xff]  ;;  %v9961_v36 = vld [vmem:[#allocation27_spill] sm:$0xff] }
 0x348   :  { %v5652_v22 = vpop.eup %5651  ;;  %v9062_v21 = vmul.f32 %v3248_v62, %v8977_v4  ;;  %v3250_v56 = vadd.f32 1.0, %v5650_v26  ;;  %5663 = verf.f32 %v2744_v2  ;;  %v9064_v58 = vmul.f32 0.5, %v1878_v27  ;;  %9959 = vst [vmem:[#allocation53_spill] sm:$0xff] %v9066_v44  ;;  %v4367_v13 = vpop.f32.mrb[159].mxu1  ;;  %v9962_v62 = vld [vmem:[#allocation32_spill] sm:$0xff] }
 0x349   :  { %v3251_v41 = vadd.f32 1.0, %v5652_v22  ;;  %5665 = verf.f32 %v2746_v53  ;;  %v2747_v17 = vmul.f32 0.70710677, %v1878_v27  ;;  %v2231_v18 = vadd.f32 %v9960_v28, %v6561_v51 }
 0x34a   :  { %v9071_v12 = vmul.f32 %v3250_v56, %v8987_v35  ;;  %v1880_v4 = vadd.f32 %v9961_v36, %v6566_v3  ;;  %v2233_v2 = vadd.f32 %v9962_v62, %v6569_v16  ;;  %v3695_v26 = vpack.c.bf16 %v8792_v24, %v8768_v30 }
 0x34b   :  { %v5654_v44 = vpop.eup %5653  ;;  %v9080_v22 = vmul.f32 %v3251_v41, %v8994_v32  ;;  %5667 = verf.f32 %v2747_v17  ;;  %v9082_v27 = vmul.f32 0.5, %v2231_v18  ;;  %v2749_v53 = vmul.f32 0.70710677, %v2231_v18 }
 0x34c   :  { %v5656_v28 = vpop.eup %5655  ;;  %v3253_v35 = vadd.f32 1.0, %v5654_v44  ;;  %v9084_v56 = vmul.f32 0.5, %v1880_v4  ;;  %v2748_v13 = vmul.f32 0.70710677, %v1880_v4  ;;  %v9086_v36 = vmul.f32 0.5, %v2233_v2  ;;  %4208 = vmatmul.mubr.bf16.gmra.mrb[224].mxu0 %v3695_v26  ;;  %v9963_v4 = vld [vmem:[#allocation82_spill] sm:$0xff] }
 0x34d   :  { %v5658_v62 = vpop.eup %5657  ;;  %v3252_v10 = vadd.f32 1.0, %v5656_v28  ;;  %5669 = verf.f32 %v2749_v53  ;;  %v2750_v30 = vmul.f32 0.70710677, %v2233_v2  ;;  %v3697_v24 = vpack.c.bf16 %v8803_v6, %v8771_v45  ;;  %v9967_v26 = vld [vmem:[#allocation57_spill] sm:$0xff] }
 0x34e   :  { %v9091_v32 = vmul.f32 %v3253_v35, %v9010_v49  ;;  %v3254_v41 = vadd.f32 1.0, %v5658_v62  ;;  %5671 = verf.f32 %v2748_v13  ;;  %v3700_v44 = vpack.c.bf16 %v8876_v1, %v8846_v20  ;;  %v9102_v45 = vpop.f32.mrb[160].mxu0  ;;  %v9965_v20 = vld [vmem:[#allocation28_spill] sm:$0xff] }
 0x34f   :  { %v9096_v17 = vmul.f32 %v3252_v10, %v9012_v40  ;;  %5673 = verf.f32 %v2750_v30  ;;  %4497 = vmatmul.mubr.bf16.gmra.mrb[224].mxu1 %v3697_v24  ;;  %v3702_v18 = vpack.c.bf16 %v8883_v43, %v8853_v39  ;;  %v1884_v2 = vadd.f32 %v9963_v4, %v6551_v59  ;;  %9964 = vst [vmem:[#allocation73_spill] sm:$0xff] %v9102_v45  ;;  %v9966_v40 = vld [vmem:[#allocation34_spill] sm:$0xff]  ;;  %v4083_v39 = vpop.f32.mrb[161].mxu0 }
 0x350   :  { %v5660_v6 = vpop.eup %5659  ;;  %v9105_v49 = vmul.f32 %v3254_v41, %v9017_v7  ;;  %4215 = vmatprep.mubr.bf16.mxu0 %v3700_v44  ;;  %v2237_v1 = vadd.f32 %v9965_v20, %v6561_v51  ;;  %v1886_v10 = vadd.f32 %v9966_v40, %v6566_v3  ;;  %v2239_v53 = vadd.f32 %v9967_v26, %v6569_v16  ;;  %v9968_v7 = vld [vmem:[#allocation83_spill] sm:$0xff]  ;;  %v9117_v30 = vpop.f32.mrb[162].mxu0 }
 0x351   :  { %v5662_v43 = vpop.eup %5661  ;;  %v3255_v28 = vadd.f32 1.0, %v5660_v6  ;;  %4504 = vmatprep.mubr.bf16.mxu1 %v3702_v18  ;;  %v9113_v35 = vmul.f32 0.5, %v1884_v2  ;;  %v2751_v13 = vmul.f32 0.70710677, %v1884_v2  ;;  %v1888_v62 = vadd.f32 %v9968_v7, %v6551_v59  ;;  %9969 = vst [vmem:[#allocation55_spill] sm:$0xff] %v9117_v30  ;;  %v9123_v40 = vpop.f32.mrb[160].mxu1 }
 0x352   :  { %v5664_v24 = vpop.eup %5663  ;;  %v3257_v41 = vadd.f32 1.0, %v5662_v43  ;;  %v9119_v44 = vmul.f32 0.5, %v2237_v1  ;;  %v2753_v4 = vmul.f32 0.70710677, %v2237_v1  ;;  %v9121_v20 = vmul.f32 0.5, %v1886_v10  ;;  %9970 = vst [vmem:[#allocation56_spill] sm:$0xff] %v9123_v40 }
 0x353   :  { %v5666_v26 = vpop.eup %5665  ;;  %v9126_v18 = vmul.f32 %v3255_v28, %v9041_v50  ;;  %v3256_v6 = vadd.f32 1.0, %v5664_v24  ;;  %5675 = verf.f32 %v2751_v13  ;;  %v2752_v2 = vmul.f32 0.70710677, %v1886_v10  ;;  %v4372_v39 = vpop.f32.mrb[161].mxu1 }
 0x354   :  { %v4086_v7 = vpop.f32.mrb[163].mxu0  ;;  %v9129_v30 = vmul.f32 %v3257_v41, %v9047_v19  ;;  %v3258_v43 = vadd.f32 1.0, %v5666_v26  ;;  %5677 = verf.f32 %v2753_v4  ;;  %v9131_v45 = vmul.f32 0.5, %v2239_v53  ;;  %v9133_v1 = vpop.f32.mrb[162].mxu1  ;;  %v9972_v41 = vld [vmem:[#allocation64_spill] sm:$0xff]  ;;  %v9973_v39 = vld [vmem:[#allocation58_spill] sm:$0xff] }
 0x355   :  { %9971 = vst [vmem:[#allocation30_spill] sm:$0xff] %v9133_v1  ;;  %v5668_v11 = vpop.eup %5667  ;;  %v9136_v40 = vmul.f32 %v3256_v6, %v9049_v63  ;;  %5679 = verf.f32 %v2752_v2  ;;  %v2754_v50 = vmul.f32 0.70710677, %v2239_v53  ;;  %v9138_v28 = vmul.f32 0.5, %v1888_v62  ;;  %v4375_v10 = vpop.f32.mrb[163].mxu1  ;;  %v9974_v63 = vld [vmem:[#allocation59_spill] sm:$0xff] }
 0x356   :  { %v9141_v13 = vmul.f32 %v3258_v43, %v9059_v15  ;;  %v3259_v19 = vadd.f32 1.0, %v5668_v11  ;;  %v2755_v24 = vmul.f32 0.70710677, %v1888_v62  ;;  %v2241_v4 = vadd.f32 %v9972_v41, %v6561_v51 }
 0x357   :  { %v5670_v26 = vpop.eup %5669  ;;  %5681 = verf.f32 %v2754_v50  ;;  %v1890_v7 = vadd.f32 %v9973_v39, %v6566_v3  ;;  %v2243_v6 = vadd.f32 %v9974_v63, %v6569_v16  ;;  %v3699_v53 = vpack.c.bf16 %v8864_v57, %v8836_v5 }
 0x358   :  { %v5672_v2 = vpop.eup %5671  ;;  %v9152_v15 = vmul.f32 %v3259_v19, %v9064_v58  ;;  %v3261_v11 = vadd.f32 1.0, %v5670_v26  ;;  %5683 = verf.f32 %v2755_v24  ;;  %v9154_v62 = vmul.f32 0.5, %v2241_v4  ;;  %v9975_v26 = vld [vmem:[#allocation60_spill] sm:$0xff] }
 0x359   :  { %v5674_v43 = vpop.eup %5673  ;;  %v3260_v10 = vadd.f32 1.0, %v5672_v2  ;;  %v2757_v50 = vmul.f32 0.70710677, %v2241_v4  ;;  %v9156_v41 = vmul.f32 0.5, %v1890_v7  ;;  %v2756_v39 = vmul.f32 0.70710677, %v1890_v7  ;;  %4216 = vmatmul.mubr.bf16.gmra.mrb[228].mxu0 %v3699_v53 }
 0x35a   :  { %v9159_v63 = vmul.f32 %v3261_v11, %v9082_v27  ;;  %v3262_v1 = vadd.f32 1.0, %v5674_v43  ;;  %v9161_v5 = vmul.f32 0.5, %v2243_v6  ;;  %v2758_v57 = vmul.f32 0.70710677, %v2243_v6 }
 0x35b   :  { %v9164_v58 = vmul.f32 %v3260_v10, %v9084_v56  ;;  %5685 = verf.f32 %v2757_v50  ;;  %v3701_v19 = vpack.c.bf16 %v8871_v33, %v8841_v61  ;;  %v3704_v24 = vpack.c.bf16 %v8952_v37, %v8918_v55  ;;  %v9177_v6 = vpop.f32.mrb[164].mxu0  ;;  %v9976_v61 = vld [vmem:[#allocation61_spill] sm:$0xff]  ;;  %v9977_v55 = vld [vmem:[#allocation14_spill] sm:$0xff] }
 0x35c   :  { %v9171_v4 = vmul.f32 %v3262_v1, %v9086_v36  ;;  %5687 = verf.f32 %v2756_v39  ;;  %v3706_v27 = vpack.c.bf16 %v8961_v34, %v8927_v25  ;;  %v1894_v7 = vadd.f32 %v9975_v26, %v6551_v59  ;;  %v9978_v36 = vld [vmem:[#allocation43_spill] sm:$0xff]  ;;  %v4091_v53 = vpop.f32.mrb[165].mxu0 }
 0x35d   :  { %v5676_v56 = vpop.eup %5675  ;;  %5689 = verf.f32 %v2758_v57  ;;  %4505 = vmatmul.mubr.bf16.gmra.mrb[228].mxu1 %v3701_v19  ;;  %4223 = vmatprep.mubr.bf16.mxu0 %v3704_v24  ;;  %v2247_v33 = vadd.f32 %v9976_v61, %v6561_v51  ;;  %v1896_v37 = vadd.f32 %v9977_v55, %v6566_v3  ;;  %v2249_v1 = vadd.f32 %v9978_v36, %v6569_v16  ;;  %v9189_v10 = vpop.f32.mrb[166].mxu0 }
 0x35e   :  { %v5678_v25 = vpop.eup %5677  ;;  %v3263_v34 = vadd.f32 1.0, %v5676_v56  ;;  %4512 = vmatprep.mubr.bf16.mxu1 %v3706_v27  ;;  %v9185_v2 = vmul.f32 0.5, %v1894_v7  ;;  %v2759_v11 = vmul.f32 0.70710677, %v1894_v7  ;;  %v1898_v43 = vadd.f32 %v8564_v9, %v6551_v59  ;;  %v4094_v26 = vpop.f32.mrb[167].mxu0 }
 0x35f   :  { %v5680_v50 = vpop.eup %5679  ;;  %v3265_v39 = vadd.f32 1.0, %v5678_v25  ;;  %v9191_v57 = vmul.f32 0.5, %v2247_v33  ;;  %v2761_v19 = vmul.f32 0.70710677, %v2247_v33  ;;  %v9193_v24 = vmul.f32 0.5, %v1896_v37  ;;  %v9198_v7 = vpop.f32.mrb[164].mxu1 }
 0x360   :  { %v9196_v61 = vmul.f32 %v3263_v34, %v9113_v35  ;;  %v3264_v27 = vadd.f32 1.0, %v5680_v50  ;;  %5691 = verf.f32 %v2759_v11  ;;  %v2760_v56 = vmul.f32 0.70710677, %v1896_v37  ;;  %v4380_v33 = vpop.f32.mrb[165].mxu1  ;;  %v9980_v26 = vld [vmem:[#allocation42_spill] sm:$0xff] }
 0x361   :  { %v5682_v55 = vpop.eup %5681  ;;  %v9201_v59 = vmul.f32 %v3265_v39, %v9119_v44  ;;  %5693 = verf.f32 %v2761_v19  ;;  %v9203_v9 = vmul.f32 0.5, %v2249_v1  ;;  %v2762_v36 = vmul.f32 0.70710677, %v2249_v1  ;;  %v9210_v37 = vpop.f32.mrb[166].mxu1  ;;  %v9979_v44 = vld [vmem:[#allocation36_spill] sm:$0xff] }
 0x362   :  { %v5684_v53 = vpop.eup %5683  ;;  %v9206_v25 = vmul.f32 %v3264_v27, %v9121_v20  ;;  %v3266_v35 = vadd.f32 1.0, %v5682_v55  ;;  %5695 = verf.f32 %v2760_v56  ;;  %v9208_v34 = vmul.f32 0.5, %v1898_v43  ;;  %v4383_v19 = vpop.f32.mrb[167].mxu1  ;;  %v9981_v27 = vld [vmem:[#allocation39_spill] sm:$0xff] }
 0x363   :  { %v3267_v11 = vadd.f32 1.0, %v5684_v53  ;;  %5697 = verf.f32 %v2762_v36  ;;  %v2763_v50 = vmul.f32 0.70710677, %v1898_v43  ;;  %v2251_v39 = vadd.f32 %v9979_v44, %v6561_v51 }
 0x364   :  { %v9215_v1 = vmul.f32 %v3266_v35, %v9131_v45  ;;  %v1900_v20 = vadd.f32 %v9980_v26, %v6566_v3  ;;  %v2253_v56 = vadd.f32 %v9981_v27, %v6569_v16  ;;  %v3703_v55 = vpack.c.bf16 %v8936_v0, %v8908_v8 }
 0x365   :  { %v5686_v33 = vpop.eup %5685  ;;  %v9224_v36 = vmul.f32 %v3267_v11, %v9138_v28  ;;  %5699 = verf.f32 %v2763_v50  ;;  %v9226_v43 = vmul.f32 0.5, %v2251_v39  ;;  %v2765_v51 = vmul.f32 0.70710677, %v2251_v39  ;;  %v9242_v39 = vld [vmem:[%s9482_s6] ss:$0 sm:$0xff]  ;;  %s5864_s6 = smov [#allocation10]  }
 0x366   :  { %v5688_v53 = vpop.eup %5687  ;;  %v3269_v45 = vadd.f32 1.0, %v5686_v33  ;;  %v9228_v35 = vmul.f32 0.5, %v1900_v20  ;;  %v2764_v44 = vmul.f32 0.70710677, %v1900_v20  ;;  %v9230_v3 = vmul.f32 0.5, %v2253_v56  ;;  %4224 = vmatmul.mubr.bf16.gmra.mrb[232].mxu0 %v3703_v55  ;;  %v9985_v55 = vld [vmem:[#allocation48_spill] sm:$0xff] }
 0x367   :  { %v5690_v16 = vpop.eup %5689  ;;  %v3268_v19 = vadd.f32 1.0, %v5688_v53  ;;  %5701 = verf.f32 %v2765_v51  ;;  %v2766_v8 = vmul.f32 0.70710677, %v2253_v56  ;;  %v3705_v0 = vpack.c.bf16 %v8947_v47, %v8913_v14  ;;  %v9982_v47 = vld [vmem:[#allocation15_spill] sm:$0xff]  ;;  %s4896_s8 = sshll.u32 %s5864_s6, 4  ;;  %s4897_s8 = int_to_ptr.vmem [resolvable:$true] %s4896_s8 }
 0x368   :  { %v9235_v28 = vmul.f32 %v3269_v45, %v9154_v62  ;;  %v3270_v11 = vadd.f32 1.0, %v5690_v16  ;;  %5703 = verf.f32 %v2764_v44  ;;  %v3708_v50 = vpack.c.bf16 %v9020_v54, %v8992_v48  ;;  %v9983_v62 = vld [vmem:[#allocation46_spill] sm:$0xff]  ;;  %v9251_v27 = vpop.f32.mrb[168].mxu0  ;;  %v9984_v54 = vld [vmem:[#allocation47_spill] sm:$0xff]  ;;  %s5826_s9 = scalar_lea.vmem %s4897_s8, 8192  ;;  %p5831_p11 = scmp.lt.s32.totalorder %s4897_s8, %s4897_s8 }
 0x369   :  { %v9245_v26 = vmul.f32 %v3268_v19, %v9156_v41  ;;  %5705 = verf.f32 %v2766_v8  ;;  %4513 = vmatmul.mubr.bf16.gmra.mrb[232].mxu1 %v3705_v0  ;;  %v3710_v14 = vpack.c.bf16 %v9027_v38, %v8997_v23  ;;  %v4307_v20 = vadd.f32 %v9983_v62, %v9982_v47  ;;  %v4099_v23 = vpop.f32.mrb[169].mxu0  ;;  %v9988_v0 = vld [vmem:[#allocation63_spill] sm:$0xff]  ;;  %p5827_p10 = scmp.ne.s32.totalorder %s4897_s8, %s5826_s9  ;;  %p5832_p12 = scmp.lt.s32.totalorder %s5826_s9, %s5826_s9 }
 0x36a   :  { %v5692_v56 = vpop.eup %5691  ;;  %v9254_v48 = vmul.f32 %v3270_v11, %v9161_v5  ;;  %4231 = vmatprep.mubr.bf16.mxu0 %v3708_v50  ;;  %v4310_v33 = vadd.f32 %v9985_v55, %v9984_v54  ;;  %v3707_v41 = vpack.c.bf16 %v9008_v31, %v8982_v60  ;;  %v3709_v51 = vpack.c.bf16 %v9015_v29, %v8985_v42  ;;  %v9267_v16 = vpop.f32.mrb[170].mxu0  ;;  %v9986_v31 = vld [vmem:[#allocation62_spill] sm:$0xff]  ;;  %v9987_v42 = vld [vmem:[#allocation84_spill] sm:$0xff]  ;;  %v9989_v11 = vld [vmem:[#allocation65_spill] sm:$0xff] }
 0x36b   :  { %v5694_v38 = vpop.eup %5693  ;;  %v3271_v53 = vadd.f32 1.0, %v5692_v56  ;;  %4520 = vmatprep.mubr.bf16.mxu1 %v3710_v14  ;;  %v4763_v45 = vadd.f32 %v9242_v39, %v4307_v20  ;;  %v3712_v5 = vpack.c.bf16 %v9096_v17, %v9062_v21  ;;  %v3714_v44 = vpack.c.bf16 %v9105_v49, %v9071_v12  ;;  %v9274_v14 = vpop.f32.mrb[168].mxu1  ;;  %p5833_p13 = por %p5832_p12, %p5831_p11 }
 0x36c   :  { %v5696_v19 = vpop.eup %5695  ;;  %v3273_v8 = vadd.f32 1.0, %v5694_v38  ;;  %v4764_v60 = vadd.f32 %v9242_v39, %v4310_v33  ;;  %v4315_v29 = vadd.f32 %v9987_v42, %v9986_v31  ;;  %v4318_v50 = vadd.f32 %v9989_v11, %v9988_v0  ;;  %v4102_v47 = vpop.f32.mrb[171].mxu0 }
 0x36d   :  { %v5698_v62 = vpop.eup %5697  ;;  %v9277_v21 = vmul.f32 %v3271_v53, %v9185_v2  ;;  %v3272_v12 = vadd.f32 1.0, %v5696_v19  ;;  %4827 = vst [vmem:[#allocation10] sm:$0xff] %v4763_v45  ;;  %v3711_v17 = vpack.c.bf16 %v9080_v22, %v9052_v52  ;;  %v3713_v49 = vpack.c.bf16 %v9091_v32, %v9057_v46  ;;  %v4388_v20 = vpop.f32.mrb[169].mxu1  ;;  %v9991_v53 = vld [vmem:[#allocation51_spill] sm:$0xff]  ;;  %v10017_v32 = vld [vmem:[#allocation30_spill] sm:$0xff]  ;;  %p5834_p0 = pnand %p5833_p13, %p5827_p10 }
 0x36e   :  { %v9284_v56 = vmul.f32 %v3273_v8, %v9191_v57  ;;  %v3274_v54 = vadd.f32 1.0, %v5698_v62  ;;  %4828 = vst [vmem:[#allocation10 + $0x8] sm:$0xff] %v4764_v60  ;;  %4232 = vmatmul.mubr.bf16.gmra.mrb[236].mxu0 %v3707_v41  ;;  %v4765_v55 = vadd.f32 %v9242_v39, %v4315_v29  ;;  %v4766_v2 = vadd.f32 %v9242_v39, %v4318_v50  ;;  %v9288_v33 = vpop.f32.mrb[170].mxu1  ;;  %v9990_v57 = vld [vmem:[#allocation49_spill] sm:$0xff]  ;;  %v9992_v60 = vld [vmem:[#allocation52_spill] sm:$0xff]  ;;  %v9996_v20 = vld [vmem:[#allocation18_spill] sm:$0xff] }
 0x36f   :  { %v5700_v23 = vpop.eup %5699  ;;  %v9291_v38 = vmul.f32 %v3272_v12, %v9193_v24  ;;  %4239 = vmatprep.mubr.bf16.mxu0 %v3712_v5  ;;  %v3716_v52 = vpack.c.bf16 %v9164_v58, %v9136_v40  ;;  %v3718_v22 = vpack.c.bf16 %v9171_v4, %v9141_v13  ;;  %v4323_v41 = vadd.f32 %v9991_v53, %v9990_v57  ;;  %v4391_v45 = vpop.f32.mrb[171].mxu1  ;;  %v9993_v24 = vld [vmem:[#allocation44_spill] sm:$0xff]  ;;  %v9995_v50 = vld [vmem:[#allocation45_spill] sm:$0xff]  ;;  %v9998_v53 = vld [vmem:[#allocation66_spill] sm:$0xff] }
 0x370   :  { %v9300_v19 = vmul.f32 %v3274_v54, %v9203_v9  ;;  %v3275_v8 = vadd.f32 1.0, %v5700_v23  ;;  %4829 = vst [vmem:[#allocation10 + $0x10] sm:$0xff] %v4765_v55  ;;  %4830 = vst [vmem:[#allocation10 + $0x18] sm:$0xff] %v4766_v2  ;;  %v4326_v31 = vadd.f32 %v9993_v24, %v9992_v60  ;;  %v3715_v5 = vpack.c.bf16 %v9152_v15, %v9126_v18  ;;  %v9997_v54 = vld [vmem:[#allocation16_spill] sm:$0xff]  ;;  %v10000_v24 = vld [vmem:[#allocation67_spill] sm:$0xff] }
 0x371   :  { %v5702_v40 = vpop.eup %5701  ;;  %4521 = vmatmul.mubr.bf16.gmra.mrb[236].mxu1 %v3709_v51  ;;  %v4767_v13 = vadd.f32 %v9242_v39, %v4323_v41  ;;  %v3717_v58 = vpack.c.bf16 %v9159_v63, %v9129_v30  ;;  %v3720_v4 = vpack.c.bf16 %v9245_v26, %v9206_v25  ;;  %v3722_v9 = vpack.c.bf16 %v9254_v48, %v9215_v1  ;;  %v9994_v51 = vld [vmem:[#allocation50_spill] sm:$0xff]  ;;  %v9999_v41 = vld [vmem:[#allocation68_spill] sm:$0xff]  ;;  %v10016_v46 = vld [vmem:[#allocation55_spill] sm:$0xff] }
 0x372   :  { %v5704_v42 = vpop.eup %5703  ;;  %v9314_v29 = vmul.f32 %v3275_v8, %v9208_v34  ;;  %v3277_v0 = vadd.f32 1.0, %v5702_v40  ;;  %4528 = vmatprep.mubr.bf16.mxu1 %v3714_v44  ;;  %v4768_v11 = vadd.f32 %v9242_v39, %v4326_v31  ;;  %v4331_v47 = vadd.f32 %v9995_v50, %v9994_v51  ;;  %v10001_v31 = vld [vmem:[#allocation69_spill] sm:$0xff] }
 0x373   :  { %v5706_v62 = vpop.eup %5705  ;;  %v3276_v12 = vadd.f32 1.0, %v5704_v42  ;;  %4831 = vst [vmem:[#allocation10 + $0x20] sm:$0xff] %v4767_v13  ;;  %v4334_v55 = vadd.f32 %v9997_v54, %v9996_v20  ;;  %v3719_v2 = vpack.c.bf16 %v9224_v36, %v9196_v61  ;;  %v3721_v34 = vpack.c.bf16 %v9235_v28, %v9201_v59  ;;  %v10006_v20 = vld [vmem:[#allocation29_spill] sm:$0xff] }
 0x374   :  { %v9326_v23 = vmul.f32 %v3277_v0, %v9226_v43  ;;  %v3278_v44 = vadd.f32 1.0, %v5706_v62  ;;  %4832 = vst [vmem:[#allocation10 + $0x28] sm:$0xff] %v4768_v11  ;;  %v4769_v57 = vadd.f32 %v9242_v39, %v4331_v47  ;;  %v4339_v45 = vadd.f32 %v9999_v41, %v9998_v53  ;;  %v10003_v11 = vld [vmem:[#allocation72_spill] sm:$0xff]  ;;  %v10007_v54 = vld [vmem:[#allocation21_spill] sm:$0xff] }
 0x375   :  { %v9332_v8 = vmul.f32 %v3276_v12, %v9228_v35  ;;  %v4770_v60 = vadd.f32 %v9242_v39, %v4334_v55  ;;  %v4342_v40 = vadd.f32 %v10001_v31, %v10000_v24  ;;  %v3723_v13 = vpack.c.bf16 %v9314_v29, %v9277_v21  ;;  %v10002_v35 = vld [vmem:[#allocation70_spill] sm:$0xff]  ;;  %v4105_v50 = vpop.f32.mrb[172].mxu0  ;;  %v10005_v12 = vld [vmem:[#allocation17_spill] sm:$0xff] }
 0x376   :  { %v9340_v43 = vmul.f32 %v3278_v44, %v9230_v3  ;;  %4240 = vmatmul.mubr.bf16.gmra.mrb[240].mxu0 %v3711_v17  ;;  %4833 = vst [vmem:[#allocation10 + $0x30] sm:$0xff] %v4769_v57  ;;  %v4771_v42 = vadd.f32 %v9242_v39, %v4339_v45  ;;  %v3725_v0 = vpack.c.bf16 %v9326_v23, %v9284_v56  ;;  %v10004_v3 = vld [vmem:[#allocation71_spill] sm:$0xff]  ;;  %v4107_v44 = vpop.f32.mrb[173].mxu0  ;;  %v10009_v41 = vld [vmem:[#allocation25_spill] sm:$0xff] }
 0x377   :  { %v4347_v51 = vadd.f32 %v10003_v11, %v10002_v35  ;;  %4247 = vmatprep.mubr.bf16.mxu0 %v3716_v52  ;;  %4834 = vst [vmem:[#allocation10 + $0x38] sm:$0xff] %v4770_v60  ;;  %v3724_v47 = vpack.c.bf16 %v9332_v8, %v9291_v38  ;;  %v4772_v62 = vadd.f32 %v9242_v39, %v4342_v40  ;;  %v10008_v52 = vld [vmem:[#allocation54_spill] sm:$0xff]  ;;  %v10010_v60 = vld [vmem:[#allocation24_spill] sm:$0xff]  ;;  %v10011_v24 = vld [vmem:[#allocation33_spill] sm:$0xff]  ;;  %v4108_v40 = vpop.f32.mrb[174].mxu0 }
 0x378   :  { %v4350_v17 = vadd.f32 %v10005_v12, %v10004_v3  ;;  %v4355_v55 = vadd.f32 %v10007_v54, %v10006_v20  ;;  %v3726_v57 = vpack.c.bf16 %v9340_v43, %v9300_v19  ;;  %4835 = vst [vmem:[#allocation10 + $0x40] sm:$0xff] %v4771_v42  ;;  %v4358_v45 = vadd.f32 %v10009_v41, %v10008_v52  ;;  %v10012_v3 = vld [vmem:[#allocation26_spill] sm:$0xff]  ;;  %v10013_v42 = vld [vmem:[#allocation53_spill] sm:$0xff]  ;;  %v10015_v20 = vld [vmem:[#allocation56_spill] sm:$0xff]  ;;  %v4110_v44 = vpop.f32.mrb[175].mxu0 }
 0x379   :  { %v4773_v53 = vadd.f32 %v9242_v39, %v4347_v51  ;;  %v4363_v31 = vadd.f32 %v10011_v24, %v10010_v60  ;;  %4529 = vmatmul.mubr.bf16.gmra.mrb[240].mxu1 %v3713_v49  ;;  %4836 = vst [vmem:[#allocation10 + $0x48] sm:$0xff] %v4772_v62  ;;  %v4366_v12 = vadd.f32 %v10013_v42, %v10012_v3  ;;  %v10014_v51 = vld [vmem:[#allocation73_spill] sm:$0xff] }
 0x37a   :  { %v4774_v35 = vadd.f32 %v9242_v39, %v4350_v17  ;;  %v4775_v11 = vadd.f32 %v9242_v39, %v4355_v55  ;;  %v4371_v54 = vadd.f32 %v10015_v20, %v10014_v51  ;;  %4536 = vmatprep.mubr.bf16.mxu1 %v3718_v22  ;;  %v4776_v52 = vadd.f32 %v9242_v39, %v4358_v45  ;;  %v4394_v17 = vpop.f32.mrb[172].mxu1 }
 0x37b   :  { %4837 = vst [vmem:[#allocation10 + $0x50] sm:$0xff] %v4773_v53  ;;  %v4777_v41 = vadd.f32 %v9242_v39, %v4363_v31  ;;  %v4374_v49 = vadd.f32 %v10017_v32, %v10016_v46  ;;  %v4379_v62 = vadd.f32 %v9198_v7, %v9177_v6  ;;  %v4778_v55 = vadd.f32 %v9242_v39, %v4366_v12  ;;  %v4396_v45 = vpop.f32.mrb[173].mxu1 }
 0x37c   :  { %4838 = vst [vmem:[#allocation10 + $0x58] sm:$0xff] %v4774_v35  ;;  %4839 = vst [vmem:[#allocation10 + $0x60] sm:$0xff] %v4775_v11  ;;  %v4779_v60 = vadd.f32 %v9242_v39, %v4371_v54  ;;  %v4382_v22 = vadd.f32 %v9210_v37, %v9189_v10  ;;  %v4387_v53 = vadd.f32 %v9274_v14, %v9251_v27  ;;  %v4397_v35 = vpop.f32.mrb[174].mxu1 }
 0x37d   :  { %4840 = vst [vmem:[#allocation10 + $0x68] sm:$0xff] %v4776_v52  ;;  %4841 = vst [vmem:[#allocation10 + $0x70] sm:$0xff] %v4777_v41  ;;  %v4780_v24 = vadd.f32 %v9242_v39, %v4374_v49  ;;  %v4781_v6 = vadd.f32 %v9242_v39, %v4379_v62  ;;  %v4390_v7 = vadd.f32 %v9288_v33, %v9267_v16  ;;  %v4399_v27 = vpop.f32.mrb[175].mxu1 }
 0x37e   :  { %v4395_v31 = vadd.f32 %v4394_v17, %v4105_v50  ;;  %4842 = vst [vmem:[#allocation10 + $0x78] sm:$0xff] %v4778_v55  ;;  %4843 = vst [vmem:[#allocation10 + $0x80] sm:$0xff] %v4779_v60  ;;  %v4782_v11 = vadd.f32 %v9242_v39, %v4382_v22  ;;  %v4783_v10 = vadd.f32 %v9242_v39, %v4387_v53  ;;  %4248 = vmatmul.mubr.bf16.gmra.mrb[244].mxu0 %v3715_v5 }
 0x37f   :  { %v4398_v37 = vadd.f32 %v4397_v35, %v4108_v40  ;;  %4844 = vst [vmem:[#allocation10 + $0x88] sm:$0xff] %v4780_v24  ;;  %4845 = vst [vmem:[#allocation10 + $0x90] sm:$0xff] %v4781_v6  ;;  %v4784_v14 = vadd.f32 %v9242_v39, %v4390_v7  ;;  %4255 = vmatprep.mubr.bf16.mxu0 %v3720_v4 }
 0x380   :  { %v4785_v16 = vadd.f32 %v9242_v39, %v4395_v31  ;;  %4846 = vst [vmem:[#allocation10 + $0x98] sm:$0xff] %v4782_v11  ;;  %4847 = vst [vmem:[#allocation10 + $0xa0] sm:$0xff] %v4783_v10 }
 0x381   :  { %v4786_v33 = vadd.f32 %v9242_v39, %v4398_v37  ;;  %4848 = vst [vmem:[#allocation10 + $0xa8] sm:$0xff] %v4784_v14  ;;  %4537 = vmatmul.mubr.bf16.gmra.mrb[244].mxu1 %v3717_v58 }
 0x382   :  { %4849 = vst [vmem:[#allocation10 + $0xb0] sm:$0xff] %v4785_v16  ;;  %4544 = vmatprep.mubr.bf16.mxu1 %v3722_v9  ;;  %v4113_v18 = vpop.f32.mrb[176].mxu0 }
 0x383   :  { %4850 = vst [vmem:[#allocation10 + $0xb8] sm:$0xff] %v4786_v33  ;;  %v4115_v15 = vpop.f32.mrb[177].mxu0 }
 0x384   :  { %v4116_v5 = vpop.f32.mrb[178].mxu0 }
 0x385   :  { %v4402_v25 = vpop.f32.mrb[176].mxu1  ;;  %v4118_v26 = vpop.f32.mrb[179].mxu0 }
 0x386   :  { %4256 = vmatmul.mubr.bf16.gmra.mrb[248].mxu0 %v3719_v2  ;;  %v4403_v30 = vadd.f32 %v4402_v25, %v4113_v18  ;;  %v4404_v63 = vpop.f32.mrb[177].mxu1 }
 0x387   :  { %4263 = vmatprep.mubr.bf16.mxu0 %v3724_v47  ;;  %v4405_v58 = vpop.f32.mrb[178].mxu1 }
 0x388   :  { %v4787_v1 = vadd.f32 %v9242_v39, %v4403_v30  ;;  %v4406_v48 = vadd.f32 %v4405_v58, %v4116_v5  ;;  %v4407_v4 = vpop.f32.mrb[179].mxu1 }
 0x389   :  { %4545 = vmatmul.mubr.bf16.gmra.mrb[248].mxu1 %v3721_v34 }
 0x38a   :  { %4552 = vmatprep.mubr.bf16.mxu1 %v3726_v57  ;;  %4851 = vst [vmem:[#allocation10 + $0xc0] sm:$0xff] %v4787_v1  ;;  %v4788_v61 = vadd.f32 %v9242_v39, %v4406_v48 }
 0x38c   :  { %4852 = vst [vmem:[#allocation10 + $0xc8] sm:$0xff] %v4788_v61 }
 0x38e   :  { %4264 = vmatmul.mubr.bf16.gmra.mrb[252].mxu0 %v3723_v13 }
 0x38f   :  { %v4121_v36 = vpop.f32.mrb[180].mxu0 }
 0x390   :  { %v4123_v59 = vpop.f32.mrb[181].mxu0 }
 0x391   :  { %4553 = vmatmul.mubr.bf16.gmra.mrb[252].mxu1 %v3725_v0  ;;  %v4124_v28 = vpop.f32.mrb[182].mxu0 }
 0x392   :  { %v4126_v38 = vpop.f32.mrb[183].mxu0 }
 0x393   :  { %v4410_v9 = vpop.f32.mrb[180].mxu1 }
 0x394   :  { %v4411_v2 = vadd.f32 %v4410_v9, %v4121_v36  ;;  %v4412_v19 = vpop.f32.mrb[181].mxu1 }
 0x395   :  { %v4413_v34 = vpop.f32.mrb[182].mxu1 }
 0x396   :  { %v4789_v8 = vadd.f32 %v9242_v39, %v4411_v2  ;;  %v4414_v43 = vadd.f32 %v4413_v34, %v4124_v28  ;;  %v4415_v50 = vpop.f32.mrb[183].mxu1 }
 0x398   :  { %4853 = vst [vmem:[#allocation10 + $0xd0] sm:$0xff] %v4789_v8  ;;  %v4790_v21 = vadd.f32 %v9242_v39, %v4414_v43 }
 0x39a   :  { %4854 = vst [vmem:[#allocation10 + $0xd8] sm:$0xff] %v4790_v21 }
 0x39c   :  { %v4129_v29 = vpop.f32.mrb[184].mxu0 }
 0x39d   :  { %v4131_v13 = vpop.f32.mrb[185].mxu0 }
 0x39e   :  { %v4132_v47 = vpop.f32.mrb[186].mxu0 }
 0x39f   :  { %v4418_v56 = vpop.f32.mrb[184].mxu1  ;;  %v4134_v23 = vpop.f32.mrb[187].mxu0 }
 0x3a0   :  { %v4419_v0 = vadd.f32 %v4418_v56, %v4129_v29  ;;  %v4420_v57 = vpop.f32.mrb[185].mxu1 }
 0x3a1   :  { %v4421_v40 = vpop.f32.mrb[186].mxu1 }
 0x3a2   :  { %v4791_v3 = vadd.f32 %v9242_v39, %v4419_v0  ;;  %v4422_v42 = vadd.f32 %v4421_v40, %v4132_v47  ;;  %v4423_v12 = vpop.f32.mrb[187].mxu1 }
 0x3a4   :  { %4855 = vst [vmem:[#allocation10 + $0xe0] sm:$0xff] %v4791_v3  ;;  %v4792_v51 = vadd.f32 %v9242_v39, %v4422_v42 }
 0x3a6   :  { %4856 = vst [vmem:[#allocation10 + $0xe8] sm:$0xff] %v4792_v51 }
 0x3a9   :  { %v4137_v20 = vpop.f32.mrb[188].mxu0 }
 0x3aa   :  { %v4139_v54 = vpop.f32.mrb[189].mxu0 }
 0x3ab   :  { %v4140_v44 = vpop.f32.mrb[190].mxu0 }
 0x3ac   :  { %v4142_v52 = vpop.f32.mrb[191].mxu0 }
 0x3ad   :  { %v4426_v41 = vpop.f32.mrb[188].mxu1 }
 0x3ae   :  { %v4427_v46 = vadd.f32 %v4426_v41, %v4137_v20  ;;  %v4428_v32 = vpop.f32.mrb[189].mxu1 }
 0x3af   :  { %v4429_v49 = vpop.f32.mrb[190].mxu1 }
 0x3b0   :  { %v4793_v62 = vadd.f32 %v9242_v39, %v4427_v46  ;;  %v4430_v17 = vadd.f32 %v4429_v49, %v4140_v44  ;;  %v4431_v55 = vpop.f32.mrb[191].mxu1 }
 0x3b2   :  { %4857 = vst [vmem:[#allocation10 + $0xf0] sm:$0xff] %v4793_v62  ;;  %v4794_v60 = vadd.f32 %v9242_v39, %v4430_v17 }
 0x3b4   :  { %4858 = vst [vmem:[#allocation10 + $0xf8] sm:$0xff] %v4794_v60 }
 0x3b6   :  { %v4145_v22 = vpop.f32.mrb[192].mxu0 }
 0x3b7   :  { %v4147_v53 = vpop.f32.mrb[193].mxu0 }
 0x3b8   :  { %v4148_v45 = vpop.f32.mrb[194].mxu0 }
 0x3b9   :  { %v4434_v24 = vpop.f32.mrb[192].mxu1  ;;  %v4150_v6 = vpop.f32.mrb[195].mxu0 }
 0x3ba   :  { %v4435_v7 = vadd.f32 %v4434_v24, %v4145_v22  ;;  %v4436_v31 = vpop.f32.mrb[193].mxu1 }
 0x3bb   :  { %v4437_v35 = vpop.f32.mrb[194].mxu1 }
 0x3bc   :  { %v4795_v11 = vadd.f32 %v9242_v39, %v4435_v7  ;;  %v4438_v10 = vadd.f32 %v4437_v35, %v4148_v45  ;;  %v4439_v37 = vpop.f32.mrb[195].mxu1 }
 0x3be   :  { %4859 = vst [vmem:[#allocation10 + $0x100] sm:$0xff] %v4795_v11  ;;  %v4796_v27 = vadd.f32 %v9242_v39, %v4438_v10 }
 0x3c0   :  { %4860 = vst [vmem:[#allocation10 + $0x108] sm:$0xff] %v4796_v27 }
 0x3c3   :  { %v4153_v14 = vpop.f32.mrb[196].mxu0 }
 0x3c4   :  { %v4155_v16 = vpop.f32.mrb[197].mxu0 }
 0x3c5   :  { %v4156_v33 = vpop.f32.mrb[198].mxu0 }
 0x3c6   :  { %v4158_v18 = vpop.f32.mrb[199].mxu0 }
 0x3c7   :  { %v4442_v15 = vpop.f32.mrb[196].mxu1 }
 0x3c8   :  { %v4443_v5 = vadd.f32 %v4442_v15, %v4153_v14  ;;  %v4444_v25 = vpop.f32.mrb[197].mxu1 }
 0x3c9   :  { %v4445_v26 = vpop.f32.mrb[198].mxu1 }
 0x3ca   :  { %v4797_v30 = vadd.f32 %v9242_v39, %v4443_v5  ;;  %v4446_v63 = vadd.f32 %v4445_v26, %v4156_v33  ;;  %v4447_v58 = vpop.f32.mrb[199].mxu1 }
 0x3cc   :  { %4861 = vst [vmem:[#allocation10 + $0x110] sm:$0xff] %v4797_v30  ;;  %v4798_v1 = vadd.f32 %v9242_v39, %v4446_v63 }
 0x3ce   :  { %4862 = vst [vmem:[#allocation10 + $0x118] sm:$0xff] %v4798_v1 }
 0x3d0   :  { %v4161_v48 = vpop.f32.mrb[200].mxu0 }
 0x3d1   :  { %v4163_v4 = vpop.f32.mrb[201].mxu0 }
 0x3d2   :  { %v4164_v61 = vpop.f32.mrb[202].mxu0  ;;  %v4450_v36 = vpop.f32.mrb[200].mxu1 }
 0x3d3   :  { %v4166_v59 = vpop.f32.mrb[203].mxu0  ;;  %v4451_v28 = vadd.f32 %v4450_v36, %v4161_v48  ;;  %v4452_v38 = vpop.f32.mrb[201].mxu1 }
 0x3d4   :  { %v4453_v9 = vpop.f32.mrb[202].mxu1 }
 0x3d5   :  { %v4799_v2 = vadd.f32 %v9242_v39, %v4451_v28  ;;  %v4454_v19 = vadd.f32 %v4453_v9, %v4164_v61  ;;  %v4455_v34 = vpop.f32.mrb[203].mxu1 }
 0x3d7   :  { %4863 = vst [vmem:[#allocation10 + $0x120] sm:$0xff] %v4799_v2  ;;  %v4800_v8 = vadd.f32 %v9242_v39, %v4454_v19 }
 0x3d9   :  { %4864 = vst [vmem:[#allocation10 + $0x128] sm:$0xff] %v4800_v8 }
 0x3de   :  { %v4169_v43 = vpop.f32.mrb[204].mxu0 }
 0x3df   :  { %v4171_v50 = vpop.f32.mrb[205].mxu0 }
 0x3e0   :  { %v4172_v21 = vpop.f32.mrb[206].mxu0 }
 0x3e1   :  { %v4174_v29 = vpop.f32.mrb[207].mxu0  ;;  %v4458_v13 = vpop.f32.mrb[204].mxu1 }
 0x3e2   :  { %v4459_v47 = vadd.f32 %v4458_v13, %v4169_v43  ;;  %v4460_v56 = vpop.f32.mrb[205].mxu1 }
 0x3e3   :  { %v4461_v23 = vpop.f32.mrb[206].mxu1 }
 0x3e4   :  { %v4801_v0 = vadd.f32 %v9242_v39, %v4459_v47  ;;  %v4462_v57 = vadd.f32 %v4461_v23, %v4172_v21  ;;  %v4463_v40 = vpop.f32.mrb[207].mxu1 }
 0x3e6   :  { %4865 = vst [vmem:[#allocation10 + $0x130] sm:$0xff] %v4801_v0  ;;  %v4802_v3 = vadd.f32 %v9242_v39, %v4462_v57 }
 0x3e8   :  { %4866 = vst [vmem:[#allocation10 + $0x138] sm:$0xff] %v4802_v3 }
 0x3eb   :  { %v4177_v42 = vpop.f32.mrb[208].mxu0 }
 0x3ec   :  { %v4179_v12 = vpop.f32.mrb[209].mxu0 }
 0x3ed   :  { %v4180_v51 = vpop.f32.mrb[210].mxu0 }
 0x3ee   :  { %v4466_v20 = vpop.f32.mrb[208].mxu1  ;;  %v4182_v54 = vpop.f32.mrb[211].mxu0 }
 0x3ef   :  { %v4467_v44 = vadd.f32 %v4466_v20, %v4177_v42  ;;  %v4468_v52 = vpop.f32.mrb[209].mxu1 }
 0x3f0   :  { %v4469_v41 = vpop.f32.mrb[210].mxu1 }
 0x3f1   :  { %v4803_v46 = vadd.f32 %v9242_v39, %v4467_v44  ;;  %v4470_v32 = vadd.f32 %v4469_v41, %v4180_v51  ;;  %v4471_v49 = vpop.f32.mrb[211].mxu1 }
 0x3f3   :  { %4867 = vst [vmem:[#allocation10 + $0x140] sm:$0xff] %v4803_v46  ;;  %v4804_v62 = vadd.f32 %v9242_v39, %v4470_v32 }
 0x3f5   :  { %4868 = vst [vmem:[#allocation10 + $0x148] sm:$0xff] %v4804_v62 }
 0x3f8   :  { %v4185_v17 = vpop.f32.mrb[212].mxu0 }
 0x3f9   :  { %v4187_v55 = vpop.f32.mrb[213].mxu0 }
 0x3fa   :  { %v4188_v60 = vpop.f32.mrb[214].mxu0 }
 0x3fb   :  { %v4190_v22 = vpop.f32.mrb[215].mxu0 }
 0x3fc   :  { %v4474_v53 = vpop.f32.mrb[212].mxu1 }
 0x3fd   :  { %v4475_v45 = vadd.f32 %v4474_v53, %v4185_v17  ;;  %v4476_v24 = vpop.f32.mrb[213].mxu1 }
 0x3fe   :  { %v4477_v6 = vpop.f32.mrb[214].mxu1 }
 0x3ff   :  { %v4805_v7 = vadd.f32 %v9242_v39, %v4475_v45  ;;  %v4478_v31 = vadd.f32 %v4477_v6, %v4188_v60  ;;  %v4479_v35 = vpop.f32.mrb[215].mxu1 }
 0x401   :  { %4869 = vst [vmem:[#allocation10 + $0x150] sm:$0xff] %v4805_v7  ;;  %v4806_v11 = vadd.f32 %v9242_v39, %v4478_v31 }
 0x403   :  { %4870 = vst [vmem:[#allocation10 + $0x158] sm:$0xff] %v4806_v11 }
 0x405   :  { %v4193_v10 = vpop.f32.mrb[216].mxu0 }
 0x406   :  { %v4195_v37 = vpop.f32.mrb[217].mxu0 }
 0x407   :  { %v4196_v27 = vpop.f32.mrb[218].mxu0 }
 0x408   :  { %v4482_v14 = vpop.f32.mrb[216].mxu1  ;;  %v4198_v16 = vpop.f32.mrb[219].mxu0 }
 0x409   :  { %v4483_v33 = vadd.f32 %v4482_v14, %v4193_v10  ;;  %v4484_v18 = vpop.f32.mrb[217].mxu1 }
 0x40a   :  { %v4485_v15 = vpop.f32.mrb[218].mxu1 }
 0x40b   :  { %v4807_v5 = vadd.f32 %v9242_v39, %v4483_v33  ;;  %v4486_v25 = vadd.f32 %v4485_v15, %v4196_v27  ;;  %v4487_v26 = vpop.f32.mrb[219].mxu1 }
 0x40d   :  { %4871 = vst [vmem:[#allocation10 + $0x160] sm:$0xff] %v4807_v5  ;;  %v4808_v30 = vadd.f32 %v9242_v39, %v4486_v25 }
 0x40f   :  { %4872 = vst [vmem:[#allocation10 + $0x168] sm:$0xff] %v4808_v30 }
 0x412   :  { %v4201_v63 = vpop.f32.mrb[220].mxu0 }
 0x413   :  { %v4203_v58 = vpop.f32.mrb[221].mxu0 }
 0x414   :  { %v4204_v1 = vpop.f32.mrb[222].mxu0 }
 0x415   :  { %v4206_v48 = vpop.f32.mrb[223].mxu0 }
 0x416   :  { %v4490_v4 = vpop.f32.mrb[220].mxu1 }
 0x417   :  { %v4491_v61 = vadd.f32 %v4490_v4, %v4201_v63  ;;  %v4492_v36 = vpop.f32.mrb[221].mxu1 }
 0x418   :  { %v4493_v59 = vpop.f32.mrb[222].mxu1 }
 0x419   :  { %v4809_v28 = vadd.f32 %v9242_v39, %v4491_v61  ;;  %v4494_v38 = vadd.f32 %v4493_v59, %v4204_v1  ;;  %v4495_v9 = vpop.f32.mrb[223].mxu1 }
 0x41b   :  { %4873 = vst [vmem:[#allocation10 + $0x170] sm:$0xff] %v4809_v28  ;;  %v4810_v2 = vadd.f32 %v9242_v39, %v4494_v38 }
 0x41d   :  { %4874 = vst [vmem:[#allocation10 + $0x178] sm:$0xff] %v4810_v2 }
 0x41f   :  { %v4209_v19 = vpop.f32.mrb[224].mxu0 }
 0x420   :  { %v4211_v34 = vpop.f32.mrb[225].mxu0 }
 0x421   :  { %v4212_v8 = vpop.f32.mrb[226].mxu0 }
 0x422   :  { %v4498_v43 = vpop.f32.mrb[224].mxu1  ;;  %v4214_v50 = vpop.f32.mrb[227].mxu0 }
 0x423   :  { %v4499_v21 = vadd.f32 %v4498_v43, %v4209_v19  ;;  %v4500_v29 = vpop.f32.mrb[225].mxu1 }
 0x424   :  { %v4501_v13 = vpop.f32.mrb[226].mxu1 }
 0x425   :  { %v4811_v47 = vadd.f32 %v9242_v39, %v4499_v21  ;;  %v4502_v56 = vadd.f32 %v4501_v13, %v4212_v8  ;;  %v4503_v23 = vpop.f32.mrb[227].mxu1 }
 0x427   :  { %4875 = vst [vmem:[#allocation10 + $0x180] sm:$0xff] %v4811_v47  ;;  %v4812_v0 = vadd.f32 %v9242_v39, %v4502_v56 }
 0x429   :  { %4876 = vst [vmem:[#allocation10 + $0x188] sm:$0xff] %v4812_v0 }
 0x42c   :  { %v4217_v57 = vpop.f32.mrb[228].mxu0 }
 0x42d   :  { %v4219_v40 = vpop.f32.mrb[229].mxu0 }
 0x42e   :  { %v4220_v3 = vpop.f32.mrb[230].mxu0 }
 0x42f   :  { %v4222_v42 = vpop.f32.mrb[231].mxu0 }
 0x430   :  { %v4506_v12 = vpop.f32.mrb[228].mxu1 }
 0x431   :  { %v4507_v51 = vadd.f32 %v4506_v12, %v4217_v57  ;;  %v4508_v20 = vpop.f32.mrb[229].mxu1 }
 0x432   :  { %v4509_v54 = vpop.f32.mrb[230].mxu1 }
 0x433   :  { %v4813_v44 = vadd.f32 %v9242_v39, %v4507_v51  ;;  %v4510_v52 = vadd.f32 %v4509_v54, %v4220_v3  ;;  %v4511_v41 = vpop.f32.mrb[231].mxu1 }
 0x435   :  { %4877 = vst [vmem:[#allocation10 + $0x190] sm:$0xff] %v4813_v44  ;;  %v4814_v46 = vadd.f32 %v9242_v39, %v4510_v52 }
 0x437   :  { %4878 = vst [vmem:[#allocation10 + $0x198] sm:$0xff] %v4814_v46 }
 0x439   :  { %v4225_v32 = vpop.f32.mrb[232].mxu0 }
 0x43a   :  { %v4227_v49 = vpop.f32.mrb[233].mxu0 }
 0x43b   :  { %v4228_v62 = vpop.f32.mrb[234].mxu0 }
 0x43c   :  { %v4514_v17 = vpop.f32.mrb[232].mxu1  ;;  %v4230_v55 = vpop.f32.mrb[235].mxu0 }
 0x43d   :  { %v4515_v60 = vadd.f32 %v4514_v17, %v4225_v32  ;;  %v4516_v22 = vpop.f32.mrb[233].mxu1 }
 0x43e   :  { %v4517_v53 = vpop.f32.mrb[234].mxu1 }
 0x43f   :  { %v4815_v45 = vadd.f32 %v9242_v39, %v4515_v60  ;;  %v4518_v24 = vadd.f32 %v4517_v53, %v4228_v62  ;;  %v4519_v6 = vpop.f32.mrb[235].mxu1 }
 0x441   :  { %4879 = vst [vmem:[#allocation10 + $0x1a0] sm:$0xff] %v4815_v45  ;;  %v4816_v7 = vadd.f32 %v9242_v39, %v4518_v24  ;;  %v4233_v31 = vpop.f32.mrb[236].mxu0 }
 0x442   :  { %v4235_v35 = vpop.f32.mrb[237].mxu0 }
 0x443   :  { %4880 = vst [vmem:[#allocation10 + $0x1a8] sm:$0xff] %v4816_v7  ;;  %v4236_v11 = vpop.f32.mrb[238].mxu0 }
 0x444   :  { %v4522_v10 = vpop.f32.mrb[236].mxu1  ;;  %v4238_v37 = vpop.f32.mrb[239].mxu0 }
 0x445   :  { %v4523_v27 = vadd.f32 %v4522_v10, %v4233_v31  ;;  %v4524_v14 = vpop.f32.mrb[237].mxu1 }
 0x446   :  { %v4525_v16 = vpop.f32.mrb[238].mxu1 }
 0x447   :  { %v4817_v33 = vadd.f32 %v9242_v39, %v4523_v27  ;;  %v4526_v18 = vadd.f32 %v4525_v16, %v4236_v11  ;;  %v4527_v15 = vpop.f32.mrb[239].mxu1 }
 0x449   :  { %4881 = vst [vmem:[#allocation10 + $0x1b0] sm:$0xff] %v4817_v33  ;;  %v4818_v5 = vadd.f32 %v9242_v39, %v4526_v18  ;;  %v4241_v25 = vpop.f32.mrb[240].mxu0 }
 0x44a   :  { %v4243_v26 = vpop.f32.mrb[241].mxu0 }
 0x44b   :  { %4882 = vst [vmem:[#allocation10 + $0x1b8] sm:$0xff] %v4818_v5  ;;  %v4244_v30 = vpop.f32.mrb[242].mxu0 }
 0x44c   :  { %v4530_v63 = vpop.f32.mrb[240].mxu1  ;;  %v4246_v58 = vpop.f32.mrb[243].mxu0 }
 0x44d   :  { %v4531_v1 = vadd.f32 %v4530_v63, %v4241_v25  ;;  %v4532_v48 = vpop.f32.mrb[241].mxu1 }
 0x44e   :  { %v4533_v4 = vpop.f32.mrb[242].mxu1 }
 0x44f   :  { %v4819_v61 = vadd.f32 %v9242_v39, %v4531_v1  ;;  %v4534_v36 = vadd.f32 %v4533_v4, %v4244_v30  ;;  %v4535_v59 = vpop.f32.mrb[243].mxu1 }
 0x451   :  { %4883 = vst [vmem:[#allocation10 + $0x1c0] sm:$0xff] %v4819_v61  ;;  %v4820_v28 = vadd.f32 %v9242_v39, %v4534_v36  ;;  %v4249_v38 = vpop.f32.mrb[244].mxu0 }
 0x452   :  { %v4251_v9 = vpop.f32.mrb[245].mxu0 }
 0x453   :  { %4884 = vst [vmem:[#allocation10 + $0x1c8] sm:$0xff] %v4820_v28  ;;  %v4252_v2 = vpop.f32.mrb[246].mxu0 }
 0x454   :  { %v4538_v19 = vpop.f32.mrb[244].mxu1  ;;  %v4254_v34 = vpop.f32.mrb[247].mxu0 }
 0x455   :  { %v4539_v8 = vadd.f32 %v4538_v19, %v4249_v38  ;;  %v4540_v43 = vpop.f32.mrb[245].mxu1 }
 0x456   :  { %v4541_v50 = vpop.f32.mrb[246].mxu1 }
 0x457   :  { %v4821_v21 = vadd.f32 %v9242_v39, %v4539_v8  ;;  %v4542_v29 = vadd.f32 %v4541_v50, %v4252_v2  ;;  %v4543_v13 = vpop.f32.mrb[247].mxu1 }
 0x459   :  { %4885 = vst [vmem:[#allocation10 + $0x1d0] sm:$0xff] %v4821_v21  ;;  %v4822_v47 = vadd.f32 %v9242_v39, %v4542_v29  ;;  %v4257_v56 = vpop.f32.mrb[248].mxu0 }
 0x45a   :  { %v4259_v23 = vpop.f32.mrb[249].mxu0 }
 0x45b   :  { %4886 = vst [vmem:[#allocation10 + $0x1d8] sm:$0xff] %v4822_v47  ;;  %v4260_v0 = vpop.f32.mrb[250].mxu0 }
 0x45c   :  { %v4546_v57 = vpop.f32.mrb[248].mxu1  ;;  %v4262_v40 = vpop.f32.mrb[251].mxu0 }
 0x45d   :  { %v4547_v3 = vadd.f32 %v4546_v57, %v4257_v56  ;;  %v4548_v42 = vpop.f32.mrb[249].mxu1 }
 0x45e   :  { %v4549_v12 = vpop.f32.mrb[250].mxu1 }
 0x45f   :  { %v4823_v51 = vadd.f32 %v9242_v39, %v4547_v3  ;;  %v4550_v20 = vadd.f32 %v4549_v12, %v4260_v0  ;;  %v4551_v54 = vpop.f32.mrb[251].mxu1 }
 0x461   :  { %4887 = vst [vmem:[#allocation10 + $0x1e0] sm:$0xff] %v4823_v51  ;;  %v4824_v44 = vadd.f32 %v9242_v39, %v4550_v20  ;;  %v4265_v52 = vpop.f32.mrb[252].mxu0 }
 0x462   :  { %v4267_v41 = vpop.f32.mrb[253].mxu0 }
 0x463   :  { %4888 = vst [vmem:[#allocation10 + $0x1e8] sm:$0xff] %v4824_v44  ;;  %v4268_v46 = vpop.f32.mrb[254].mxu0 }
 0x464   :  { %v4554_v32 = vpop.f32.mrb[252].mxu1  ;;  %v4270_v49 = vpop.f32.mrb[255].mxu0 }
 0x465   :  { %v4555_v62 = vadd.f32 %v4554_v32, %v4265_v52  ;;  %v4556_v17 = vpop.f32.mrb[253].mxu1 }
 0x466   :  { %v4557_v55 = vpop.f32.mrb[254].mxu1 }
 0x467   :  { %v4825_v60 = vadd.f32 %v9242_v39, %v4555_v62  ;;  %v4558_v22 = vadd.f32 %v4557_v55, %v4268_v46  ;;  %v4559_v53 = vpop.f32.mrb[255].mxu1 }
 0x469   :  { %4889 = vst [vmem:[#allocation10 + $0x1f0] sm:$0xff] %v4825_v60  ;;  %v4826_v45 = vadd.f32 %v9242_v39, %v4558_v22 }
 0x46b   :  { %4890 = vst [vmem:[#allocation10 + $0x1f8] sm:$0xff] %v4826_v45 }
 0x46c   :  { %5837 = shalt.err (!%p5834_p0)
}
 0x46d   :  { %s5838_s12 = scalar_lea.hbm %s9483_s7, 8192 }
 0x46e   :  { %p5839_p1 = scmp.ne.s32.totalorder %s9483_s7, %s5838_s12  ;;  %p5842_p2 = scmp.lt.u32.totalorder %s5838_s12, %s9483_s7 }
 0x470   :  { %p5844_p3 = pnand %p5842_p2, %p5839_p1 }
 0x472   :  { %5847 = shalt.err (!%p5844_p3)
}
 0x473   :  { %4902 = dma.vmem_to_hbm [thread:$0]  %s4897_s8, 8192, %s9483_s7, [#allocation6], %s5858_s3, %s5858_s3, %s5859_s25  }
 0x474   :  { %5852 = dma.done.wait [#allocation6], 8192  }
 0x475   :  { %5853 = vsyncadd [#allocation6], 4294959104 }
 0x476   :  { %4906 = vsyncpa [#allocation5], 1 }
 0x477   :  { %4907 = vsyncpa [#allocation8], 1 }
 0x478   :  { %4908 = vsyncpa [#allocation6], 1 }

</bundles_post_ra>
